<compile_context>
chip_gen: v7x
topology: tpu7x:2x2x1
jax: 0.10.0
libtpu: 0.0.40
codegen_flags: <defaults>
</compile_context>

<pallas_src>
import math

import jax
import jax.numpy as jnp
from jax.experimental import pallas as pl
from jax.experimental.pallas import tpu as pltpu

GEM_EPS = 1e-6   # GeneralizedMeanPooling eps
BN_EPS = 1e-5    # nn.BatchNorm1d default eps
L2_EPS = 1e-12   # F.normalize default eps

_VMEM_LIMIT = 32 << 20   # scoped-VMEM request; fits v5e/v6e/v7x defaults


# --------------------------------------------------------------------------
# Tile choosers
# --------------------------------------------------------------------------
def _per_buffer_budget():
    """Per-input-block VMEM budget (Pallas double-buffers each input block)."""
    try:
        vmem = pltpu.get_tpu_info().vmem_capacity_bytes
    except Exception:
        vmem = 64 << 20
    # 128 MiB VMEM chips (v5e/v6e): favour long contiguous spatial runs, the
    # kernel is HBM-bound there.  64 MiB (v7x): EUP-bound, keep blocks small
    # and preserve headroom.
    return (12 << 20) if vmem >= (100 << 20) else (6 << 20)


def _channel_tile(C, cap=512):
    """Largest multiple-of-128 divisor of C that is <= cap, else full C."""
    if C % 128 != 0:
        return C
    best, t = 128, 256
    while t <= min(C, cap):
        if C % t == 0:
            best = t
        t += 128
    return best


def _batch_tile(B, cap=256):
    """Divisor of B, multiple of 8, <= cap (else full B)."""
    if B <= cap:
        return B
    t = (cap // 8) * 8
    while t >= 8:
        if B % t == 0:
            return t
        t -= 8
    return B


def _choose_gem_tiles(B, C, HW, itemsize):
    budget = _per_buffer_budget()
    bs = 8 if B % 8 == 0 else B
    tc = _channel_tile(C, cap=512)

    def fits(t):
        return bs * tc * t * itemsize <= budget

    if HW % 128 == 0:
        # Largest multiple-of-128 divisor of HW whose block fits the budget
        # (full-HW contiguous rows when they fit).
        thw, t = 128, 256
        while t <= HW:
            if HW % t == 0 and fits(t):
                thw = t
            t += 128
        need_mask = False
    elif fits(HW):
        thw, need_mask = HW, False          # full spatial extent, one block
    else:
        # HW not lane-aligned and too big for one block: padded + lane-masked
        # spatial tiles (largest multiple of 128 fitting the budget).
        thw = max(128, (budget // (bs * tc * itemsize)) // 128 * 128)
        thw = min(thw, -(-HW // 128) * 128)
        need_mask = (HW % thw) != 0

    # Final guard: if the block still exceeds the budget, shrink the channel
    # tile (stays a multiple of 128 so the pooled output block stays legal).
    while not fits(thw) and tc % 256 == 0:
        tc //= 2
    return bs, tc, thw, need_mask


# --------------------------------------------------------------------------
# GeM pooling kernel (shared by train & eval)
#   grid = (B//bs, C//tc, cdiv(HW, thw)); scratch acc (bs, tc) in VMEM
# --------------------------------------------------------------------------
def _make_gem_pool_kernel(hw_total, thw, need_mask):
    log_hw = math.log(float(hw_total))

    def kernel(p_ref, x_ref, pooled_ref, acc_ref):
        h = pl.program_id(2)

        @pl.when(h == 0)
        def _():
            acc_ref[...] = jnp.zeros_like(acc_ref)

        p = p_ref[0]
        # clamp(x, eps) ** p == exp(p * log(clamp(x, eps))); up-cast happens
        # in-register (features streamed in native dtype).
        x = jnp.maximum(x_ref[...].astype(jnp.float32), GEM_EPS)   # (bs, tc, thw)
        xp = jnp.exp(p * jnp.log(x))
        if need_mask:
            lane = jax.lax.broadcasted_iota(jnp.int32, xp.shape, 2)
            xp = jnp.where(h * thw + lane < hw_total, xp, 0.0)
        acc_ref[...] += jnp.sum(xp, axis=-1)                        # (bs, tc)

        @pl.when(h == pl.num_programs(2) - 1)
        def _():
            # mean(x^p) ** (1/p) == exp((log(sum x^p) - log(HW)) / p)
            pooled_ref[...] = jnp.exp((jnp.log(acc_ref[...]) - log_hw) / p)

    return kernel


def _gem_pool(features, p):
    """features: (B, C, H, W) any float dtype -> pooled (B, C) f32."""
    B, C, H, W = features.shape
    HW = H * W
    x = features.reshape(B, C, HW)                       # free reshape, native dtype
    bs, tc, thw, need_mask = _choose_gem_tiles(B, C, HW, x.dtype.itemsize)
    grid = (B // bs, C // tc, -(-HW // thw))
    p = jnp.asarray(p).reshape(1).astype(jnp.float32)

    return pl.pallas_call(
        _make_gem_pool_kernel(HW, thw, need_mask),
        out_shape=jax.ShapeDtypeStruct((B, C), jnp.float32),
        grid=grid,
        in_specs=[
            pl.BlockSpec(memory_space=pltpu.MemorySpace.SMEM),        # p (scalar)
            pl.BlockSpec((bs, tc, thw), lambda b, c, h: (b, c, h)),   # features
        ],
        out_specs=pl.BlockSpec((bs, tc), lambda b, c, h: (b, c)),
        scratch_shapes=[pltpu.VMEM((bs, tc), jnp.float32)],
        compiler_params=pltpu.CompilerParams(
            dimension_semantics=("parallel", "parallel", "arbitrary"),
            vmem_limit_bytes=_VMEM_LIMIT),
    )(p, x)


# --------------------------------------------------------------------------
# Eval epilogue: folded BN (scale/shift) + L2 normalize
# --------------------------------------------------------------------------
def _bn_l2_kernel(pooled_ref, scale_ref, shift_ref, out_ref):
    bn = pooled_ref[...] * scale_ref[...] + shift_ref[...]          # (bs, C)
    sumsq = jnp.sum(bn * bn, axis=-1, keepdims=True)
    # rsqrt on the EUP; clamping sumsq at eps^2 == clamping the norm at eps.
    out_ref[...] = bn * jax.lax.rsqrt(jnp.maximum(sumsq, L2_EPS * L2_EPS))


def gem_bn_linear_eval(features, params):
    B, C = features.shape[0], features.shape[1]
    pooled = _gem_pool(features, params["p"])                       # (B, C) f32

    # Fold eval-mode BN into a single scale/shift (hoisted out of the kernel).
    scale = (params["bn_weight"].astype(jnp.float32)
             * jax.lax.rsqrt(params["bn_running_var"].astype(jnp.float32)
                             + BN_EPS))
    shift = (params["bn_bias"].astype(jnp.float32)
             - params["bn_running_mean"].astype(jnp.float32) * scale)
    scale = scale.reshape(1, C)
    shift = shift.reshape(1, C)

    bs = _batch_tile(B, cap=256)
    out = pl.pallas_call(
        _bn_l2_kernel,
        out_shape=jax.ShapeDtypeStruct((B, C), jnp.float32),
        grid=(B // bs,),
        in_specs=[
            pl.BlockSpec((bs, C), lambda b: (b, 0)),
            pl.BlockSpec((1, C), lambda b: (0, 0)),
            pl.BlockSpec((1, C), lambda b: (0, 0)),
        ],
        out_specs=pl.BlockSpec((bs, C), lambda b: (b, 0)),
        compiler_params=pltpu.CompilerParams(
            dimension_semantics=("parallel",)),
    )(pooled, scale, shift)
    return (out,)


# --------------------------------------------------------------------------
# Train epilogue: batch-stat BN (C-tiled) + bias-free classifier (NC-tiled)
# --------------------------------------------------------------------------
def _bn_train_kernel(pooled_ref, gamma_ref, beta_ref, bn_ref):
    x = pooled_ref[...]                                             # (B, tc) f32
    mu = jnp.mean(x, axis=0, keepdims=True)
    var = jnp.mean(jnp.square(x - mu), axis=0, keepdims=True)       # biased var
    bn = (x - mu) * jax.lax.rsqrt(var + BN_EPS) * gamma_ref[...] + beta_ref[...]
    bn_ref[...] = bn.astype(bn_ref.dtype)


def _classifier_kernel(bn_ref, w_ref, logits_ref):
    # (B, C) . (tn, C)^T via contracting dim 1 of both operands: no weight
    # relayout, native (bf16-capable) operands, f32 accumulation on the MXU.
    logits_ref[...] = jax.lax.dot_general(
        bn_ref[...], w_ref[...],
        dimension_numbers=(((1,), (1,)), ((), ())),
        preferred_element_type=jnp.float32)


def gem_bn_linear_train(features, targets, params):
    B, C = features.shape[0], features.shape[1]
    NC = params["cls_weight"].shape[0]
    pooled = _gem_pool(features, params["p"])       # (B, C) f32 = global_features

    w = params["cls_weight"]                        # (NC, C) native dtype
    mm_dtype = jnp.bfloat16 if w.dtype == jnp.bfloat16 else jnp.float32

    gamma = params["bn_weight"].astype(jnp.float32).reshape(1, C)
    beta = params["bn_bias"].astype(jnp.float32).reshape(1, C)

    # Batch-statistics BN, tiled over channels (fully parallel).
    tc = _channel_tile(C, cap=512)
    bn_feat = pl.pallas_call(
        _bn_train_kernel,
        out_shape=jax.ShapeDtypeStruct((B, C), mm_dtype),
        grid=(C // tc,),
        in_specs=[
            pl.BlockSpec((B, tc), lambda c: (0, c)),
            pl.BlockSpec((1, tc), lambda c: (0, c)),
            pl.BlockSpec((1, tc), lambda c: (0, c)),
        ],
        out_specs=pl.BlockSpec((B, tc), lambda c: (0, c)),
        compiler_params=pltpu.CompilerParams(
            dimension_semantics=("parallel",)),
    )(pooled, gamma, beta)

    # Bias-free classifier, tiled over the class axis (weight streamed).
    tn = _channel_tile(NC, cap=256)
    logits = pl.pallas_call(
        _classifier_kernel,
        out_shape=jax.ShapeDtypeStruct((B, NC), jnp.float32),
        grid=(NC // tn,),
        in_specs=[
            pl.BlockSpec((B, C), lambda j: (0, 0)),
            pl.BlockSpec((tn, C), lambda j: (j, 0)),
        ],
        out_specs=pl.BlockSpec((B, tn), lambda j: (0, j)),
        compiler_params=pltpu.CompilerParams(
            dimension_semantics=("parallel",),
            vmem_limit_bytes=_VMEM_LIMIT),
    )(bn_feat, w)
    return (logits, pooled, targets)


# --------------------------------------------------------------------------
# Pure-JAX references (sanity check)
# --------------------------------------------------------------------------
def _reference_eval(features, params):
    p = params["p"][0]
    x = jnp.clip(features.astype(jnp.float32), GEM_EPS, None) ** p
    pooled = jnp.mean(x, axis=(2, 3)) ** (1.0 / p)
    bn = (pooled - params["bn_running_mean"]) \
        / jnp.sqrt(params["bn_running_var"] + BN_EPS) \
        * params["bn_weight"] + params["bn_bias"]
    n = jnp.linalg.norm(bn, axis=-1, keepdims=True)
    return bn / jnp.maximum(n, L2_EPS)


def _reference_train(features, params):
    p = params["p"][0]
    x = jnp.clip(features.astype(jnp.float32), GEM_EPS, None) ** p
    pooled = jnp.mean(x, axis=(2, 3)) ** (1.0 / p)
    mu = jnp.mean(pooled, axis=0, keepdims=True)
    var = jnp.mean((pooled - mu) ** 2, axis=0, keepdims=True)
    bn = (pooled - mu) / jnp.sqrt(var + BN_EPS) * params["bn_weight"] \
        + params["bn_bias"]
    logits = bn @ params["cls_weight"].T
    return logits, pooled


if __name__ == "__main__":
    key = jax.random.PRNGKey(0)
    # BatchNorm1d(2048)/Linear(2048, .) fix the channel dim at 2048;
    # batch / spatial / class dims are kept small.
    B, C, H, W = 2, 2048, 16, 16
    NUM_CLASSES = 128
    k1, k2, k3, k4, k5 = jax.random.split(key, 5)

    features = jax.random.uniform(k1, (B, C, H, W), jnp.float32)
    targets = jnp.arange(B, dtype=jnp.int32)

    params = {
        "p": jnp.array([3.0], jnp.float32),                         # GeM p
        "bn_weight": 1.0 + 0.1 * jax.random.normal(k2, (C,), jnp.float32),
        "bn_bias": jnp.zeros((C,), jnp.float32),                    # frozen bias
        "bn_running_mean": 0.01 * jax.random.normal(k3, (C,), jnp.float32),
        "bn_running_var": jnp.abs(
            1.0 + 0.1 * jax.random.normal(k4, (C,), jnp.float32)),
        "cls_weight": 0.001 * jax.random.normal(
            k5, (NUM_CLASSES, C), jnp.float32),                     # Linear, no bias
    }

    # Eval path: (F.normalize(bn_features),)
    (norm_feat,) = gem_bn_linear_eval(features, params)
    # Training path: (logits, global_features, targets)
    logits, global_feat, tgt = gem_bn_linear_train(features, targets, params)
    jax.block_until_ready((norm_feat, logits, global_feat))

    ref_eval = _reference_eval(features, params)
    ref_logits, ref_pooled = _reference_train(features, params)

    assert jnp.allclose(norm_feat, ref_eval, rtol=1e-3, atol=1e-3), \
        "eval-path mismatch vs reference"
    assert jnp.allclose(global_feat, ref_pooled, rtol=1e-3, atol=1e-3), \
        "global_features mismatch vs reference"
    assert jnp.allclose(logits, ref_logits, rtol=1e-3, atol=1e-3), \
        "logits mismatch vs reference"

    print("KERNEL_OK")
</pallas_src>

<mosaic_0001>
module attributes {stable_mosaic.version = 11 : i64} {
  func.func @kernel(%arg0: i32, %arg1: i32, %arg2: i32, %arg3: memref<1xf32, #tpu.memory_space<smem>>, %arg4: memref<2x512x256xf32, #tpu.memory_space<vmem>>, %arg5: memref<2x512xf32, #tpu.memory_space<vmem>>, %arg6: memref<2x512xf32, #tpu.memory_space<vmem>>) attributes {dimension_semantics = [#tpu.dimension_semantics<parallel>, #tpu.dimension_semantics<parallel>, #tpu.dimension_semantics<arbitrary>], iteration_bounds = array<i64: 1, 4, 1>, scalar_prefetch = 0 : i64, scratch_operands = 1 : i64, tpu.core_type = #tpu.core_type<tc>, window_params = [{transform_indices = @transform_0, window_bounds = array<i64: 1>}, {transform_indices = @transform_1, window_bounds = array<i64: 2, 512, 256>}, {transform_indices = @transform_2, window_bounds = array<i64: 2, 512>}]} {
    %c0_i32 = arith.constant 0 : i32
    %0 = arith.cmpi eq, %arg2, %c0_i32 : i32
    %1 = arith.extui %0 : i1 to i32
    %c0_i32_0 = arith.constant 0 : i32
    %2 = arith.cmpi ne, %1, %c0_i32_0 : i32
    scf.if %2 {
      %cst_11 = arith.constant 0.000000e+00 : f32
      %18 = vector.broadcast %cst_11 : f32 to vector<2x512xf32>
      %c0_12 = arith.constant 0 : index
      %c0_13 = arith.constant 0 : index
      %19 = vector.load %arg6[%c0_12, %c0_13] : memref<2x512xf32, #tpu.memory_space<vmem>>, vector<2x512xf32>
      tpu.vector_store %arg6[%c0_12, %c0_13], %18 {strides = array<i32>} : memref<2x512xf32, #tpu.memory_space<vmem>>, vector<2x512xf32>,
    } else {
    }
    %c0 = arith.constant 0 : index
    %3 = memref.load %arg3[%c0] : memref<1xf32, #tpu.memory_space<smem>>
    %c0_1 = arith.constant 0 : index
    %c0_2 = arith.constant 0 : index
    %c0_3 = arith.constant 0 : index
    %4 = vector.load %arg4[%c0_1, %c0_2, %c0_3] : memref<2x512x256xf32, #tpu.memory_space<vmem>>, vector<2x512x256xf32>
    %cst = arith.constant 9.99999997E-7 : f32
    %5 = vector.broadcast %cst : f32 to vector<2x512x256xf32>
    %6 = arith.maximumf %4, %5 : vector<2x512x256xf32>
    %7 = math.log %6 : vector<2x512x256xf32>
    %8 = vector.broadcast %3 : f32 to vector<2x512x256xf32>
    %9 = arith.mulf %8, %7 : vector<2x512x256xf32>
    %10 = math.exp %9 : vector<2x512x256xf32>
    %c0_4 = arith.constant 0 : index
    %c0_5 = arith.constant 0 : index
    %11 = vector.load %arg6[%c0_4, %c0_5] : memref<2x512xf32, #tpu.memory_space<vmem>>, vector<2x512xf32>
    %cst_6 = arith.constant dense<0.000000e+00> : vector<2x512xf32>
    %12 = vector.multi_reduction <add>, %10, %cst_6 [2] : vector<2x512x256xf32> to vector<2x512xf32>
    %13 = arith.addf %11, %12 : vector<2x512xf32>
    %c0_7 = arith.constant 0 : index
    %c0_8 = arith.constant 0 : index
    %14 = vector.load %arg6[%c0_7, %c0_8] : memref<2x512xf32, #tpu.memory_space<vmem>>, vector<2x512xf32>
    tpu.vector_store %arg6[%c0_7, %c0_8], %13 {strides = array<i32>} : memref<2x512xf32, #tpu.memory_space<vmem>>, vector<2x512xf32>,
    %c0_i32_9 = arith.constant 0 : i32
    %15 = arith.cmpi eq, %arg2, %c0_i32_9 : i32
    %16 = arith.extui %15 : i1 to i32
    %c0_i32_10 = arith.constant 0 : i32
    %17 = arith.cmpi ne, %16, %c0_i32_10 : i32
    scf.if %17 {
      %c0_11 = arith.constant 0 : index
      %c0_12 = arith.constant 0 : index
      %18 = vector.load %arg6[%c0_11, %c0_12] : memref<2x512xf32, #tpu.memory_space<vmem>>, vector<2x512xf32>
      %19 = math.log %18 : vector<2x512xf32>
      %cst_13 = arith.constant 5.54517746 : f32
      %20 = vector.broadcast %cst_13 : f32 to vector<2x512xf32>
      %21 = arith.subf %19, %20 : vector<2x512xf32>
      %22 = vector.broadcast %3 : f32 to vector<2x512xf32>
      %23 = arith.divf %21, %22 : vector<2x512xf32>
      %24 = math.exp %23 : vector<2x512xf32>
      %c0_14 = arith.constant 0 : index
      %c0_15 = arith.constant 0 : index
      %25 = vector.load %arg5[%c0_14, %c0_15] : memref<2x512xf32, #tpu.memory_space<vmem>>, vector<2x512xf32>
      tpu.vector_store %arg5[%c0_14, %c0_15], %24 {strides = array<i32>} : memref<2x512xf32, #tpu.memory_space<vmem>>, vector<2x512xf32>,
    } else {
    }
    return
  }
  func.func @transform_0(%arg0: i32, %arg1: i32, %arg2: i32) -> i32 {
    %c0_i32 = arith.constant 0 : i32
    %c0_i32_0 = arith.constant 0 : i32
    return %c0_i32 : i32
  }
  func.func @transform_1(%arg0: i32, %arg1: i32, %arg2: i32) -> (i32, i32, i32) {
    %c0_i32 = arith.constant 0 : i32
    return %arg0, %arg1, %arg2 : i32, i32, i32
  }
  func.func @transform_2(%arg0: i32, %arg1: i32, %arg2: i32) -> (i32, i32) {
    %c0_i32 = arith.constant 0 : i32
    return %arg0, %arg1 : i32, i32
  }
}

</mosaic_0001>

<bundles_post_ra>
// kernel: tpu_custom_call.1
= control target key start
LH: loop header
LB: loop body
LE: loop exit
PB: predicated region body
PF: predicated region fallthrough
CT: control target
= control target key end

     0   :  { %s14235_s0 = inlined_call_operand.<no memory space> [shape: f32[1], index: 0, kind: input, shape index: {}]   ;;  %s14236_s1 = inlined_call_operand.hbm [shape: f32[2,2048,256], index: 1, kind: input, shape index: {}]   ;;  %s14237_s2 = inlined_call_operand.hbm [shape: f32[2,2048], index: 2, kind: output, shape index: {}]  }
   0x1   :  { %7 = sst [smem:[#allocation3]] %s14235_s0 }
   0x2   :  { %8 = vsyncpa [#allocation5], 0 }
   0x3   :  { %10 = vsyncpa [#allocation5 + $0x1], 0 }
   0x4   :  { %11 = vsyncpa [#allocation6], 0 }
   0x5   :  { %13 = vsyncpa [#allocation6 + $0x1], 0  ;;  %s10731_s11 = smov 0   ;;  %s10733_s12 = smov 0  }
   0x6   :  { %s10735_s13 = smov 0   ;;  %s10737_s14 = smov 0  }
   0x7   :  { %s10739_s15 = smov 0   ;;  %s10741_s16 = smov 0  }
   0x8 LB: > { %s9486_s0 = sadd.s32 4294967295, %s10698_s16   ;;  %s9487_s17 = sadd.s32 4294967294, %s10698_s16   ;;  %s10698_s16 = sphi %s10741_s16, %s19_s16   ;;  %s10694_s15 = sphi %s10739_s15, %s14838_s15   ;;  %s10690_s14 = sphi %s10737_s14, %s14837_s14   ;;  %s10686_s13 = sphi %s10735_s13, %s14836_s13   ;;  %s10682_s12 = sphi %s10733_s12, %s14835_s12   ;;  %s10678_s11 = sphi %s10731_s11, %s14834_s11  }
   0x9   : > { %s34_s18 = sadd.s32 1, %s10694_s15  ;;  %s70_s19 = sadd.s32 1, %s10686_s13 }
   0xa   : > { %p36_p0 = scmp.ge.s32.totalorder %s34_s18, 4  ;;  %p77_p1 = scmp.ne.s32.totalorder %s10686_s13, %s10682_s12 }
   0xb   : > { %p78_p2 = scmp.eq.s32.totalorder %s10698_s16, 0  ;;  %p83_p3 = scmp.ne.s32.totalorder %s10682_s12, %s10678_s11 }
   0xc   : > { %s14840_s18 = smov (%p36_p0, %s34_s18), 0  ;;  %p84_p5 = scmp.eq.s32.totalorder %s9486_s0, 0 }
   0xd   : > { %p10772_p4 = por %p78_p2, %p77_p1  ;;  %s64_s21 = ssub.s32 %s10694_s15, %s14840_s18 }
   0xe   : > { %p109_p6 = scmp.eq.s32.totalorder %s9486_s0, 3  ;;  %p68_p7 = scmp.eq.s32.totalorder %s64_s21, 0 }
   0xf   : > { %p10778_p8 = por %p84_p5, %p83_p3  ;;  %p115_p10 = scmp.eq.s32.totalorder %s9487_s17, 3 }
  0x10   : > { %p10782_p9 = por %p109_p6, %p77_p1  ;;  %p9489_p12 = scmp.ge.s32.totalorder %s10698_s16, 4 }
  0x11   : > { %s10787_s24 = scalar_select %p68_p7, %s10686_s13, %s70_s19  }
  0x12   : > { %p10789_p11 = por %p115_p10, %p83_p3  ;;  %134 = sbr.rel (%p9489_p12) target bundleno = 38 (0x26), region = 20 }
  0x19   : > { %s138_s26 = sand.u32 1, %s10686_s13   ;;  %s9506_s27 = sshll.u32 %s10694_s15, 14 }
  0x1a   : > { %s9490_s28 = sshll.u32 %s138_s26, 11  ;;  %s154_s3 = scalar_lea.hbm %s14236_s1, %s9506_s27 }
  0x1b   : > { %s9508_s4 = scalar_select %p10772_p4, [#allocation0], [#allocation10] }
  0x1c   : > { %s142_s5 = scalar_lea.vmem [#allocation4], %s9490_s28  ;;  %s10700_s8 = smov 65536  }
  0x1d   : > { %s167_s6 = sshll.u32 %s142_s5, 4  ;;  %s159_s7 = sld [smem:[%s9508_s4]]   ;;  %s168_s6 = int_to_ptr.vmem [resolvable:$true] %s167_s6 }
  0x1e   : > { %9509 = sst [smem:[#allocation9]] (%p10772_p4), %s10700_s8  ;;  %s10701_s9 = smov 16384  }
  0x1f   : > { %9510 = sst [smem:[#allocation9 + $0x1]] (%p10772_p4), %s10701_s9  ;;  %s10702_s10 = smov 64  }
  0x20   : > { %9511 = sst [smem:[#allocation9 + $0x2]] (%p10772_p4), %s10702_s10  ;;  %s10703_s0 = smov 256  }
  0x21   : > { %9512 = sst [smem:[#allocation9 + $0x3]] (%p10772_p4), %s10703_s0  ;;  %s10704_s19 = smov 16  }
  0x22   : > { %9513 = sst [smem:[#allocation9 + $0x4]] (%p10772_p4), %s10703_s0  ;;  %s139_s27 = scalar_lea.sflag [#allocation5], %s138_s26 }
  0x23   : > { %s9494_s17 = sshll.u32 %s159_s7, 26  ;;  %9514 = sst [smem:[#allocation9 + $0x5]] (%p10772_p4), %s10704_s19 }
  0x24   : > { %s9495_s21 = sadd.s32 134217728, %s9494_s17  ;;  %s10705_s28 = smov [#allocation8]  }
  0x25   : > { %9515 = dma.general (%p10772_p4), %s154_s3, 32768, %s168_s6, %s139_s27, %s10705_s28, [#allocation9], %s9495_s21, 0  }
  0x26 PF: > { %p9496_p13 = scmp.ge.s32.totalorder %s10698_s16, 1  ;;  %p188_p0 = scmp.lt.s32.totalorder %s10698_s16, 5 }
  0x28   : > { %p189_p1 = pnand %p9496_p13, %p188_p0 }
  0x2a   : > { %192 = sbr.rel (%p189_p1) target bundleno = 1072 (0x430), region = 28 }
  0x31   : > { %s10818_s29 = sand.u32 1, %s10682_s12  }
  0x32   : > { %s9497_s30 = sshll.u32 %s10818_s29, 11  ;;  %s195_s4 = scalar_lea.sflag [#allocation5], %s10818_s29 }
  0x33   : > { %s10822_s5 = scalar_lea.vmem [#allocation4], %s9497_s30 }
  0x34   : > { %10669 = dma.done.wait (%p10778_p8), %s195_s4, 32768  }
  0x35   : > { %10671 = vsyncadd (%p10778_p8), %s195_s4, 4294934528  ;;  %v233_v0 = vld [vmem:[%s10822_s5 + $0x20] sm:$0xff]  ;;  %v234_v1 = vld [vmem:[%s10822_s5 + $0x28] sm:$0xff]  ;;  %s228_s20 = sld [smem:[#allocation3]]  ;;  %vm8690_vm0 = vcmask 130112   ;;  %vm8697_vm1 = vcmask 195712  }
  0x36   : > { %v229_v2 = vld [vmem:[%s10822_s5] sm:$0xff]  ;;  %v489_v3 = vmax.f32 %v233_v0, 1e-06  ;;  %v490_v4 = vmax.f32 %v234_v1, 1e-06  ;;  %v230_v5 = vld [vmem:[%s10822_s5 + $0x8] sm:$0xff] }
  0x37   : > { %v235_v6 = vld [vmem:[%s10822_s5 + $0x30] sm:$0xff]  ;;  %v485_v7 = vmax.f32 %v229_v2, 1e-06  ;;  %v486_v8 = vmax.f32 %v230_v5, 1e-06  ;;  %v236_v9 = vld [vmem:[%s10822_s5 + $0x38] sm:$0xff] }
  0x38   : > { %v231_v10 = vld [vmem:[%s10822_s5 + $0x10] sm:$0xff]  ;;  %9586 = vlog2.f32 %v489_v3  ;;  %v491_v11 = vmax.f32 %v235_v6, 1e-06  ;;  %v232_v12 = vld [vmem:[%s10822_s5 + $0x18] sm:$0xff]  ;;  %v492_v13 = vmax.f32 %v236_v9, 1e-06 }
  0x39   : > { %9588 = vlog2.f32 %v490_v4  ;;  %v239_v14 = vld [vmem:[%s10822_s5 + $0x50] sm:$0xff]  ;;  %v487_v15 = vmax.f32 %v231_v10, 1e-06  ;;  %v240_v16 = vld [vmem:[%s10822_s5 + $0x58] sm:$0xff]  ;;  %v488_v17 = vmax.f32 %v232_v12, 1e-06 }
  0x3a   : > { %9590 = vlog2.f32 %v485_v7  ;;  %v237_v18 = vld [vmem:[%s10822_s5 + $0x40] sm:$0xff]  ;;  %v495_v19 = vmax.f32 %v239_v14, 1e-06  ;;  %v238_v20 = vld [vmem:[%s10822_s5 + $0x48] sm:$0xff]  ;;  %v496_v21 = vmax.f32 %v240_v16, 1e-06 }
  0x3b   : > { %9592 = vlog2.f32 %v486_v8  ;;  %v243_v22 = vld [vmem:[%s10822_s5 + $0x70] sm:$0xff]  ;;  %v493_v23 = vmax.f32 %v237_v18, 1e-06  ;;  %v244_v24 = vld [vmem:[%s10822_s5 + $0x78] sm:$0xff]  ;;  %v494_v25 = vmax.f32 %v238_v20, 1e-06  ;;  %v10845_v32 = vstv %s228_s20 }
  0x3c   : > { %9594 = vlog2.f32 %v491_v11  ;;  %v241_v26 = vld [vmem:[%s10822_s5 + $0x60] sm:$0xff]  ;;  %v499_v27 = vmax.f32 %v243_v22, 1e-06  ;;  %v242_v28 = vld [vmem:[%s10822_s5 + $0x68] sm:$0xff]  ;;  %v500_v29 = vmax.f32 %v244_v24, 1e-06 }
  0x3d   : > { %9596 = vlog2.f32 %v492_v13  ;;  %v247_v30 = vld [vmem:[%s10822_s5 + $0x90] sm:$0xff]  ;;  %14332 = vst [vmem:[#allocation13_spill] sm:$0xff] %v10845_v32  ;;  %v497_v33 = vmax.f32 %v241_v26, 1e-06  ;;  %v498_v36 = vmax.f32 %v242_v28, 1e-06 }
  0x3e   : > { %9598 = vlog2.f32 %v487_v15  ;;  %v503_v39 = vmax.f32 %v247_v30, 1e-06  ;;  %v248_v26 = vld [vmem:[%s10822_s5 + $0x98] sm:$0xff]  ;;  %vm8704_vm2 = vcmask 261312   ;;  %vm8711_vm3 = vcmask 326912   ;;  %s9498_s22 = sshll.u32 %s10818_s29, 3 }
  0x3f   : > { %9600 = vlog2.f32 %v488_v17  ;;  %vm8718_vm4 = vcmask 392512   ;;  %vm8725_vm5 = vcmask 458112   ;;  %vm8732_vm6 = vcmask 523712   ;;  %s9507_s26 = sshll.u32 %s10690_s14, 7  ;;  %s218_s3 = scalar_lea.vmem [#allocation7], %s9498_s22 }
  0x40   : > { %9602 = vlog2.f32 %v495_v19  ;;  %vm8739_vm7 = vcmask 589312   ;;  %vm8746_vm8 = vcmask 654912   ;;  %vm8753_vm9 = vcmask 720512   ;;  %s9397_s6 = sshll.u32 %s218_s3, 4  ;;  %s14187_s9 = scalar_lea.hbm %s14237_s2, %s9507_s26  ;;  %s14189_s6 = int_to_ptr.vmem [resolvable:$true] %s9397_s6 }
  0x41   : > { %9604 = vlog2.f32 %v496_v21  ;;  %vm8760_vm10 = vcmask 786112   ;;  %vm8767_vm11 = vcmask 851712   ;;  %vm8774_vm12 = vcmask 917312   ;;  %s9381_s10 = scalar_lea.sflag [#allocation6], %s10818_s29  ;;  %s10616_s0 = scalar_lea.vmem %s14189_s6, 128 }
  0x42   : > { %v9587_v31 = vpop.eup %9586  ;;  %9606 = vlog2.f32 %v493_v23  ;;  %vm8781_vm13 = vcmask 982912   ;;  %vm8788_vm14 = vcmask 1048512   ;;  %vm9343_vm15 = vcmask 1041409   ;;  %p10617_p2 = scmp.ne.s32.totalorder %s14189_s6, %s10616_s0  ;;  %s10712_s14 = smov [#allocation7]  }
  0x43   : > { %v9589_v34 = vpop.eup %9588  ;;  %v750_v35 = vmul.f32 0.6931472, %v9587_v31  ;;  %9608 = vlog2.f32 %v494_v25  ;;  %s10620_s17 = sshll.u32 %s10712_s14, 4  ;;  %s10621_s17 = int_to_ptr.vmem [resolvable:$false] %s10620_s17 }
  0x44   : > { %v9591_v37 = vpop.eup %9590  ;;  %v752_v38 = vmul.f32 0.6931472, %v9589_v34  ;;  %9610 = vlog2.f32 %v499_v27  ;;  %p10618_p3 = pnand %p10617_p2, %p10782_p9  ;;  %s10622_s19 = scalar_lea.vmem %s10621_s17, 256 }
  0x45   : > { %v9593_v40 = vpop.eup %9592  ;;  %v1258_v41 = vmul.f32 %v10845_v32, %v750_v35  ;;  %v742_v42 = vmul.f32 0.6931472, %v9591_v37  ;;  %9612 = vlog2.f32 %v500_v29  ;;  %p10623_p5 = scmp.lt.s32.totalorder %s14189_s6, %s10621_s17  ;;  %p10624_p6 = scmp.lt.s32.totalorder %s10622_s19, %s10616_s0 }
  0x46   : > { %v9595_v43 = vpop.eup %9594  ;;  %v1259_v44 = vmul.f32 %v10845_v32, %v752_v38  ;;  %v744_v45 = vmul.f32 0.6931472, %v9593_v40  ;;  %9614 = vlog2.f32 %v497_v33  ;;  %v245_v40 = vld [vmem:[%s10822_s5 + $0x80] sm:$0xff]  ;;  %p10619_p4 = pneg %p10618_p3 }
  0x47   : > { %v9597_v46 = vpop.eup %9596  ;;  %v1518_v47 = vmul.f32 1.442695, %v1258_v41  ;;  %v1254_v48 = vmul.f32 %v10845_v32, %v742_v42  ;;  %v754_v49 = vmul.f32 0.6931472, %v9595_v43  ;;  %9616 = vlog2.f32 %v498_v36  ;;  %p10625_p7 = por %p10624_p6, %p10623_p5 }
  0x48   : > { %v9599_v50 = vpop.eup %9598  ;;  %v1520_v51 = vmul.f32 1.442695, %v1259_v44  ;;  %v1255_v52 = vmul.f32 %v10845_v32, %v744_v45  ;;  %v756_v53 = vmul.f32 0.6931472, %v9597_v46  ;;  %9618 = vlog2.f32 %v503_v39  ;;  %v246_v45 = vld [vmem:[%s10822_s5 + $0x88] sm:$0xff] }
  0x49   : > { %v9601_v54 = vpop.eup %9600  ;;  %9620 = vpow2.f32 %v1518_v47  ;;  %v1510_v55 = vmul.f32 1.442695, %v1254_v48  ;;  %v1260_v56 = vmul.f32 %v10845_v32, %v754_v49  ;;  %v746_v57 = vmul.f32 0.6931472, %v9599_v50  ;;  %v251_v48 = vld [vmem:[%s10822_s5 + $0xb0] sm:$0xff]  ;;  %p10626_p8 = pnand %p10625_p7, %p10619_p4 }
  0x4a   : > { %v9603_v58 = vpop.eup %9602  ;;  %9622 = vpow2.f32 %v1520_v51  ;;  %v1512_v59 = vmul.f32 1.442695, %v1255_v52  ;;  %v1261_v60 = vmul.f32 %v10845_v32, %v756_v53  ;;  %v748_v61 = vmul.f32 0.6931472, %v9601_v54  ;;  %v252_v53 = vld [vmem:[%s10822_s5 + $0xb8] sm:$0xff] }
  0x4b   : > { %v9605_v62 = vpop.eup %9604  ;;  %9624 = vpow2.f32 %v1510_v55  ;;  %v1522_v63 = vmul.f32 1.442695, %v1260_v56  ;;  %v1256_v0 = vmul.f32 %v10845_v32, %v746_v57  ;;  %v762_v1 = vmul.f32 0.6931472, %v9603_v58  ;;  %v249_v56 = vld [vmem:[%s10822_s5 + $0xa0] sm:$0xff] }
  0x4c   : > { %v9607_v2 = vpop.eup %9606  ;;  %9626 = vpow2.f32 %v1512_v59  ;;  %v1524_v3 = vmul.f32 1.442695, %v1261_v60  ;;  %v1257_v4 = vmul.f32 %v10845_v32, %v748_v61  ;;  %v764_v5 = vmul.f32 0.6931472, %v9605_v62  ;;  %v250_v60 = vld [vmem:[%s10822_s5 + $0xa8] sm:$0xff] }
  0x4d   : > { %v9609_v6 = vpop.eup %9608  ;;  %9628 = vpow2.f32 %v1522_v63  ;;  %v1514_v7 = vmul.f32 1.442695, %v1256_v0  ;;  %v1264_v8 = vmul.f32 %v10845_v32, %v762_v1  ;;  %v758_v9 = vmul.f32 0.6931472, %v9607_v2  ;;  %v255_v63 = vld [vmem:[%s10822_s5 + $0xd0] sm:$0xff] }
  0x4e   : > { %v9611_v10 = vpop.eup %9610  ;;  %9630 = vpow2.f32 %v1524_v3  ;;  %v1516_v11 = vmul.f32 1.442695, %v1257_v4  ;;  %v1265_v12 = vmul.f32 %v10845_v32, %v764_v5  ;;  %v760_v13 = vmul.f32 0.6931472, %v9609_v6  ;;  %v256_v3 = vld [vmem:[%s10822_s5 + $0xd8] sm:$0xff]  ;;  %v253_v6 = vld [vmem:[%s10822_s5 + $0xc0] sm:$0xff] }
  0x4f   : > { %v9613_v14 = vpop.eup %9612  ;;  %9632 = vpow2.f32 %v1514_v7  ;;  %v1530_v15 = vmul.f32 1.442695, %v1264_v8  ;;  %v1262_v16 = vmul.f32 %v10845_v32, %v758_v9  ;;  %v770_v17 = vmul.f32 0.6931472, %v9611_v10  ;;  %v254_v10 = vld [vmem:[%s10822_s5 + $0xc8] sm:$0xff] }
  0x50   : > { %v9615_v18 = vpop.eup %9614  ;;  %9634 = vpow2.f32 %v1516_v11  ;;  %v1532_v19 = vmul.f32 1.442695, %v1265_v12  ;;  %v1263_v20 = vmul.f32 %v10845_v32, %v760_v13  ;;  %v772_v21 = vmul.f32 0.6931472, %v9613_v14  ;;  %v259_v13 = vld [vmem:[%s10822_s5 + $0xf0] sm:$0xff] }
  0x51   : > { %v9617_v22 = vpop.eup %9616  ;;  %9636 = vpow2.f32 %v1530_v15  ;;  %v1526_v23 = vmul.f32 1.442695, %v1262_v16  ;;  %v1268_v24 = vmul.f32 %v10845_v32, %v770_v17  ;;  %v766_v25 = vmul.f32 0.6931472, %v9615_v18  ;;  %v260_v17 = vld [vmem:[%s10822_s5 + $0xf8] sm:$0xff] }
  0x52   : > { %v9619_v27 = vpop.eup %9618  ;;  %9638 = vpow2.f32 %v1532_v19  ;;  %v1528_v28 = vmul.f32 1.442695, %v1263_v20  ;;  %v1269_v29 = vmul.f32 %v10845_v32, %v772_v21  ;;  %v768_v30 = vmul.f32 0.6931472, %v9617_v22  ;;  %v257_v20 = vld [vmem:[%s10822_s5 + $0xe0] sm:$0xff] }
  0x53   : > { %v9621_v31 = vpop.eup %9620  ;;  %9640 = vpow2.f32 %v1526_v23  ;;  %v1538_v33 = vmul.f32 1.442695, %v1268_v24  ;;  %v1266_v34 = vmul.f32 %v10845_v32, %v766_v25  ;;  %v778_v35 = vmul.f32 0.6931472, %v9619_v27  ;;  %v258_v24 = vld [vmem:[%s10822_s5 + $0xe8] sm:$0xff]  ;;  %v263_v27 = vld [vmem:[%s10822_s5 + $0x110] sm:$0xff] }
  0x54   : > { %v9623_v36 = vpop.eup %9622  ;;  %9642 = vpow2.f32 %v1528_v28  ;;  %v1540_v37 = vmul.f32 1.442695, %v1269_v29  ;;  %v1267_v38 = vmul.f32 %v10845_v32, %v768_v30  ;;  %v504_v39 = vmax.f32 %v248_v26, 1e-06 }
  0x55   : > { %v9625_v41 = vpop.eup %9624  ;;  %v2029_v42 = vadd.f32 %v9623_v36, %v9621_v31  ;;  %9644 = vpow2.f32 %v1538_v33  ;;  %v1534_v43 = vmul.f32 1.442695, %v1266_v34  ;;  %v1272_v44 = vmul.f32 %v10845_v32, %v778_v35  ;;  %v264_v35 = vld [vmem:[%s10822_s5 + $0x118] sm:$0xff] }
  0x56   : > { %v9627_v46 = vpop.eup %9626  ;;  %9646 = vpow2.f32 %v1540_v37  ;;  %v1536_v47 = vmul.f32 1.442695, %v1267_v38  ;;  %v501_v52 = vmax.f32 %v245_v40, 1e-06  ;;  %v502_v55 = vmax.f32 %v246_v45, 1e-06 }
  0x57   : > { %v9629_v49 = vpop.eup %9628  ;;  %2030 = vadd.xlane.f32.xlu1 %v2029_v42  ;;  %v2023_v50 = vadd.f32 %v9627_v46, %v9625_v41  ;;  %9648 = vpow2.f32 %v1534_v43  ;;  %v1546_v51 = vmul.f32 1.442695, %v1272_v44  ;;  %v507_v59 = vmax.f32 %v251_v48, 1e-06 }
  0x58   : > { %v9631_v54 = vpop.eup %9630  ;;  %9650 = vpow2.f32 %v1536_v47  ;;  %v508_v62 = vmax.f32 %v252_v53, 1e-06  ;;  %v505_v2 = vmax.f32 %v249_v56, 1e-06  ;;  %v506_v5 = vmax.f32 %v250_v60, 1e-06 }
  0x59   : > { %v9633_v57 = vpop.eup %9632  ;;  %2024 = vadd.xlane.f32.xlu0 %v2023_v50  ;;  %v2032_v58 = vadd.f32 %v9631_v54, %v9629_v49  ;;  %9652 = vlog2.f32 %v504_v39  ;;  %v511_v9 = vmax.f32 %v255_v63, 1e-06  ;;  %v512_v12 = vmax.f32 %v256_v3, 1e-06 }
  0x5a   : > { %v9635_v61 = vpop.eup %9634  ;;  %9654 = vpow2.f32 %v1546_v51  ;;  %v509_v16 = vmax.f32 %v253_v6, 1e-06  ;;  %v510_v19 = vmax.f32 %v254_v10, 1e-06  ;;  %v515_v23 = vmax.f32 %v259_v13, 1e-06 }
  0x5b   : > { %v9637_v0 = vpop.eup %9636  ;;  %2033 = vadd.xlane.f32.xlu1 %v2032_v58  ;;  %v2026_v1 = vadd.f32 %v9635_v61, %v9633_v57  ;;  %9656 = vlog2.f32 %v501_v52  ;;  %v516_v26 = vmax.f32 %v260_v17, 1e-06  ;;  %v513_v30 = vmax.f32 %v257_v20, 1e-06 }
  0x5c   : > { %v9639_v4 = vpop.eup %9638  ;;  %9658 = vlog2.f32 %v502_v55  ;;  %v514_v34 = vmax.f32 %v258_v24, 1e-06  ;;  %v519_v37 = vmax.f32 %v263_v27, 1e-06  ;;  %v520_v43 = vmax.f32 %v264_v35, 1e-06 }
  0x5d   : > { %v9641_v7 = vpop.eup %9640  ;;  %2027 = vadd.xlane.f32.xlu0 %v2026_v1  ;;  %v2038_v8 = vadd.f32 %v9639_v4, %v9637_v0  ;;  %9660 = vlog2.f32 %v507_v59 }
  0x5e   : > { %v9643_v11 = vpop.eup %9642  ;;  %9662 = vlog2.f32 %v508_v62 }
  0x5f   : > { %v9645_v14 = vpop.eup %9644  ;;  %2039 = vadd.xlane.f32.xlu1 %v2038_v8  ;;  %v2035_v15 = vadd.f32 %v9643_v11, %v9641_v7  ;;  %9664 = vlog2.f32 %v505_v2 }
  0x60   : > { %v9647_v18 = vpop.eup %9646  ;;  %9666 = vlog2.f32 %v506_v5 }
  0x61   : > { %v9649_v21 = vpop.eup %9648  ;;  %2036 = vadd.xlane.f32.xlu0 %v2035_v15  ;;  %v2044_v22 = vadd.f32 %v9647_v18, %v9645_v14  ;;  %9668 = vlog2.f32 %v511_v9 }
  0x62   : > { %v9651_v25 = vpop.eup %9650  ;;  %9670 = vlog2.f32 %v512_v12 }
  0x63   : > { %v9653_v28 = vpop.eup %9652  ;;  %2045 = vadd.xlane.f32.xlu1 %v2044_v22  ;;  %v2041_v29 = vadd.f32 %v9651_v25, %v9649_v21  ;;  %9672 = vlog2.f32 %v509_v16 }
  0x64   : > { %v10880_v31 = vpop.eup %9654  ;;  %v780_v33 = vmul.f32 0.6931472, %v9653_v28  ;;  %9674 = vlog2.f32 %v510_v19 }
  0x65   : > { %v9657_v36 = vpop.eup %9656  ;;  %2042 = vadd.xlane.f32.xlu0 %v2041_v29  ;;  %9676 = vlog2.f32 %v515_v23 }
  0x66   : > { %v9659_v38 = vpop.eup %9658  ;;  %v1273_v39 = vmul.f32 %v10845_v32, %v780_v33  ;;  %v774_v40 = vmul.f32 0.6931472, %v9657_v36  ;;  %9678 = vlog2.f32 %v516_v26  ;;  %v261_v33 = vld [vmem:[%s10822_s5 + $0x100] sm:$0xff] }
  0x67   : > { %v9661_v41 = vpop.eup %9660  ;;  %v776_v42 = vmul.f32 0.6931472, %v9659_v38  ;;  %9680 = vlog2.f32 %v513_v30 }
  0x68   : > { %v9663_v44 = vpop.eup %9662  ;;  %v1548_v45 = vmul.f32 1.442695, %v1273_v39  ;;  %v1270_v46 = vmul.f32 %v10845_v32, %v774_v40  ;;  %v786_v47 = vmul.f32 0.6931472, %v9661_v41  ;;  %9682 = vlog2.f32 %v514_v34 }
  0x69   : > { %v9665_v48 = vpop.eup %9664  ;;  %v1271_v49 = vmul.f32 %v10845_v32, %v776_v42  ;;  %v788_v50 = vmul.f32 0.6931472, %v9663_v44  ;;  %9684 = vlog2.f32 %v519_v37  ;;  %v262_v42 = vld [vmem:[%s10822_s5 + $0x108] sm:$0xff] }
  0x6a   : > { %v9667_v51 = vpop.eup %9666  ;;  %9686 = vpow2.f32 %v1548_v45  ;;  %v1542_v52 = vmul.f32 1.442695, %v1270_v46  ;;  %v1276_v53 = vmul.f32 %v10845_v32, %v786_v47  ;;  %v782_v54 = vmul.f32 0.6931472, %v9665_v48  ;;  %v267_v46 = vld [vmem:[%s10822_s5 + $0x130] sm:$0xff] }
  0x6b   : > { %v9669_v55 = vpop.eup %9668  ;;  %v1544_v56 = vmul.f32 1.442695, %v1271_v49  ;;  %v1277_v57 = vmul.f32 %v10845_v32, %v788_v50  ;;  %v784_v58 = vmul.f32 0.6931472, %v9667_v51  ;;  %9688 = vlog2.f32 %v520_v43  ;;  %v268_v50 = vld [vmem:[%s10822_s5 + $0x138] sm:$0xff] }
  0x6c   : > { %v9671_v59 = vpop.eup %9670  ;;  %9690 = vpow2.f32 %v1542_v52  ;;  %v1554_v60 = vmul.f32 1.442695, %v1276_v53  ;;  %v1274_v61 = vmul.f32 %v10845_v32, %v782_v54  ;;  %v794_v62 = vmul.f32 0.6931472, %v9669_v55  ;;  %v265_v53 = vld [vmem:[%s10822_s5 + $0x120] sm:$0xff] }
  0x6d   : > { %v9673_v63 = vpop.eup %9672  ;;  %9692 = vpow2.f32 %v1544_v56  ;;  %v1556_v0 = vmul.f32 1.442695, %v1277_v57  ;;  %v1275_v1 = vmul.f32 %v10845_v32, %v784_v58  ;;  %v796_v2 = vmul.f32 0.6931472, %v9671_v59  ;;  %v266_v58 = vld [vmem:[%s10822_s5 + $0x128] sm:$0xff] }
  0x6e   : > { %v9675_v3 = vpop.eup %9674  ;;  %9694 = vpow2.f32 %v1554_v60  ;;  %v1550_v4 = vmul.f32 1.442695, %v1274_v61  ;;  %v1280_v5 = vmul.f32 %v10845_v32, %v794_v62  ;;  %v790_v6 = vmul.f32 0.6931472, %v9673_v63  ;;  %v271_v61 = vld [vmem:[%s10822_s5 + $0x150] sm:$0xff] }
  0x6f   : > { %v9677_v7 = vpop.eup %9676  ;;  %9696 = vpow2.f32 %v1556_v0  ;;  %v1552_v8 = vmul.f32 1.442695, %v1275_v1  ;;  %v1281_v9 = vmul.f32 %v10845_v32, %v796_v2  ;;  %v792_v10 = vmul.f32 0.6931472, %v9675_v3  ;;  %v272_v1 = vld [vmem:[%s10822_s5 + $0x158] sm:$0xff] }
  0x70   : > { %v9679_v11 = vpop.eup %9678  ;;  %9698 = vpow2.f32 %v1550_v4  ;;  %v1562_v12 = vmul.f32 1.442695, %v1280_v5  ;;  %v1278_v13 = vmul.f32 %v10845_v32, %v790_v6  ;;  %v802_v14 = vmul.f32 0.6931472, %v9677_v7  ;;  %v269_v4 = vld [vmem:[%s10822_s5 + $0x140] sm:$0xff] }
  0x71   : > { %v9681_v15 = vpop.eup %9680  ;;  %9700 = vpow2.f32 %v1552_v8  ;;  %v1564_v16 = vmul.f32 1.442695, %v1281_v9  ;;  %v1279_v17 = vmul.f32 %v10845_v32, %v792_v10  ;;  %v804_v18 = vmul.f32 0.6931472, %v9679_v11  ;;  %v270_v8 = vld [vmem:[%s10822_s5 + $0x148] sm:$0xff]  ;;  %v275_v11 = vld [vmem:[%s10822_s5 + $0x170] sm:$0xff] }
  0x72   : > { %v9683_v19 = vpop.eup %9682  ;;  %9702 = vpow2.f32 %v1562_v12  ;;  %v1558_v20 = vmul.f32 1.442695, %v1278_v13  ;;  %v1284_v21 = vmul.f32 %v10845_v32, %v802_v14  ;;  %v798_v22 = vmul.f32 0.6931472, %v9681_v15  ;;  %v276_v15 = vld [vmem:[%s10822_s5 + $0x178] sm:$0xff] }
  0x73   : > { %v9685_v23 = vpop.eup %9684  ;;  %9704 = vpow2.f32 %v1564_v16  ;;  %v1560_v24 = vmul.f32 1.442695, %v1279_v17  ;;  %v1285_v25 = vmul.f32 %v10845_v32, %v804_v18  ;;  %v800_v26 = vmul.f32 0.6931472, %v9683_v19  ;;  %v273_v18 = vld [vmem:[%s10822_s5 + $0x160] sm:$0xff] }
  0x74   : > { %v9687_v27 = vpop.eup %9686  ;;  %9706 = vpow2.f32 %v1558_v20  ;;  %v1570_v28 = vmul.f32 1.442695, %v1284_v21  ;;  %v1282_v29 = vmul.f32 %v10845_v32, %v798_v22  ;;  %v810_v30 = vmul.f32 0.6931472, %v9685_v23  ;;  %v274_v22 = vld [vmem:[%s10822_s5 + $0x168] sm:$0xff] }
  0x75   : > { %v9689_v34 = vpop.eup %9688  ;;  %v2050_v35 = vadd.f32 %v9687_v27, %v10880_v31  ;;  %9708 = vpow2.f32 %v1560_v24  ;;  %v1572_v36 = vmul.f32 1.442695, %v1285_v25  ;;  %v1283_v37 = vmul.f32 %v10845_v32, %v800_v26  ;;  %v279_v25 = vld [vmem:[%s10822_s5 + $0x190] sm:$0xff] }
  0x76   : > { %v9691_v38 = vpop.eup %9690  ;;  %9710 = vpow2.f32 %v1570_v28  ;;  %v1566_v39 = vmul.f32 1.442695, %v1282_v29  ;;  %v812_v40 = vmul.f32 0.6931472, %v9689_v34  ;;  %v1288_v41 = vmul.f32 %v10845_v32, %v810_v30  ;;  %v280_v29 = vld [vmem:[%s10822_s5 + $0x198] sm:$0xff] }
  0x77   : > { %v9693_v43 = vpop.eup %9692  ;;  %2051 = vadd.xlane.f32.xlu1 %v2050_v35  ;;  %9712 = vpow2.f32 %v1572_v36  ;;  %v1568_v44 = vmul.f32 1.442695, %v1283_v37  ;;  %v517_v45 = vmax.f32 %v261_v33, 1e-06  ;;  %v518_v52 = vmax.f32 %v262_v42, 1e-06 }
  0x78   : > { %v9695_v31 = vpop.eup %9694  ;;  %v2047_v47 = vadd.f32 %v9693_v43, %v9691_v38  ;;  %9714 = vpow2.f32 %v1566_v39  ;;  %v1289_v48 = vmul.f32 %v10845_v32, %v812_v40  ;;  %v1578_v49 = vmul.f32 1.442695, %v1288_v41  ;;  %v277_v37 = vld [vmem:[%s10822_s5 + $0x180] sm:$0xff] }
  0x79   : > { %v9697_v51 = vpop.eup %9696  ;;  %9716 = vpow2.f32 %v1568_v44  ;;  %v523_v57 = vmax.f32 %v267_v46, 1e-06  ;;  %v524_v60 = vmax.f32 %v268_v50, 1e-06  ;;  %v521_v0 = vmax.f32 %v265_v53, 1e-06 }
  0x7a   : > { %v9699_v54 = vpop.eup %9698  ;;  %2048 = vadd.xlane.f32.xlu0 %v2047_v47  ;;  %v2056_v55 = vadd.f32 %v9697_v51, %v9695_v31  ;;  %9718 = vpow2.f32 %v1578_v49  ;;  %v1580_v56 = vmul.f32 1.442695, %v1289_v48  ;;  %v522_v3 = vmax.f32 %v266_v58, 1e-06 }
  0x7b   : > { %v9701_v59 = vpop.eup %9700  ;;  %9720 = vlog2.f32 %v517_v45  ;;  %v527_v7 = vmax.f32 %v271_v61, 1e-06  ;;  %v528_v10 = vmax.f32 %v272_v1, 1e-06  ;;  %v525_v14 = vmax.f32 %v269_v4, 1e-06 }
  0x7c   : > { %v9703_v62 = vpop.eup %9702  ;;  %2057 = vadd.xlane.f32.xlu1 %v2056_v55  ;;  %v2053_v63 = vadd.f32 %v9701_v59, %v9699_v54  ;;  %9722 = vpow2.f32 %v1580_v56  ;;  %v526_v17 = vmax.f32 %v270_v8, 1e-06  ;;  %v531_v21 = vmax.f32 %v275_v11, 1e-06 }
  0x7d   : > { %v9705_v2 = vpop.eup %9704  ;;  %9724 = vlog2.f32 %v518_v52  ;;  %v532_v24 = vmax.f32 %v276_v15, 1e-06  ;;  %v529_v28 = vmax.f32 %v273_v18, 1e-06  ;;  %v530_v33 = vmax.f32 %v274_v22, 1e-06 }
  0x7e   : > { %v9707_v5 = vpop.eup %9706  ;;  %2054 = vadd.xlane.f32.xlu0 %v2053_v63  ;;  %v2062_v6 = vadd.f32 %v9705_v2, %v9703_v62  ;;  %9726 = vlog2.f32 %v523_v57  ;;  %v535_v36 = vmax.f32 %v279_v25, 1e-06  ;;  %v536_v40 = vmax.f32 %v280_v29, 1e-06 }
  0x7f   : > { %v9709_v9 = vpop.eup %9708  ;;  %9728 = vlog2.f32 %v524_v60  ;;  %v533_v46 = vmax.f32 %v277_v37, 1e-06 }
  0x80   : > { %v9711_v12 = vpop.eup %9710  ;;  %2063 = vadd.xlane.f32.xlu1 %v2062_v6  ;;  %v2059_v13 = vadd.f32 %v9709_v9, %v9707_v5  ;;  %9730 = vlog2.f32 %v521_v0 }
  0x81   : > { %v9713_v16 = vpop.eup %9712  ;;  %9732 = vlog2.f32 %v522_v3 }
  0x82   : > { %v9715_v19 = vpop.eup %9714  ;;  %2060 = vadd.xlane.f32.xlu0 %v2059_v13  ;;  %v2068_v20 = vadd.f32 %v9713_v16, %v9711_v12  ;;  %9734 = vlog2.f32 %v527_v7 }
  0x83   : > { %v9717_v23 = vpop.eup %9716  ;;  %9736 = vlog2.f32 %v528_v10 }
  0x84   : > { %v9719_v26 = vpop.eup %9718  ;;  %2069 = vadd.xlane.f32.xlu1 %v2068_v20  ;;  %v2065_v27 = vadd.f32 %v9717_v23, %v9715_v19  ;;  %9738 = vlog2.f32 %v525_v14 }
  0x85   : > { %v9721_v30 = vpop.eup %9720  ;;  %9740 = vlog2.f32 %v526_v17 }
  0x86   : > { %v9723_v34 = vpop.eup %9722  ;;  %2066 = vadd.xlane.f32.xlu0 %v2065_v27  ;;  %v806_v35 = vmul.f32 0.6931472, %v9721_v30  ;;  %9742 = vlog2.f32 %v531_v21 }
  0x87   : > { %v9725_v38 = vpop.eup %9724  ;;  %v2074_v39 = vadd.f32 %v9723_v34, %v9719_v26  ;;  %9744 = vlog2.f32 %v532_v24 }
  0x88   : > { %v9727_v41 = vpop.eup %9726  ;;  %v808_v42 = vmul.f32 0.6931472, %v9725_v38  ;;  %v1286_v43 = vmul.f32 %v10845_v32, %v806_v35  ;;  %9746 = vlog2.f32 %v529_v28  ;;  %v278_v35 = vld [vmem:[%s10822_s5 + $0x188] sm:$0xff] }
  0x89   : > { %v9729_v44 = vpop.eup %9728  ;;  %2075 = vadd.xlane.f32.xlu1 %v2074_v39  ;;  %v818_v45 = vmul.f32 0.6931472, %v9727_v41  ;;  %9748 = vlog2.f32 %v530_v33 }
  0x8a   : > { %v9731_v31 = vpop.eup %9730  ;;  %v1287_v47 = vmul.f32 %v10845_v32, %v808_v42  ;;  %v1574_v48 = vmul.f32 1.442695, %v1286_v43  ;;  %v820_v49 = vmul.f32 0.6931472, %v9729_v44  ;;  %9750 = vlog2.f32 %v535_v36  ;;  %v283_v43 = vld [vmem:[%s10822_s5 + $0x1b0] sm:$0xff] }
  0x8b   : > { %v9733_v50 = vpop.eup %9732  ;;  %v1292_v51 = vmul.f32 %v10845_v32, %v818_v45  ;;  %v814_v52 = vmul.f32 0.6931472, %v9731_v31  ;;  %9752 = vlog2.f32 %v536_v40  ;;  %v534_v31 = vmax.f32 %v278_v35, 1e-06 }
  0x8c   : > { %v9735_v53 = vpop.eup %9734  ;;  %9754 = vpow2.f32 %v1574_v48  ;;  %v1576_v54 = vmul.f32 1.442695, %v1287_v47  ;;  %v1293_v55 = vmul.f32 %v10845_v32, %v820_v49  ;;  %v816_v56 = vmul.f32 0.6931472, %v9733_v50  ;;  %v284_v47 = vld [vmem:[%s10822_s5 + $0x1b8] sm:$0xff] }
  0x8d   : > { %v9737_v57 = vpop.eup %9736  ;;  %v1586_v58 = vmul.f32 1.442695, %v1292_v51  ;;  %v1290_v59 = vmul.f32 %v10845_v32, %v814_v52  ;;  %v826_v60 = vmul.f32 0.6931472, %v9735_v53  ;;  %9756 = vlog2.f32 %v533_v46  ;;  %v281_v51 = vld [vmem:[%s10822_s5 + $0x1a0] sm:$0xff] }
  0x8e   : > { %v9739_v61 = vpop.eup %9738  ;;  %9758 = vpow2.f32 %v1576_v54  ;;  %v1588_v62 = vmul.f32 1.442695, %v1293_v55  ;;  %v1291_v63 = vmul.f32 %v10845_v32, %v816_v56  ;;  %v828_v0 = vmul.f32 0.6931472, %v9737_v57  ;;  %v282_v55 = vld [vmem:[%s10822_s5 + $0x1a8] sm:$0xff] }
  0x8f   : > { %v9741_v1 = vpop.eup %9740  ;;  %9760 = vpow2.f32 %v1586_v58  ;;  %v1582_v2 = vmul.f32 1.442695, %v1290_v59  ;;  %v1296_v3 = vmul.f32 %v10845_v32, %v826_v60  ;;  %v822_v4 = vmul.f32 0.6931472, %v9739_v61  ;;  %v287_v59 = vld [vmem:[%s10822_s5 + $0x1d0] sm:$0xff] }
  0x90   : > { %v9743_v5 = vpop.eup %9742  ;;  %9762 = vpow2.f32 %v1588_v62  ;;  %v1584_v6 = vmul.f32 1.442695, %v1291_v63  ;;  %v1297_v7 = vmul.f32 %v10845_v32, %v828_v0  ;;  %v824_v8 = vmul.f32 0.6931472, %v9741_v1  ;;  %v288_v63 = vld [vmem:[%s10822_s5 + $0x1d8] sm:$0xff] }
  0x91   : > { %v9745_v9 = vpop.eup %9744  ;;  %9764 = vpow2.f32 %v1582_v2  ;;  %v1594_v10 = vmul.f32 1.442695, %v1296_v3  ;;  %v1294_v11 = vmul.f32 %v10845_v32, %v822_v4  ;;  %v834_v12 = vmul.f32 0.6931472, %v9743_v5  ;;  %v285_v2 = vld [vmem:[%s10822_s5 + $0x1c0] sm:$0xff] }
  0x92   : > { %v9747_v13 = vpop.eup %9746  ;;  %9766 = vpow2.f32 %v1584_v6  ;;  %v1596_v14 = vmul.f32 1.442695, %v1297_v7  ;;  %v1295_v15 = vmul.f32 %v10845_v32, %v824_v8  ;;  %v836_v16 = vmul.f32 0.6931472, %v9745_v9  ;;  %v286_v6 = vld [vmem:[%s10822_s5 + $0x1c8] sm:$0xff]  ;;  %v291_v9 = vld [vmem:[%s10822_s5 + $0x1f0] sm:$0xff] }
  0x93   : > { %v9749_v17 = vpop.eup %9748  ;;  %9768 = vpow2.f32 %v1594_v10  ;;  %v1590_v18 = vmul.f32 1.442695, %v1294_v11  ;;  %v1300_v19 = vmul.f32 %v10845_v32, %v834_v12  ;;  %v830_v20 = vmul.f32 0.6931472, %v9747_v13  ;;  %v292_v13 = vld [vmem:[%s10822_s5 + $0x1f8] sm:$0xff] }
  0x94   : > { %v9751_v21 = vpop.eup %9750  ;;  %9770 = vpow2.f32 %v1596_v14  ;;  %v1592_v22 = vmul.f32 1.442695, %v1295_v15  ;;  %v1301_v23 = vmul.f32 %v10845_v32, %v836_v16  ;;  %v832_v24 = vmul.f32 0.6931472, %v9749_v17  ;;  %v289_v16 = vld [vmem:[%s10822_s5 + $0x1e0] sm:$0xff] }
  0x95   : > { %v9753_v25 = vpop.eup %9752  ;;  %9772 = vpow2.f32 %v1590_v18  ;;  %v1602_v26 = vmul.f32 1.442695, %v1300_v19  ;;  %v1298_v27 = vmul.f32 %v10845_v32, %v830_v20  ;;  %v842_v28 = vmul.f32 0.6931472, %v9751_v21  ;;  %v290_v20 = vld [vmem:[%s10822_s5 + $0x1e8] sm:$0xff] }
  0x96   : > { %v9755_v29 = vpop.eup %9754  ;;  %9774 = vpow2.f32 %v1592_v22  ;;  %v1604_v30 = vmul.f32 1.442695, %v1301_v23  ;;  %v1299_v33 = vmul.f32 %v10845_v32, %v832_v24  ;;  %v844_v34 = vmul.f32 0.6931472, %v9753_v25  ;;  %v295_v23 = vld [vmem:[%s10822_s5 + $0x210] sm:$0xff] }
  0x97   : > { %v9757_v36 = vpop.eup %9756  ;;  %9776 = vpow2.f32 %v1602_v26  ;;  %v1598_v37 = vmul.f32 1.442695, %v1298_v27  ;;  %v1304_v38 = vmul.f32 %v10845_v32, %v842_v28  ;;  %v539_v54 = vmax.f32 %v283_v43, 1e-06  ;;  %v296_v27 = vld [vmem:[%s10822_s5 + $0x218] sm:$0xff] }
  0x98   : > { %v9759_v39 = vpop.eup %9758  ;;  %9778 = vpow2.f32 %v1604_v30  ;;  %v1600_v40 = vmul.f32 1.442695, %v1299_v33  ;;  %v1305_v41 = vmul.f32 %v10845_v32, %v844_v34  ;;  %v838_v42 = vmul.f32 0.6931472, %v9757_v36  ;;  %v293_v30 = vld [vmem:[%s10822_s5 + $0x200] sm:$0xff] }
  0x99   : > { %v9761_v44 = vpop.eup %9760  ;;  %v2071_v45 = vadd.f32 %v9759_v39, %v9755_v29  ;;  %9780 = vpow2.f32 %v1598_v37  ;;  %v1610_v46 = vmul.f32 1.442695, %v1304_v38  ;;  %v540_v58 = vmax.f32 %v284_v47, 1e-06  ;;  %v294_v39 = vld [vmem:[%s10822_s5 + $0x208] sm:$0xff] }
  0x9a   : > { %v9763_v48 = vpop.eup %9762  ;;  %9782 = vpow2.f32 %v1600_v40  ;;  %v1612_v49 = vmul.f32 1.442695, %v1305_v41  ;;  %v1302_v50 = vmul.f32 %v10845_v32, %v838_v42  ;;  %v537_v62 = vmax.f32 %v281_v51, 1e-06 }
  0x9b   : > { %v9765_v52 = vpop.eup %9764  ;;  %2072 = vadd.xlane.f32.xlu0 %v2071_v45  ;;  %v2080_v53 = vadd.f32 %v9763_v48, %v9761_v44  ;;  %9784 = vpow2.f32 %v1610_v46  ;;  %v538_v1 = vmax.f32 %v282_v55, 1e-06  ;;  %v543_v5 = vmax.f32 %v287_v59, 1e-06 }
  0x9c   : > { %v9767_v56 = vpop.eup %9766  ;;  %9786 = vpow2.f32 %v1612_v49  ;;  %v1606_v57 = vmul.f32 1.442695, %v1302_v50  ;;  %v544_v8 = vmax.f32 %v288_v63, 1e-06  ;;  %v541_v12 = vmax.f32 %v285_v2, 1e-06 }
  0x9d   : > { %v9769_v60 = vpop.eup %9768  ;;  %2081 = vadd.xlane.f32.xlu1 %v2080_v53  ;;  %v2077_v61 = vadd.f32 %v9767_v56, %v9765_v52  ;;  %9788 = vlog2.f32 %v534_v31  ;;  %v542_v15 = vmax.f32 %v286_v6, 1e-06  ;;  %v547_v19 = vmax.f32 %v291_v9, 1e-06 }
  0x9e   : > { %v9771_v0 = vpop.eup %9770  ;;  %9790 = vpow2.f32 %v1606_v57  ;;  %v548_v22 = vmax.f32 %v292_v13, 1e-06  ;;  %v545_v26 = vmax.f32 %v289_v16, 1e-06  ;;  %v546_v29 = vmax.f32 %v290_v20, 1e-06 }
  0x9f   : > { %v9773_v3 = vpop.eup %9772  ;;  %2078 = vadd.xlane.f32.xlu0 %v2077_v61  ;;  %v2086_v4 = vadd.f32 %v9771_v0, %v9769_v60  ;;  %9792 = vlog2.f32 %v539_v54  ;;  %v551_v35 = vmax.f32 %v295_v23, 1e-06  ;;  %v552_v38 = vmax.f32 %v296_v27, 1e-06 }
  0xa0   : > { %v9775_v7 = vpop.eup %9774  ;;  %9794 = vlog2.f32 %v540_v58  ;;  %v549_v41 = vmax.f32 %v293_v30, 1e-06  ;;  %v550_v31 = vmax.f32 %v294_v39, 1e-06 }
  0xa1   : > { %v9777_v10 = vpop.eup %9776  ;;  %2087 = vadd.xlane.f32.xlu1 %v2086_v4  ;;  %v2083_v11 = vadd.f32 %v9775_v7, %v9773_v3  ;;  %9796 = vlog2.f32 %v537_v62 }
  0xa2   : > { %v9779_v14 = vpop.eup %9778  ;;  %9798 = vlog2.f32 %v538_v1 }
  0xa3   : > { %v9781_v17 = vpop.eup %9780  ;;  %2084 = vadd.xlane.f32.xlu0 %v2083_v11  ;;  %v2092_v18 = vadd.f32 %v9779_v14, %v9777_v10  ;;  %9800 = vlog2.f32 %v543_v5 }
  0xa4   : > { %v9783_v21 = vpop.eup %9782  ;;  %9802 = vlog2.f32 %v544_v8 }
  0xa5   : > { %v9785_v24 = vpop.eup %9784  ;;  %2093 = vadd.xlane.f32.xlu1 %v2092_v18  ;;  %v2089_v25 = vadd.f32 %v9783_v21, %v9781_v17  ;;  %9804 = vlog2.f32 %v541_v12 }
  0xa6   : > { %v9787_v28 = vpop.eup %9786  ;;  %9806 = vlog2.f32 %v542_v15 }
  0xa7   : > { %v9789_v33 = vpop.eup %9788  ;;  %2090 = vadd.xlane.f32.xlu0 %v2089_v25  ;;  %v2098_v34 = vadd.f32 %v9787_v28, %v9785_v24  ;;  %9808 = vlog2.f32 %v547_v19 }
  0xa8   : > { %v10951_v36 = vpop.eup %9790  ;;  %v840_v37 = vmul.f32 0.6931472, %v9789_v33  ;;  %9810 = vlog2.f32 %v548_v22 }
  0xa9   : > { %v9793_v40 = vpop.eup %9792  ;;  %2099 = vadd.xlane.f32.xlu1 %v2098_v34  ;;  %9812 = vlog2.f32 %v545_v26 }
  0xaa   : > { %v9795_v42 = vpop.eup %9794  ;;  %v1303_v43 = vmul.f32 %v10845_v32, %v840_v37  ;;  %v850_v44 = vmul.f32 0.6931472, %v9793_v40  ;;  %9814 = vlog2.f32 %v546_v29  ;;  %v299_v37 = vld [vmem:[%s10822_s5 + $0x230] sm:$0xff] }
  0xab   : > { %v9797_v45 = vpop.eup %9796  ;;  %v852_v46 = vmul.f32 0.6931472, %v9795_v42  ;;  %9816 = vlog2.f32 %v551_v35 }
  0xac   : > { %v9799_v47 = vpop.eup %9798  ;;  %v1608_v48 = vmul.f32 1.442695, %v1303_v43  ;;  %v1308_v49 = vmul.f32 %v10845_v32, %v850_v44  ;;  %v846_v50 = vmul.f32 0.6931472, %v9797_v45  ;;  %9818 = vlog2.f32 %v552_v38 }
  0xad   : > { %v9801_v51 = vpop.eup %9800  ;;  %v1309_v52 = vmul.f32 %v10845_v32, %v852_v46  ;;  %v848_v53 = vmul.f32 0.6931472, %v9799_v47  ;;  %9820 = vlog2.f32 %v549_v41  ;;  %v300_v46 = vld [vmem:[%s10822_s5 + $0x238] sm:$0xff] }
  0xae   : > { %v9803_v54 = vpop.eup %9802  ;;  %9822 = vpow2.f32 %v1608_v48  ;;  %v1618_v55 = vmul.f32 1.442695, %v1308_v49  ;;  %v1306_v56 = vmul.f32 %v10845_v32, %v846_v50  ;;  %v858_v57 = vmul.f32 0.6931472, %v9801_v51  ;;  %v297_v49 = vld [vmem:[%s10822_s5 + $0x220] sm:$0xff] }
  0xaf   : > { %v9805_v58 = vpop.eup %9804  ;;  %v1620_v59 = vmul.f32 1.442695, %v1309_v52  ;;  %v1307_v60 = vmul.f32 %v10845_v32, %v848_v53  ;;  %v860_v61 = vmul.f32 0.6931472, %v9803_v54  ;;  %9824 = vlog2.f32 %v550_v31  ;;  %v298_v53 = vld [vmem:[%s10822_s5 + $0x228] sm:$0xff] }
  0xb0   : > { %v9807_v62 = vpop.eup %9806  ;;  %9826 = vpow2.f32 %v1618_v55  ;;  %v1614_v63 = vmul.f32 1.442695, %v1306_v56  ;;  %v1312_v0 = vmul.f32 %v10845_v32, %v858_v57  ;;  %v854_v1 = vmul.f32 0.6931472, %v9805_v58  ;;  %v303_v56 = vld [vmem:[%s10822_s5 + $0x250] sm:$0xff] }
  0xb1   : > { %v9809_v2 = vpop.eup %9808  ;;  %9828 = vpow2.f32 %v1620_v59  ;;  %v1616_v3 = vmul.f32 1.442695, %v1307_v60  ;;  %v1313_v4 = vmul.f32 %v10845_v32, %v860_v61  ;;  %v856_v5 = vmul.f32 0.6931472, %v9807_v62  ;;  %v304_v61 = vld [vmem:[%s10822_s5 + $0x258] sm:$0xff] }
  0xb2   : > { %v9811_v6 = vpop.eup %9810  ;;  %9830 = vpow2.f32 %v1614_v63  ;;  %v1626_v7 = vmul.f32 1.442695, %v1312_v0  ;;  %v1310_v8 = vmul.f32 %v10845_v32, %v854_v1  ;;  %v866_v9 = vmul.f32 0.6931472, %v9809_v2  ;;  %v301_v0 = vld [vmem:[%s10822_s5 + $0x240] sm:$0xff] }
  0xb3   : > { %v9813_v10 = vpop.eup %9812  ;;  %9832 = vpow2.f32 %v1616_v3  ;;  %v1628_v11 = vmul.f32 1.442695, %v1313_v4  ;;  %v1311_v12 = vmul.f32 %v10845_v32, %v856_v5  ;;  %v868_v13 = vmul.f32 0.6931472, %v9811_v6  ;;  %v302_v4 = vld [vmem:[%s10822_s5 + $0x248] sm:$0xff] }
  0xb4   : > { %v9815_v14 = vpop.eup %9814  ;;  %9834 = vpow2.f32 %v1626_v7  ;;  %v1622_v15 = vmul.f32 1.442695, %v1310_v8  ;;  %v1316_v16 = vmul.f32 %v10845_v32, %v866_v9  ;;  %v862_v17 = vmul.f32 0.6931472, %v9813_v10  ;;  %v307_v7 = vld [vmem:[%s10822_s5 + $0x270] sm:$0xff] }
  0xb5   : > { %v9817_v18 = vpop.eup %9816  ;;  %9836 = vpow2.f32 %v1628_v11  ;;  %v1624_v19 = vmul.f32 1.442695, %v1311_v12  ;;  %v1317_v20 = vmul.f32 %v10845_v32, %v868_v13  ;;  %v864_v21 = vmul.f32 0.6931472, %v9815_v14  ;;  %v308_v11 = vld [vmem:[%s10822_s5 + $0x278] sm:$0xff]  ;;  %v305_v14 = vld [vmem:[%s10822_s5 + $0x260] sm:$0xff] }
  0xb6   : > { %v9819_v22 = vpop.eup %9818  ;;  %9838 = vpow2.f32 %v1622_v15  ;;  %v1634_v23 = vmul.f32 1.442695, %v1316_v16  ;;  %v1314_v24 = vmul.f32 %v10845_v32, %v862_v17  ;;  %v874_v25 = vmul.f32 0.6931472, %v9817_v18  ;;  %v306_v18 = vld [vmem:[%s10822_s5 + $0x268] sm:$0xff] }
  0xb7   : > { %v9821_v26 = vpop.eup %9820  ;;  %9840 = vpow2.f32 %v1624_v19  ;;  %v1636_v27 = vmul.f32 1.442695, %v1317_v20  ;;  %v1315_v28 = vmul.f32 %v10845_v32, %v864_v21  ;;  %v876_v29 = vmul.f32 0.6931472, %v9819_v22  ;;  %v311_v21 = vld [vmem:[%s10822_s5 + $0x290] sm:$0xff] }
  0xb8   : > { %v9823_v30 = vpop.eup %9822  ;;  %9842 = vpow2.f32 %v1634_v23  ;;  %v1630_v33 = vmul.f32 1.442695, %v1314_v24  ;;  %v1320_v34 = vmul.f32 %v10845_v32, %v874_v25  ;;  %v870_v35 = vmul.f32 0.6931472, %v9821_v26  ;;  %v312_v25 = vld [vmem:[%s10822_s5 + $0x298] sm:$0xff] }
  0xb9   : > { %v9825_v38 = vpop.eup %9824  ;;  %v2095_v39 = vadd.f32 %v9823_v30, %v10951_v36  ;;  %9844 = vpow2.f32 %v1636_v27  ;;  %v1632_v40 = vmul.f32 1.442695, %v1315_v28  ;;  %v1321_v41 = vmul.f32 %v10845_v32, %v876_v29  ;;  %v309_v28 = vld [vmem:[%s10822_s5 + $0x280] sm:$0xff] }
  0xba   : > { %v9827_v42 = vpop.eup %9826  ;;  %9846 = vpow2.f32 %v1630_v33  ;;  %v1642_v43 = vmul.f32 1.442695, %v1320_v34  ;;  %v872_v44 = vmul.f32 0.6931472, %v9825_v38  ;;  %v1318_v45 = vmul.f32 %v10845_v32, %v870_v35  ;;  %v310_v34 = vld [vmem:[%s10822_s5 + $0x288] sm:$0xff] }
  0xbb   : > { %v9829_v31 = vpop.eup %9828  ;;  %2096 = vadd.xlane.f32.xlu0 %v2095_v39  ;;  %9848 = vpow2.f32 %v1632_v40  ;;  %v1644_v47 = vmul.f32 1.442695, %v1321_v41  ;;  %v555_v48 = vmax.f32 %v299_v37, 1e-06  ;;  %v556_v55 = vmax.f32 %v300_v46, 1e-06 }
  0xbc   : > { %v9831_v36 = vpop.eup %9830  ;;  %v2104_v50 = vadd.f32 %v9829_v31, %v9827_v42  ;;  %9850 = vpow2.f32 %v1642_v43  ;;  %v1319_v51 = vmul.f32 %v10845_v32, %v872_v44  ;;  %v1638_v52 = vmul.f32 1.442695, %v1318_v45  ;;  %v315_v41 = vld [vmem:[%s10822_s5 + $0x2b0] sm:$0xff] }
  0xbd   : > { %v9833_v54 = vpop.eup %9832  ;;  %9852 = vpow2.f32 %v1644_v47  ;;  %v553_v60 = vmax.f32 %v297_v49, 1e-06  ;;  %v554_v63 = vmax.f32 %v298_v53, 1e-06  ;;  %v559_v3 = vmax.f32 %v303_v56, 1e-06 }
  0xbe   : > { %v9835_v57 = vpop.eup %9834  ;;  %2105 = vadd.xlane.f32.xlu1 %v2104_v50  ;;  %v2101_v58 = vadd.f32 %v9833_v54, %v9831_v36  ;;  %9854 = vpow2.f32 %v1638_v52  ;;  %v1640_v59 = vmul.f32 1.442695, %v1319_v51  ;;  %v560_v6 = vmax.f32 %v304_v61, 1e-06 }
  0xbf   : > { %v9837_v62 = vpop.eup %9836  ;;  %9856 = vlog2.f32 %v555_v48  ;;  %v557_v10 = vmax.f32 %v301_v0, 1e-06  ;;  %v558_v13 = vmax.f32 %v302_v4, 1e-06  ;;  %v563_v17 = vmax.f32 %v307_v7, 1e-06 }
  0xc0   : > { %v9839_v1 = vpop.eup %9838  ;;  %2102 = vadd.xlane.f32.xlu0 %v2101_v58  ;;  %v2110_v2 = vadd.f32 %v9837_v62, %v9835_v57  ;;  %9858 = vpow2.f32 %v1640_v59  ;;  %v564_v20 = vmax.f32 %v308_v11, 1e-06  ;;  %v561_v24 = vmax.f32 %v305_v14, 1e-06 }
  0xc1   : > { %v9841_v5 = vpop.eup %9840  ;;  %9860 = vlog2.f32 %v556_v55  ;;  %v562_v27 = vmax.f32 %v306_v18, 1e-06  ;;  %v567_v33 = vmax.f32 %v311_v21, 1e-06  ;;  %v568_v37 = vmax.f32 %v312_v25, 1e-06 }
  0xc2   : > { %v9843_v8 = vpop.eup %9842  ;;  %2111 = vadd.xlane.f32.xlu1 %v2110_v2  ;;  %v2107_v9 = vadd.f32 %v9841_v5, %v9839_v1  ;;  %9862 = vlog2.f32 %v553_v60  ;;  %v565_v40 = vmax.f32 %v309_v28, 1e-06  ;;  %v566_v44 = vmax.f32 %v310_v34, 1e-06 }
  0xc3   : > { %v9845_v12 = vpop.eup %9844  ;;  %9864 = vlog2.f32 %v554_v63  ;;  %v571_v49 = vmax.f32 %v315_v41, 1e-06 }
  0xc4   : > { %v9847_v15 = vpop.eup %9846  ;;  %2108 = vadd.xlane.f32.xlu0 %v2107_v9  ;;  %v2116_v16 = vadd.f32 %v9845_v12, %v9843_v8  ;;  %9866 = vlog2.f32 %v559_v3 }
  0xc5   : > { %v9849_v19 = vpop.eup %9848  ;;  %9868 = vlog2.f32 %v560_v6 }
  0xc6   : > { %v9851_v22 = vpop.eup %9850  ;;  %2117 = vadd.xlane.f32.xlu1 %v2116_v16  ;;  %v2113_v23 = vadd.f32 %v9849_v19, %v9847_v15  ;;  %9870 = vlog2.f32 %v557_v10 }
  0xc7   : > { %v9853_v26 = vpop.eup %9852  ;;  %9872 = vlog2.f32 %v558_v13 }
  0xc8   : > { %v9855_v29 = vpop.eup %9854  ;;  %2114 = vadd.xlane.f32.xlu0 %v2113_v23  ;;  %v2122_v30 = vadd.f32 %v9853_v26, %v9851_v22  ;;  %9874 = vlog2.f32 %v563_v17 }
  0xc9   : > { %v9857_v35 = vpop.eup %9856  ;;  %9876 = vlog2.f32 %v564_v20 }
  0xca   : > { %v9859_v38 = vpop.eup %9858  ;;  %2123 = vadd.xlane.f32.xlu1 %v2122_v30  ;;  %v882_v39 = vmul.f32 0.6931472, %v9857_v35  ;;  %9878 = vlog2.f32 %v561_v24 }
  0xcb   : > { %v9861_v42 = vpop.eup %9860  ;;  %v2119_v43 = vadd.f32 %v9859_v38, %v9855_v29  ;;  %9880 = vlog2.f32 %v562_v27 }
  0xcc   : > { %v9863_v45 = vpop.eup %9862  ;;  %v884_v46 = vmul.f32 0.6931472, %v9861_v42  ;;  %v1324_v31 = vmul.f32 %v10845_v32, %v882_v39  ;;  %9882 = vlog2.f32 %v567_v33  ;;  %v316_v39 = vld [vmem:[%s10822_s5 + $0x2b8] sm:$0xff] }
  0xcd   : > { %v9865_v47 = vpop.eup %9864  ;;  %2120 = vadd.xlane.f32.xlu0 %v2119_v43  ;;  %v878_v48 = vmul.f32 0.6931472, %v9863_v45  ;;  %9884 = vlog2.f32 %v568_v37 }
  0xce   : > { %v9867_v36 = vpop.eup %9866  ;;  %v1325_v50 = vmul.f32 %v10845_v32, %v884_v46  ;;  %v1650_v51 = vmul.f32 1.442695, %v1324_v31  ;;  %v880_v52 = vmul.f32 0.6931472, %v9865_v47  ;;  %9886 = vlog2.f32 %v565_v40  ;;  %v313_v31 = vld [vmem:[%s10822_s5 + $0x2a0] sm:$0xff] }
  0xcf   : > { %v9869_v53 = vpop.eup %9868  ;;  %v1322_v54 = vmul.f32 %v10845_v32, %v878_v48  ;;  %v890_v55 = vmul.f32 0.6931472, %v9867_v36  ;;  %9888 = vlog2.f32 %v566_v44  ;;  %v572_v36 = vmax.f32 %v316_v39, 1e-06 }
  0xd0   : > { %v9871_v56 = vpop.eup %9870  ;;  %9890 = vpow2.f32 %v1650_v51  ;;  %v1652_v57 = vmul.f32 1.442695, %v1325_v50  ;;  %v1323_v58 = vmul.f32 %v10845_v32, %v880_v52  ;;  %v892_v59 = vmul.f32 0.6931472, %v9869_v53  ;;  %v314_v50 = vld [vmem:[%s10822_s5 + $0x2a8] sm:$0xff] }
  0xd1   : > { %v9873_v60 = vpop.eup %9872  ;;  %v1646_v61 = vmul.f32 1.442695, %v1322_v54  ;;  %v1328_v62 = vmul.f32 %v10845_v32, %v890_v55  ;;  %v886_v63 = vmul.f32 0.6931472, %v9871_v56  ;;  %9892 = vlog2.f32 %v571_v49  ;;  %v319_v54 = vld [vmem:[%s10822_s5 + $0x2d0] sm:$0xff] }
  0xd2   : > { %v9875_v0 = vpop.eup %9874  ;;  %9894 = vpow2.f32 %v1652_v57  ;;  %v1648_v1 = vmul.f32 1.442695, %v1323_v58  ;;  %v1329_v2 = vmul.f32 %v10845_v32, %v892_v59  ;;  %v888_v3 = vmul.f32 0.6931472, %v9873_v60  ;;  %v320_v58 = vld [vmem:[%s10822_s5 + $0x2d8] sm:$0xff] }
  0xd3   : > { %v9877_v4 = vpop.eup %9876  ;;  %9896 = vpow2.f32 %v1646_v61  ;;  %v1658_v5 = vmul.f32 1.442695, %v1328_v62  ;;  %v1326_v6 = vmul.f32 %v10845_v32, %v886_v63  ;;  %v898_v7 = vmul.f32 0.6931472, %v9875_v0  ;;  %v317_v62 = vld [vmem:[%s10822_s5 + $0x2c0] sm:$0xff] }
  0xd4   : > { %v9879_v8 = vpop.eup %9878  ;;  %9898 = vpow2.f32 %v1648_v1  ;;  %v1660_v9 = vmul.f32 1.442695, %v1329_v2  ;;  %v1327_v10 = vmul.f32 %v10845_v32, %v888_v3  ;;  %v900_v11 = vmul.f32 0.6931472, %v9877_v4  ;;  %v318_v2 = vld [vmem:[%s10822_s5 + $0x2c8] sm:$0xff] }
  0xd5   : > { %v9881_v12 = vpop.eup %9880  ;;  %9900 = vpow2.f32 %v1658_v5  ;;  %v1654_v13 = vmul.f32 1.442695, %v1326_v6  ;;  %v1332_v14 = vmul.f32 %v10845_v32, %v898_v7  ;;  %v894_v15 = vmul.f32 0.6931472, %v9879_v8  ;;  %v323_v5 = vld [vmem:[%s10822_s5 + $0x2f0] sm:$0xff] }
  0xd6   : > { %v9883_v16 = vpop.eup %9882  ;;  %9902 = vpow2.f32 %v1660_v9  ;;  %v1656_v17 = vmul.f32 1.442695, %v1327_v10  ;;  %v1333_v18 = vmul.f32 %v10845_v32, %v900_v11  ;;  %v896_v19 = vmul.f32 0.6931472, %v9881_v12  ;;  %v324_v9 = vld [vmem:[%s10822_s5 + $0x2f8] sm:$0xff]  ;;  %v321_v12 = vld [vmem:[%s10822_s5 + $0x2e0] sm:$0xff] }
  0xd7   : > { %v9885_v20 = vpop.eup %9884  ;;  %9904 = vpow2.f32 %v1654_v13  ;;  %v1666_v21 = vmul.f32 1.442695, %v1332_v14  ;;  %v1330_v22 = vmul.f32 %v10845_v32, %v894_v15  ;;  %v906_v23 = vmul.f32 0.6931472, %v9883_v16  ;;  %v322_v16 = vld [vmem:[%s10822_s5 + $0x2e8] sm:$0xff] }
  0xd8   : > { %v9887_v24 = vpop.eup %9886  ;;  %9906 = vpow2.f32 %v1656_v17  ;;  %v1668_v25 = vmul.f32 1.442695, %v1333_v18  ;;  %v1331_v26 = vmul.f32 %v10845_v32, %v896_v19  ;;  %v908_v27 = vmul.f32 0.6931472, %v9885_v20  ;;  %v327_v19 = vld [vmem:[%s10822_s5 + $0x310] sm:$0xff] }
  0xd9   : > { %v9889_v28 = vpop.eup %9888  ;;  %9908 = vpow2.f32 %v1666_v21  ;;  %v1662_v29 = vmul.f32 1.442695, %v1330_v22  ;;  %v1336_v30 = vmul.f32 %v10845_v32, %v906_v23  ;;  %v902_v33 = vmul.f32 0.6931472, %v9887_v24  ;;  %v328_v23 = vld [vmem:[%s10822_s5 + $0x318] sm:$0xff] }
  0xda   : > { %v9891_v34 = vpop.eup %9890  ;;  %9910 = vpow2.f32 %v1668_v25  ;;  %v1664_v35 = vmul.f32 1.442695, %v1331_v26  ;;  %v1337_v37 = vmul.f32 %v10845_v32, %v908_v27  ;;  %v904_v38 = vmul.f32 0.6931472, %v9889_v28  ;;  %v325_v26 = vld [vmem:[%s10822_s5 + $0x300] sm:$0xff] }
  0xdb   : > { %v9893_v40 = vpop.eup %9892  ;;  %9912 = vpow2.f32 %v1662_v29  ;;  %v1674_v41 = vmul.f32 1.442695, %v1336_v30  ;;  %v1334_v42 = vmul.f32 %v10845_v32, %v902_v33  ;;  %v569_v57 = vmax.f32 %v313_v31, 1e-06  ;;  %v326_v30 = vld [vmem:[%s10822_s5 + $0x308] sm:$0xff] }
  0xdc   : > { %v9895_v43 = vpop.eup %9894  ;;  %9914 = vpow2.f32 %v1664_v35  ;;  %v1676_v44 = vmul.f32 1.442695, %v1337_v37  ;;  %v1335_v45 = vmul.f32 %v10845_v32, %v904_v38  ;;  %v914_v46 = vmul.f32 0.6931472, %v9893_v40  ;;  %v331_v35 = vld [vmem:[%s10822_s5 + $0x330] sm:$0xff] }
  0xdd   : > { %v9897_v47 = vpop.eup %9896  ;;  %v2128_v48 = vadd.f32 %v9895_v43, %v9891_v34  ;;  %9916 = vpow2.f32 %v1674_v41  ;;  %v1670_v49 = vmul.f32 1.442695, %v1334_v42  ;;  %v570_v61 = vmax.f32 %v314_v50, 1e-06  ;;  %v332_v43 = vld [vmem:[%s10822_s5 + $0x338] sm:$0xff] }
  0xde   : > { %v9899_v51 = vpop.eup %9898  ;;  %9918 = vpow2.f32 %v1676_v44  ;;  %v1672_v52 = vmul.f32 1.442695, %v1335_v45  ;;  %v1340_v53 = vmul.f32 %v10845_v32, %v914_v46  ;;  %v575_v1 = vmax.f32 %v319_v54, 1e-06 }
  0xdf   : > { %v9901_v55 = vpop.eup %9900  ;;  %2129 = vadd.xlane.f32.xlu1 %v2128_v48  ;;  %v2125_v56 = vadd.f32 %v9899_v51, %v9897_v47  ;;  %9920 = vpow2.f32 %v1670_v49  ;;  %v576_v4 = vmax.f32 %v320_v58, 1e-06  ;;  %v573_v8 = vmax.f32 %v317_v62, 1e-06 }
  0xe0   : > { %v9903_v59 = vpop.eup %9902  ;;  %9922 = vpow2.f32 %v1672_v52  ;;  %v1682_v60 = vmul.f32 1.442695, %v1340_v53  ;;  %v574_v11 = vmax.f32 %v318_v2, 1e-06  ;;  %v579_v15 = vmax.f32 %v323_v5, 1e-06 }
  0xe1   : > { %v9905_v63 = vpop.eup %9904  ;;  %2126 = vadd.xlane.f32.xlu0 %v2125_v56  ;;  %v2134_v0 = vadd.f32 %v9903_v59, %v9901_v55  ;;  %9924 = vlog2.f32 %v572_v36  ;;  %v580_v18 = vmax.f32 %v324_v9, 1e-06  ;;  %v577_v22 = vmax.f32 %v321_v12, 1e-06 }
  0xe2   : > { %v9907_v3 = vpop.eup %9906  ;;  %9926 = vpow2.f32 %v1682_v60  ;;  %v578_v25 = vmax.f32 %v322_v16, 1e-06  ;;  %v583_v29 = vmax.f32 %v327_v19, 1e-06  ;;  %v584_v34 = vmax.f32 %v328_v23, 1e-06 }
  0xe3   : > { %v9909_v6 = vpop.eup %9908  ;;  %2135 = vadd.xlane.f32.xlu1 %v2134_v0  ;;  %v2131_v7 = vadd.f32 %v9907_v3, %v9905_v63  ;;  %9928 = vlog2.f32 %v569_v57  ;;  %v581_v39 = vmax.f32 %v325_v26, 1e-06  ;;  %v582_v42 = vmax.f32 %v326_v30, 1e-06 }
  0xe4   : > { %v9911_v10 = vpop.eup %9910  ;;  %9930 = vlog2.f32 %v570_v61  ;;  %v587_v45 = vmax.f32 %v331_v35, 1e-06  ;;  %v588_v36 = vmax.f32 %v332_v43, 1e-06 }
  0xe5   : > { %v9913_v13 = vpop.eup %9912  ;;  %2132 = vadd.xlane.f32.xlu0 %v2131_v7  ;;  %v2140_v14 = vadd.f32 %v9911_v10, %v9909_v6  ;;  %9932 = vlog2.f32 %v575_v1 }
  0xe6   : > { %v9915_v17 = vpop.eup %9914  ;;  %9934 = vlog2.f32 %v576_v4 }
  0xe7   : > { %v9917_v20 = vpop.eup %9916  ;;  %2141 = vadd.xlane.f32.xlu1 %v2140_v14  ;;  %v2137_v21 = vadd.f32 %v9915_v17, %v9913_v13  ;;  %9936 = vlog2.f32 %v573_v8 }
  0xe8   : > { %v9919_v24 = vpop.eup %9918  ;;  %9938 = vlog2.f32 %v574_v11 }
  0xe9   : > { %v9921_v27 = vpop.eup %9920  ;;  %2138 = vadd.xlane.f32.xlu0 %v2137_v21  ;;  %v2146_v28 = vadd.f32 %v9919_v24, %v9917_v20  ;;  %9940 = vlog2.f32 %v579_v15 }
  0xea   : > { %v9923_v33 = vpop.eup %9922  ;;  %9942 = vlog2.f32 %v580_v18 }
  0xeb   : > { %v9925_v37 = vpop.eup %9924  ;;  %2147 = vadd.xlane.f32.xlu1 %v2146_v28  ;;  %v2143_v38 = vadd.f32 %v9923_v33, %v9921_v27  ;;  %9944 = vlog2.f32 %v577_v22 }
  0xec   : > { %v11022_v40 = vpop.eup %9926  ;;  %v916_v41 = vmul.f32 0.6931472, %v9925_v37  ;;  %9946 = vlog2.f32 %v578_v25 }
  0xed   : > { %v9929_v44 = vpop.eup %9928  ;;  %2144 = vadd.xlane.f32.xlu0 %v2143_v38  ;;  %9948 = vlog2.f32 %v583_v29 }
  0xee   : > { %v9931_v46 = vpop.eup %9930  ;;  %v1341_v31 = vmul.f32 %v10845_v32, %v916_v41  ;;  %v910_v47 = vmul.f32 0.6931472, %v9929_v44  ;;  %9950 = vlog2.f32 %v584_v34  ;;  %v329_v41 = vld [vmem:[%s10822_s5 + $0x320] sm:$0xff] }
  0xef   : > { %v9933_v48 = vpop.eup %9932  ;;  %v912_v49 = vmul.f32 0.6931472, %v9931_v46  ;;  %9952 = vlog2.f32 %v581_v39 }
  0xf0   : > { %v9935_v50 = vpop.eup %9934  ;;  %v1684_v51 = vmul.f32 1.442695, %v1341_v31  ;;  %v1338_v52 = vmul.f32 %v10845_v32, %v910_v47  ;;  %v922_v53 = vmul.f32 0.6931472, %v9933_v48  ;;  %9954 = vlog2.f32 %v582_v42 }
  0xf1   : > { %v9937_v54 = vpop.eup %9936  ;;  %v1339_v55 = vmul.f32 %v10845_v32, %v912_v49  ;;  %v924_v56 = vmul.f32 0.6931472, %v9935_v50  ;;  %9956 = vlog2.f32 %v587_v45  ;;  %v330_v49 = vld [vmem:[%s10822_s5 + $0x328] sm:$0xff] }
  0xf2   : > { %v9939_v57 = vpop.eup %9938  ;;  %9958 = vpow2.f32 %v1684_v51  ;;  %v1678_v58 = vmul.f32 1.442695, %v1338_v52  ;;  %v1344_v59 = vmul.f32 %v10845_v32, %v922_v53  ;;  %v918_v60 = vmul.f32 0.6931472, %v9937_v54  ;;  %v335_v52 = vld [vmem:[%s10822_s5 + $0x350] sm:$0xff] }
  0xf3   : > { %v9941_v61 = vpop.eup %9940  ;;  %v1680_v62 = vmul.f32 1.442695, %v1339_v55  ;;  %v1345_v63 = vmul.f32 %v10845_v32, %v924_v56  ;;  %v920_v0 = vmul.f32 0.6931472, %v9939_v57  ;;  %9960 = vlog2.f32 %v588_v36  ;;  %v336_v56 = vld [vmem:[%s10822_s5 + $0x358] sm:$0xff] }
  0xf4   : > { %v9943_v1 = vpop.eup %9942  ;;  %9962 = vpow2.f32 %v1678_v58  ;;  %v1690_v2 = vmul.f32 1.442695, %v1344_v59  ;;  %v1342_v3 = vmul.f32 %v10845_v32, %v918_v60  ;;  %v930_v4 = vmul.f32 0.6931472, %v9941_v61  ;;  %v333_v59 = vld [vmem:[%s10822_s5 + $0x340] sm:$0xff] }
  0xf5   : > { %v9945_v5 = vpop.eup %9944  ;;  %9964 = vpow2.f32 %v1680_v62  ;;  %v1692_v6 = vmul.f32 1.442695, %v1345_v63  ;;  %v1343_v7 = vmul.f32 %v10845_v32, %v920_v0  ;;  %v932_v8 = vmul.f32 0.6931472, %v9943_v1  ;;  %v334_v0 = vld [vmem:[%s10822_s5 + $0x348] sm:$0xff] }
  0xf6   : > { %v9947_v9 = vpop.eup %9946  ;;  %9966 = vpow2.f32 %v1690_v2  ;;  %v1686_v10 = vmul.f32 1.442695, %v1342_v3  ;;  %v1348_v11 = vmul.f32 %v10845_v32, %v930_v4  ;;  %v926_v12 = vmul.f32 0.6931472, %v9945_v5  ;;  %v339_v3 = vld [vmem:[%s10822_s5 + $0x370] sm:$0xff] }
  0xf7   : > { %v9949_v13 = vpop.eup %9948  ;;  %9968 = vpow2.f32 %v1692_v6  ;;  %v1688_v14 = vmul.f32 1.442695, %v1343_v7  ;;  %v1349_v15 = vmul.f32 %v10845_v32, %v932_v8  ;;  %v928_v16 = vmul.f32 0.6931472, %v9947_v9  ;;  %v340_v7 = vld [vmem:[%s10822_s5 + $0x378] sm:$0xff] }
  0xf8   : > { %v9951_v17 = vpop.eup %9950  ;;  %9970 = vpow2.f32 %v1686_v10  ;;  %v1698_v18 = vmul.f32 1.442695, %v1348_v11  ;;  %v1346_v19 = vmul.f32 %v10845_v32, %v926_v12  ;;  %v938_v20 = vmul.f32 0.6931472, %v9949_v13  ;;  %v337_v10 = vld [vmem:[%s10822_s5 + $0x360] sm:$0xff] }
  0xf9   : > { %v9953_v21 = vpop.eup %9952  ;;  %9972 = vpow2.f32 %v1688_v14  ;;  %v1700_v22 = vmul.f32 1.442695, %v1349_v15  ;;  %v1347_v23 = vmul.f32 %v10845_v32, %v928_v16  ;;  %v940_v24 = vmul.f32 0.6931472, %v9951_v17  ;;  %v338_v14 = vld [vmem:[%s10822_s5 + $0x368] sm:$0xff]  ;;  %v343_v17 = vld [vmem:[%s10822_s5 + $0x390] sm:$0xff] }
  0xfa   : > { %v9955_v25 = vpop.eup %9954  ;;  %9974 = vpow2.f32 %v1698_v18  ;;  %v1694_v26 = vmul.f32 1.442695, %v1346_v19  ;;  %v1352_v27 = vmul.f32 %v10845_v32, %v938_v20  ;;  %v934_v28 = vmul.f32 0.6931472, %v9953_v21  ;;  %v344_v21 = vld [vmem:[%s10822_s5 + $0x398] sm:$0xff] }
  0xfb   : > { %v9957_v29 = vpop.eup %9956  ;;  %9976 = vpow2.f32 %v1700_v22  ;;  %v1696_v30 = vmul.f32 1.442695, %v1347_v23  ;;  %v1353_v33 = vmul.f32 %v10845_v32, %v940_v24  ;;  %v936_v34 = vmul.f32 0.6931472, %v9955_v25  ;;  %v341_v24 = vld [vmem:[%s10822_s5 + $0x380] sm:$0xff] }
  0xfc   : > { %v9959_v35 = vpop.eup %9958  ;;  %9978 = vpow2.f32 %v1694_v26  ;;  %v1706_v37 = vmul.f32 1.442695, %v1352_v27  ;;  %v1350_v38 = vmul.f32 %v10845_v32, %v934_v28  ;;  %v946_v39 = vmul.f32 0.6931472, %v9957_v29  ;;  %v342_v28 = vld [vmem:[%s10822_s5 + $0x388] sm:$0xff] }
  0xfd   : > { %v9961_v42 = vpop.eup %9960  ;;  %v2152_v43 = vadd.f32 %v9959_v35, %v11022_v40  ;;  %9980 = vpow2.f32 %v1696_v30  ;;  %v1708_v44 = vmul.f32 1.442695, %v1353_v33  ;;  %v1351_v45 = vmul.f32 %v10845_v32, %v936_v34  ;;  %v347_v33 = vld [vmem:[%s10822_s5 + $0x3b0] sm:$0xff] }
  0xfe   : > { %v9963_v46 = vpop.eup %9962  ;;  %9982 = vpow2.f32 %v1706_v37  ;;  %v1702_v31 = vmul.f32 1.442695, %v1350_v38  ;;  %v948_v47 = vmul.f32 0.6931472, %v9961_v42  ;;  %v1356_v48 = vmul.f32 %v10845_v32, %v946_v39  ;;  %v348_v38 = vld [vmem:[%s10822_s5 + $0x3b8] sm:$0xff] }
  0xff   : > { %v9965_v36 = vpop.eup %9964  ;;  %2153 = vadd.xlane.f32.xlu1 %v2152_v43  ;;  %9984 = vpow2.f32 %v1708_v44  ;;  %v1704_v50 = vmul.f32 1.442695, %v1351_v45  ;;  %v585_v51 = vmax.f32 %v329_v41, 1e-06  ;;  %v586_v58 = vmax.f32 %v330_v49, 1e-06 }
 0x100   : > { %v9967_v40 = vpop.eup %9966  ;;  %v2149_v53 = vadd.f32 %v9965_v36, %v9963_v46  ;;  %9986 = vpow2.f32 %v1702_v31  ;;  %v1357_v54 = vmul.f32 %v10845_v32, %v948_v47  ;;  %v1714_v55 = vmul.f32 1.442695, %v1356_v48  ;;  %v345_v45 = vld [vmem:[%s10822_s5 + $0x3a0] sm:$0xff] }
 0x101   : > { %v9969_v57 = vpop.eup %9968  ;;  %9988 = vpow2.f32 %v1704_v50  ;;  %v591_v63 = vmax.f32 %v335_v52, 1e-06  ;;  %v592_v2 = vmax.f32 %v336_v56, 1e-06  ;;  %v589_v6 = vmax.f32 %v333_v59, 1e-06 }
 0x102   : > { %v9971_v60 = vpop.eup %9970  ;;  %2150 = vadd.xlane.f32.xlu0 %v2149_v53  ;;  %v2158_v61 = vadd.f32 %v9969_v57, %v9967_v40  ;;  %9990 = vpow2.f32 %v1714_v55  ;;  %v1716_v62 = vmul.f32 1.442695, %v1357_v54  ;;  %v590_v9 = vmax.f32 %v334_v0, 1e-06 }
 0x103   : > { %v9973_v1 = vpop.eup %9972  ;;  %9992 = vlog2.f32 %v585_v51  ;;  %v595_v13 = vmax.f32 %v339_v3, 1e-06  ;;  %v596_v16 = vmax.f32 %v340_v7, 1e-06  ;;  %v593_v20 = vmax.f32 %v337_v10, 1e-06 }
 0x104   : > { %v9975_v4 = vpop.eup %9974  ;;  %2159 = vadd.xlane.f32.xlu1 %v2158_v61  ;;  %v2155_v5 = vadd.f32 %v9973_v1, %v9971_v60  ;;  %9994 = vpow2.f32 %v1716_v62  ;;  %v594_v23 = vmax.f32 %v338_v14, 1e-06  ;;  %v599_v27 = vmax.f32 %v343_v17, 1e-06 }
 0x105   : > { %v9977_v8 = vpop.eup %9976  ;;  %9996 = vlog2.f32 %v586_v58  ;;  %v600_v30 = vmax.f32 %v344_v21, 1e-06  ;;  %v597_v37 = vmax.f32 %v341_v24, 1e-06  ;;  %v598_v41 = vmax.f32 %v342_v28, 1e-06 }
 0x106   : > { %v9979_v11 = vpop.eup %9978  ;;  %2156 = vadd.xlane.f32.xlu0 %v2155_v5  ;;  %v2164_v12 = vadd.f32 %v9977_v8, %v9975_v4  ;;  %9998 = vlog2.f32 %v591_v63  ;;  %v603_v44 = vmax.f32 %v347_v33, 1e-06  ;;  %v604_v47 = vmax.f32 %v348_v38, 1e-06 }
 0x107   : > { %v9981_v15 = vpop.eup %9980  ;;  %10000 = vlog2.f32 %v592_v2  ;;  %v601_v52 = vmax.f32 %v345_v45, 1e-06 }
 0x108   : > { %v9983_v18 = vpop.eup %9982  ;;  %2165 = vadd.xlane.f32.xlu1 %v2164_v12  ;;  %v2161_v19 = vadd.f32 %v9981_v15, %v9979_v11  ;;  %10002 = vlog2.f32 %v589_v6 }
 0x109   : > { %v9985_v22 = vpop.eup %9984  ;;  %10004 = vlog2.f32 %v590_v9 }
 0x10a   : > { %v9987_v25 = vpop.eup %9986  ;;  %2162 = vadd.xlane.f32.xlu0 %v2161_v19  ;;  %v2170_v26 = vadd.f32 %v9985_v22, %v9983_v18  ;;  %10006 = vlog2.f32 %v595_v13 }
 0x10b   : > { %v9989_v29 = vpop.eup %9988  ;;  %10008 = vlog2.f32 %v596_v16 }
 0x10c   : > { %v9991_v34 = vpop.eup %9990  ;;  %2171 = vadd.xlane.f32.xlu1 %v2170_v26  ;;  %v2167_v35 = vadd.f32 %v9989_v29, %v9987_v25  ;;  %10010 = vlog2.f32 %v593_v20 }
 0x10d   : > { %v9993_v39 = vpop.eup %9992  ;;  %10012 = vlog2.f32 %v594_v23 }
 0x10e   : > { %v9995_v42 = vpop.eup %9994  ;;  %2168 = vadd.xlane.f32.xlu0 %v2167_v35  ;;  %v942_v43 = vmul.f32 0.6931472, %v9993_v39  ;;  %10014 = vlog2.f32 %v599_v27 }
 0x10f   : > { %v9997_v46 = vpop.eup %9996  ;;  %v2176_v31 = vadd.f32 %v9995_v42, %v9991_v34  ;;  %10016 = vlog2.f32 %v600_v30 }
 0x110   : > { %v9999_v48 = vpop.eup %9998  ;;  %v944_v49 = vmul.f32 0.6931472, %v9997_v46  ;;  %v1354_v36 = vmul.f32 %v10845_v32, %v942_v43  ;;  %10018 = vlog2.f32 %v597_v37  ;;  %v346_v43 = vld [vmem:[%s10822_s5 + $0x3a8] sm:$0xff] }
 0x111   : > { %v10001_v50 = vpop.eup %10000  ;;  %2177 = vadd.xlane.f32.xlu1 %v2176_v31  ;;  %v954_v51 = vmul.f32 0.6931472, %v9999_v48  ;;  %10020 = vlog2.f32 %v598_v41 }
 0x112   : > { %v10003_v40 = vpop.eup %10002  ;;  %v1355_v53 = vmul.f32 %v10845_v32, %v944_v49  ;;  %v1710_v54 = vmul.f32 1.442695, %v1354_v36  ;;  %v956_v55 = vmul.f32 0.6931472, %v10001_v50  ;;  %10022 = vlog2.f32 %v603_v44  ;;  %v351_v36 = vld [vmem:[%s10822_s5 + $0x3d0] sm:$0xff] }
 0x113   : > { %v10005_v56 = vpop.eup %10004  ;;  %v1360_v57 = vmul.f32 %v10845_v32, %v954_v51  ;;  %v950_v58 = vmul.f32 0.6931472, %v10003_v40  ;;  %10024 = vlog2.f32 %v604_v47  ;;  %v602_v40 = vmax.f32 %v346_v43, 1e-06 }
 0x114   : > { %v10007_v59 = vpop.eup %10006  ;;  %10026 = vpow2.f32 %v1710_v54  ;;  %v1712_v60 = vmul.f32 1.442695, %v1355_v53  ;;  %v1361_v61 = vmul.f32 %v10845_v32, %v956_v55  ;;  %v952_v62 = vmul.f32 0.6931472, %v10005_v56  ;;  %v352_v53 = vld [vmem:[%s10822_s5 + $0x3d8] sm:$0xff] }
 0x115   : > { %v10009_v63 = vpop.eup %10008  ;;  %v1722_v0 = vmul.f32 1.442695, %v1360_v57  ;;  %v1358_v1 = vmul.f32 %v10845_v32, %v950_v58  ;;  %v962_v2 = vmul.f32 0.6931472, %v10007_v59  ;;  %10028 = vlog2.f32 %v601_v52  ;;  %v349_v57 = vld [vmem:[%s10822_s5 + $0x3c0] sm:$0xff] }
 0x116   : > { %v10011_v3 = vpop.eup %10010  ;;  %10030 = vpow2.f32 %v1712_v60  ;;  %v1724_v4 = vmul.f32 1.442695, %v1361_v61  ;;  %v1359_v5 = vmul.f32 %v10845_v32, %v952_v62  ;;  %v964_v6 = vmul.f32 0.6931472, %v10009_v63  ;;  %v350_v61 = vld [vmem:[%s10822_s5 + $0x3c8] sm:$0xff] }
 0x117   : > { %v10013_v7 = vpop.eup %10012  ;;  %10032 = vpow2.f32 %v1722_v0  ;;  %v1718_v8 = vmul.f32 1.442695, %v1358_v1  ;;  %v1364_v9 = vmul.f32 %v10845_v32, %v962_v2  ;;  %v958_v10 = vmul.f32 0.6931472, %v10011_v3  ;;  %v355_v1 = vld [vmem:[%s10822_s5 + $0x3f0] sm:$0xff] }
 0x118   : > { %v10015_v11 = vpop.eup %10014  ;;  %10034 = vpow2.f32 %v1724_v4  ;;  %v1720_v12 = vmul.f32 1.442695, %v1359_v5  ;;  %v1365_v13 = vmul.f32 %v10845_v32, %v964_v6  ;;  %v960_v14 = vmul.f32 0.6931472, %v10013_v7  ;;  %v356_v5 = vld [vmem:[%s10822_s5 + $0x3f8] sm:$0xff] }
 0x119   : > { %v10017_v15 = vpop.eup %10016  ;;  %10036 = vpow2.f32 %v1718_v8  ;;  %v1730_v16 = vmul.f32 1.442695, %v1364_v9  ;;  %v1362_v17 = vmul.f32 %v10845_v32, %v958_v10  ;;  %v970_v18 = vmul.f32 0.6931472, %v10015_v11  ;;  %v353_v8 = vld [vmem:[%s10822_s5 + $0x3e0] sm:$0xff] }
 0x11a   : > { %v10019_v19 = vpop.eup %10018  ;;  %10038 = vpow2.f32 %v1720_v12  ;;  %v1732_v20 = vmul.f32 1.442695, %v1365_v13  ;;  %v1363_v21 = vmul.f32 %v10845_v32, %v960_v14  ;;  %v972_v22 = vmul.f32 0.6931472, %v10017_v15  ;;  %v354_v12 = vld [vmem:[%s10822_s5 + $0x3e8] sm:$0xff]  ;;  %v359_v15 = vld [vmem:[%s10822_s5 + $0x410] sm:$0xff] }
 0x11b   : > { %v10021_v23 = vpop.eup %10020  ;;  %10040 = vpow2.f32 %v1730_v16  ;;  %v1726_v24 = vmul.f32 1.442695, %v1362_v17  ;;  %v1368_v25 = vmul.f32 %v10845_v32, %v970_v18  ;;  %v966_v26 = vmul.f32 0.6931472, %v10019_v19  ;;  %v360_v19 = vld [vmem:[%s10822_s5 + $0x418] sm:$0xff] }
 0x11c   : > { %v10023_v27 = vpop.eup %10022  ;;  %10042 = vpow2.f32 %v1732_v20  ;;  %v1728_v28 = vmul.f32 1.442695, %v1363_v21  ;;  %v1369_v29 = vmul.f32 %v10845_v32, %v972_v22  ;;  %v968_v30 = vmul.f32 0.6931472, %v10021_v23  ;;  %v357_v22 = vld [vmem:[%s10822_s5 + $0x400] sm:$0xff] }
 0x11d   : > { %v10025_v33 = vpop.eup %10024  ;;  %10044 = vpow2.f32 %v1726_v24  ;;  %v1738_v34 = vmul.f32 1.442695, %v1368_v25  ;;  %v1366_v35 = vmul.f32 %v10845_v32, %v966_v26  ;;  %v978_v37 = vmul.f32 0.6931472, %v10023_v27  ;;  %v358_v26 = vld [vmem:[%s10822_s5 + $0x408] sm:$0xff] }
 0x11e   : > { %v10027_v38 = vpop.eup %10026  ;;  %10046 = vpow2.f32 %v1728_v28  ;;  %v1740_v39 = vmul.f32 1.442695, %v1369_v29  ;;  %v1367_v41 = vmul.f32 %v10845_v32, %v968_v30  ;;  %v980_v42 = vmul.f32 0.6931472, %v10025_v33  ;;  %v363_v29 = vld [vmem:[%s10822_s5 + $0x430] sm:$0xff] }
 0x11f   : > { %v10029_v44 = vpop.eup %10028  ;;  %10048 = vpow2.f32 %v1738_v34  ;;  %v1734_v45 = vmul.f32 1.442695, %v1366_v35  ;;  %v1372_v46 = vmul.f32 %v10845_v32, %v978_v37  ;;  %v607_v60 = vmax.f32 %v351_v36, 1e-06  ;;  %v364_v35 = vld [vmem:[%s10822_s5 + $0x438] sm:$0xff] }
 0x120   : > { %v10031_v31 = vpop.eup %10030  ;;  %10050 = vpow2.f32 %v1740_v39  ;;  %v1736_v47 = vmul.f32 1.442695, %v1367_v41  ;;  %v1373_v48 = vmul.f32 %v10845_v32, %v980_v42  ;;  %v974_v49 = vmul.f32 0.6931472, %v10029_v44  ;;  %v361_v39 = vld [vmem:[%s10822_s5 + $0x420] sm:$0xff] }
 0x121   : > { %v10033_v50 = vpop.eup %10032  ;;  %v2173_v51 = vadd.f32 %v10031_v31, %v10027_v38  ;;  %10052 = vpow2.f32 %v1734_v45  ;;  %v1746_v52 = vmul.f32 1.442695, %v1372_v46  ;;  %v608_v0 = vmax.f32 %v352_v53, 1e-06  ;;  %v362_v31 = vld [vmem:[%s10822_s5 + $0x428] sm:$0xff] }
 0x122   : > { %v10035_v54 = vpop.eup %10034  ;;  %10054 = vpow2.f32 %v1736_v47  ;;  %v1748_v55 = vmul.f32 1.442695, %v1373_v48  ;;  %v1370_v56 = vmul.f32 %v10845_v32, %v974_v49  ;;  %v605_v4 = vmax.f32 %v349_v57, 1e-06 }
 0x123   : > { %v10037_v58 = vpop.eup %10036  ;;  %2174 = vadd.xlane.f32.xlu0 %v2173_v51  ;;  %v2182_v59 = vadd.f32 %v10035_v54, %v10033_v50  ;;  %10056 = vpow2.f32 %v1746_v52  ;;  %v606_v7 = vmax.f32 %v350_v61, 1e-06  ;;  %v611_v11 = vmax.f32 %v355_v1, 1e-06 }
 0x124   : > { %v10039_v62 = vpop.eup %10038  ;;  %10058 = vpow2.f32 %v1748_v55  ;;  %v1742_v63 = vmul.f32 1.442695, %v1370_v56  ;;  %v612_v14 = vmax.f32 %v356_v5, 1e-06  ;;  %v609_v18 = vmax.f32 %v353_v8, 1e-06 }
 0x125   : > { %v10041_v2 = vpop.eup %10040  ;;  %2183 = vadd.xlane.f32.xlu1 %v2182_v59  ;;  %v2179_v3 = vadd.f32 %v10039_v62, %v10037_v58  ;;  %10060 = vlog2.f32 %v602_v40  ;;  %v610_v21 = vmax.f32 %v354_v12, 1e-06  ;;  %v615_v25 = vmax.f32 %v359_v15, 1e-06 }
 0x126   : > { %v10043_v6 = vpop.eup %10042  ;;  %10062 = vpow2.f32 %v1742_v63  ;;  %v616_v28 = vmax.f32 %v360_v19, 1e-06  ;;  %v613_v34 = vmax.f32 %v357_v22, 1e-06  ;;  %v614_v38 = vmax.f32 %v358_v26, 1e-06 }
 0x127   : > { %v10045_v9 = vpop.eup %10044  ;;  %2180 = vadd.xlane.f32.xlu0 %v2179_v3  ;;  %v2188_v10 = vadd.f32 %v10043_v6, %v10041_v2  ;;  %10064 = vlog2.f32 %v607_v60  ;;  %v619_v43 = vmax.f32 %v363_v29, 1e-06  ;;  %v620_v46 = vmax.f32 %v364_v35, 1e-06 }
 0x128   : > { %v10047_v13 = vpop.eup %10046  ;;  %10066 = vlog2.f32 %v608_v0  ;;  %v617_v48 = vmax.f32 %v361_v39, 1e-06  ;;  %v618_v40 = vmax.f32 %v362_v31, 1e-06 }
 0x129   : > { %v10049_v16 = vpop.eup %10048  ;;  %2189 = vadd.xlane.f32.xlu1 %v2188_v10  ;;  %v2185_v17 = vadd.f32 %v10047_v13, %v10045_v9  ;;  %10068 = vlog2.f32 %v605_v4 }
 0x12a   : > { %v10051_v20 = vpop.eup %10050  ;;  %10070 = vlog2.f32 %v606_v7 }
 0x12b   : > { %v10053_v23 = vpop.eup %10052  ;;  %2186 = vadd.xlane.f32.xlu0 %v2185_v17  ;;  %v2194_v24 = vadd.f32 %v10051_v20, %v10049_v16  ;;  %10072 = vlog2.f32 %v611_v11 }
 0x12c   : > { %v10055_v27 = vpop.eup %10054  ;;  %10074 = vlog2.f32 %v612_v14 }
 0x12d   : > { %v10057_v30 = vpop.eup %10056  ;;  %2195 = vadd.xlane.f32.xlu1 %v2194_v24  ;;  %v2191_v33 = vadd.f32 %v10055_v27, %v10053_v23  ;;  %10076 = vlog2.f32 %v609_v18 }
 0x12e   : > { %v10059_v37 = vpop.eup %10058  ;;  %10078 = vlog2.f32 %v610_v21 }
 0x12f   : > { %v10061_v41 = vpop.eup %10060  ;;  %2192 = vadd.xlane.f32.xlu0 %v2191_v33  ;;  %v2200_v42 = vadd.f32 %v10059_v37, %v10057_v30  ;;  %10080 = vlog2.f32 %v615_v25 }
 0x130   : > { %v11093_v44 = vpop.eup %10062  ;;  %v976_v45 = vmul.f32 0.6931472, %v10061_v41  ;;  %10082 = vlog2.f32 %v616_v28 }
 0x131   : > { %v10065_v47 = vpop.eup %10064  ;;  %2201 = vadd.xlane.f32.xlu1 %v2200_v42  ;;  %10084 = vlog2.f32 %v613_v34 }
 0x132   : > { %v10067_v49 = vpop.eup %10066  ;;  %v1371_v36 = vmul.f32 %v10845_v32, %v976_v45  ;;  %v986_v50 = vmul.f32 0.6931472, %v10065_v47  ;;  %10086 = vlog2.f32 %v614_v38  ;;  %v367_v45 = vld [vmem:[%s10822_s5 + $0x450] sm:$0xff] }
 0x133   : > { %v10069_v51 = vpop.eup %10068  ;;  %v988_v52 = vmul.f32 0.6931472, %v10067_v49  ;;  %10088 = vlog2.f32 %v619_v43 }
 0x134   : > { %v10071_v53 = vpop.eup %10070  ;;  %v1744_v54 = vmul.f32 1.442695, %v1371_v36  ;;  %v1376_v55 = vmul.f32 %v10845_v32, %v986_v50  ;;  %v982_v56 = vmul.f32 0.6931472, %v10069_v51  ;;  %10090 = vlog2.f32 %v620_v46 }
 0x135   : > { %v10073_v57 = vpop.eup %10072  ;;  %v1377_v58 = vmul.f32 %v10845_v32, %v988_v52  ;;  %v984_v59 = vmul.f32 0.6931472, %v10071_v53  ;;  %10092 = vlog2.f32 %v617_v48  ;;  %v368_v52 = vld [vmem:[%s10822_s5 + $0x458] sm:$0xff] }
 0x136   : > { %v10075_v60 = vpop.eup %10074  ;;  %10094 = vpow2.f32 %v1744_v54  ;;  %v1754_v61 = vmul.f32 1.442695, %v1376_v55  ;;  %v1374_v62 = vmul.f32 %v10845_v32, %v982_v56  ;;  %v994_v63 = vmul.f32 0.6931472, %v10073_v57  ;;  %v365_v55 = vld [vmem:[%s10822_s5 + $0x440] sm:$0xff] }
 0x137   : > { %v10077_v0 = vpop.eup %10076  ;;  %v1756_v1 = vmul.f32 1.442695, %v1377_v58  ;;  %v1375_v2 = vmul.f32 %v10845_v32, %v984_v59  ;;  %v996_v3 = vmul.f32 0.6931472, %v10075_v60  ;;  %10096 = vlog2.f32 %v618_v40  ;;  %v366_v59 = vld [vmem:[%s10822_s5 + $0x448] sm:$0xff] }
 0x138   : > { %v10079_v4 = vpop.eup %10078  ;;  %10098 = vpow2.f32 %v1754_v61  ;;  %v1750_v5 = vmul.f32 1.442695, %v1374_v62  ;;  %v1380_v6 = vmul.f32 %v10845_v32, %v994_v63  ;;  %v990_v7 = vmul.f32 0.6931472, %v10077_v0  ;;  %v371_v62 = vld [vmem:[%s10822_s5 + $0x470] sm:$0xff] }
 0x139   : > { %v10081_v8 = vpop.eup %10080  ;;  %10100 = vpow2.f32 %v1756_v1  ;;  %v1752_v9 = vmul.f32 1.442695, %v1375_v2  ;;  %v1381_v10 = vmul.f32 %v10845_v32, %v996_v3  ;;  %v992_v11 = vmul.f32 0.6931472, %v10079_v4  ;;  %v372_v3 = vld [vmem:[%s10822_s5 + $0x478] sm:$0xff] }
 0x13a   : > { %v10083_v12 = vpop.eup %10082  ;;  %10102 = vpow2.f32 %v1750_v5  ;;  %v1762_v13 = vmul.f32 1.442695, %v1380_v6  ;;  %v1378_v14 = vmul.f32 %v10845_v32, %v990_v7  ;;  %v1002_v15 = vmul.f32 0.6931472, %v10081_v8  ;;  %v369_v6 = vld [vmem:[%s10822_s5 + $0x460] sm:$0xff] }
 0x13b   : > { %v10085_v16 = vpop.eup %10084  ;;  %10104 = vpow2.f32 %v1752_v9  ;;  %v1764_v17 = vmul.f32 1.442695, %v1381_v10  ;;  %v1379_v18 = vmul.f32 %v10845_v32, %v992_v11  ;;  %v1004_v19 = vmul.f32 0.6931472, %v10083_v12  ;;  %v370_v10 = vld [vmem:[%s10822_s5 + $0x468] sm:$0xff] }
 0x13c   : > { %v10087_v20 = vpop.eup %10086  ;;  %10106 = vpow2.f32 %v1762_v13  ;;  %v1758_v21 = vmul.f32 1.442695, %v1378_v14  ;;  %v1384_v22 = vmul.f32 %v10845_v32, %v1002_v15  ;;  %v998_v23 = vmul.f32 0.6931472, %v10085_v16  ;;  %v375_v13 = vld [vmem:[%s10822_s5 + $0x490] sm:$0xff] }
 0x13d   : > { %v10089_v24 = vpop.eup %10088  ;;  %10108 = vpow2.f32 %v1764_v17  ;;  %v1760_v25 = vmul.f32 1.442695, %v1379_v18  ;;  %v1385_v26 = vmul.f32 %v10845_v32, %v1004_v19  ;;  %v1000_v27 = vmul.f32 0.6931472, %v10087_v20  ;;  %v376_v17 = vld [vmem:[%s10822_s5 + $0x498] sm:$0xff]  ;;  %v373_v20 = vld [vmem:[%s10822_s5 + $0x480] sm:$0xff] }
 0x13e   : > { %v10091_v28 = vpop.eup %10090  ;;  %10110 = vpow2.f32 %v1758_v21  ;;  %v1770_v29 = vmul.f32 1.442695, %v1384_v22  ;;  %v1382_v30 = vmul.f32 %v10845_v32, %v998_v23  ;;  %v1010_v33 = vmul.f32 0.6931472, %v10089_v24  ;;  %v374_v24 = vld [vmem:[%s10822_s5 + $0x488] sm:$0xff] }
 0x13f   : > { %v10093_v34 = vpop.eup %10092  ;;  %10112 = vpow2.f32 %v1760_v25  ;;  %v1772_v35 = vmul.f32 1.442695, %v1385_v26  ;;  %v1383_v37 = vmul.f32 %v10845_v32, %v1000_v27  ;;  %v1012_v38 = vmul.f32 0.6931472, %v10091_v28  ;;  %v379_v27 = vld [vmem:[%s10822_s5 + $0x4b0] sm:$0xff] }
 0x140   : > { %v10095_v39 = vpop.eup %10094  ;;  %10114 = vpow2.f32 %v1770_v29  ;;  %v1766_v41 = vmul.f32 1.442695, %v1382_v30  ;;  %v1388_v42 = vmul.f32 %v10845_v32, %v1010_v33  ;;  %v1006_v43 = vmul.f32 0.6931472, %v10093_v34  ;;  %v380_v33 = vld [vmem:[%s10822_s5 + $0x4b8] sm:$0xff] }
 0x141   : > { %v10097_v46 = vpop.eup %10096  ;;  %v2197_v31 = vadd.f32 %v10095_v39, %v11093_v44  ;;  %10116 = vpow2.f32 %v1772_v35  ;;  %v1768_v47 = vmul.f32 1.442695, %v1383_v37  ;;  %v1389_v48 = vmul.f32 %v10845_v32, %v1012_v38  ;;  %v377_v37 = vld [vmem:[%s10822_s5 + $0x4a0] sm:$0xff] }
 0x142   : > { %v10099_v49 = vpop.eup %10098  ;;  %10118 = vpow2.f32 %v1766_v41  ;;  %v1778_v36 = vmul.f32 1.442695, %v1388_v42  ;;  %v1008_v50 = vmul.f32 0.6931472, %v10097_v46  ;;  %v1386_v51 = vmul.f32 %v10845_v32, %v1006_v43  ;;  %v378_v42 = vld [vmem:[%s10822_s5 + $0x4a8] sm:$0xff] }
 0x143   : > { %v10101_v40 = vpop.eup %10100  ;;  %2198 = vadd.xlane.f32.xlu0 %v2197_v31  ;;  %10120 = vpow2.f32 %v1768_v47  ;;  %v1780_v53 = vmul.f32 1.442695, %v1389_v48  ;;  %v623_v54 = vmax.f32 %v367_v45, 1e-06  ;;  %v624_v61 = vmax.f32 %v368_v52, 1e-06 }
 0x144   : > { %v10103_v44 = vpop.eup %10102  ;;  %v2206_v56 = vadd.f32 %v10101_v40, %v10099_v49  ;;  %10122 = vpow2.f32 %v1778_v36  ;;  %v1387_v57 = vmul.f32 %v10845_v32, %v1008_v50  ;;  %v1774_v58 = vmul.f32 1.442695, %v1386_v51  ;;  %v383_v48 = vld [vmem:[%s10822_s5 + $0x4d0] sm:$0xff] }
 0x145   : > { %v10105_v60 = vpop.eup %10104  ;;  %10124 = vpow2.f32 %v1780_v53  ;;  %v621_v2 = vmax.f32 %v365_v55, 1e-06  ;;  %v622_v5 = vmax.f32 %v366_v59, 1e-06  ;;  %v627_v9 = vmax.f32 %v371_v62, 1e-06 }
 0x146   : > { %v10107_v63 = vpop.eup %10106  ;;  %2207 = vadd.xlane.f32.xlu1 %v2206_v56  ;;  %v2203_v0 = vadd.f32 %v10105_v60, %v10103_v44  ;;  %10126 = vpow2.f32 %v1774_v58  ;;  %v1776_v1 = vmul.f32 1.442695, %v1387_v57  ;;  %v628_v12 = vmax.f32 %v372_v3, 1e-06 }
 0x147   : > { %v10109_v4 = vpop.eup %10108  ;;  %10128 = vlog2.f32 %v623_v54  ;;  %v625_v16 = vmax.f32 %v369_v6, 1e-06  ;;  %v626_v19 = vmax.f32 %v370_v10, 1e-06  ;;  %v631_v23 = vmax.f32 %v375_v13, 1e-06 }
 0x148   : > { %v10111_v7 = vpop.eup %10110  ;;  %2204 = vadd.xlane.f32.xlu0 %v2203_v0  ;;  %v2212_v8 = vadd.f32 %v10109_v4, %v10107_v63  ;;  %10130 = vpow2.f32 %v1776_v1  ;;  %v632_v26 = vmax.f32 %v376_v17, 1e-06  ;;  %v629_v30 = vmax.f32 %v373_v20, 1e-06 }
 0x149   : > { %v10113_v11 = vpop.eup %10112  ;;  %10132 = vlog2.f32 %v624_v61  ;;  %v630_v35 = vmax.f32 %v374_v24, 1e-06  ;;  %v635_v41 = vmax.f32 %v379_v27, 1e-06  ;;  %v636_v45 = vmax.f32 %v380_v33, 1e-06 }
 0x14a   : > { %v10115_v14 = vpop.eup %10114  ;;  %2213 = vadd.xlane.f32.xlu1 %v2212_v8  ;;  %v2209_v15 = vadd.f32 %v10113_v11, %v10111_v7  ;;  %10134 = vlog2.f32 %v621_v2  ;;  %v633_v47 = vmax.f32 %v377_v37, 1e-06  ;;  %v634_v50 = vmax.f32 %v378_v42, 1e-06 }
 0x14b   : > { %v10117_v18 = vpop.eup %10116  ;;  %10136 = vlog2.f32 %v622_v5  ;;  %v639_v55 = vmax.f32 %v383_v48, 1e-06 }
 0x14c   : > { %v10119_v21 = vpop.eup %10118  ;;  %2210 = vadd.xlane.f32.xlu0 %v2209_v15  ;;  %v2218_v22 = vadd.f32 %v10117_v18, %v10115_v14  ;;  %10138 = vlog2.f32 %v627_v9 }
 0x14d   : > { %v10121_v25 = vpop.eup %10120  ;;  %10140 = vlog2.f32 %v628_v12 }
 0x14e   : > { %v10123_v28 = vpop.eup %10122  ;;  %2219 = vadd.xlane.f32.xlu1 %v2218_v22  ;;  %v2215_v29 = vadd.f32 %v10121_v25, %v10119_v21  ;;  %10142 = vlog2.f32 %v625_v16 }
 0x14f   : > { %v10125_v34 = vpop.eup %10124  ;;  %10144 = vlog2.f32 %v626_v19 }
 0x150   : > { %v10127_v38 = vpop.eup %10126  ;;  %2216 = vadd.xlane.f32.xlu0 %v2215_v29  ;;  %v2224_v39 = vadd.f32 %v10125_v34, %v10123_v28  ;;  %10146 = vlog2.f32 %v631_v23 }
 0x151   : > { %v10129_v43 = vpop.eup %10128  ;;  %10148 = vlog2.f32 %v632_v26 }
 0x152   : > { %v10131_v46 = vpop.eup %10130  ;;  %2225 = vadd.xlane.f32.xlu1 %v2224_v39  ;;  %v1018_v31 = vmul.f32 0.6931472, %v10129_v43  ;;  %10150 = vlog2.f32 %v629_v30 }
 0x153   : > { %v10133_v49 = vpop.eup %10132  ;;  %v2221_v36 = vadd.f32 %v10131_v46, %v10127_v38  ;;  %10152 = vlog2.f32 %v630_v35 }
 0x154   : > { %v10135_v51 = vpop.eup %10134  ;;  %v1020_v52 = vmul.f32 0.6931472, %v10133_v49  ;;  %v1392_v40 = vmul.f32 %v10845_v32, %v1018_v31  ;;  %10154 = vlog2.f32 %v635_v41  ;;  %v384_v31 = vld [vmem:[%s10822_s5 + $0x4d8] sm:$0xff] }
 0x155   : > { %v10137_v53 = vpop.eup %10136  ;;  %2222 = vadd.xlane.f32.xlu0 %v2221_v36  ;;  %v1014_v54 = vmul.f32 0.6931472, %v10135_v51  ;;  %10156 = vlog2.f32 %v636_v45 }
 0x156   : > { %v10139_v44 = vpop.eup %10138  ;;  %v1393_v56 = vmul.f32 %v10845_v32, %v1020_v52  ;;  %v1786_v57 = vmul.f32 1.442695, %v1392_v40  ;;  %v1016_v58 = vmul.f32 0.6931472, %v10137_v53  ;;  %10158 = vlog2.f32 %v633_v47  ;;  %v381_v40 = vld [vmem:[%s10822_s5 + $0x4c0] sm:$0xff] }
 0x157   : > { %v10141_v59 = vpop.eup %10140  ;;  %v1390_v60 = vmul.f32 %v10845_v32, %v1014_v54  ;;  %v1026_v61 = vmul.f32 0.6931472, %v10139_v44  ;;  %10160 = vlog2.f32 %v634_v50  ;;  %v640_v44 = vmax.f32 %v384_v31, 1e-06 }
 0x158   : > { %v10143_v62 = vpop.eup %10142  ;;  %10162 = vpow2.f32 %v1786_v57  ;;  %v1788_v63 = vmul.f32 1.442695, %v1393_v56  ;;  %v1391_v0 = vmul.f32 %v10845_v32, %v1016_v58  ;;  %v1028_v1 = vmul.f32 0.6931472, %v10141_v59  ;;  %v382_v56 = vld [vmem:[%s10822_s5 + $0x4c8] sm:$0xff] }
 0x159   : > { %v10145_v2 = vpop.eup %10144  ;;  %v1782_v3 = vmul.f32 1.442695, %v1390_v60  ;;  %v1396_v4 = vmul.f32 %v10845_v32, %v1026_v61  ;;  %v1022_v5 = vmul.f32 0.6931472, %v10143_v62  ;;  %10164 = vlog2.f32 %v639_v55  ;;  %v387_v60 = vld [vmem:[%s10822_s5 + $0x4f0] sm:$0xff] }
 0x15a   : > { %v10147_v6 = vpop.eup %10146  ;;  %10166 = vpow2.f32 %v1788_v63  ;;  %v1784_v7 = vmul.f32 1.442695, %v1391_v0  ;;  %v1397_v8 = vmul.f32 %v10845_v32, %v1028_v1  ;;  %v1024_v9 = vmul.f32 0.6931472, %v10145_v2  ;;  %v11152_v63 = vpop.xlane.xlu1 %2030  ;;  %v388_v1 = vld [vmem:[%s10822_s5 + $0x4f8] sm:$0xff] }
 0x15b   : > { %v10149_v10 = vpop.eup %10148  ;;  %10168 = vpow2.f32 %v1782_v3  ;;  %v1794_v11 = vmul.f32 1.442695, %v1396_v4  ;;  %v1394_v12 = vmul.f32 %v10845_v32, %v1022_v5  ;;  %v1034_v13 = vmul.f32 0.6931472, %v10147_v6  ;;  %v385_v5 = vld [vmem:[%s10822_s5 + $0x4e0] sm:$0xff] }
 0x15c   : > { %v10151_v14 = vpop.eup %10150  ;;  %10170 = vpow2.f32 %v1784_v7  ;;  %v1796_v15 = vmul.f32 1.442695, %v1397_v8  ;;  %v1395_v16 = vmul.f32 %v10845_v32, %v1024_v9  ;;  %v1036_v17 = vmul.f32 0.6931472, %v10149_v10  ;;  %v386_v9 = vld [vmem:[%s10822_s5 + $0x4e8] sm:$0xff] }
 0x15d   : > { %v10153_v18 = vpop.eup %10152  ;;  %10172 = vpow2.f32 %v1794_v11  ;;  %v1790_v19 = vmul.f32 1.442695, %v1394_v12  ;;  %v1400_v20 = vmul.f32 %v10845_v32, %v1034_v13  ;;  %v1030_v21 = vmul.f32 0.6931472, %v10151_v14  ;;  %v11157_v11 = vpop.xlane.xlu0 %2024  ;;  %v391_v13 = vld [vmem:[%s10822_s5 + $0x510] sm:$0xff] }
 0x15e   : > { %v10155_v22 = vpop.eup %10154  ;;  %10174 = vpow2.f32 %v1796_v15  ;;  %v1792_v23 = vmul.f32 1.442695, %v1395_v16  ;;  %v1401_v24 = vmul.f32 %v10845_v32, %v1036_v17  ;;  %v1032_v25 = vmul.f32 0.6931472, %v10153_v18  ;;  %v392_v17 = vld [vmem:[%s10822_s5 + $0x518] sm:$0xff] }
 0x15f   : > { %v10157_v26 = vpop.eup %10156  ;;  %10176 = vpow2.f32 %v1790_v19  ;;  %v1802_v27 = vmul.f32 1.442695, %v1400_v20  ;;  %v1398_v28 = vmul.f32 %v10845_v32, %v1030_v21  ;;  %v1042_v29 = vmul.f32 0.6931472, %v10155_v22  ;;  %v389_v20 = vld [vmem:[%s10822_s5 + $0x500] sm:$0xff] }
 0x160   : > { %v10159_v30 = vpop.eup %10158  ;;  %10178 = vpow2.f32 %v1792_v23  ;;  %v1804_v33 = vmul.f32 1.442695, %v1401_v24  ;;  %v1399_v34 = vmul.f32 %v10845_v32, %v1032_v25  ;;  %v1044_v35 = vmul.f32 0.6931472, %v10157_v26  ;;  %v11162_v23 = vpop.xlane.xlu1 %2033  ;;  %v390_v25 = vld [vmem:[%s10822_s5 + $0x508] sm:$0xff] }
 0x161   : > { %v10161_v37 = vpop.eup %10160  ;;  %10180 = vpow2.f32 %v1802_v27  ;;  %v1798_v38 = vmul.f32 1.442695, %v1398_v28  ;;  %v1404_v39 = vmul.f32 %v10845_v32, %v1042_v29  ;;  %v1038_v41 = vmul.f32 0.6931472, %v10159_v30  ;;  %v395_v28 = vld [vmem:[%s10822_s5 + $0x530] sm:$0xff] }
 0x162   : > { %v10163_v42 = vpop.eup %10162  ;;  %10182 = vpow2.f32 %v1804_v33  ;;  %v1800_v43 = vmul.f32 1.442695, %v1399_v34  ;;  %v1405_v45 = vmul.f32 %v10845_v32, %v1044_v35  ;;  %v1040_v46 = vmul.f32 0.6931472, %v10161_v37  ;;  %v396_v34 = vld [vmem:[%s10822_s5 + $0x538] sm:$0xff]  ;;  %v11167_v37 = vpop.xlane.xlu0 %2027 }
 0x163   : > { %v10165_v47 = vpop.eup %10164  ;;  %10184 = vpow2.f32 %v1798_v38  ;;  %v1810_v48 = vmul.f32 1.442695, %v1404_v39  ;;  %v1402_v49 = vmul.f32 %v10845_v32, %v1038_v41  ;;  %v637_v0 = vmax.f32 %v381_v40, 1e-06  ;;  %v393_v39 = vld [vmem:[%s10822_s5 + $0x520] sm:$0xff] }
 0x164   : > { %v10167_v36 = vpop.eup %10166  ;;  %10186 = vpow2.f32 %v1800_v43  ;;  %v1812_v50 = vmul.f32 1.442695, %v1405_v45  ;;  %v1403_v51 = vmul.f32 %v10845_v32, %v1040_v46  ;;  %v1050_v52 = vmul.f32 0.6931472, %v10165_v47  ;;  %v394_v45 = vld [vmem:[%s10822_s5 + $0x528] sm:$0xff]  ;;  %v399_v47 = vld [vmem:[%s10822_s5 + $0x550] sm:$0xff] }
 0x165   : > { %v10169_v53 = vpop.eup %10168  ;;  %v2230_v54 = vadd.f32 %v10167_v36, %v10163_v42  ;;  %10188 = vpow2.f32 %v1810_v48  ;;  %v1806_v55 = vmul.f32 1.442695, %v1402_v49  ;;  %v638_v4 = vmax.f32 %v382_v56, 1e-06  ;;  %v11172_v36 = vpop.xlane.xlu1 %2039 }
 0x166   : > { %v10171_v57 = vpop.eup %10170  ;;  %10190 = vpow2.f32 %v1812_v50  ;;  %v1808_v58 = vmul.f32 1.442695, %v1403_v51  ;;  %v1408_v59 = vmul.f32 %v10845_v32, %v1050_v52  ;;  %v643_v8 = vmax.f32 %v387_v60, 1e-06 }
 0x167   : > { %v10173_v61 = vpop.eup %10172  ;;  %2231 = vadd.xlane.f32.xlu1 %v2230_v54  ;;  %v2227_v62 = vadd.f32 %v10171_v57, %v10169_v53  ;;  %10192 = vpow2.f32 %v1806_v55  ;;  %v644_v12 = vmax.f32 %v388_v1, 1e-06  ;;  %v641_v16 = vmax.f32 %v385_v5, 1e-06  ;;  %v400_v53 = vld [vmem:[%s10822_s5 + $0x558] sm:$0xff] }
 0x168   : > { %v10175_v2 = vpop.eup %10174  ;;  %10194 = vpow2.f32 %v1808_v58  ;;  %v1818_v3 = vmul.f32 1.442695, %v1408_v59  ;;  %v642_v19 = vmax.f32 %v386_v9, 1e-06  ;;  %v647_v24 = vmax.f32 %v391_v13, 1e-06  ;;  %v11178_v58 = vpop.xlane.xlu0 %2036 }
 0x169   : > { %v10177_v6 = vpop.eup %10176  ;;  %2228 = vadd.xlane.f32.xlu0 %v2227_v62  ;;  %v2236_v7 = vadd.f32 %v10175_v2, %v10173_v61  ;;  %10196 = vlog2.f32 %v640_v44  ;;  %v648_v27 = vmax.f32 %v392_v17, 1e-06  ;;  %v645_v33 = vmax.f32 %v389_v20, 1e-06  ;;  %v11182_v5 = vpop.xlane.xlu1 %2045 }
 0x16a   : > { %v10179_v10 = vpop.eup %10178  ;;  %10198 = vpow2.f32 %v1818_v3  ;;  %v646_v38 = vmax.f32 %v390_v25, 1e-06  ;;  %v651_v43 = vmax.f32 %v395_v28, 1e-06  ;;  %v652_v31 = vmax.f32 %v396_v34, 1e-06 }
 0x16b   : > { %v10181_v14 = vpop.eup %10180  ;;  %2237 = vadd.xlane.f32.xlu1 %v2236_v7  ;;  %v2233_v15 = vadd.f32 %v10179_v10, %v10177_v6  ;;  %10200 = vlog2.f32 %v637_v0  ;;  %v649_v50 = vmax.f32 %v393_v39, 1e-06  ;;  %v650_v40 = vmax.f32 %v394_v45, 1e-06 }
 0x16c   : > { %v10183_v18 = vpop.eup %10182  ;;  %10202 = vlog2.f32 %v638_v4  ;;  %v655_v55 = vmax.f32 %v399_v47, 1e-06  ;;  %v656_v61 = vmax.f32 %v400_v53, 1e-06 }
 0x16d   : > { %v10185_v21 = vpop.eup %10184  ;;  %2234 = vadd.xlane.f32.xlu0 %v2233_v15  ;;  %v2242_v22 = vadd.f32 %v10183_v18, %v10181_v14  ;;  %10204 = vlog2.f32 %v643_v8  ;;  %v11191_v34 = vpop.xlane.xlu1 %2051 }
 0x16e   : > { %v10187_v26 = vpop.eup %10186  ;;  %10206 = vlog2.f32 %v644_v12 }
 0x16f   : > { %v10189_v29 = vpop.eup %10188  ;;  %2243 = vadd.xlane.f32.xlu1 %v2242_v22  ;;  %v2239_v30 = vadd.f32 %v10187_v26, %v10185_v21  ;;  %10208 = vlog2.f32 %v641_v16 }
 0x170   : > { %v10191_v35 = vpop.eup %10190  ;;  %10210 = vlog2.f32 %v642_v19  ;;  %v11187_v19 = vpop.xlane.xlu0 %2042 }
 0x171   : > { %v10193_v41 = vpop.eup %10192  ;;  %2240 = vadd.xlane.f32.xlu0 %v2239_v30  ;;  %v2248_v42 = vadd.f32 %v10191_v35, %v10189_v29  ;;  %10212 = vlog2.f32 %v647_v24 }
 0x172   : > { %v10195_v46 = vpop.eup %10194  ;;  %10214 = vlog2.f32 %v648_v27 }
 0x173   : > { %v10197_v48 = vpop.eup %10196  ;;  %2249 = vadd.xlane.f32.xlu1 %v2248_v42  ;;  %v2245_v49 = vadd.f32 %v10195_v46, %v10193_v41  ;;  %10216 = vlog2.f32 %v645_v33 }
 0x174   : > { %v11174_v51 = vpop.eup %10198  ;;  %v1052_v52 = vmul.f32 0.6931472, %v10197_v48  ;;  %10218 = vlog2.f32 %v646_v38 }
 0x175   : > { %v10201_v54 = vpop.eup %10200  ;;  %2246 = vadd.xlane.f32.xlu0 %v2245_v49  ;;  %10220 = vlog2.f32 %v651_v43 }
 0x176   : > { %v10203_v44 = vpop.eup %10202  ;;  %v1409_v56 = vmul.f32 %v10845_v32, %v1052_v52  ;;  %v1046_v57 = vmul.f32 0.6931472, %v10201_v54  ;;  %10222 = vlog2.f32 %v652_v31 }
 0x177   : > { %v10205_v59 = vpop.eup %10204  ;;  %v1048_v60 = vmul.f32 0.6931472, %v10203_v44  ;;  %10224 = vlog2.f32 %v649_v50  ;;  %v11196_v50 = vpop.xlane.xlu0 %2048 }
 0x178   : > { %v10207_v62 = vpop.eup %10206  ;;  %v1820_v0 = vmul.f32 1.442695, %v1409_v56  ;;  %v1406_v1 = vmul.f32 %v10845_v32, %v1046_v57  ;;  %v1058_v2 = vmul.f32 0.6931472, %v10205_v59  ;;  %10226 = vlog2.f32 %v650_v40 }
 0x179   : > { %v10209_v3 = vpop.eup %10208  ;;  %v1407_v4 = vmul.f32 %v10845_v32, %v1048_v60  ;;  %v1060_v6 = vmul.f32 0.6931472, %v10207_v62  ;;  %10228 = vlog2.f32 %v655_v55 }
 0x17a   : > { %v10211_v7 = vpop.eup %10210  ;;  %10230 = vpow2.f32 %v1820_v0  ;;  %v1814_v8 = vmul.f32 1.442695, %v1406_v1  ;;  %v1412_v9 = vmul.f32 %v10845_v32, %v1058_v2  ;;  %v1054_v10 = vmul.f32 0.6931472, %v10209_v3  ;;  %v11203_v1 = vpop.xlane.xlu1 %2057 }
 0x17b   : > { %v10213_v12 = vpop.eup %10212  ;;  %v1816_v13 = vmul.f32 1.442695, %v1407_v4  ;;  %v1413_v14 = vmul.f32 %v10845_v32, %v1060_v6  ;;  %v1056_v15 = vmul.f32 0.6931472, %v10211_v7  ;;  %10232 = vlog2.f32 %v656_v61  ;;  %v397_v61 = vld [vmem:[%s10822_s5 + $0x540] sm:$0xff] }
 0x17c   : > { %v10215_v16 = vpop.eup %10214  ;;  %10234 = vpow2.f32 %v1814_v8  ;;  %v1826_v17 = vmul.f32 1.442695, %v1412_v9  ;;  %v1410_v18 = vmul.f32 %v10845_v32, %v1054_v10  ;;  %v1066_v20 = vmul.f32 0.6931472, %v10213_v12  ;;  %v398_v9 = vld [vmem:[%s10822_s5 + $0x548] sm:$0xff] }
 0x17d   : > { %v10217_v21 = vpop.eup %10216  ;;  %10236 = vpow2.f32 %v1816_v13  ;;  %v1828_v22 = vmul.f32 1.442695, %v1413_v14  ;;  %v1411_v24 = vmul.f32 %v10845_v32, %v1056_v15  ;;  %v1068_v25 = vmul.f32 0.6931472, %v10215_v16  ;;  %v403_v13 = vld [vmem:[%s10822_s5 + $0x570] sm:$0xff]  ;;  %v11209_v16 = vpop.xlane.xlu0 %2054 }
 0x17e   : > { %v10219_v26 = vpop.eup %10218  ;;  %10238 = vpow2.f32 %v1826_v17  ;;  %v1822_v27 = vmul.f32 1.442695, %v1410_v18  ;;  %v1416_v28 = vmul.f32 %v10845_v32, %v1066_v20  ;;  %v1062_v29 = vmul.f32 0.6931472, %v10217_v21  ;;  %v404_v20 = vld [vmem:[%s10822_s5 + $0x578] sm:$0xff] }
 0x17f   : > { %v10221_v30 = vpop.eup %10220  ;;  %10240 = vpow2.f32 %v1828_v22  ;;  %v1824_v33 = vmul.f32 1.442695, %v1411_v24  ;;  %v1417_v35 = vmul.f32 %v10845_v32, %v1068_v25  ;;  %v1064_v38 = vmul.f32 0.6931472, %v10219_v26  ;;  %v401_v24 = vld [vmem:[%s10822_s5 + $0x560] sm:$0xff] }
 0x180   : > { %v10223_v39 = vpop.eup %10222  ;;  %10242 = vpow2.f32 %v1822_v27  ;;  %v1834_v41 = vmul.f32 1.442695, %v1416_v28  ;;  %v1414_v42 = vmul.f32 %v10845_v32, %v1062_v29  ;;  %v1074_v43 = vmul.f32 0.6931472, %v10221_v30  ;;  %v402_v29 = vld [vmem:[%s10822_s5 + $0x568] sm:$0xff] }
 0x181   : > { %v10225_v45 = vpop.eup %10224  ;;  %10244 = vpow2.f32 %v1824_v33  ;;  %v1836_v46 = vmul.f32 1.442695, %v1417_v35  ;;  %v1415_v31 = vmul.f32 %v10845_v32, %v1064_v38  ;;  %v1076_v47 = vmul.f32 0.6931472, %v10223_v39  ;;  %v11215_v33 = vpop.xlane.xlu1 %2063  ;;  %v407_v38 = vld [vmem:[%s10822_s5 + $0x590] sm:$0xff] }
 0x182   : > { %v10227_v48 = vpop.eup %10226  ;;  %10246 = vpow2.f32 %v1834_v41  ;;  %v1830_v49 = vmul.f32 1.442695, %v1414_v42  ;;  %v1420_v52 = vmul.f32 %v10845_v32, %v1074_v43  ;;  %v1070_v40 = vmul.f32 0.6931472, %v10225_v45  ;;  %v408_v43 = vld [vmem:[%s10822_s5 + $0x598] sm:$0xff] }
 0x183   : > { %v10229_v53 = vpop.eup %10228  ;;  %10248 = vpow2.f32 %v1836_v46  ;;  %v1832_v54 = vmul.f32 1.442695, %v1415_v31  ;;  %v1421_v55 = vmul.f32 %v10845_v32, %v1076_v47  ;;  %v1072_v44 = vmul.f32 0.6931472, %v10227_v48  ;;  %v405_v31 = vld [vmem:[%s10822_s5 + $0x580] sm:$0xff] }
 0x184   : > { %v10231_v56 = vpop.eup %10230  ;;  %10250 = vpow2.f32 %v1830_v49  ;;  %v1842_v57 = vmul.f32 1.442695, %v1420_v52  ;;  %v1418_v59 = vmul.f32 %v10845_v32, %v1070_v40  ;;  %v1082_v60 = vmul.f32 0.6931472, %v10229_v53  ;;  %v11220_v49 = vpop.xlane.xlu0 %2060  ;;  %v406_v40 = vld [vmem:[%s10822_s5 + $0x588] sm:$0xff] }
 0x185   : > { %v10233_v62 = vpop.eup %10232  ;;  %v2254_v0 = vadd.f32 %v10231_v56, %v11174_v51  ;;  %10252 = vpow2.f32 %v1832_v54  ;;  %v1844_v2 = vmul.f32 1.442695, %v1421_v55  ;;  %v1419_v3 = vmul.f32 %v10845_v32, %v1072_v44  ;;  %v411_v55 = vld [vmem:[%s10822_s5 + $0x5b0] sm:$0xff] }
 0x186   : > { %v10235_v4 = vpop.eup %10234  ;;  %10254 = vpow2.f32 %v1842_v57  ;;  %v1838_v6 = vmul.f32 1.442695, %v1418_v59  ;;  %v1084_v7 = vmul.f32 0.6931472, %v10233_v62  ;;  %v1424_v8 = vmul.f32 %v10845_v32, %v1082_v60  ;;  %v412_v59 = vld [vmem:[%s10822_s5 + $0x5b8] sm:$0xff] }
 0x187   : > { %v10237_v10 = vpop.eup %10236  ;;  %2255 = vadd.xlane.f32.xlu1 %v2254_v0  ;;  %10256 = vpow2.f32 %v1844_v2  ;;  %v1840_v51 = vmul.f32 1.442695, %v1419_v3  ;;  %v653_v12 = vmax.f32 %v397_v61, 1e-06  ;;  %v654_v22 = vmax.f32 %v398_v9, 1e-06  ;;  %v11225_v61 = vpop.xlane.xlu1 %2069 }
 0x188   : > { %v10239_v14 = vpop.eup %10238  ;;  %v2251_v15 = vadd.f32 %v10237_v10, %v10235_v4  ;;  %10258 = vpow2.f32 %v1838_v6  ;;  %v1425_v17 = vmul.f32 %v10845_v32, %v1084_v7  ;;  %v1850_v18 = vmul.f32 1.442695, %v1424_v8  ;;  %v409_v0 = vld [vmem:[%s10822_s5 + $0x5a0] sm:$0xff]  ;;  %v410_v6 = vld [vmem:[%s10822_s5 + $0x5a8] sm:$0xff] }
 0x189   : > { %v10241_v21 = vpop.eup %10240  ;;  %10260 = vpow2.f32 %v1840_v51  ;;  %v659_v28 = vmax.f32 %v403_v13, 1e-06  ;;  %v660_v35 = vmax.f32 %v404_v20, 1e-06  ;;  %v657_v42 = vmax.f32 %v401_v24, 1e-06 }
 0x18a   : > { %v10243_v25 = vpop.eup %10242  ;;  %2252 = vadd.xlane.f32.xlu0 %v2251_v15  ;;  %v2260_v26 = vadd.f32 %v10241_v21, %v10239_v14  ;;  %10262 = vpow2.f32 %v1850_v18  ;;  %v1852_v27 = vmul.f32 1.442695, %v1425_v17  ;;  %v658_v46 = vmax.f32 %v402_v29, 1e-06  ;;  %v415_v51 = vld [vmem:[%s10822_s5 + $0x5d0] sm:$0xff]  ;;  %v11232_v15 = vpop.xlane.xlu0 %2066  ;;  %v416_v18 = vld [vmem:[%s10822_s5 + $0x5d8] sm:$0xff] }
 0x18b   : > { %v10245_v30 = vpop.eup %10244  ;;  %10264 = vlog2.f32 %v653_v12  ;;  %v663_v52 = vmax.f32 %v407_v38, 1e-06  ;;  %v664_v54 = vmax.f32 %v408_v43, 1e-06  ;;  %v661_v57 = vmax.f32 %v405_v31, 1e-06 }
 0x18c   : > { %v10247_v39 = vpop.eup %10246  ;;  %2261 = vadd.xlane.f32.xlu1 %v2260_v26  ;;  %v2257_v41 = vadd.f32 %v10245_v30, %v10243_v25  ;;  %10266 = vpow2.f32 %v1852_v27  ;;  %v662_v62 = vmax.f32 %v406_v40, 1e-06  ;;  %v667_v4 = vmax.f32 %v411_v55, 1e-06  ;;  %v413_v30 = vld [vmem:[%s10822_s5 + $0x5c0] sm:$0xff] }
 0x18d   : > { %v10249_v45 = vpop.eup %10248  ;;  %10268 = vlog2.f32 %v654_v22  ;;  %v10706_v8 = vmov 269488144   ;;  %v668_v10 = vmax.f32 %v412_v59, 1e-06  ;;  %v14238_v13 = vlaneseq }
 0x18e   : > { %v10251_v47 = vpop.eup %10250  ;;  %2258 = vadd.xlane.f32.xlu0 %v2257_v41  ;;  %v2266_v48 = vadd.f32 %v10249_v45, %v10247_v39  ;;  %10270 = vlog2.f32 %v659_v28  ;;  %v11229_v9 = vunpack.c.l.s4 %v10706_v8  ;;  %v665_v17 = vmax.f32 %v409_v0, 1e-06  ;;  %v11241_v41 = vpop.xlane.xlu1 %2075 }
 0x18f   : > { %v10253_v53 = vpop.eup %10252  ;;  %10272 = vlog2.f32 %v660_v35  ;;  %v10707_v21 = vmov 842150450   ;;  %v666_v24 = vmax.f32 %v410_v6, 1e-06  ;;  %v10708_v26 = vmov 1414812756  }
 0x190   : > { %v10255_v44 = vpop.eup %10254  ;;  %2267 = vadd.xlane.f32.xlu1 %v2266_v48  ;;  %v2263_v56 = vadd.f32 %v10253_v53, %v10251_v47  ;;  %10274 = vlog2.f32 %v657_v42  ;;  %v11235_v22 = vunpack.c.l.s4 %v10707_v21  ;;  %v11237_v27 = vunpack.c.l.s4 %v10708_v26 }
 0x191   : > { %v10257_v60 = vpop.eup %10256  ;;  %10276 = vlog2.f32 %v658_v46  ;;  %v671_v29 = vmax.f32 %v415_v51, 1e-06  ;;  %v2537_v38 = vunpack.c.0.s8 %v11229_v9  ;;  %v672_v42 = vmax.f32 %v416_v18, 1e-06  ;;  %v423_v9 = vld [vmem:[%s10822_s5 + $0x610] sm:$0xff] }
 0x192   : > { %v10259_v2 = vpop.eup %10258  ;;  %2264 = vadd.xlane.f32.xlu0 %v2263_v56  ;;  %v2272_v3 = vadd.f32 %v10257_v60, %v10255_v44  ;;  %10278 = vlog2.f32 %v663_v52  ;;  %v11244_v45 = vshrl.u32 %v14238_v13, 7  ;;  %v2544_v48 = vunpack.c.0.s8 %v11235_v22  ;;  %v11249_v56 = vpop.xlane.xlu0 %2072 }
 0x193   : > { %v10261_v7 = vpop.eup %10260  ;;  %10280 = vlog2.f32 %v664_v54  ;;  %v669_v40 = vmax.f32 %v413_v30, 1e-06  ;;  %v10709_v59 = vmov 1987475062  }
 0x194   : > { %v10263_v12 = vpop.eup %10262  ;;  %2273 = vadd.xlane.f32.xlu1 %v2272_v3  ;;  %v2269_v14 = vadd.f32 %v10261_v7, %v10259_v2  ;;  %10282 = vlog2.f32 %v661_v57  ;;  %14333 = vst [vmem:[#allocation14_spill] sm:$0xff] %v11244_v45  ;;  %v11251_v60 = vunpack.c.l.s4 %v10709_v59 }
 0x195   : > { %v10265_v20 = vpop.eup %10264  ;;  %10284 = vlog2.f32 %v662_v62 }
 0x196   : > { %v10267_v25 = vpop.eup %10266  ;;  %2270 = vadd.xlane.f32.xlu0 %v2269_v14  ;;  %v1078_v28 = vmul.f32 0.6931472, %v10265_v20  ;;  %10286 = vlog2.f32 %v667_v4 }
 0x197   : > { %v10269_v35 = vpop.eup %10268  ;;  %v2278_v39 = vadd.f32 %v10267_v25, %v10263_v12  ;;  %10288 = vlog2.f32 %v668_v10  ;;  %v11256_v12 = vpop.xlane.xlu1 %2081 }
 0x198   : > { %v10271_v43 = vpop.eup %10270  ;;  %v1080_v46 = vmul.f32 0.6931472, %v10269_v35  ;;  %v1422_v31 = vmul.f32 %v10845_v32, %v1078_v28  ;;  %10290 = vlog2.f32 %v665_v17 }
 0x199   : > { %v10273_v47 = vpop.eup %10272  ;;  %2279 = vadd.xlane.f32.xlu1 %v2278_v39  ;;  %v1090_v52 = vmul.f32 0.6931472, %v10271_v43  ;;  %10292 = vlog2.f32 %v666_v24  ;;  %v11261_v39 = vpop.xlane.xlu0 %2078 }
 0x19a   : > { %v10275_v53 = vpop.eup %10274  ;;  %v1423_v54 = vmul.f32 %v10845_v32, %v1080_v46  ;;  %v1846_v55 = vmul.f32 1.442695, %v1422_v31  ;;  %v1092_v44 = vmul.f32 0.6931472, %v10273_v47  ;;  %10294 = vlog2.f32 %v671_v29 }
 0x19b   : > { %v10277_v57 = vpop.eup %10276  ;;  %v1428_v62 = vmul.f32 %v10845_v32, %v1090_v52  ;;  %v1086_v0 = vmul.f32 0.6931472, %v10275_v53  ;;  %10296 = vlog2.f32 %v672_v42  ;;  %v11266_v59 = vpop.xlane.xlu1 %2087 }
 0x19c   : > { %v10279_v2 = vpop.eup %10278  ;;  %10298 = vpow2.f32 %v1846_v55  ;;  %v1848_v3 = vmul.f32 1.442695, %v1423_v54  ;;  %v1429_v4 = vmul.f32 %v10845_v32, %v1092_v44  ;;  %v1088_v6 = vmul.f32 0.6931472, %v10277_v57 }
 0x19d   : > { %v10281_v7 = vpop.eup %10280  ;;  %v1858_v8 = vmul.f32 1.442695, %v1428_v62  ;;  %v1426_v10 = vmul.f32 %v10845_v32, %v1086_v0  ;;  %v1098_v51 = vmul.f32 0.6931472, %v10279_v2  ;;  %10300 = vlog2.f32 %v669_v40 }
 0x19e   : > { %v10283_v14 = vpop.eup %10282  ;;  %10302 = vpow2.f32 %v1848_v3  ;;  %v1860_v17 = vmul.f32 1.442695, %v1429_v4  ;;  %v1427_v18 = vmul.f32 %v10845_v32, %v1088_v6  ;;  %v1100_v20 = vmul.f32 0.6931472, %v10281_v7 }
 0x19f   : > { %v10285_v21 = vpop.eup %10284  ;;  %10304 = vpow2.f32 %v1858_v8  ;;  %v1854_v24 = vmul.f32 1.442695, %v1426_v10  ;;  %v1432_v25 = vmul.f32 %v10845_v32, %v1098_v51  ;;  %v1094_v26 = vmul.f32 0.6931472, %v10283_v14 }
 0x1a0   : > { %v10287_v28 = vpop.eup %10286  ;;  %10306 = vpow2.f32 %v1860_v17  ;;  %v1856_v29 = vmul.f32 1.442695, %v1427_v18  ;;  %v1433_v30 = vmul.f32 %v10845_v32, %v1100_v20  ;;  %v1096_v35 = vmul.f32 0.6931472, %v10285_v21  ;;  %v414_v18 = vld [vmem:[%s10822_s5 + $0x5c8] sm:$0xff]  ;;  %v11272_v20 = vpop.xlane.xlu0 %2084 }
 0x1a1   : > { %v10289_v42 = vpop.eup %10288  ;;  %10308 = vpow2.f32 %v1854_v24  ;;  %v1866_v43 = vmul.f32 1.442695, %v1432_v25  ;;  %v1430_v46 = vmul.f32 %v10845_v32, %v1094_v26  ;;  %v1106_v31 = vmul.f32 0.6931472, %v10287_v28 }
 0x1a2   : > { %v10291_v47 = vpop.eup %10290  ;;  %10310 = vpow2.f32 %v1856_v29  ;;  %v1868_v52 = vmul.f32 1.442695, %v1433_v30  ;;  %v1431_v40 = vmul.f32 %v10845_v32, %v1096_v35  ;;  %v1108_v53 = vmul.f32 0.6931472, %v10289_v42  ;;  %v419_v42 = vld [vmem:[%s10822_s5 + $0x5f0] sm:$0xff] }
 0x1a3   : > { %v10293_v54 = vpop.eup %10292  ;;  %10312 = vpow2.f32 %v1866_v43  ;;  %v1862_v55 = vmul.f32 1.442695, %v1430_v46  ;;  %v1436_v44 = vmul.f32 %v10845_v32, %v1106_v31  ;;  %v1102_v57 = vmul.f32 0.6931472, %v10291_v47 }
 0x1a4   : > { %v10295_v62 = vpop.eup %10294  ;;  %10314 = vpow2.f32 %v1868_v52  ;;  %v1864_v0 = vmul.f32 1.442695, %v1431_v40  ;;  %v1437_v2 = vmul.f32 %v10845_v32, %v1108_v53  ;;  %v1104_v3 = vmul.f32 0.6931472, %v10293_v54  ;;  %v420_v52 = vld [vmem:[%s10822_s5 + $0x5f8] sm:$0xff] }
 0x1a5   : > { %v10297_v4 = vpop.eup %10296  ;;  %10316 = vpow2.f32 %v1862_v55  ;;  %v1874_v6 = vmul.f32 1.442695, %v1436_v44  ;;  %v1434_v7 = vmul.f32 %v10845_v32, %v1102_v57  ;;  %v1114_v8 = vmul.f32 0.6931472, %v10295_v62  ;;  %v417_v44 = vld [vmem:[%s10822_s5 + $0x5e0] sm:$0xff] }
 0x1a6   : > { %v10299_v10 = vpop.eup %10298  ;;  %10318 = vpow2.f32 %v1864_v0  ;;  %v1876_v51 = vmul.f32 1.442695, %v1437_v2  ;;  %v1435_v14 = vmul.f32 %v10845_v32, %v1104_v3  ;;  %v1116_v17 = vmul.f32 0.6931472, %v10297_v4  ;;  %v418_v3 = vld [vmem:[%s10822_s5 + $0x5e8] sm:$0xff] }
 0x1a7   : > { %v10301_v21 = vpop.eup %10300  ;;  %v2551_v24 = vunpack.c.0.s8 %v11237_v27  ;;  %10320 = vpow2.f32 %v1874_v6  ;;  %v1870_v25 = vmul.f32 1.442695, %v1434_v7  ;;  %v1440_v26 = vmul.f32 %v10845_v32, %v1114_v8  ;;  %v11278_v27 = vpop.xlane.xlu1 %2093 }
 0x1a8   : > { %v10303_v28 = vpop.eup %10302  ;;  %10322 = vpow2.f32 %v1876_v51  ;;  %v1872_v29 = vmul.f32 1.442695, %v1435_v14  ;;  %v1441_v30 = vmul.f32 %v10845_v32, %v1116_v17  ;;  %v1110_v35 = vmul.f32 0.6931472, %v10301_v21  ;;  %v11295_v8 = vpop.xlane.xlu0 %2090  ;;  %v424_v14 = vld [vmem:[%s10822_s5 + $0x618] sm:$0xff]  ;;  %v421_v21 = vld [vmem:[%s10822_s5 + $0x600] sm:$0xff] }
 0x1a9   : > { %v10305_v43 = vpop.eup %10304  ;;  %v2275_v46 = vadd.f32 %v10303_v28, %v10299_v10  ;;  %10324 = vpow2.f32 %v1870_v25  ;;  %v1882_v31 = vmul.f32 1.442695, %v1440_v26  ;;  %v670_v47 = vmax.f32 %v414_v18, 1e-06 }
 0x1aa   : > { %v10307_v40 = vpop.eup %10306  ;;  %v2558_v53 = vunpack.c.0.s8 %v11251_v60  ;;  %10326 = vpow2.f32 %v1872_v29  ;;  %v1884_v54 = vmul.f32 1.442695, %v1441_v30  ;;  %v1438_v55 = vmul.f32 %v10845_v32, %v1110_v35  ;;  %v422_v30 = vld [vmem:[%s10822_s5 + $0x608] sm:$0xff] }
 0x1ab   : > { %v10309_v57 = vpop.eup %10308  ;;  %v11287_v62 = vsub.s32 %v2537_v38, %v11244_v45  ;;  %2276 = vadd.xlane.f32.xlu0 %v2275_v46  ;;  %v2284_v0 = vadd.f32 %v10307_v40, %v10305_v43  ;;  %10328 = vpow2.f32 %v1882_v31  ;;  %v675_v2 = vmax.f32 %v419_v42, 1e-06  ;;  %v11306_v28 = vpop.xlane.xlu1 %2099  ;;  %v427_v46 = vld [vmem:[%s10822_s5 + $0x630] sm:$0xff]  ;;  %v428_v40 = vld [vmem:[%s10822_s5 + $0x638] sm:$0xff] }
 0x1ac   : > { %v10311_v4 = vpop.eup %10310  ;;  %v11293_v60 = vsub.s32 %v2544_v48, %v11244_v45  ;;  %10330 = vpow2.f32 %v1884_v54  ;;  %v1878_v6 = vmul.f32 1.442695, %v1438_v55  ;;  %v676_v7 = vmax.f32 %v420_v52, 1e-06 }
 0x1ad   : > { %v10313_v38 = vpop.eup %10312  ;;  %2285 = vadd.xlane.f32.xlu1 %v2284_v0  ;;  %v2281_v10 = vadd.f32 %v10311_v4, %v10309_v57  ;;  %10332 = vlog2.f32 %v670_v47  ;;  %v673_v51 = vmax.f32 %v417_v44, 1e-06  ;;  %v11300_v18 = vsub.s32 %v2551_v24, %v11244_v45  ;;  %v11319_v57 = vpop.xlane.xlu0 %2096  ;;  %v425_v0 = vld [vmem:[%s10822_s5 + $0x620] sm:$0xff] }
 0x1ae   : > { %v10315_v17 = vpop.eup %10314  ;;  %v11303_v22 = vsub.s32 %v2558_v53, %v11244_v45  ;;  %10334 = vpow2.f32 %v1878_v6  ;;  %v674_v48 = vmax.f32 %v418_v3, 1e-06  ;;  %v679_v29 = vmax.f32 %v423_v9, 1e-06  ;;  %v426_v6 = vld [vmem:[%s10822_s5 + $0x628] sm:$0xff] }
 0x1af   : > { %v10317_v25 = vpop.eup %10316  ;;  %2282 = vadd.xlane.f32.xlu0 %v2281_v10  ;;  %v2290_v26 = vadd.f32 %v10315_v17, %v10313_v38  ;;  %10336 = vlog2.f32 %v675_v2  ;;  %v2597_v24 = vrot.slane %v11152_v63, %v11287_v62  ;;  %v2604_v42 = vrot.slane %v11152_v63, %v11293_v60  ;;  %v431_v10 = vld [vmem:[%s10822_s5 + $0x650] sm:$0xff] }
 0x1b0   : > { %v10319_v35 = vpop.eup %10318  ;;  %10338 = vlog2.f32 %v676_v7  ;;  %v680_v43 = vmax.f32 %v424_v14, 1e-06  ;;  %v677_v52 = vmax.f32 %v421_v21, 1e-06  ;;  %v2611_v54 = vrot.slane %v11152_v63, %v11300_v18 }
 0x1b1   : > { %v10321_v31 = vpop.eup %10320  ;;  %2291 = vadd.xlane.f32.xlu1 %v2290_v26  ;;  %v2287_v47 = vadd.f32 %v10319_v35, %v10317_v25  ;;  %10340 = vlog2.f32 %v673_v51  ;;  %v2618_v55 = vrot.slane %v11152_v63, %v11303_v22  ;;  %v678_v44 = vmax.f32 %v422_v30, 1e-06  ;;  %v432_v25 = vld [vmem:[%s10822_s5 + $0x658] sm:$0xff] }
 0x1b2   : > { %v10323_v53 = vpop.eup %10322  ;;  %10342 = vlog2.f32 %v674_v48  ;;  %v683_v4 = vmax.f32 %v427_v46, 1e-06  ;;  %v11323_v9 = vcombine.low %v2597_v24, %v2604_v42  ;;  %v2625_v38 = vrot.slane %v11162_v23, %v11287_v62  ;;  %v11330_v48 = vpop.xlane.xlu1 %2105  ;;  %v429_v24 = vld [vmem:[%s10822_s5 + $0x640] sm:$0xff] }
 0x1b3   : > { %v10325_v2 = vpop.eup %10324  ;;  %2288 = vadd.xlane.f32.xlu0 %v2287_v47  ;;  %v2296_v3 = vadd.f32 %v10323_v53, %v10321_v31  ;;  %10344 = vlog2.f32 %v679_v29  ;;  %v684_v63 = vmax.f32 %v428_v40, 1e-06  ;;  %v2632_v14 = vrot.slane %v11162_v23, %v11293_v60  ;;  %v11344_v53 = vpop.xlane.xlu0 %2102 }
 0x1b4   : > { %v10327_v7 = vpop.eup %10326  ;;  %14334 = vst [vmem:[#allocation15_spill] sm:$0xff] %v11323_v9  ;;  %10346 = vlog2.f32 %v680_v43  ;;  %v681_v21 = vmax.f32 %v425_v0, 1e-06  ;;  %v11333_v29 = vcombine.low %v2611_v54, %v2618_v55  ;;  %v2639_v30 = vrot.slane %v11162_v23, %v11300_v18  ;;  %v430_v55 = vld [vmem:[%s10822_s5 + $0x648] sm:$0xff] }
 0x1b5   : > { %v10329_v51 = vpop.eup %10328  ;;  %2297 = vadd.xlane.f32.xlu1 %v2296_v3  ;;  %v2293_v17 = vadd.f32 %v10327_v7, %v10325_v2  ;;  %10348 = vlog2.f32 %v677_v52  ;;  %v682_v35 = vmax.f32 %v426_v6, 1e-06  ;;  %v2646_v43 = vrot.slane %v11162_v23, %v11303_v22 }
 0x1b6   : > { %v10331_v26 = vpop.eup %10330  ;;  %14335 = vst [vmem:[#allocation16_spill] sm:$0xff] %v11333_v29  ;;  %10350 = vlog2.f32 %v678_v44  ;;  %v687_v31 = vmax.f32 %v431_v10, 1e-06  ;;  %v2541_v52 = vrot.slane %v11157_v11, %v11287_v62  ;;  %v688_v54 = vmax.f32 %v432_v25, 1e-06 }
 0x1b7   : > { %v10333_v42 = vpop.eup %10332  ;;  %2294 = vadd.xlane.f32.xlu0 %v2293_v17  ;;  %v2302_v46 = vadd.f32 %v10331_v26, %v10329_v51  ;;  %10352 = vlog2.f32 %v683_v4  ;;  %v11347_v0 = vcombine.low %v2625_v38, %v2632_v14  ;;  %v2548_v23 = vrot.slane %v11157_v11, %v11293_v60  ;;  %v11356_v38 = vpop.xlane.xlu1 %2111 }
 0x1b8   : > { %v11340_v47 = vpop.eup %10334  ;;  %v1112_v40 = vmul.f32 0.6931472, %v10333_v42  ;;  %10354 = vlog2.f32 %v684_v63  ;;  %v685_v2 = vmax.f32 %v429_v24, 1e-06  ;;  %v11354_v10 = vcombine.low %v2639_v30, %v2646_v43 }
 0x1b9   : > { %v10337_v44 = vpop.eup %10336  ;;  %14336 = vst [vmem:[#allocation17_spill] sm:$0xff] %v11347_v0  ;;  %2303 = vadd.xlane.f32.xlu1 %v2302_v46  ;;  %10356 = vlog2.f32 %v681_v21  ;;  %v686_v14 = vmax.f32 %v430_v55, 1e-06  ;;  %v11363_v55 = vpop.xlane.xlu0 %2108  ;;  %v2583_v29 = vrot.slane %v11167_v37, %v11300_v18  ;;  %v2590_v9 = vrot.slane %v11167_v37, %v11303_v22 }
 0x1ba   : > { %v10339_v3 = vpop.eup %10338  ;;  %v1439_v6 = vmul.f32 %v10845_v32, %v1112_v40  ;;  %v1122_v7 = vmul.f32 0.6931472, %v10337_v44  ;;  %10358 = vlog2.f32 %v682_v35  ;;  %14337 = vst [vmem:[#allocation18_spill] sm:$0xff] %v11354_v10  ;;  %v2681_v10 = vrot.slane %v11172_v36, %v11287_v62 }
 0x1bb   : > { %v10341_v63 = vpop.eup %10340  ;;  %v1124_v51 = vmul.f32 0.6931472, %v10339_v3  ;;  %10360 = vlog2.f32 %v687_v31 }
 0x1bc   : > { %v10343_v17 = vpop.eup %10342  ;;  %v1880_v25 = vmul.f32 1.442695, %v1439_v6  ;;  %v1444_v21 = vmul.f32 %v10845_v32, %v1122_v7  ;;  %v1118_v26 = vmul.f32 0.6931472, %v10341_v63  ;;  %10362 = vlog2.f32 %v688_v54 }
 0x1bd   : > { %v10345_v24 = vpop.eup %10344  ;;  %v1445_v35 = vmul.f32 %v10845_v32, %v1124_v51  ;;  %v1120_v46 = vmul.f32 0.6931472, %v10343_v17  ;;  %10364 = vlog2.f32 %v685_v2 }
 0x1be   : > { %v10347_v30 = vpop.eup %10346  ;;  %10366 = vpow2.f32 %v1880_v25  ;;  %v1890_v43 = vmul.f32 1.442695, %v1444_v21  ;;  %v1442_v31 = vmul.f32 %v10845_v32, %v1118_v26  ;;  %v1130_v40 = vmul.f32 0.6931472, %v10345_v24  ;;  %v11368_v24 = vpop.xlane.xlu1 %2117 }
 0x1bf   : > { %v10349_v44 = vpop.eup %10348  ;;  %v1892_v3 = vmul.f32 1.442695, %v1445_v35  ;;  %v1443_v54 = vmul.f32 %v10845_v32, %v1120_v46  ;;  %v1132_v6 = vmul.f32 0.6931472, %v10347_v30  ;;  %10368 = vlog2.f32 %v686_v14 }
 0x1c0   : > { %v10351_v7 = vpop.eup %10350  ;;  %10370 = vpow2.f32 %v1890_v43  ;;  %v1886_v63 = vmul.f32 1.442695, %v1442_v31  ;;  %v1448_v51 = vmul.f32 %v10845_v32, %v1130_v40  ;;  %v1126_v2 = vmul.f32 0.6931472, %v10349_v44 }
 0x1c1   : > { %v10353_v17 = vpop.eup %10352  ;;  %10372 = vpow2.f32 %v1892_v3  ;;  %v1888_v25 = vmul.f32 1.442695, %v1443_v54  ;;  %v1449_v21 = vmul.f32 %v10845_v32, %v1132_v6  ;;  %v1128_v26 = vmul.f32 0.6931472, %v10351_v7  ;;  %v11373_v7 = vpop.xlane.xlu0 %2114 }
 0x1c2   : > { %v10355_v13 = vpop.eup %10354  ;;  %10374 = vpow2.f32 %v1886_v63  ;;  %v1898_v35 = vmul.f32 1.442695, %v1448_v51  ;;  %v1446_v46 = vmul.f32 %v10845_v32, %v1126_v2  ;;  %v1138_v14 = vmul.f32 0.6931472, %v10353_v17 }
 0x1c3   : > { %v10357_v30 = vpop.eup %10356  ;;  %10376 = vpow2.f32 %v1888_v25  ;;  %v1900_v43 = vmul.f32 1.442695, %v1449_v21  ;;  %v1447_v31 = vmul.f32 %v10845_v32, %v1128_v26  ;;  %v1140_v40 = vmul.f32 0.6931472, %v10355_v13 }
 0x1c4   : > { %v10359_v44 = vpop.eup %10358  ;;  %10378 = vpow2.f32 %v1898_v35  ;;  %v1894_v3 = vmul.f32 1.442695, %v1446_v46  ;;  %v1452_v54 = vmul.f32 %v10845_v32, %v1138_v14  ;;  %v1134_v6 = vmul.f32 0.6931472, %v10357_v30  ;;  %v11378_v30 = vpop.xlane.xlu1 %2123 }
 0x1c5   : > { %v10361_v4 = vpop.eup %10360  ;;  %10380 = vpow2.f32 %v1900_v43  ;;  %v1896_v63 = vmul.f32 1.442695, %v1447_v31  ;;  %v1453_v51 = vmul.f32 %v10845_v32, %v1140_v40  ;;  %v1136_v2 = vmul.f32 0.6931472, %v10359_v44  ;;  %v11386_v42 = vpop.xlane.xlu0 %2120 }
 0x1c6   : > { %v10363_v17 = vpop.eup %10362  ;;  %10382 = vpow2.f32 %v1894_v3  ;;  %v1906_v25 = vmul.f32 1.442695, %v1452_v54  ;;  %v1450_v13 = vmul.f32 %v10845_v32, %v1134_v6  ;;  %v1146_v21 = vmul.f32 0.6931472, %v10361_v4  ;;  %v435_v3 = vld [vmem:[%s10822_s5 + $0x670] sm:$0xff] }
 0x1c7   : > { %v10365_v26 = vpop.eup %10364  ;;  %10384 = vpow2.f32 %v1896_v63  ;;  %v1908_v35 = vmul.f32 1.442695, %v1453_v51  ;;  %v1451_v46 = vmul.f32 %v10845_v32, %v1136_v2  ;;  %v1148_v14 = vmul.f32 0.6931472, %v10363_v17 }
 0x1c8   : > { %v10367_v43 = vpop.eup %10366  ;;  %10386 = vpow2.f32 %v1906_v25  ;;  %v1902_v31 = vmul.f32 1.442695, %v1450_v13  ;;  %v1456_v40 = vmul.f32 %v10845_v32, %v1146_v21  ;;  %v1142_v44 = vmul.f32 0.6931472, %v10365_v26  ;;  %v436_v13 = vld [vmem:[%s10822_s5 + $0x678] sm:$0xff] }
 0x1c9   : > { %v10369_v54 = vpop.eup %10368  ;;  %v2299_v6 = vadd.f32 %v10367_v43, %v11340_v47  ;;  %10388 = vpow2.f32 %v1908_v35  ;;  %v1904_v4 = vmul.f32 1.442695, %v1451_v46  ;;  %v1457_v63 = vmul.f32 %v10845_v32, %v1148_v14  ;;  %v433_v46 = vld [vmem:[%s10822_s5 + $0x660] sm:$0xff] }
 0x1ca   : > { %v10371_v51 = vpop.eup %10370  ;;  %10390 = vpow2.f32 %v1902_v31  ;;  %v1914_v2 = vmul.f32 1.442695, %v1456_v40  ;;  %v1144_v17 = vmul.f32 0.6931472, %v10369_v54  ;;  %v1454_v25 = vmul.f32 %v10845_v32, %v1142_v44  ;;  %v434_v44 = vld [vmem:[%s10822_s5 + $0x668] sm:$0xff] }
 0x1cb   : > { %v10373_v21 = vpop.eup %10372  ;;  %v11394_v47 = vcombine.low %v2541_v52, %v2548_v23  ;;  %2300 = vadd.xlane.f32.xlu0 %v2299_v6  ;;  %10392 = vpow2.f32 %v1904_v4  ;;  %v1916_v26 = vmul.f32 1.442695, %v1457_v63  ;;  %v691_v35 = vmax.f32 %v435_v3, 1e-06  ;;  %v439_v3 = vld [vmem:[%s10822_s5 + $0x690] sm:$0xff]  ;;  %v11404_v6 = vpop.xlane.xlu1 %2129 }
 0x1cc   : > { %v10375_v14 = vpop.eup %10374  ;;  %v2308_v43 = vadd.f32 %v10373_v21, %v10371_v51  ;;  %10394 = vpow2.f32 %v1914_v2  ;;  %v1455_v31 = vmul.f32 %v10845_v32, %v1144_v17  ;;  %v1910_v40 = vmul.f32 1.442695, %v1454_v25  ;;  %v440_v17 = vld [vmem:[%s10822_s5 + $0x698] sm:$0xff] }
 0x1cd   : > { %14338 = vst [vmem:[#allocation19_spill] sm:$0xff] %v11394_v47  ;;  %v10377_v54 = vpop.eup %10376  ;;  %v2688_v52 = vrot.slane %v11172_v36, %v11293_v60  ;;  %10396 = vpow2.f32 %v1916_v26  ;;  %v692_v23 = vmax.f32 %v436_v13, 1e-06  ;;  %v689_v2 = vmax.f32 %v433_v46, 1e-06  ;;  %v438_v47 = vld [vmem:[%s10822_s5 + $0x688] sm:$0xff] }
 0x1ce   : > { %v10379_v4 = vpop.eup %10378  ;;  %2309 = vadd.xlane.f32.xlu1 %v2308_v43  ;;  %v2305_v63 = vadd.f32 %v10377_v54, %v10375_v14  ;;  %10398 = vpow2.f32 %v1910_v40  ;;  %v1912_v51 = vmul.f32 1.442695, %v1455_v31  ;;  %v14339_v21 = vrot.slane %v11157_v11, %v11303_v22  ;;  %v437_v43 = vld [vmem:[%s10822_s5 + $0x680] sm:$0xff] }
 0x1cf   : > { %v10381_v25 = vpop.eup %10380  ;;  %v14340_v26 = vrot.slane %v11157_v11, %v11300_v18  ;;  %v2695_v13 = vrot.slane %v11172_v36, %v11300_v18  ;;  %10400 = vlog2.f32 %v691_v35  ;;  %v690_v14 = vmax.f32 %v434_v44, 1e-06  ;;  %v11421_v11 = vpop.xlane.xlu0 %2126 }
 0x1d0   : > { %v10383_v40 = vpop.eup %10382  ;;  %v2702_v46 = vrot.slane %v11172_v36, %v11303_v22  ;;  %2306 = vadd.xlane.f32.xlu0 %v2305_v63  ;;  %v2314_v31 = vadd.f32 %v10381_v25, %v10379_v4  ;;  %10402 = vpow2.f32 %v1912_v51  ;;  %v695_v54 = vmax.f32 %v439_v3, 1e-06  ;;  %14342 = vst [vmem:[#allocation21_spill] sm:$0xff] %v11421_v11  ;;  %v444_v51 = vld [vmem:[%s10822_s5 + $0x6b8] sm:$0xff]  ;;  %v11436_v45 = vpop.xlane.xlu1 %2135 }
 0x1d1   : > { %v11413_v0 = vcombine.low %v14340_v26, %v14339_v21  ;;  %v10385_v21 = vpop.eup %10384  ;;  %v2569_v26 = vrot.slane %v11167_v37, %v11287_v62  ;;  %v2576_v35 = vrot.slane %v11167_v37, %v11293_v60  ;;  %10404 = vlog2.f32 %v692_v23 }
 0x1d2   : > { %v696_v44 = vmax.f32 %v440_v17, 1e-06  ;;  %v10387_v36 = vpop.eup %10386  ;;  %v11428_v63 = vcombine.low %v2681_v10, %v2688_v52  ;;  %2315 = vadd.xlane.f32.xlu1 %v2314_v31  ;;  %v2311_v4 = vadd.f32 %v10385_v21, %v10383_v40  ;;  %10406 = vlog2.f32 %v689_v2  ;;  %v441_v17 = vld [vmem:[%s10822_s5 + $0x6a0] sm:$0xff]  ;;  %v442_v40 = vld [vmem:[%s10822_s5 + $0x6a8] sm:$0xff] }
 0x1d3   : > { %14341 = vst [vmem:[#allocation20_spill] sm:$0xff] %v11413_v0  ;;  %v443_v0 = vld [vmem:[%s10822_s5 + $0x6b0] sm:$0xff]  ;;  %v693_v3 = vmax.f32 %v437_v43, 1e-06  ;;  %v10389_v25 = vpop.eup %10388  ;;  %10408 = vlog2.f32 %v690_v14  ;;  %v694_v23 = vmax.f32 %v438_v47, 1e-06  ;;  %v11438_v52 = vcombine.low %v2695_v13, %v2702_v46 }
 0x1d4   : > { %14343 = vst [vmem:[#allocation22_spill] sm:$0xff] %v11428_v63  ;;  %v10391_v10 = vpop.eup %10390  ;;  %2312 = vadd.xlane.f32.xlu0 %v2311_v4  ;;  %v2320_v2 = vadd.f32 %v10389_v25, %v10387_v36  ;;  %10410 = vlog2.f32 %v695_v54  ;;  %v699_v43 = vmax.f32 %v443_v0, 1e-06  ;;  %v11441_v21 = vcombine.low %v2569_v26, %v2576_v35  ;;  %v447_v14 = vld [vmem:[%s10822_s5 + $0x6d0] sm:$0xff]  ;;  %v448_v54 = vld [vmem:[%s10822_s5 + $0x6d8] sm:$0xff]  ;;  %v11449_v36 = vpop.xlane.xlu0 %2132 }
 0x1d5   : > { %14344 = vst [vmem:[#allocation23_spill] sm:$0xff] %v11438_v52  ;;  %v10393_v31 = vpop.eup %10392  ;;  %v2737_v37 = vrot.slane %v11182_v5, %v11287_v62  ;;  %10412 = vlog2.f32 %v696_v44  ;;  %v700_v47 = vmax.f32 %v444_v51, 1e-06  ;;  %v2744_v13 = vrot.slane %v11182_v5, %v11293_v60  ;;  %14346 = vst [vmem:[#allocation25_spill] sm:$0xff] %v11449_v36  ;;  %v445_v51 = vld [vmem:[%s10822_s5 + $0x6c0] sm:$0xff] }
 0x1d6   : > { %14345 = vst [vmem:[#allocation24_spill] sm:$0xff] %v11441_v21  ;;  %v10395_v63 = vpop.eup %10394  ;;  %2321 = vadd.xlane.f32.xlu1 %v2320_v2  ;;  %v2317_v46 = vadd.f32 %v10393_v31, %v10391_v10  ;;  %10414 = vlog2.f32 %v693_v3  ;;  %v697_v0 = vmax.f32 %v441_v17, 1e-06  ;;  %v11451_v35 = vcombine.low %v2583_v29, %v2590_v9  ;;  %v446_v10 = vld [vmem:[%s10822_s5 + $0x6c8] sm:$0xff] }
 0x1d7   : > { %v10397_v26 = vpop.eup %10396  ;;  %v2751_v44 = vrot.slane %v11182_v5, %v11300_v18  ;;  %10416 = vlog2.f32 %v694_v23  ;;  %v698_v4 = vmax.f32 %v442_v40, 1e-06  ;;  %v2758_v2 = vrot.slane %v11182_v5, %v11303_v22  ;;  %v11463_v40 = vpop.xlane.xlu1 %2141 }
 0x1d8   : > { %14347 = vst [vmem:[#allocation26_spill] sm:$0xff] %v11451_v35  ;;  %v10399_v25 = vpop.eup %10398  ;;  %2318 = vadd.xlane.f32.xlu0 %v2317_v46  ;;  %v2326_v3 = vadd.f32 %v10397_v26, %v10395_v63  ;;  %10418 = vlog2.f32 %v699_v43  ;;  %v703_v17 = vmax.f32 %v447_v14, 1e-06  ;;  %v2653_v9 = vrot.slane %v11178_v58, %v11287_v62  ;;  %14348 = vst [vmem:[#allocation27_spill] sm:$0xff] %v11463_v40  ;;  %v11472_v40 = vpop.xlane.xlu0 %2138 }
 0x1d9   : > { %v10401_v31 = vpop.eup %10400  ;;  %v2660_v29 = vrot.slane %v11178_v58, %v11293_v60  ;;  %10420 = vlog2.f32 %v700_v47  ;;  %v704_v23 = vmax.f32 %v448_v54, 1e-06  ;;  %v2667_v5 = vrot.slane %v11178_v58, %v11300_v18  ;;  %14350 = vst [vmem:[#allocation29_spill] sm:$0xff] %v11472_v40 }
 0x1da   : > { %v10403_v52 = vpop.eup %10402  ;;  %2327 = vadd.xlane.f32.xlu1 %v2326_v3  ;;  %v1154_v63 = vmul.f32 0.6931472, %v10401_v31  ;;  %10422 = vlog2.f32 %v697_v0  ;;  %v701_v43 = vmax.f32 %v445_v51, 1e-06  ;;  %v2674_v46 = vrot.slane %v11178_v58, %v11303_v22 }
 0x1db   : > { %v10405_v14 = vpop.eup %10404  ;;  %v2323_v26 = vadd.f32 %v10403_v52, %v10399_v25  ;;  %10424 = vlog2.f32 %v698_v4  ;;  %v702_v35 = vmax.f32 %v446_v10, 1e-06  ;;  %v11469_v47 = vcombine.low %v2737_v37, %v2744_v13 }
 0x1dc   : > { %v10407_v21 = vpop.eup %10406  ;;  %v1156_v54 = vmul.f32 0.6931472, %v10405_v14  ;;  %v1460_v36 = vmul.f32 %v10845_v32, %v1154_v63  ;;  %10426 = vlog2.f32 %v703_v17  ;;  %v11474_v31 = vcombine.low %v2751_v44, %v2758_v2  ;;  %v11482_v44 = vpop.xlane.xlu1 %2147 }
 0x1dd   : > { %14349 = vst [vmem:[#allocation28_spill] sm:$0xff] %v11469_v47  ;;  %v10409_v3 = vpop.eup %10408  ;;  %v11476_v0 = vcombine.low %v2653_v9, %v2660_v29  ;;  %2324 = vadd.xlane.f32.xlu0 %v2323_v26  ;;  %v1150_v51 = vmul.f32 0.6931472, %v10407_v21  ;;  %10428 = vlog2.f32 %v704_v23  ;;  %v11479_v25 = vcombine.low %v2667_v5, %v2674_v46  ;;  %14354 = vst [vmem:[#allocation33_spill] sm:$0xff] %v11482_v44 }
 0x1de   : > { %14351 = vst [vmem:[#allocation30_spill] sm:$0xff] %v11474_v31  ;;  %v10411_v58 = vpop.eup %10410  ;;  %v1461_v52 = vmul.f32 %v10845_v32, %v1156_v54  ;;  %v1922_v4 = vmul.f32 1.442695, %v1460_v36  ;;  %v1152_v37 = vmul.f32 0.6931472, %v10409_v3  ;;  %10430 = vlog2.f32 %v701_v43  ;;  %v11489_v54 = vpop.xlane.xlu0 %2144 }
 0x1df   : > { %14352 = vst [vmem:[#allocation31_spill] sm:$0xff] %v11476_v0  ;;  %v10413_v13 = vpop.eup %10412  ;;  %14353 = vst [vmem:[#allocation32_spill] sm:$0xff] %v11479_v25  ;;  %v1458_v17 = vmul.f32 %v10845_v32, %v1150_v51  ;;  %v1162_v10 = vmul.f32 0.6931472, %v10411_v58  ;;  %10432 = vlog2.f32 %v702_v35 }
 0x1e0   : > { %v10415_v2 = vpop.eup %10414  ;;  %10434 = vpow2.f32 %v1922_v4  ;;  %v1924_v9 = vmul.f32 1.442695, %v1461_v52  ;;  %v1459_v21 = vmul.f32 %v10845_v32, %v1152_v37  ;;  %v1164_v29 = vmul.f32 0.6931472, %v10413_v13  ;;  %14355 = vst [vmem:[#allocation34_spill] sm:$0xff] %v11489_v54 }
 0x1e1   : > { %v10417_v23 = vpop.eup %10416  ;;  %v1918_v63 = vmul.f32 1.442695, %v1458_v17  ;;  %v1464_v5 = vmul.f32 %v10845_v32, %v1162_v10  ;;  %v1158_v43 = vmul.f32 0.6931472, %v10415_v2 }
 0x1e2   : > { %v10419_v14 = vpop.eup %10418  ;;  %10436 = vpow2.f32 %v1924_v9  ;;  %v1920_v46 = vmul.f32 1.442695, %v1459_v21  ;;  %v1465_v35 = vmul.f32 %v10845_v32, %v1164_v29  ;;  %v1160_v26 = vmul.f32 0.6931472, %v10417_v23  ;;  %v11494_v29 = vpop.xlane.xlu1 %2153 }
 0x1e3   : > { %v10421_v3 = vpop.eup %10420  ;;  %10438 = vpow2.f32 %v1918_v63  ;;  %v1930_v51 = vmul.f32 1.442695, %v1464_v5  ;;  %v1462_v58 = vmul.f32 %v10845_v32, %v1158_v43  ;;  %v1170_v52 = vmul.f32 0.6931472, %v10419_v14  ;;  %14356 = vst [vmem:[#allocation35_spill] sm:$0xff] %v11494_v29 }
 0x1e4   : > { %v10423_v4 = vpop.eup %10422  ;;  %10440 = vpow2.f32 %v1920_v46  ;;  %v1932_v37 = vmul.f32 1.442695, %v1465_v35  ;;  %v1463_v13 = vmul.f32 %v10845_v32, %v1160_v26  ;;  %v1172_v17 = vmul.f32 0.6931472, %v10421_v3 }
 0x1e5   : > { %v10425_v10 = vpop.eup %10424  ;;  %10442 = vpow2.f32 %v1930_v51  ;;  %v1926_v2 = vmul.f32 1.442695, %v1462_v58  ;;  %v1468_v9 = vmul.f32 %v10845_v32, %v1170_v52  ;;  %v1166_v21 = vmul.f32 0.6931472, %v10423_v4  ;;  %v11499_v4 = vpop.xlane.xlu0 %2150 }
 0x1e6   : > { %v10427_v23 = vpop.eup %10426  ;;  %10444 = vpow2.f32 %v1932_v37  ;;  %v1928_v63 = vmul.f32 1.442695, %v1463_v13  ;;  %v1469_v5 = vmul.f32 %v10845_v32, %v1172_v17  ;;  %v1168_v43 = vmul.f32 0.6931472, %v10425_v10  ;;  %14357 = vst [vmem:[#allocation36_spill] sm:$0xff] %v11499_v4 }
 0x1e7   : > { %v10429_v14 = vpop.eup %10428  ;;  %10446 = vpow2.f32 %v1926_v2  ;;  %v1938_v46 = vmul.f32 1.442695, %v1468_v9  ;;  %v1466_v35 = vmul.f32 %v10845_v32, %v1166_v21  ;;  %v1178_v26 = vmul.f32 0.6931472, %v10427_v23 }
 0x1e8   : > { %v10431_v3 = vpop.eup %10430  ;;  %10448 = vpow2.f32 %v1928_v63  ;;  %v1940_v51 = vmul.f32 1.442695, %v1469_v5  ;;  %v1467_v58 = vmul.f32 %v10845_v32, %v1168_v43  ;;  %v1180_v52 = vmul.f32 0.6931472, %v10429_v14  ;;  %v451_v63 = vld [vmem:[%s10822_s5 + $0x6f0] sm:$0xff] }
 0x1e9   : > { %v10433_v37 = vpop.eup %10432  ;;  %10450 = vpow2.f32 %v1938_v46  ;;  %v1934_v13 = vmul.f32 1.442695, %v1466_v35  ;;  %v1472_v17 = vmul.f32 %v10845_v32, %v1178_v26  ;;  %v1174_v10 = vmul.f32 0.6931472, %v10431_v3  ;;  %v452_v46 = vld [vmem:[%s10822_s5 + $0x6f8] sm:$0xff]  ;;  %v11508_v35 = vpop.xlane.xlu1 %2159 }
 0x1ea   : > { %v10435_v2 = vpop.eup %10434  ;;  %10452 = vpow2.f32 %v1940_v51  ;;  %v1936_v9 = vmul.f32 1.442695, %v1467_v58  ;;  %v1473_v21 = vmul.f32 %v10845_v32, %v1180_v52  ;;  %v1176_v23 = vmul.f32 0.6931472, %v10433_v37  ;;  %14358 = vst [vmem:[#allocation37_spill] sm:$0xff] %v11508_v35  ;;  %v449_v52 = vld [vmem:[%s10822_s5 + $0x6e0] sm:$0xff] }
 0x1eb   : > { %v2800_v5 = vrot.slane %v11191_v34, %v11293_v60  ;;  %10454 = vpow2.f32 %v1934_v13  ;;  %v1946_v43 = vmul.f32 1.442695, %v1472_v17  ;;  %v1470_v14 = vmul.f32 %v10845_v32, %v1174_v10  ;;  %v450_v17 = vld [vmem:[%s10822_s5 + $0x6e8] sm:$0xff] }
 0x1ec   : > { %v10437_v26 = vpop.eup %10436  ;;  %v2807_v3 = vrot.slane %v11191_v34, %v11300_v18  ;;  %10456 = vpow2.f32 %v1936_v9  ;;  %v1948_v51 = vmul.f32 1.442695, %v1473_v21  ;;  %v1471_v58 = vmul.f32 %v10845_v32, %v1176_v23  ;;  %v11517_v9 = vpop.xlane.xlu0 %2156 }
 0x1ed   : > { %v10439_v37 = vpop.eup %10438  ;;  %v2332_v36 = vadd.f32 %v10437_v26, %v10435_v2  ;;  %10458 = vpow2.f32 %v1946_v43  ;;  %v1942_v13 = vmul.f32 1.442695, %v1470_v14  ;;  %v707_v31 = vmax.f32 %v451_v63, 1e-06  ;;  %14359 = vst [vmem:[#allocation38_spill] sm:$0xff] %v11517_v9  ;;  %v11533_v4 = vpop.xlane.xlu1 %2165 }
 0x1ee   : > { %v10441_v47 = vpop.eup %10440  ;;  %v2814_v10 = vrot.slane %v11191_v34, %v11303_v22  ;;  %10460 = vpow2.f32 %v1948_v51  ;;  %v1944_v25 = vmul.f32 1.442695, %v1471_v58  ;;  %v708_v0 = vmax.f32 %v452_v46, 1e-06  ;;  %v455_v51 = vld [vmem:[%s10822_s5 + $0x710] sm:$0xff]  ;;  %v456_v58 = vld [vmem:[%s10822_s5 + $0x718] sm:$0xff] }
 0x1ef   : > { %v10443_v21 = vpop.eup %10442  ;;  %v2709_v23 = vrot.slane %v11187_v19, %v11287_v62  ;;  %2333 = vadd.xlane.f32.xlu1 %v2332_v36  ;;  %v2329_v2 = vadd.f32 %v10441_v47, %v10439_v37  ;;  %10462 = vpow2.f32 %v1942_v13  ;;  %v705_v63 = vmax.f32 %v449_v52, 1e-06  ;;  %v453_v37 = vld [vmem:[%s10822_s5 + $0x700] sm:$0xff]  ;;  %v454_v13 = vld [vmem:[%s10822_s5 + $0x708] sm:$0xff]  ;;  %14360 = vst [vmem:[#allocation39_spill] sm:$0xff] %v11533_v4 }
 0x1f0   : > { %v10445_v43 = vpop.eup %10444  ;;  %v2716_v14 = vrot.slane %v11187_v19, %v11293_v60  ;;  %v2723_v26 = vrot.slane %v11187_v19, %v11300_v18  ;;  %10464 = vpow2.f32 %v1944_v25  ;;  %v706_v46 = vmax.f32 %v450_v17, 1e-06  ;;  %v11546_v11 = vpop.xlane.xlu0 %2162 }
 0x1f1   : > { %v10447_v9 = vpop.eup %10446  ;;  %v2730_v36 = vrot.slane %v11187_v19, %v11303_v22  ;;  %v2849_v47 = vrot.slane %v11203_v1, %v11287_v62  ;;  %2330 = vadd.xlane.f32.xlu0 %v2329_v2  ;;  %v2338_v52 = vadd.f32 %v10445_v43, %v10443_v21  ;;  %10466 = vlog2.f32 %v707_v31 }
 0x1f2   : > { %v10449_v35 = vpop.eup %10448  ;;  %v2856_v25 = vrot.slane %v11203_v1, %v11293_v60  ;;  %v2863_v17 = vrot.slane %v11203_v1, %v11300_v18  ;;  %v2870_v19 = vrot.slane %v11203_v1, %v11303_v22  ;;  %10468 = vlog2.f32 %v708_v0 }
 0x1f3   : > { %v10451_v54 = vpop.eup %10450  ;;  %2339 = vadd.xlane.f32.xlu1 %v2338_v52  ;;  %v2335_v2 = vadd.f32 %v10449_v35, %v10447_v9  ;;  %10470 = vlog2.f32 %v705_v63  ;;  %v711_v31 = vmax.f32 %v455_v51, 1e-06  ;;  %v712_v21 = vmax.f32 %v456_v58, 1e-06  ;;  %v460_v51 = vld [vmem:[%s10822_s5 + $0x738] sm:$0xff]  ;;  %v11566_v58 = vpop.xlane.xlu1 %2171 }
 0x1f4   : > { %v10453_v43 = vpop.eup %10452  ;;  %v14361_v4 = vrot.slane %v11191_v34, %v11287_v62  ;;  %10472 = vlog2.f32 %v706_v46  ;;  %v709_v40 = vmax.f32 %v453_v37, 1e-06  ;;  %v710_v44 = vmax.f32 %v454_v13, 1e-06  ;;  %v459_v46 = vld [vmem:[%s10822_s5 + $0x730] sm:$0xff] }
 0x1f5   : > { %v10455_v1 = vpop.eup %10454  ;;  %v11548_v0 = vcombine.low %v2807_v3, %v2814_v10  ;;  %v11550_v35 = vcombine.low %v2709_v23, %v2716_v14  ;;  %2336 = vadd.xlane.f32.xlu0 %v2335_v2  ;;  %v2344_v9 = vadd.f32 %v10453_v43, %v10451_v54  ;;  %10474 = vlog2.f32 %v711_v31  ;;  %v457_v14 = vld [vmem:[%s10822_s5 + $0x720] sm:$0xff] }
 0x1f6   : > { %v11544_v29 = vcombine.low %v14361_v4, %v2800_v5  ;;  %v10457_v34 = vpop.eup %10456  ;;  %v11552_v4 = vcombine.low %v2723_v26, %v2730_v36  ;;  %v11554_v5 = vcombine.low %v2849_v47, %v2856_v25  ;;  %v2765_v63 = vrot.slane %v11196_v50, %v11287_v62  ;;  %v458_v26 = vld [vmem:[%s10822_s5 + $0x728] sm:$0xff] }
 0x1f7   : > { %14362 = vst [vmem:[#allocation40_spill] sm:$0xff] %v11550_v35  ;;  %10476 = vlog2.f32 %v712_v21  ;;  %v10459_v3 = vpop.eup %10458  ;;  %v11560_v10 = vcombine.low %v2863_v17, %v2870_v19  ;;  %v2772_v23 = vrot.slane %v11196_v50, %v11293_v60  ;;  %2345 = vadd.xlane.f32.xlu1 %v2344_v9  ;;  %v2341_v54 = vadd.f32 %v10457_v34, %v10455_v1  ;;  %v11580_v1 = vpop.xlane.xlu0 %2168 }
 0x1f8   : > { %14363 = vst [vmem:[#allocation41_spill] sm:$0xff] %v11552_v4  ;;  %10478 = vlog2.f32 %v709_v40  ;;  %v10461_v36 = vpop.eup %10460  ;;  %v2779_v47 = vrot.slane %v11196_v50, %v11300_v18  ;;  %v2786_v52 = vrot.slane %v11196_v50, %v11303_v22  ;;  %v2905_v37 = vrot.slane %v11215_v33, %v11287_v62 }
 0x1f9   : > { %10480 = vlog2.f32 %v710_v44  ;;  %v10463_v13 = vpop.eup %10462  ;;  %v2912_v25 = vrot.slane %v11215_v33, %v11293_v60  ;;  %2342 = vadd.xlane.f32.xlu0 %v2341_v54  ;;  %v2350_v40 = vadd.f32 %v10461_v36, %v10459_v3  ;;  %v715_v17 = vmax.f32 %v459_v46, 1e-06 }
 0x1fa   : > { %v716_v19 = vmax.f32 %v460_v51, 1e-06  ;;  %v10465_v2 = vpop.eup %10464  ;;  %v2919_v31 = vrot.slane %v11215_v33, %v11300_v18  ;;  %v2926_v21 = vrot.slane %v11215_v33, %v11303_v22  ;;  %v713_v50 = vmax.f32 %v457_v14, 1e-06 }
 0x1fb   : > { %v714_v43 = vmax.f32 %v458_v26, 1e-06  ;;  %v10467_v44 = vpop.eup %10466  ;;  %v2821_v9 = vrot.slane %v11209_v16, %v11287_v62  ;;  %v2828_v34 = vrot.slane %v11209_v16, %v11293_v60  ;;  %2351 = vadd.xlane.f32.xlu1 %v2350_v40  ;;  %v2347_v46 = vadd.f32 %v10465_v2, %v10463_v13  ;;  %v11594_v40 = vpop.xlane.xlu1 %2177 }
 0x1fc   : > { %10482 = vlog2.f32 %v715_v17  ;;  %v10469_v51 = vpop.eup %10468  ;;  %v2835_v3 = vrot.slane %v11209_v16, %v11300_v18  ;;  %v2842_v33 = vrot.slane %v11209_v16, %v11303_v22  ;;  %v1186_v54 = vmul.f32 0.6931472, %v10467_v44 }
 0x1fd   : > { %10484 = vlog2.f32 %v716_v19  ;;  %v10471_v14 = vpop.eup %10470  ;;  %v11590_v26 = vcombine.low %v2765_v63, %v2772_v23  ;;  %v11592_v36 = vcombine.low %v2779_v47, %v2786_v52  ;;  %2348 = vadd.xlane.f32.xlu0 %v2347_v46  ;;  %v1188_v4 = vmul.f32 0.6931472, %v10469_v51 }
 0x1fe   : > { %10486 = vlog2.f32 %v713_v50  ;;  %v10473_v13 = vpop.eup %10472  ;;  %v11596_v17 = vcombine.low %v2905_v37, %v2912_v25  ;;  %v1476_v2 = vmul.f32 %v10845_v32, %v1186_v54  ;;  %v1182_v35 = vmul.f32 0.6931472, %v10471_v14  ;;  %v11607_v25 = vpop.xlane.xlu0 %2174 }
 0x1ff   : > { %14364 = vst [vmem:[#allocation42_spill] sm:$0xff] %v11590_v26  ;;  %14365 = vst [vmem:[#allocation43_spill] sm:$0xff] %v11592_v36  ;;  %10488 = vlog2.f32 %v714_v43  ;;  %v10475_v16 = vpop.eup %10474  ;;  %v11599_v44 = vcombine.low %v2919_v31, %v2926_v21  ;;  %v11601_v19 = vcombine.low %v2821_v9, %v2828_v34  ;;  %v1477_v63 = vmul.f32 %v10845_v32, %v1188_v4 }
 0x200   : > { %14366 = vst [vmem:[#allocation44_spill] sm:$0xff] %v11596_v17  ;;  %v1184_v23 = vmul.f32 0.6931472, %v10473_v13  ;;  %v11604_v52 = vcombine.low %v2835_v3, %v2842_v33  ;;  %v1954_v50 = vmul.f32 1.442695, %v1476_v2  ;;  %v1474_v46 = vmul.f32 %v10845_v32, %v1182_v35  ;;  %14370 = vst [vmem:[#allocation48_spill] sm:$0xff] %v11607_v25  ;;  %v11615_v2 = vpop.xlane.xlu1 %2183 }
 0x201   : > { %14367 = vst [vmem:[#allocation45_spill] sm:$0xff] %v11599_v44  ;;  %14368 = vst [vmem:[#allocation46_spill] sm:$0xff] %v11601_v19  ;;  %v10477_v47 = vpop.eup %10476  ;;  %v1194_v37 = vmul.f32 0.6931472, %v10475_v16  ;;  %v1956_v21 = vmul.f32 1.442695, %v1477_v63  ;;  %v14377_v44 = vrot.slane %v11225_v61, %v11287_v62 }
 0x202   : > { %14369 = vst [vmem:[#allocation47_spill] sm:$0xff] %v11604_v52  ;;  %v10479_v51 = vpop.eup %10478  ;;  %v1475_v43 = vmul.f32 %v10845_v32, %v1184_v23  ;;  %v1196_v9 = vmul.f32 0.6931472, %v10477_v47  ;;  %10490 = vpow2.f32 %v1954_v50  ;;  %v1950_v34 = vmul.f32 1.442695, %v1474_v46  ;;  %v463_v13 = vld [vmem:[%s10822_s5 + $0x750] sm:$0xff]  ;;  %v11624_v31 = vpop.xlane.xlu0 %2180 }
 0x203   : > { %v10481_v4 = vpop.eup %10480  ;;  %v1480_v3 = vmul.f32 %v10845_v32, %v1194_v37  ;;  %v1190_v33 = vmul.f32 0.6931472, %v10479_v51  ;;  %10492 = vpow2.f32 %v1956_v21  ;;  %14371 = vst [vmem:[#allocation49_spill] sm:$0xff] %v11615_v2  ;;  %v464_v47 = vld [vmem:[%s10822_s5 + $0x758] sm:$0xff]  ;;  %14372 = vst [vmem:[#allocation50_spill] sm:$0xff] %v11624_v31  ;;  %v467_v19 = vld [vmem:[%s10822_s5 + $0x770] sm:$0xff]  ;;  %v14376_v2 = vrot.slane %v11225_v61, %v11293_v60 }
 0x204   : > { %v1952_v35 = vmul.f32 1.442695, %v1475_v43  ;;  %v1481_v54 = vmul.f32 %v10845_v32, %v1196_v9  ;;  %v1192_v14 = vmul.f32 0.6931472, %v10481_v4  ;;  %10494 = vpow2.f32 %v1950_v34 }
 0x205   : > { %v1962_v63 = vmul.f32 1.442695, %v1480_v3  ;;  %v1478_v23 = vmul.f32 %v10845_v32, %v1190_v33  ;;  %v719_v4 = vmax.f32 %v463_v13, 1e-06  ;;  %v720_v16 = vmax.f32 %v464_v47, 1e-06 }
 0x206   : > { %v10483_v50 = vpop.eup %10482  ;;  %10496 = vpow2.f32 %v1952_v35  ;;  %v1964_v37 = vmul.f32 1.442695, %v1481_v54  ;;  %v1479_v51 = vmul.f32 %v10845_v32, %v1192_v14  ;;  %v2982_v35 = vrot.slane %v11225_v61, %v11303_v22 }
 0x207   : > { %v10485_v21 = vpop.eup %10484  ;;  %10498 = vpow2.f32 %v1962_v63  ;;  %v1958_v43 = vmul.f32 1.442695, %v1478_v23  ;;  %v1202_v9 = vmul.f32 0.6931472, %v10483_v50  ;;  %v2877_v13 = vrot.slane %v11220_v49, %v11287_v62  ;;  %v461_v50 = vld [vmem:[%s10822_s5 + $0x740] sm:$0xff] }
 0x208   : > { %v10487_v34 = vpop.eup %10486  ;;  %10500 = vpow2.f32 %v1964_v37  ;;  %v1960_v3 = vmul.f32 1.442695, %v1479_v51  ;;  %v1204_v33 = vmul.f32 0.6931472, %v10485_v21  ;;  %v11633_v37 = vpop.xlane.xlu1 %2189  ;;  %v2884_v47 = vrot.slane %v11220_v49, %v11293_v60 }
 0x209   : > { %v10489_v52 = vpop.eup %10488  ;;  %10502 = vpow2.f32 %v1958_v43  ;;  %v1484_v54 = vmul.f32 %v10845_v32, %v1202_v9  ;;  %v1198_v14 = vmul.f32 0.6931472, %v10487_v34  ;;  %14373 = vst [vmem:[#allocation51_spill] sm:$0xff] %v11633_v37  ;;  %v462_v43 = vld [vmem:[%s10822_s5 + $0x748] sm:$0xff]  ;;  %v2891_v9 = vrot.slane %v11220_v49, %v11300_v18 }
 0x20a   : > { %10504 = vpow2.f32 %v1960_v3  ;;  %v1485_v63 = vmul.f32 %v10845_v32, %v1204_v33  ;;  %v1200_v23 = vmul.f32 0.6931472, %v10489_v52  ;;  %v2898_v33 = vrot.slane %v11220_v49, %v11303_v22 }
 0x20b   : > { %v1970_v51 = vmul.f32 1.442695, %v1484_v54  ;;  %v1482_v21 = vmul.f32 %v10845_v32, %v1198_v14  ;;  %10506 = vlog2.f32 %v719_v4  ;;  %v717_v54 = vmax.f32 %v461_v50, 1e-06  ;;  %v468_v14 = vld [vmem:[%s10822_s5 + $0x778] sm:$0xff]  ;;  %v11646_v4 = vpop.xlane.xlu0 %2186 }
 0x20c   : > { %v1972_v34 = vmul.f32 1.442695, %v1485_v63  ;;  %v1483_v52 = vmul.f32 %v10845_v32, %v1200_v23  ;;  %10508 = vlog2.f32 %v720_v16  ;;  %v10491_v3 = vpop.eup %10490  ;;  %14374 = vst [vmem:[#allocation52_spill] sm:$0xff] %v11646_v4  ;;  %v3017_v63 = vrot.slane %v11241_v41, %v11287_v62  ;;  %v465_v16 = vld [vmem:[%s10822_s5 + $0x760] sm:$0xff] }
 0x20d   : > { %10510 = vpow2.f32 %v1970_v51  ;;  %v1966_v46 = vmul.f32 1.442695, %v1482_v21  ;;  %v10493_v36 = vpop.eup %10492  ;;  %v718_v23 = vmax.f32 %v462_v43, 1e-06  ;;  %v3024_v49 = vrot.slane %v11241_v41, %v11293_v60  ;;  %v466_v21 = vld [vmem:[%s10822_s5 + $0x768] sm:$0xff] }
 0x20e   : > { %10512 = vpow2.f32 %v1972_v34  ;;  %v1968_v26 = vmul.f32 1.442695, %v1483_v52  ;;  %v10495_v31 = vpop.eup %10494  ;;  %v3031_v51 = vrot.slane %v11241_v41, %v11300_v18  ;;  %v2356_v50 = vadd.f32 %v10493_v36, %v10491_v3  ;;  %v11658_v52 = vpop.xlane.xlu1 %2195 }
 0x20f   : > { %10514 = vpow2.f32 %v1966_v46  ;;  %v3038_v4 = vrot.slane %v11241_v41, %v11303_v22  ;;  %v723_v25 = vmax.f32 %v467_v19, 1e-06  ;;  %v724_v34 = vmax.f32 %v468_v14, 1e-06  ;;  %14375 = vst [vmem:[#allocation53_spill] sm:$0xff] %v11658_v52 }
 0x210   : > { %v10497_v37 = vpop.eup %10496  ;;  %10516 = vpow2.f32 %v1968_v26  ;;  %v11666_v17 = vcombine.low %v14377_v44, %v14376_v2  ;;  %2357 = vadd.xlane.f32.xlu1 %v2356_v50  ;;  %v721_v46 = vmax.f32 %v465_v16, 1e-06  ;;  %v2933_v41 = vrot.slane %v11232_v15, %v11287_v62 }
 0x211   : > { %v10499_v43 = vpop.eup %10498  ;;  %v2353_v36 = vadd.f32 %v10497_v37, %v10495_v31  ;;  %10518 = vlog2.f32 %v717_v54  ;;  %v2940_v26 = vrot.slane %v11232_v15, %v11293_v60  ;;  %v722_v19 = vmax.f32 %v466_v21, 1e-06  ;;  %v11679_v54 = vpop.xlane.xlu0 %2192 }
 0x212   : > { %v10501_v3 = vpop.eup %10500  ;;  %10520 = vlog2.f32 %v718_v23  ;;  %v14378_v44 = vrot.slane %v11225_v61, %v11300_v18  ;;  %v11677_v31 = vcombine.low %v2877_v13, %v2884_v47  ;;  %14380 = vst [vmem:[#allocation55_spill] sm:$0xff] %v11679_v54  ;;  %v11681_v50 = vcombine.low %v2891_v9, %v2898_v33  ;;  %v471_v61 = vld [vmem:[%s10822_s5 + $0x790] sm:$0xff]  ;;  %v469_v9 = vld [vmem:[%s10822_s5 + $0x780] sm:$0xff] }
 0x213   : > { %v10503_v14 = vpop.eup %10502  ;;  %2354 = vadd.xlane.f32.xlu0 %v2353_v36  ;;  %v2362_v37 = vadd.f32 %v10501_v3, %v10499_v43  ;;  %10522 = vlog2.f32 %v723_v25  ;;  %v11683_v52 = vcombine.low %v3017_v63, %v3024_v49  ;;  %v11685_v23 = vcombine.low %v3031_v51, %v3038_v4  ;;  %v470_v51 = vld [vmem:[%s10822_s5 + $0x788] sm:$0xff] }
 0x214   : > { %v11675_v2 = vcombine.low %v14378_v44, %v2982_v35  ;;  %14379 = vst [vmem:[#allocation54_spill] sm:$0xff] %v11677_v31  ;;  %v10505_v16 = vpop.eup %10504  ;;  %14381 = vst [vmem:[#allocation56_spill] sm:$0xff] %v11681_v50  ;;  %10524 = vlog2.f32 %v724_v34  ;;  %v472_v35 = vld [vmem:[%s10822_s5 + $0x798] sm:$0xff]  ;;  %v2947_v13 = vrot.slane %v11232_v15, %v11300_v18  ;;  %v2954_v25 = vrot.slane %v11232_v15, %v11303_v22  ;;  %v11699_v34 = vpop.xlane.xlu1 %2201  ;;  %v483_v31 = vld [vmem:[%s10822_s5 + $0x7f0] sm:$0xff] }
 0x215   : > { %v10507_v21 = vpop.eup %10506  ;;  %2363 = vadd.xlane.f32.xlu1 %v2362_v37  ;;  %v2359_v47 = vadd.f32 %v10505_v16, %v10503_v14  ;;  %10526 = vlog2.f32 %v721_v46  ;;  %v11694_v63 = vcombine.low %v2933_v41, %v2940_v26  ;;  %v3073_v4 = vrot.slane %v11256_v12, %v11287_v62  ;;  %14383 = vst [vmem:[#allocation58_spill] sm:$0xff] %v11699_v34 }
 0x216   : > { %v10509_v33 = vpop.eup %10508  ;;  %v1210_v49 = vmul.f32 0.6931472, %v10507_v21  ;;  %10528 = vlog2.f32 %v722_v19  ;;  %v3080_v36 = vrot.slane %v11256_v12, %v11293_v60  ;;  %v727_v3 = vmax.f32 %v471_v61, 1e-06  ;;  %v11711_v61 = vpop.xlane.xlu0 %2198 }
 0x217   : > { %14382 = vst [vmem:[#allocation57_spill] sm:$0xff] %v11694_v63  ;;  %v10511_v43 = vpop.eup %10510  ;;  %2360 = vadd.xlane.f32.xlu0 %v2359_v47  ;;  %v1212_v15 = vmul.f32 0.6931472, %v10509_v33  ;;  %v728_v46 = vmax.f32 %v472_v35, 1e-06  ;;  %v3087_v41 = vrot.slane %v11256_v12, %v11300_v18  ;;  %v3094_v26 = vrot.slane %v11256_v12, %v11303_v22  ;;  %14384 = vst [vmem:[#allocation59_spill] sm:$0xff] %v11711_v61 }
 0x218   : > { %v10513_v14 = vpop.eup %10512  ;;  %v1488_v19 = vmul.f32 %v10845_v32, %v1210_v49  ;;  %v725_v44 = vmax.f32 %v469_v9, 1e-06  ;;  %v2989_v16 = vrot.slane %v11249_v56, %v11287_v62  ;;  %10530 = vlog2.f32 %v727_v3  ;;  %v11721_v61 = vpop.xlane.xlu1 %2207 }
 0x219   : > { %v10515_v37 = vpop.eup %10514  ;;  %v2368_v21 = vadd.f32 %v10513_v14, %v10511_v43  ;;  %v1489_v47 = vmul.f32 %v10845_v32, %v1212_v15  ;;  %v2996_v33 = vrot.slane %v11249_v56, %v11293_v60  ;;  %10532 = vlog2.f32 %v728_v46  ;;  %14386 = vst [vmem:[#allocation61_spill] sm:$0xff] %v11721_v61 }
 0x21a   : > { %v10517_v35 = vpop.eup %10516  ;;  %v1978_v63 = vmul.f32 1.442695, %v1488_v19  ;;  %v726_v12 = vmax.f32 %v470_v51, 1e-06  ;;  %v11715_v49 = vcombine.low %v2947_v13, %v2954_v25  ;;  %10534 = vlog2.f32 %v725_v44 }
 0x21b   : > { %v10519_v54 = vpop.eup %10518  ;;  %2369 = vadd.xlane.f32.xlu1 %v2368_v21  ;;  %v2365_v9 = vadd.f32 %v10517_v35, %v10515_v37  ;;  %v1980_v50 = vmul.f32 1.442695, %v1489_v47  ;;  %v3003_v15 = vrot.slane %v11249_v56, %v11300_v18  ;;  %v3010_v3 = vrot.slane %v11249_v56, %v11303_v22 }
 0x21c   : > { %14385 = vst [vmem:[#allocation60_spill] sm:$0xff] %v11715_v49  ;;  %v10521_v43 = vpop.eup %10520  ;;  %10536 = vpow2.f32 %v1978_v63  ;;  %v1206_v14 = vmul.f32 0.6931472, %v10519_v54  ;;  %v11723_v51 = vcombine.low %v3073_v4, %v3080_v36  ;;  %v11725_v13 = vcombine.low %v3087_v41, %v3094_v26 }
 0x21d   : > { %v10523_v46 = vpop.eup %10522  ;;  %2366 = vadd.xlane.f32.xlu0 %v2365_v9  ;;  %10538 = vpow2.f32 %v1980_v50  ;;  %v1208_v25 = vmul.f32 0.6931472, %v10521_v43  ;;  %v11727_v44 = vcombine.low %v2989_v16, %v2996_v33  ;;  %v3129_v54 = vrot.slane %v11266_v59, %v11287_v62  ;;  %v11735_v50 = vpop.xlane.xlu0 %2204 }
 0x21e   : > { %v10525_v19 = vpop.eup %10524  ;;  %v1486_v37 = vmul.f32 %v10845_v32, %v1206_v14  ;;  %v1218_v21 = vmul.f32 0.6931472, %v10523_v46  ;;  %10540 = vlog2.f32 %v726_v12  ;;  %v3136_v63 = vrot.slane %v11266_v59, %v11293_v60  ;;  %14388 = vst [vmem:[#allocation63_spill] sm:$0xff] %v11735_v50  ;;  %v475_v14 = vld [vmem:[%s10822_s5 + $0x7b0] sm:$0xff] }
 0x21f   : > { %14387 = vst [vmem:[#allocation62_spill] sm:$0xff] %v11727_v44  ;;  %v10527_v56 = vpop.eup %10526  ;;  %v1487_v4 = vmul.f32 %v10845_v32, %v1208_v25  ;;  %v1220_v36 = vmul.f32 0.6931472, %v10525_v19  ;;  %v11737_v26 = vcombine.low %v3003_v15, %v3010_v3  ;;  %v476_v3 = vld [vmem:[%s10822_s5 + $0x7b8] sm:$0xff]  ;;  %v11748_v19 = vpop.xlane.xlu1 %2213  ;;  %v731_v46 = vmax.f32 %v475_v14, 1e-06 }
 0x220   : > { %v10529_v41 = vpop.eup %10528  ;;  %v1974_v16 = vmul.f32 1.442695, %v1486_v37  ;;  %v1492_v47 = vmul.f32 %v10845_v32, %v1218_v21  ;;  %v1214_v35 = vmul.f32 0.6931472, %v10527_v56  ;;  %14390 = vst [vmem:[#allocation65_spill] sm:$0xff] %v11748_v19  ;;  %v11750_v21 = vcombine.low %v3129_v54, %v3136_v63 }
 0x221   : > { %14389 = vst [vmem:[#allocation64_spill] sm:$0xff] %v11737_v26  ;;  %v1976_v12 = vmul.f32 1.442695, %v1487_v4  ;;  %v1493_v9 = vmul.f32 %v10845_v32, %v1220_v36  ;;  %v1216_v43 = vmul.f32 0.6931472, %v10529_v41  ;;  %v11753_v19 = vpop.xlane.xlu0 %2210  ;;  %v3045_v63 = vrot.slane %v11261_v39, %v11287_v62 }
 0x222   : > { %10542 = vpow2.f32 %v1974_v16  ;;  %v1986_v25 = vmul.f32 1.442695, %v1492_v47  ;;  %v1490_v15 = vmul.f32 %v10845_v32, %v1214_v35  ;;  %v10531_v37 = vpop.eup %10530  ;;  %14391 = vst [vmem:[#allocation66_spill] sm:$0xff] %v11750_v21  ;;  %v732_v50 = vmax.f32 %v476_v3, 1e-06  ;;  %14392 = vst [vmem:[#allocation67_spill] sm:$0xff] %v11753_v19 }
 0x223   : > { %10544 = vpow2.f32 %v1976_v12  ;;  %v1988_v56 = vmul.f32 1.442695, %v1493_v9  ;;  %v1491_v4 = vmul.f32 %v10845_v32, %v1216_v43  ;;  %v10533_v36 = vpop.eup %10532  ;;  %v1226_v33 = vmul.f32 0.6931472, %v10531_v37  ;;  %v473_v43 = vld [vmem:[%s10822_s5 + $0x7a0] sm:$0xff]  ;;  %v474_v37 = vld [vmem:[%s10822_s5 + $0x7a8] sm:$0xff] }
 0x224   : > { %10546 = vpow2.f32 %v1986_v25  ;;  %v1982_v41 = vmul.f32 1.442695, %v1490_v15  ;;  %v10535_v16 = vpop.eup %10534  ;;  %v1228_v35 = vmul.f32 0.6931472, %v10533_v36  ;;  %v3052_v14 = vrot.slane %v11261_v39, %v11293_v60  ;;  %v484_v21 = vld [vmem:[%s10822_s5 + $0x7f8] sm:$0xff] }
 0x225   : > { %10548 = vpow2.f32 %v1988_v56  ;;  %v1984_v47 = vmul.f32 1.442695, %v1491_v4  ;;  %v1496_v12 = vmul.f32 %v10845_v32, %v1226_v33  ;;  %v1222_v9 = vmul.f32 0.6931472, %v10535_v16  ;;  %v479_v33 = vld [vmem:[%s10822_s5 + $0x7d0] sm:$0xff]  ;;  %v11767_v16 = vpop.xlane.xlu1 %2219 }
 0x226   : > { %v10537_v54 = vpop.eup %10536  ;;  %10550 = vpow2.f32 %v1982_v41  ;;  %v3059_v15 = vrot.slane %v11261_v39, %v11300_v18  ;;  %v1497_v3 = vmul.f32 %v10845_v32, %v1228_v35  ;;  %14393 = vst [vmem:[#allocation68_spill] sm:$0xff] %v11767_v16  ;;  %v729_v44 = vmax.f32 %v473_v43, 1e-06  ;;  %v11778_v43 = vpop.xlane.xlu0 %2216 }
 0x227   : > { %v10539_v25 = vpop.eup %10538  ;;  %10552 = vpow2.f32 %v1984_v47  ;;  %v1994_v36 = vmul.f32 1.442695, %v1496_v12  ;;  %v1494_v41 = vmul.f32 %v10845_v32, %v1222_v9  ;;  %v3066_v47 = vrot.slane %v11261_v39, %v11303_v22  ;;  %v480_v12 = vld [vmem:[%s10822_s5 + $0x7d8] sm:$0xff]  ;;  %14394 = vst [vmem:[#allocation69_spill] sm:$0xff] %v11778_v43 }
 0x228   : > { %v10541_v56 = vpop.eup %10540  ;;  %v2374_v4 = vadd.f32 %v10539_v25, %v10537_v54  ;;  %10554 = vlog2.f32 %v731_v46  ;;  %v1996_v19 = vmul.f32 1.442695, %v1497_v3  ;;  %v730_v54 = vmax.f32 %v474_v37, 1e-06 }
 0x229   : > { %v1224_v26 = vmul.f32 0.6931472, %v10541_v56  ;;  %10556 = vlog2.f32 %v732_v50  ;;  %v1990_v35 = vmul.f32 1.442695, %v1494_v41  ;;  %v3185_v46 = vrot.slane %v11278_v27, %v11287_v62  ;;  %v477_v50 = vld [vmem:[%s10822_s5 + $0x7c0] sm:$0xff] }
 0x22a   : > { %2375 = vadd.xlane.f32.xlu1 %v2374_v4  ;;  %10558 = vpow2.f32 %v1994_v36  ;;  %v3192_v9 = vrot.slane %v11278_v27, %v11293_v60  ;;  %v3199_v39 = vrot.slane %v11278_v27, %v11300_v18  ;;  %v3206_v37 = vrot.slane %v11278_v27, %v11303_v22  ;;  %v478_v4 = vld [vmem:[%s10822_s5 + $0x7c8] sm:$0xff]  ;;  %v11789_v27 = vpop.xlane.xlu1 %2225 }
 0x22b   : > { %10560 = vpow2.f32 %v1996_v19  ;;  %v1495_v25 = vmul.f32 %v10845_v32, %v1224_v26  ;;  %v735_v56 = vmax.f32 %v479_v33, 1e-06  ;;  %v3101_v41 = vrot.slane %v11272_v20, %v11287_v62  ;;  %14395 = vst [vmem:[#allocation70_spill] sm:$0xff] %v11789_v27 }
 0x22c   : > { %v10543_v3 = vpop.eup %10542  ;;  %10562 = vpow2.f32 %v1990_v35  ;;  %v736_v26 = vmax.f32 %v480_v12, 1e-06  ;;  %v3108_v43 = vrot.slane %v11272_v20, %v11293_v60  ;;  %v733_v49 = vmax.f32 %v477_v50, 1e-06 }
 0x22d   : > { %v10545_v36 = vpop.eup %10544  ;;  %v1992_v19 = vmul.f32 1.442695, %v1495_v25  ;;  %10564 = vlog2.f32 %v729_v44  ;;  %v14396_v35 = vrot.slane %v11266_v59, %v11303_v22  ;;  %v14397_v25 = vrot.slane %v11266_v59, %v11300_v18 }
 0x22e   : > { %v10547_v16 = vpop.eup %10546  ;;  %v2371_v61 = vadd.f32 %v10545_v36, %v10543_v3  ;;  %10566 = vlog2.f32 %v730_v54  ;;  %v11799_v12 = vcombine.low %v3045_v63, %v3052_v14  ;;  %v734_v3 = vmax.f32 %v478_v4, 1e-06  ;;  %v481_v4 = vld [vmem:[%s10822_s5 + $0x7e0] sm:$0xff] }
 0x22f   : > { %v10549_v33 = vpop.eup %10548  ;;  %v11797_v44 = vcombine.low %v14397_v25, %v14396_v35  ;;  %10568 = vpow2.f32 %v1992_v19  ;;  %v11801_v54 = vcombine.low %v3059_v15, %v3066_v47  ;;  %v11803_v50 = vcombine.low %v3185_v46, %v3192_v9  ;;  %v482_v15 = vld [vmem:[%s10822_s5 + $0x7e8] sm:$0xff]  ;;  %v11815_v47 = vpop.xlane.xlu0 %2222 }
 0x230   : > { %14398 = vst [vmem:[#allocation71_spill] sm:$0xff] %v11799_v12  ;;  %v10551_v36 = vpop.eup %10550  ;;  %2372 = vadd.xlane.f32.xlu0 %v2371_v61  ;;  %v2380_v27 = vadd.f32 %v10549_v33, %v10547_v16  ;;  %10570 = vlog2.f32 %v735_v56  ;;  %v11807_v59 = vcombine.low %v3199_v39, %v3206_v37  ;;  %v3115_v63 = vrot.slane %v11272_v20, %v11300_v18 }
 0x231   : > { %14399 = vst [vmem:[#allocation72_spill] sm:$0xff] %v11801_v54  ;;  %v10553_v34 = vpop.eup %10552  ;;  %v3122_v14 = vrot.slane %v11272_v20, %v11303_v22  ;;  %10572 = vlog2.f32 %v736_v26  ;;  %14400 = vst [vmem:[#allocation73_spill] sm:$0xff] %v11815_v47  ;;  %v11817_v61 = vcombine.low %v3101_v41, %v3108_v43  ;;  %v3241_v16 = vrot.slane %v11306_v28, %v11287_v62  ;;  %v11823_v41 = vpop.xlane.xlu1 %2231 }
 0x232   : > { %v10555_v46 = vpop.eup %10554  ;;  %2381 = vadd.xlane.f32.xlu1 %v2380_v27  ;;  %v2377_v9 = vadd.f32 %v10553_v34, %v10551_v36  ;;  %10574 = vlog2.f32 %v733_v49  ;;  %v739_v56 = vmax.f32 %v483_v31, 1e-06  ;;  %v740_v19 = vmax.f32 %v484_v21, 1e-06  ;;  %14402 = vst [vmem:[#allocation75_spill] sm:$0xff] %v11823_v41 }
 0x233   : > { %14401 = vst [vmem:[#allocation74_spill] sm:$0xff] %v11817_v61  ;;  %v10557_v39 = vpop.eup %10556  ;;  %v1234_v37 = vmul.f32 0.6931472, %v10555_v46  ;;  %10576 = vlog2.f32 %v734_v3  ;;  %v3248_v26 = vrot.slane %v11306_v28, %v11293_v60  ;;  %v737_v35 = vmax.f32 %v481_v4, 1e-06 }
 0x234   : > { %v10559_v20 = vpop.eup %10558  ;;  %2378 = vadd.xlane.f32.xlu0 %v2377_v9  ;;  %v1236_v33 = vmul.f32 0.6931472, %v10557_v39  ;;  %v738_v43 = vmax.f32 %v482_v15, 1e-06  ;;  %v3255_v34 = vrot.slane %v11306_v28, %v11300_v18  ;;  %v3262_v49 = vrot.slane %v11306_v28, %v11303_v22  ;;  %v11837_v28 = vpop.xlane.xlu0 %2228 }
 0x235   : > { %v10561_v25 = vpop.eup %10560  ;;  %v1500_v31 = vmul.f32 %v10845_v32, %v1234_v37  ;;  %10578 = vlog2.f32 %v739_v56  ;;  %v11830_v27 = vcombine.low %v3115_v63, %v3122_v14  ;;  %v3157_v15 = vrot.slane %v11295_v8, %v11287_v62  ;;  %14404 = vst [vmem:[#allocation77_spill] sm:$0xff] %v11837_v28 }
 0x236   : > { %v10563_v21 = vpop.eup %10562  ;;  %v2386_v3 = vadd.f32 %v10561_v25, %v10559_v20  ;;  %v1501_v36 = vmul.f32 %v10845_v32, %v1236_v33  ;;  %10580 = vlog2.f32 %v740_v19  ;;  %v3164_v46 = vrot.slane %v11295_v8, %v11293_v60 }
 0x237   : > { %14403 = vst [vmem:[#allocation76_spill] sm:$0xff] %v11830_v27  ;;  %v10565_v4 = vpop.eup %10564  ;;  %v2002_v9 = vmul.f32 1.442695, %v1500_v31  ;;  %10582 = vlog2.f32 %v737_v35  ;;  %v11839_v37 = vcombine.low %v3241_v16, %v3248_v26  ;;  %v11841_v19 = vcombine.low %v3255_v34, %v3262_v49  ;;  %v11848_v26 = vpop.xlane.xlu1 %2237 }
 0x238   : > { %v10567_v39 = vpop.eup %10566  ;;  %2387 = vadd.xlane.f32.xlu1 %v2386_v3  ;;  %v2004_v63 = vmul.f32 1.442695, %v1501_v36  ;;  %v1230_v14 = vmul.f32 0.6931472, %v10565_v4  ;;  %10584 = vlog2.f32 %v738_v43  ;;  %14405 = vst [vmem:[#allocation78_spill] sm:$0xff] %v11848_v26  ;;  %v11850_v43 = vcombine.low %v3157_v15, %v3164_v46 }
 0x239   : > { %v10569_v56 = vpop.eup %10568  ;;  %10586 = vpow2.f32 %v2002_v9  ;;  %v1232_v33 = vmul.f32 0.6931472, %v10567_v39 }
 0x23a   : > { %v10571_v25 = vpop.eup %10570  ;;  %v2383_v31 = vadd.f32 %v10569_v56, %v10563_v21  ;;  %10588 = vpow2.f32 %v2004_v63  ;;  %v1498_v16 = vmul.f32 %v10845_v32, %v1230_v14  ;;  %14406 = vst [vmem:[#allocation79_spill] sm:$0xff] %v11850_v43 }
 0x23b   : > { %v10573_v3 = vpop.eup %10572  ;;  %v1499_v49 = vmul.f32 %v10845_v32, %v1232_v33  ;;  %v1242_v36 = vmul.f32 0.6931472, %v10571_v25  ;;  %v11862_v33 = vpop.xlane.xlu0 %2234 }
 0x23c   : > { %v10575_v4 = vpop.eup %10574  ;;  %2384 = vadd.xlane.f32.xlu0 %v2383_v31  ;;  %v1998_v39 = vmul.f32 1.442695, %v1498_v16  ;;  %v1244_v63 = vmul.f32 0.6931472, %v10573_v3  ;;  %14407 = vst [vmem:[#allocation80_spill] sm:$0xff] %v11862_v33  ;;  %v3220_v16 = vrot.slane %v11319_v57, %v11293_v60 }
 0x23d   : > { %v10577_v14 = vpop.eup %10576  ;;  %v2000_v46 = vmul.f32 1.442695, %v1499_v49  ;;  %v1504_v56 = vmul.f32 %v10845_v32, %v1242_v36  ;;  %v1238_v34 = vmul.f32 0.6931472, %v10575_v4  ;;  %v3227_v36 = vrot.slane %v11319_v57, %v11300_v18 }
 0x23e   : > { %10590 = vpow2.f32 %v1998_v39  ;;  %v1505_v9 = vmul.f32 %v10845_v32, %v1244_v63  ;;  %v1240_v21 = vmul.f32 0.6931472, %v10577_v14  ;;  %v11873_v39 = vpop.xlane.xlu1 %2243  ;;  %v3234_v14 = vrot.slane %v11319_v57, %v11303_v22 }
 0x23f   : > { %v10579_v31 = vpop.eup %10578  ;;  %10592 = vpow2.f32 %v2000_v46  ;;  %v2010_v3 = vmul.f32 1.442695, %v1504_v56  ;;  %v1502_v49 = vmul.f32 %v10845_v32, %v1238_v34  ;;  %14408 = vst [vmem:[#allocation81_spill] sm:$0xff] %v11873_v39  ;;  %v11881_v39 = vpop.xlane.xlu0 %2240 }
 0x240   : > { %v10581_v15 = vpop.eup %10580  ;;  %v2012_v4 = vmul.f32 1.442695, %v1505_v9  ;;  %v1503_v20 = vmul.f32 %v10845_v32, %v1240_v21  ;;  %v1250_v25 = vmul.f32 0.6931472, %v10579_v31  ;;  %v3353_v9 = vrot.slane %v11356_v38, %v11287_v62  ;;  %14409 = vst [vmem:[#allocation82_spill] sm:$0xff] %v11881_v39 }
 0x241   : > { %v10583_v63 = vpop.eup %10582  ;;  %10594 = vpow2.f32 %v2010_v3  ;;  %v2006_v35 = vmul.f32 1.442695, %v1502_v49  ;;  %v1252_v46 = vmul.f32 0.6931472, %v10581_v15  ;;  %v3360_v15 = vrot.slane %v11356_v38, %v11293_v60 }
 0x242   : > { %v10585_v56 = vpop.eup %10584  ;;  %10596 = vpow2.f32 %v2012_v4  ;;  %v2008_v34 = vmul.f32 1.442695, %v1503_v20  ;;  %v1508_v33 = vmul.f32 %v10845_v32, %v1250_v25  ;;  %v1246_v28 = vmul.f32 0.6931472, %v10583_v63  ;;  %v11893_v39 = vpop.xlane.xlu1 %2249 }
 0x243   : > { %v10587_v26 = vpop.eup %10586  ;;  %10598 = vpow2.f32 %v2006_v35  ;;  %v1509_v21 = vmul.f32 %v10845_v32, %v1252_v46  ;;  %v1248_v31 = vmul.f32 0.6931472, %v10585_v56  ;;  %v3367_v25 = vrot.slane %v11356_v38, %v11300_v18  ;;  %14410 = vst [vmem:[#allocation83_spill] sm:$0xff] %v11893_v39 }
 0x244   : > { %v10589_v47 = vpop.eup %10588  ;;  %10600 = vpow2.f32 %v2008_v34  ;;  %v2018_v3 = vmul.f32 1.442695, %v1508_v33  ;;  %v1506_v20 = vmul.f32 %v10845_v32, %v1246_v28  ;;  %v3374_v63 = vrot.slane %v11356_v38, %v11303_v22 }
 0x245   : > { %v2392_v49 = vadd.f32 %v10589_v47, %v10587_v26  ;;  %v2020_v4 = vmul.f32 1.442695, %v1509_v21  ;;  %v1507_v35 = vmul.f32 %v10845_v32, %v1248_v31  ;;  %v3269_v46 = vrot.slane %v11344_v53, %v11287_v62 }
 0x246   : > { %10602 = vpow2.f32 %v2018_v3  ;;  %v2014_v56 = vmul.f32 1.442695, %v1506_v20  ;;  %v3276_v28 = vrot.slane %v11344_v53, %v11293_v60  ;;  %v3283_v33 = vrot.slane %v11344_v53, %v11300_v18 }
 0x247   : > { %2393 = vadd.xlane.f32.xlu1 %v2392_v49  ;;  %10604 = vpow2.f32 %v2020_v4  ;;  %v2016_v47 = vmul.f32 1.442695, %v1507_v35  ;;  %v3290_v38 = vrot.slane %v11344_v53, %v11303_v22  ;;  %v3409_v34 = vrot.slane %v11368_v24, %v11287_v62  ;;  %v11917_v35 = vpop.xlane.xlu0 %2246 }
 0x248   : > { %v10591_v26 = vpop.eup %10590  ;;  %v3416_v21 = vrot.slane %v11368_v24, %v11293_v60  ;;  %10606 = vpow2.f32 %v2014_v56  ;;  %v14411_v3 = vrot.slane %v11295_v8, %v11303_v22  ;;  %v14412_v20 = vrot.slane %v11295_v8, %v11300_v18  ;;  %14414 = vst [vmem:[#allocation85_spill] sm:$0xff] %v11917_v35 }
 0x249   : > { %v10593_v31 = vpop.eup %10592  ;;  %v3423_v4 = vrot.slane %v11368_v24, %v11300_v18  ;;  %v3430_v53 = vrot.slane %v11368_v24, %v11303_v22  ;;  %10608 = vpow2.f32 %v2016_v47  ;;  %v14415_v56 = vrot.slane %v11330_v48, %v11293_v60 }
 0x24a   : > { %v11911_v49 = vcombine.low %v14412_v20, %v14411_v3  ;;  %v14416_v32 = vrot.slane %v11330_v48, %v11287_v62  ;;  %v14418_v8 = vrot.slane %v11330_v48, %v11303_v22  ;;  %v14419_v3 = vrot.slane %v11330_v48, %v11300_v18 }
 0x24b   : > { %v14421_v24 = vrot.slane %v11319_v57, %v11287_v62  ;;  %v2389_v35 = vadd.f32 %v10593_v31, %v10591_v26  ;;  %v10595_v41 = vpop.eup %10594  ;;  %v11942_v43 = vcombine.low %v3353_v9, %v3360_v15  ;;  %v11948_v61 = vcombine.low %v3283_v33, %v3290_v38 }
 0x24c   : > { %14413 = vst [vmem:[#allocation84_spill] sm:$0xff] %v11911_v49  ;;  %v11925_v39 = vcombine.low %v14416_v32, %v14415_v56  ;;  %v11933_v20 = vcombine.low %v14419_v3, %v14418_v8  ;;  %v11940_v49 = vcombine.low %v3227_v36, %v3234_v14  ;;  %v11944_v32 = vcombine.low %v3367_v25, %v3374_v63  ;;  %v10597_v27 = vpop.eup %10596  ;;  %v11956_v36 = vpop.xlane.xlu1 %2255 }
 0x24d   : > { %v11938_v47 = vcombine.low %v14421_v24, %v3220_v16  ;;  %14424 = vst [vmem:[#allocation90_spill] sm:$0xff] %v11942_v43  ;;  %v11946_v56 = vcombine.low %v3269_v46, %v3276_v28  ;;  %14427 = vst [vmem:[#allocation93_spill] sm:$0xff] %v11948_v61  ;;  %v11950_v48 = vcombine.low %v3409_v34, %v3416_v21  ;;  %2390 = vadd.xlane.f32.xlu0 %v2389_v35  ;;  %v10599_v14 = vpop.eup %10598 }
 0x24e   : > { %14417 = vst [vmem:[#allocation86_spill] sm:$0xff] %v11925_v39  ;;  %14420 = vst [vmem:[#allocation87_spill] sm:$0xff] %v11933_v20  ;;  %v3325_v57 = vrot.slane %v11363_v55, %v11287_v62  ;;  %v3332_v16 = vrot.slane %v11363_v55, %v11293_v60  ;;  %v11958_v9 = vcombine.low %v3423_v4, %v3430_v53  ;;  %v10601_v46 = vpop.eup %10600  ;;  %v10710_v53 = vmov 0  }
 0x24f   : > { %14422 = vst [vmem:[#allocation88_spill] sm:$0xff] %v11938_v47  ;;  %14423 = vst [vmem:[#allocation89_spill] sm:$0xff] %v11940_v49  ;;  %v3339_v15 = vrot.slane %v11363_v55, %v11300_v18  ;;  %v3346_v25 = vrot.slane %v11363_v55, %v11303_v22  ;;  %v2398_v63 = vadd.f32 %v10597_v27, %v10595_v41  ;;  %v11976_v27 = vpop.xlane.xlu0 %2252  ;;  %9585 = vset.pattern.permute.xlu1 %v10710_v53 }
 0x250   : > { %14425 = vst [vmem:[#allocation91_spill] sm:$0xff] %v11944_v32  ;;  %14426 = vst [vmem:[#allocation92_spill] sm:$0xff] %v11946_v56  ;;  %v3465_v28 = vrot.slane %v11378_v30, %v11287_v62  ;;  %v3472_v33 = vrot.slane %v11378_v30, %v11293_v60  ;;  %v3479_v26 = vrot.slane %v11378_v30, %v11300_v18  ;;  %v10603_v21 = vpop.eup %10602  ;;  %9584 = vset.pattern.permute.xlu0 %v10710_v53  ;;  %v10711_v32 = vmov 1983009808  }
 0x251   : > { %14428 = vst [vmem:[#allocation94_spill] sm:$0xff] %v11950_v48  ;;  %14429 = vst [vmem:[#allocation95_spill] sm:$0xff] %v11956_v36  ;;  %v3486_v38 = vrot.slane %v11378_v30, %v11303_v22  ;;  %v3381_v34 = vrot.slane %v11373_v7, %v11287_v62  ;;  %v3388_v55 = vrot.slane %v11373_v7, %v11293_v60  ;;  %2399 = vadd.xlane.f32.xlu1 %v2398_v63  ;;  %v10605_v35 = vpop.eup %10604 }
 0x252   : > { %14430 = vst [vmem:[#allocation96_spill] sm:$0xff] %v11958_v9  ;;  %v2395_v41 = vadd.f32 %v10601_v46, %v10599_v14  ;;  %14431 = vst [vmem:[#allocation97_spill] sm:$0xff] %v11976_v27  ;;  %v3395_v31 = vrot.slane %v11373_v7, %v11300_v18  ;;  %v3402_v4 = vrot.slane %v11373_v7, %v11303_v22  ;;  %v10607_v7 = vpop.eup %10606  ;;  %v11996_v27 = vpop.xlane.xlu1 %2261  ;;  %v6122_v43 = vunpack.c.l.s4 %v10711_v32 }
 0x253   : > { %v3521_v30 = vrot.slane %v11404_v6, %v11287_v62  ;;  %v3528_v8 = vrot.slane %v11404_v6, %v11293_v60  ;;  %v3535_v3 = vrot.slane %v11404_v6, %v11300_v18  ;;  %v3542_v24 = vrot.slane %v11404_v6, %v11303_v22  ;;  %14432 = vst [vmem:[#allocation98_spill] sm:$0xff] %v11996_v27  ;;  %v10609_v36 = vpop.eup %10608  ;;  %v12018_v54 = vpop.xlane.xlu0 %2258 }
 0x254   : > { %v3437_v14 = vrot.slane %v11386_v42, %v11287_v62  ;;  %2396 = vadd.xlane.f32.xlu0 %v2395_v41  ;;  %v3444_v63 = vrot.slane %v11386_v42, %v11293_v60  ;;  %v3451_v46 = vrot.slane %v11386_v42, %v11300_v18  ;;  %v2404_v53 = vadd.f32 %v10605_v35, %v10603_v21  ;;  %v14433_v21 = vld [vmem:[#allocation21_spill] sm:$0xff] }
 0x255   : > { %v3458_v61 = vrot.slane %v11386_v42, %v11303_v22  ;;  %v3577_v6 = vrot.slane %v11436_v45, %v11287_v62  ;;  %v3584_v41 = vrot.slane %v11436_v45, %v11293_v60  ;;  %v3591_v56 = vrot.slane %v11436_v45, %v11300_v18  ;;  %14434 = vst [vmem:[#allocation21_spill] sm:$0xff] %v12018_v54 }
 0x256   : > { %v3598_v49 = vrot.slane %v11436_v45, %v11303_v22  ;;  %v3493_v35 = vrot.slane %v14433_v21, %v11287_v62  ;;  %v3500_v27 = vrot.slane %v14433_v21, %v11293_v60  ;;  %2405 = vadd.xlane.f32.xlu1 %v2404_v53  ;;  %v2401_v42 = vadd.f32 %v10609_v36, %v10607_v7 }
 0x257   : > { %v12012_v47 = vcombine.low %v3325_v57, %v3332_v16  ;;  %v12014_v9 = vcombine.low %v3339_v15, %v3346_v25  ;;  %v12016_v48 = vcombine.low %v3465_v28, %v3472_v33  ;;  %v12020_v12 = vcombine.low %v3479_v26, %v3486_v38  ;;  %v12044_v26 = vpop.xlane.xlu1 %2267  ;;  %v14441_v38 = vld [vmem:[#allocation27_spill] sm:$0xff]  ;;  %v12068_v7 = vpop.xlane.xlu0 %2264 }
 0x258   : > { %v12022_v45 = vcombine.low %v3381_v34, %v3388_v55  ;;  %v12024_v20 = vcombine.low %v3395_v31, %v3402_v4  ;;  %v12026_v39 = vcombine.low %v3521_v30, %v3528_v8  ;;  %2402 = vadd.xlane.f32.xlu0 %v2401_v42  ;;  %v12028_v36 = vcombine.low %v3535_v3, %v3542_v24  ;;  %v14442_v31 = vld [vmem:[#allocation25_spill] sm:$0xff] }
 0x259   : > { %v12030_v57 = vcombine.low %v3437_v14, %v3444_v63  ;;  %v12032_v16 = vcombine.low %v3451_v46, %v3458_v61  ;;  %v12034_v15 = vcombine.low %v3577_v6, %v3584_v41  ;;  %v12036_v32 = vcombine.low %v3591_v56, %v3598_v49  ;;  %14440 = vst [vmem:[#allocation104_spill] sm:$0xff] %v12044_v26  ;;  %v14443_v3 = vld [vmem:[#allocation33_spill] sm:$0xff] }
 0x25a   : > { %14435 = vst [vmem:[#allocation99_spill] sm:$0xff] %v12022_v45  ;;  %14436 = vst [vmem:[#allocation100_spill] sm:$0xff] %v12024_v20  ;;  %v3507_v25 = vrot.slane %v14433_v21, %v11300_v18  ;;  %v3514_v28 = vrot.slane %v14433_v21, %v11303_v22  ;;  %v12042_v33 = vcombine.low %v3493_v35, %v3500_v27  ;;  %v6123_v56 = vunpack.c.0.s8 %v6122_v43  ;;  %v14445_v46 = vld [vmem:[#allocation29_spill] sm:$0xff]  ;;  %v14446_v35 = vld [vmem:[#allocation35_spill] sm:$0xff] }
 0x25b   : > { %14437 = vst [vmem:[#allocation101_spill] sm:$0xff] %v12030_v57  ;;  %14438 = vst [vmem:[#allocation102_spill] sm:$0xff] %v12032_v16  ;;  %v3633_v34 = vrot.slane %v14441_v38, %v11287_v62  ;;  %v3640_v61 = vrot.slane %v14441_v38, %v11293_v60  ;;  %v3647_v49 = vrot.slane %v14441_v38, %v11300_v18  ;;  %v14453_v20 = vld [vmem:[#allocation24_spill] sm:$0xff] }
 0x25c   : > { %14439 = vst [vmem:[#allocation103_spill] sm:$0xff] %v12042_v33  ;;  %v3654_v55 = vrot.slane %v14441_v38, %v11303_v22  ;;  %v3549_v4 = vrot.slane %v14442_v31, %v11287_v62  ;;  %v3556_v27 = vrot.slane %v14442_v31, %v11293_v60  ;;  %v3563_v30 = vrot.slane %v14442_v31, %v11300_v18 }
 0x25d   : > { %v3570_v8 = vrot.slane %v14442_v31, %v11303_v22  ;;  %v3689_v24 = vrot.slane %v14443_v3, %v11287_v62  ;;  %v3696_v43 = vrot.slane %v14443_v3, %v11293_v60  ;;  %v3703_v14 = vrot.slane %v14443_v3, %v11300_v18  ;;  %14444 = vst [vmem:[#allocation27_spill] sm:$0xff] %v12068_v7  ;;  %v14447_v31 = vld [vmem:[#allocation14_spill] sm:$0xff] }
 0x25e   : > { %v3710_v63 = vrot.slane %v14443_v3, %v11303_v22  ;;  %v3605_v53 = vrot.slane %v14445_v46, %v11287_v62  ;;  %v3612_v6 = vrot.slane %v14445_v46, %v11293_v60  ;;  %v3619_v41 = vrot.slane %v14445_v46, %v11300_v18 }
 0x25f   : > { %v3626_v21 = vrot.slane %v14445_v46, %v11303_v22  ;;  %v3745_v42 = vrot.slane %v14446_v35, %v11287_v62  ;;  %v3752_v38 = vrot.slane %v14446_v35, %v11293_v60  ;;  %v12085_v3 = vsub.s32 %v6123_v56, %v14447_v31  ;;  %v12095_v46 = vpop.xlane.xlu1 %2273 }
 0x260   : > { %v12087_v7 = vcombine.low %v3507_v25, %v3514_v28  ;;  %v12089_v54 = vcombine.low %v3633_v34, %v3640_v61  ;;  %v3759_v26 = vrot.slane %v14446_v35, %v11300_v18  ;;  %v3766_v33 = vrot.slane %v14446_v35, %v11303_v22  ;;  %14450 = vst [vmem:[#allocation29_spill] sm:$0xff] %v12095_v46  ;;  %v14454_v25 = vld [vmem:[#allocation26_spill] sm:$0xff] }
 0x261   : > { %v12097_v16 = vcombine.low %v3647_v49, %v3654_v55  ;;  %v12099_v57 = vcombine.low %v3549_v4, %v3556_v27  ;;  %v6144_v56 = vrot.slane %v14453_v20, %v12085_v3  ;;  %v6151_v28 = vrot.slane %v14454_v25, %v12085_v3  ;;  %v14461_v55 = vld [vmem:[#allocation34_spill] sm:$0xff]  ;;  %v12121_v27 = vpop.xlane.xlu0 %2270 }
 0x262   : > { %14448 = vst [vmem:[#allocation25_spill] sm:$0xff] %v12087_v7  ;;  %14449 = vst [vmem:[#allocation33_spill] sm:$0xff] %v12089_v54  ;;  %v12105_v34 = vcombine.low %v3563_v30, %v3570_v8  ;;  %v12107_v61 = vcombine.low %v3689_v24, %v3696_v43  ;;  %v12109_v31 = vcombine.low %v3703_v14, %v3710_v63  ;;  %v14464_v43 = vld [vmem:[#allocation37_spill] sm:$0xff] }
 0x263   : > { %14451 = vst [vmem:[#allocation35_spill] sm:$0xff] %v12097_v16  ;;  %14452 = vst [vmem:[#allocation105_spill] sm:$0xff] %v12099_v57  ;;  %v12111_v7 = vcombine.low %v3605_v53, %v3612_v6  ;;  %v12113_v35 = vcombine.low %v3619_v41, %v3626_v21  ;;  %v12115_v49 = vcombine.low %v3745_v42, %v3752_v38  ;;  %v14465_v6 = vld [vmem:[#allocation15_spill] sm:$0xff]  ;;  %v14466_v21 = vld [vmem:[#allocation16_spill] sm:$0xff] }
 0x264   : > { %14455 = vst [vmem:[#allocation24_spill] sm:$0xff] %v12105_v34  ;;  %14456 = vst [vmem:[#allocation26_spill] sm:$0xff] %v12107_v61  ;;  %v3661_v4 = vrot.slane %v14461_v55, %v11287_v62  ;;  %v3668_v20 = vrot.slane %v14461_v55, %v11293_v60  ;;  %v12123_v30 = vcombine.low %v3759_v26, %v3766_v33  ;;  %v14467_v38 = vld [vmem:[#allocation36_spill] sm:$0xff] }
 0x265   : > { %14457 = vst [vmem:[#allocation106_spill] sm:$0xff] %v12109_v31  ;;  %14458 = vst [vmem:[#allocation107_spill] sm:$0xff] %v12111_v7  ;;  %v3675_v8 = vrot.slane %v14461_v55, %v11300_v18  ;;  %v3682_v24 = vrot.slane %v14461_v55, %v11303_v22  ;;  %v3801_v14 = vrot.slane %v14464_v43, %v11287_v62  ;;  %v14471_v34 = vld [vmem:[#allocation20_spill] sm:$0xff]  ;;  %v12169_v45 = vpop.xlane.xlu0 %2276 }
 0x266   : > { %14459 = vst [vmem:[#allocation108_spill] sm:$0xff] %v12113_v35  ;;  %14460 = vst [vmem:[#allocation109_spill] sm:$0xff] %v12115_v49  ;;  %v3808_v63 = vrot.slane %v14464_v43, %v11293_v60  ;;  %v6152_v53 = vcombine.low %v6144_v56, %v6151_v28  ;;  %v6161_v41 = vrot.slane %v14465_v6, %v12085_v3  ;;  %v14469_v6 = vld [vmem:[#allocation39_spill] sm:$0xff]  ;;  %v14472_v49 = vld [vmem:[#allocation17_spill] sm:$0xff] }
 0x267   : > { %14462 = vst [vmem:[#allocation34_spill] sm:$0xff] %v12121_v27  ;;  %14463 = vst [vmem:[#allocation110_spill] sm:$0xff] %v12123_v30  ;;  %v6168_v33 = vrot.slane %v14466_v21, %v12085_v3  ;;  %v3815_v26 = vrot.slane %v14464_v43, %v11300_v18  ;;  %v3822_v42 = vrot.slane %v14464_v43, %v11303_v22  ;;  %v12145_v27 = vpop.xlane.xlu1 %2279 }
 0x268   : > { %v3717_v25 = vrot.slane %v14467_v38, %v11287_v62  ;;  %v3724_v55 = vrot.slane %v14467_v38, %v11293_v60  ;;  %14468 = vst [vmem:[#allocation37_spill] sm:$0xff] %v12145_v27  ;;  %v3731_v56 = vrot.slane %v14467_v38, %v11300_v18  ;;  %v3738_v28 = vrot.slane %v14467_v38, %v11303_v22  ;;  %v14470_v27 = vld [vmem:[#allocation19_spill] sm:$0xff] }
 0x269   : > { %v3857_v21 = vrot.slane %v14469_v6, %v11287_v62  ;;  %v3864_v43 = vrot.slane %v14469_v6, %v11293_v60  ;;  %8299 = vperm.xlu1 %9585, %v6152_v53   ;;  %v3871_v46 = vrot.slane %v14469_v6, %v11300_v18  ;;  %v3878_v35 = vrot.slane %v14469_v6, %v11303_v22  ;;  %v14473_v53 = vld [vmem:[#allocation18_spill] sm:$0xff] }
 0x26a   : > { %v6127_v7 = vrot.slane %v14470_v27, %v12085_v3  ;;  %v6134_v57 = vrot.slane %v14471_v34, %v12085_v3  ;;  %v12163_v38 = vcombine.low %v3661_v4, %v3668_v20  ;;  %v6169_v30 = vcombine.low %v6161_v41, %v6168_v33  ;;  %14474 = vst [vmem:[#allocation15_spill] sm:$0xff] %v12169_v45  ;;  %v14475_v27 = vld [vmem:[#allocation38_spill] sm:$0xff]  ;;  %v14486_v45 = vld [vmem:[#allocation44_spill] sm:$0xff] }
 0x26b   : > { %v6178_v31 = vrot.slane %v14472_v49, %v12085_v3  ;;  %v6185_v61 = vrot.slane %v14473_v53, %v12085_v3  ;;  %v12171_v16 = vcombine.low %v3675_v8, %v3682_v24  ;;  %v12173_v6 = vcombine.low %v3801_v14, %v3808_v63  ;;  %v12193_v63 = vpop.xlane.xlu1 %2285 }
 0x26c   : > { %v3773_v54 = vrot.slane %v14475_v27, %v11287_v62  ;;  %v3780_v34 = vrot.slane %v14475_v27, %v11293_v60  ;;  %v12179_v4 = vcombine.low %v3815_v26, %v3822_v42  ;;  %v12181_v20 = vcombine.low %v3717_v25, %v3724_v55  ;;  %14477 = vst [vmem:[#allocation36_spill] sm:$0xff] %v12193_v63  ;;  %v14478_v25 = vld [vmem:[#allocation31_spill] sm:$0xff]  ;;  %v14490_v63 = vld [vmem:[#allocation41_spill] sm:$0xff] }
 0x26d   : > { %v12183_v49 = vcombine.low %v3731_v56, %v3738_v28  ;;  %v12185_v41 = vcombine.low %v3857_v21, %v3864_v43  ;;  %8302 = vperm.xlu1 %9585, %v6169_v30   ;;  %v12187_v33 = vcombine.low %v3871_v46, %v3878_v35  ;;  %v6135_v8 = vcombine.low %v6127_v7, %v6134_v57  ;;  %v14479_v30 = vld [vmem:[#allocation32_spill] sm:$0xff]  ;;  %v12217_v56 = vpop.xlane.xlu0 %2282 }
 0x26e   : > { %v6280_v24 = vrot.slane %v11544_v29, %v12085_v3  ;;  %v6287_v14 = vrot.slane %v11548_v0, %v12085_v3  ;;  %v3787_v26 = vrot.slane %v14475_v27, %v11300_v18  ;;  %v6186_v42 = vcombine.low %v6178_v31, %v6185_v61  ;;  %14481 = vst [vmem:[#allocation19_spill] sm:$0xff] %v12217_v56 }
 0x26f   : > { %14476 = vst [vmem:[#allocation16_spill] sm:$0xff] %v12183_v49  ;;  %v6195_v55 = vrot.slane %v14478_v25, %v12085_v3  ;;  %v6202_v46 = vrot.slane %v14479_v30, %v12085_v3  ;;  %v3794_v57 = vrot.slane %v14475_v27, %v11303_v22  ;;  %v12203_v7 = vcombine.low %v3773_v54, %v3780_v34  ;;  %v14482_v34 = vld [vmem:[#allocation22_spill] sm:$0xff] }
 0x270   : > { %v3913_v29 = vrot.slane %v11566_v58, %v11287_v62  ;;  %v3920_v0 = vrot.slane %v11566_v58, %v11293_v60  ;;  %8296 = vperm.xlu0 %9584, %v6135_v8   ;;  %v3927_v31 = vrot.slane %v11566_v58, %v11300_v18  ;;  %v3934_v61 = vrot.slane %v11566_v58, %v11303_v22 }
 0x271   : > { %14480 = vst [vmem:[#allocation39_spill] sm:$0xff] %v12203_v7  ;;  %v3829_v35 = vrot.slane %v11546_v11, %v11287_v62  ;;  %v3836_v54 = vrot.slane %v11546_v11, %v11293_v60  ;;  %8305 = vperm.xlu1 %9585, %v6186_v42   ;;  %v3843_v28 = vrot.slane %v11546_v11, %v11300_v18  ;;  %v14483_v42 = vld [vmem:[#allocation23_spill] sm:$0xff]  ;;  %v12261_v7 = vpop.xlane.xlu0 %2288 }
 0x272   : > { %v6288_v21 = vcombine.low %v6280_v24, %v6287_v14  ;;  %v6314_v43 = vrot.slane %v11554_v5, %v12085_v3  ;;  %v6321_v53 = vrot.slane %v11560_v10, %v12085_v3  ;;  %v3850_v58 = vrot.slane %v11546_v11, %v11303_v22  ;;  %v12239_v11 = vpop.xlane.xlu1 %2291  ;;  %14491 = vst [vmem:[#allocation38_spill] sm:$0xff] %v12261_v7 }
 0x273   : > { %v6203_v27 = vcombine.low %v6195_v55, %v6202_v46  ;;  %v6212_v8 = vrot.slane %v14482_v34, %v12085_v3  ;;  %v6219_v25 = vrot.slane %v14483_v42, %v12085_v3  ;;  %v3969_v30 = vrot.slane %v11594_v40, %v11287_v62  ;;  %14484 = vst [vmem:[#allocation20_spill] sm:$0xff] %v12239_v11 }
 0x274   : > { %v3976_v24 = vrot.slane %v11594_v40, %v11293_v60  ;;  %v3983_v5 = vrot.slane %v11594_v40, %v11300_v18  ;;  %v3990_v10 = vrot.slane %v11594_v40, %v11303_v22  ;;  %8323 = vperm.xlu0 %9584, %v6288_v21   ;;  %v12241_v14 = vcombine.low %v3787_v26, %v3794_v57  ;;  %v14487_v21 = vld [vmem:[#allocation45_spill] sm:$0xff] }
 0x275   : > { %v12243_v55 = vcombine.low %v3913_v29, %v3920_v0  ;;  %v3885_v46 = vrot.slane %v11580_v1, %v11287_v62  ;;  %v3892_v34 = vrot.slane %v11580_v1, %v11293_v60  ;;  %8308 = vperm.xlu1 %9585, %v6203_v27   ;;  %v12249_v42 = vcombine.low %v3927_v31, %v3934_v61  ;;  %v14489_v29 = vld [vmem:[#allocation40_spill] sm:$0xff] }
 0x276   : > { %14485 = vst [vmem:[#allocation17_spill] sm:$0xff] %v12241_v14  ;;  %v6322_v56 = vcombine.low %v6314_v43, %v6321_v53  ;;  %v6348_v40 = vrot.slane %v14486_v45, %v12085_v3  ;;  %v6355_v11 = vrot.slane %v14487_v21, %v12085_v3  ;;  %v12255_v26 = vcombine.low %v3829_v35, %v3836_v54  ;;  %v14494_v53 = vld [vmem:[#allocation49_spill] sm:$0xff] }
 0x277   : > { %v6220_v57 = vcombine.low %v6212_v8, %v6219_v25  ;;  %v6229_v0 = vrot.slane %v14489_v29, %v12085_v3  ;;  %v6236_v14 = vrot.slane %v14490_v63, %v12085_v3  ;;  %v12263_v31 = vcombine.low %v3843_v28, %v3850_v58 }
 0x278   : > { %14488 = vst [vmem:[#allocation18_spill] sm:$0xff] %v12255_v26  ;;  %v12265_v61 = vcombine.low %v3969_v30, %v3976_v24  ;;  %v12267_v43 = vcombine.low %v3983_v5, %v3990_v10  ;;  %v3899_v45 = vrot.slane %v11580_v1, %v11300_v18  ;;  %8329 = vperm.xlu0 %9584, %v6322_v56   ;;  %v14496_v24 = vld [vmem:[#allocation28_spill] sm:$0xff]  ;;  %v14497_v10 = vld [vmem:[#allocation30_spill] sm:$0xff] }
 0x279   : > { %14492 = vst [vmem:[#allocation31_spill] sm:$0xff] %v12263_v31  ;;  %v3906_v35 = vrot.slane %v11580_v1, %v11303_v22  ;;  %v12273_v54 = vcombine.low %v3885_v46, %v3892_v34  ;;  %v4025_v63 = vrot.slane %v14494_v53, %v11287_v62  ;;  %v4032_v28 = vrot.slane %v14494_v53, %v11293_v60  ;;  %v12285_v1 = vpop.xlane.xlu1 %2297  ;;  %v14502_v31 = vld [vmem:[#allocation42_spill] sm:$0xff] }
 0x27a   : > { %8311 = vperm.xlu1 %9585, %v6220_v57   ;;  %v4039_v58 = vrot.slane %v14494_v53, %v11300_v18  ;;  %v6356_v27 = vcombine.low %v6348_v40, %v6355_v11  ;;  %v6382_v8 = vrot.slane %v11666_v17, %v12085_v3  ;;  %v6389_v56 = vrot.slane %v11675_v2, %v12085_v3  ;;  %v14498_v11 = vld [vmem:[#allocation48_spill] sm:$0xff] }
 0x27b   : > { %14493 = vst [vmem:[#allocation32_spill] sm:$0xff] %v12273_v54  ;;  %14495 = vst [vmem:[#allocation22_spill] sm:$0xff] %v12285_v1  ;;  %v4046_v25 = vrot.slane %v14494_v53, %v11303_v22  ;;  %v6237_v30 = vcombine.low %v6229_v0, %v6236_v14  ;;  %v6246_v5 = vrot.slane %v14496_v24, %v12085_v3  ;;  %v14499_v14 = vld [vmem:[#allocation51_spill] sm:$0xff]  ;;  %v12309_v53 = vpop.xlane.xlu0 %2294  ;;  %v14501_v24 = vld [vmem:[#allocation50_spill] sm:$0xff] }
 0x27c   : > { %v6253_v46 = vrot.slane %v14497_v10, %v12085_v3  ;;  %v3941_v34 = vrot.slane %v14498_v11, %v11287_v62  ;;  %v3948_v17 = vrot.slane %v14498_v11, %v11293_v60  ;;  %v3955_v2 = vrot.slane %v14498_v11, %v11300_v18  ;;  %8335 = vperm.xlu0 %9584, %v6356_v27  }
 0x27d   : > { %v3962_v40 = vrot.slane %v14498_v11, %v11303_v22  ;;  %v4081_v21 = vrot.slane %v14499_v14, %v11287_v62  ;;  %v4088_v57 = vrot.slane %v14499_v14, %v11293_v60  ;;  %v4095_v29 = vrot.slane %v14499_v14, %v11300_v18  ;;  %14500 = vst [vmem:[#allocation23_spill] sm:$0xff] %v12309_v53 }
 0x27e   : > { %v4102_v0 = vrot.slane %v14499_v14, %v11303_v22  ;;  %8314 = vperm.xlu1 %9585, %v6237_v30   ;;  %v3997_v10 = vrot.slane %v14501_v24, %v11287_v62  ;;  %v6390_v11 = vcombine.low %v6382_v8, %v6389_v56  ;;  %v6416_v27 = vrot.slane %v11683_v52, %v12085_v3  ;;  %v14503_v30 = vld [vmem:[#allocation43_spill] sm:$0xff] }
 0x27f   : > { %v6423_v7 = vrot.slane %v11685_v23, %v12085_v3  ;;  %v4004_v1 = vrot.slane %v14501_v24, %v11293_v60  ;;  %v6254_v54 = vcombine.low %v6246_v5, %v6253_v46  ;;  %v6263_v14 = vrot.slane %v14502_v31, %v12085_v3  ;;  %v12331_v23 = vpop.xlane.xlu1 %2303 }
 0x280   : > { %v6270_v53 = vrot.slane %v14503_v30, %v12085_v3  ;;  %v12323_v26 = vcombine.low %v3899_v45, %v3906_v35  ;;  %v12325_v49 = vcombine.low %v4025_v63, %v4032_v28  ;;  %v12327_v8 = vcombine.low %v4039_v58, %v4046_v25  ;;  %8341 = vperm.xlu0 %9584, %v6390_v11  }
 0x281   : > { %v12329_v52 = vcombine.low %v3941_v34, %v3948_v17  ;;  %14506 = vst [vmem:[#allocation40_spill] sm:$0xff] %v12331_v23  ;;  %v12333_v56 = vcombine.low %v3955_v2, %v3962_v40  ;;  %v12335_v5 = vcombine.low %v4081_v21, %v4088_v57  ;;  %v12337_v46 = vcombine.low %v4095_v29, %v4102_v0  ;;  %v14509_v34 = vld [vmem:[#allocation46_spill] sm:$0xff]  ;;  %v14510_v2 = vld [vmem:[#allocation47_spill] sm:$0xff]  ;;  %v14512_v21 = vld [vmem:[#allocation53_spill] sm:$0xff] }
 0x282   : > { %14504 = vst [vmem:[#allocation44_spill] sm:$0xff] %v12323_v26  ;;  %v4011_v31 = vrot.slane %v14501_v24, %v11300_v18  ;;  %8317 = vperm.xlu1 %9585, %v6254_v54   ;;  %v4018_v45 = vrot.slane %v14501_v24, %v11303_v22  ;;  %v6424_v35 = vcombine.low %v6416_v27, %v6423_v7  ;;  %v12353_v54 = vpop.xlane.xlu0 %2300  ;;  %v14513_v57 = vld [vmem:[#allocation52_spill] sm:$0xff] }
 0x283   : > { %14505 = vst [vmem:[#allocation45_spill] sm:$0xff] %v12329_v52  ;;  %14507 = vst [vmem:[#allocation41_spill] sm:$0xff] %v12333_v56  ;;  %v6450_v63 = vrot.slane %v11723_v51, %v12085_v3  ;;  %v6457_v28 = vrot.slane %v11725_v13, %v12085_v3  ;;  %v12347_v58 = vcombine.low %v3997_v10, %v4004_v1  ;;  %v14514_v10 = vld [vmem:[#allocation58_spill] sm:$0xff]  ;;  %v14542_v26 = vld [vmem:[#allocation72_spill] sm:$0xff] }
 0x284   : > { %v6271_v25 = vcombine.low %v6263_v14, %v6270_v53  ;;  %v6297_v17 = vrot.slane %v14509_v34, %v12085_v3  ;;  %v6304_v40 = vrot.slane %v14510_v2, %v12085_v3  ;;  %14511 = vst [vmem:[#allocation28_spill] sm:$0xff] %v12353_v54  ;;  %v4137_v7 = vrot.slane %v14512_v21, %v11287_v62  ;;  %v14515_v14 = vld [vmem:[#allocation66_spill] sm:$0xff]  ;;  %v12377_v34 = vpop.xlane.xlu1 %2309 }
 0x285   : > { %14508 = vst [vmem:[#allocation49_spill] sm:$0xff] %v12347_v58  ;;  %v4144_v51 = vrot.slane %v14512_v21, %v11293_v60  ;;  %v4151_v13 = vrot.slane %v14512_v21, %v11300_v18  ;;  %v4158_v1 = vrot.slane %v14512_v21, %v11303_v22  ;;  %8347 = vperm.xlu0 %9584, %v6424_v35   ;;  %14516 = vst [vmem:[#allocation30_spill] sm:$0xff] %v12377_v34  ;;  %v14517_v54 = vld [vmem:[#allocation54_spill] sm:$0xff] }
 0x286   : > { %v4053_v29 = vrot.slane %v14513_v57, %v11287_v62  ;;  %v4060_v0 = vrot.slane %v14513_v57, %v11293_v60  ;;  %v4067_v53 = vrot.slane %v14513_v57, %v11300_v18  ;;  %v4074_v24 = vrot.slane %v14513_v57, %v11303_v22  ;;  %8320 = vperm.xlu1 %9585, %v6271_v25   ;;  %v14518_v25 = vld [vmem:[#allocation56_spill] sm:$0xff]  ;;  %v12401_v58 = vpop.xlane.xlu0 %2306 }
 0x287   : > { %v4193_v11 = vrot.slane %v14514_v10, %v11287_v62  ;;  %v6458_v27 = vcombine.low %v6450_v63, %v6457_v28  ;;  %v6484_v30 = vrot.slane %v14515_v14, %v12085_v3  ;;  %v6491_v35 = vrot.slane %v11797_v44, %v12085_v3  ;;  %v14519_v44 = vld [vmem:[#allocation55_spill] sm:$0xff]  ;;  %14522 = vst [vmem:[#allocation50_spill] sm:$0xff] %v12401_v58 }
 0x288   : > { %v4200_v2 = vrot.slane %v14514_v10, %v11293_v60  ;;  %v6305_v21 = vcombine.low %v6297_v17, %v6304_v40  ;;  %v6331_v57 = vrot.slane %v14517_v54, %v12085_v3  ;;  %v6338_v23 = vrot.slane %v14518_v25, %v12085_v3 }
 0x289   : > { %v4207_v63 = vrot.slane %v14514_v10, %v11300_v18  ;;  %v4214_v28 = vrot.slane %v14514_v10, %v11303_v22  ;;  %v4109_v14 = vrot.slane %v14519_v44, %v11287_v62  ;;  %v4116_v34 = vrot.slane %v14519_v44, %v11293_v60  ;;  %8353 = vperm.xlu0 %9584, %v6458_v27  }
 0x28a   : > { %v12393_v17 = vcombine.low %v4011_v31, %v4018_v45  ;;  %v12395_v40 = vcombine.low %v4137_v7, %v4144_v51  ;;  %v12397_v54 = vcombine.low %v4151_v13, %v4158_v1  ;;  %v12399_v25 = vcombine.low %v4053_v29, %v4060_v0  ;;  %8326 = vperm.xlu1 %9585, %v6305_v21   ;;  %v14525_v7 = vld [vmem:[#allocation57_spill] sm:$0xff]  ;;  %v14526_v13 = vld [vmem:[#allocation60_spill] sm:$0xff] }
 0x28b   : > { %v12403_v56 = vcombine.low %v4067_v53, %v4074_v24  ;;  %v6492_v10 = vcombine.low %v6484_v30, %v6491_v35  ;;  %v6518_v52 = vrot.slane %v11803_v50, %v12085_v3  ;;  %v6525_v27 = vrot.slane %v11807_v59, %v12085_v3  ;;  %v12423_v59 = vpop.xlane.xlu1 %2315 }
 0x28c   : > { %14520 = vst [vmem:[#allocation48_spill] sm:$0xff] %v12393_v17  ;;  %14521 = vst [vmem:[#allocation51_spill] sm:$0xff] %v12399_v25  ;;  %v12409_v31 = vcombine.low %v4193_v11, %v4200_v2  ;;  %v6339_v45 = vcombine.low %v6331_v57, %v6338_v23  ;;  %v6365_v51 = vrot.slane %v14525_v7, %v12085_v3  ;;  %v14530_v23 = vld [vmem:[#allocation61_spill] sm:$0xff]  ;;  %v14531_v2 = vld [vmem:[#allocation59_spill] sm:$0xff] }
 0x28d   : > { %14523 = vst [vmem:[#allocation42_spill] sm:$0xff] %v12403_v56  ;;  %v6372_v1 = vrot.slane %v14526_v13, %v12085_v3  ;;  %v12415_v29 = vcombine.low %v4207_v63, %v4214_v28  ;;  %v4123_v0 = vrot.slane %v14519_v44, %v11300_v18  ;;  %v4130_v50 = vrot.slane %v14519_v44, %v11303_v22  ;;  %v14533_v7 = vld [vmem:[#allocation64_spill] sm:$0xff]  ;;  %v12445_v13 = vpop.xlane.xlu0 %2312 }
 0x28e   : > { %14524 = vst [vmem:[#allocation43_spill] sm:$0xff] %v12409_v31  ;;  %v12421_v53 = vcombine.low %v4109_v14, %v4116_v34  ;;  %8359 = vperm.xlu0 %9584, %v6492_v10   ;;  %14529 = vst [vmem:[#allocation53_spill] sm:$0xff] %v12423_v59  ;;  %v4249_v24 = vrot.slane %v14530_v23, %v11287_v62  ;;  %v4256_v11 = vrot.slane %v14530_v23, %v11293_v60  ;;  %v14532_v14 = vld [vmem:[#allocation62_spill] sm:$0xff] }
 0x28f   : > { %14527 = vst [vmem:[#allocation46_spill] sm:$0xff] %v12415_v29  ;;  %v4263_v30 = vrot.slane %v14530_v23, %v11300_v18  ;;  %v4270_v35 = vrot.slane %v14530_v23, %v11303_v22  ;;  %8332 = vperm.xlu1 %9585, %v6339_v45   ;;  %v4165_v34 = vrot.slane %v14531_v2, %v11287_v62  ;;  %14534 = vst [vmem:[#allocation52_spill] sm:$0xff] %v12445_v13  ;;  %v14538_v59 = vld [vmem:[#allocation86_spill] sm:$0xff]  ;;  %v12469_v25 = vpop.xlane.xlu1 %2321  ;;  %v14541_v29 = vld [vmem:[#allocation71_spill] sm:$0xff] }
 0x290   : > { %14528 = vst [vmem:[#allocation47_spill] sm:$0xff] %v12421_v53  ;;  %v6526_v21 = vcombine.low %v6518_v52, %v6525_v27  ;;  %v6552_v57 = vrot.slane %v11839_v37, %v12085_v3  ;;  %v6559_v63 = vrot.slane %v11841_v19, %v12085_v3  ;;  %v4172_v28 = vrot.slane %v14531_v2, %v11293_v60  ;;  %v14535_v19 = vld [vmem:[#allocation65_spill] sm:$0xff] }
 0x291   : > { %v6373_v44 = vcombine.low %v6365_v51, %v6372_v1  ;;  %v6399_v10 = vrot.slane %v14532_v14, %v12085_v3  ;;  %v6406_v45 = vrot.slane %v14533_v7, %v12085_v3  ;;  %v4179_v52 = vrot.slane %v14531_v2, %v11300_v18  ;;  %v14536_v14 = vld [vmem:[#allocation63_spill] sm:$0xff]  ;;  %14540 = vst [vmem:[#allocation66_spill] sm:$0xff] %v12469_v25 }
 0x292   : > { %v4186_v37 = vrot.slane %v14531_v2, %v11303_v22  ;;  %v4305_v27 = vrot.slane %v14535_v19, %v11287_v62  ;;  %v4312_v51 = vrot.slane %v14535_v19, %v11293_v60  ;;  %8365 = vperm.xlu0 %9584, %v6526_v21   ;;  %v4319_v1 = vrot.slane %v14535_v19, %v11300_v18  ;;  %v14539_v21 = vld [vmem:[#allocation87_spill] sm:$0xff] }
 0x293   : > { %v4326_v23 = vrot.slane %v14535_v19, %v11303_v22  ;;  %v4221_v7 = vrot.slane %v14536_v14, %v11287_v62  ;;  %v4228_v13 = vrot.slane %v14536_v14, %v11293_v60  ;;  %8338 = vperm.xlu1 %9585, %v6373_v44   ;;  %v12463_v2 = vcombine.low %v4123_v0, %v4130_v50 }
 0x294   : > { %v6560_v58 = vcombine.low %v6552_v57, %v6559_v63  ;;  %v6586_v53 = vrot.slane %v14538_v59, %v12085_v3  ;;  %v6593_v56 = vrot.slane %v14539_v21, %v12085_v3  ;;  %v12471_v17 = vcombine.low %v4249_v24, %v4256_v11 }
 0x295   : > { %14537 = vst [vmem:[#allocation58_spill] sm:$0xff] %v12463_v2  ;;  %v6407_v19 = vcombine.low %v6399_v10, %v6406_v45  ;;  %v6433_v31 = vrot.slane %v14541_v29, %v12085_v3  ;;  %v6440_v44 = vrot.slane %v14542_v26, %v12085_v3  ;;  %v12477_v0 = vcombine.low %v4263_v30, %v4270_v35  ;;  %v12493_v26 = vpop.xlane.xlu0 %2318  ;;  %v14548_v30 = vld [vmem:[#allocation68_spill] sm:$0xff]  ;;  %v14550_v10 = vld [vmem:[#allocation91_spill] sm:$0xff] }
 0x296   : > { %v12479_v50 = vcombine.low %v4165_v34, %v4172_v28  ;;  %v12481_v57 = vcombine.low %v4179_v52, %v4186_v37  ;;  %v12483_v59 = vcombine.low %v4305_v27, %v4312_v51  ;;  %8371 = vperm.xlu0 %9584, %v6560_v58   ;;  %v12485_v63 = vcombine.low %v4319_v1, %v4326_v23  ;;  %v14549_v28 = vld [vmem:[#allocation90_spill] sm:$0xff]  ;;  %v14552_v51 = vld [vmem:[#allocation76_spill] sm:$0xff] }
 0x297   : > { %v4235_v24 = vrot.slane %v14536_v14, %v11300_v18  ;;  %v4242_v29 = vrot.slane %v14536_v14, %v11303_v22  ;;  %v12491_v11 = vcombine.low %v4221_v7, %v4228_v13  ;;  %8344 = vperm.xlu1 %9585, %v6407_v19   ;;  %14547 = vst [vmem:[#allocation60_spill] sm:$0xff] %v12493_v26  ;;  %v14551_v13 = vld [vmem:[#allocation74_spill] sm:$0xff]  ;;  %v14558_v26 = vld [vmem:[#allocation96_spill] sm:$0xff] }
 0x298   : > { %14543 = vst [vmem:[#allocation54_spill] sm:$0xff] %v12479_v50  ;;  %14544 = vst [vmem:[#allocation56_spill] sm:$0xff] %v12481_v57  ;;  %v4361_v35 = vrot.slane %v14548_v30, %v11287_v62  ;;  %v6594_v34 = vcombine.low %v6586_v53, %v6593_v56  ;;  %v6620_v58 = vrot.slane %v14549_v28, %v12085_v3  ;;  %v14553_v53 = vld [vmem:[#allocation67_spill] sm:$0xff]  ;;  %v14560_v50 = vld [vmem:[#allocation84_spill] sm:$0xff] }
 0x299   : > { %14545 = vst [vmem:[#allocation55_spill] sm:$0xff] %v12485_v63  ;;  %14546 = vst [vmem:[#allocation57_spill] sm:$0xff] %v12491_v11  ;;  %v6627_v45 = vrot.slane %v14550_v10, %v12085_v3  ;;  %v4368_v52 = vrot.slane %v14548_v30, %v11293_v60  ;;  %v6441_v37 = vcombine.low %v6433_v31, %v6440_v44  ;;  %v12515_v31 = vpop.xlane.xlu1 %2327  ;;  %v14555_v44 = vld [vmem:[#allocation70_spill] sm:$0xff]  ;;  %v12537_v63 = vpop.xlane.xlu0 %2324 }
 0x29a   : > { %v6467_v27 = vrot.slane %v14551_v13, %v12085_v3  ;;  %v6474_v1 = vrot.slane %v14552_v51, %v12085_v3  ;;  %v4375_v23 = vrot.slane %v14548_v30, %v11300_v18  ;;  %v4382_v56 = vrot.slane %v14548_v30, %v11303_v22  ;;  %8377 = vperm.xlu0 %9584, %v6594_v34   ;;  %v14557_v34 = vld [vmem:[#allocation94_spill] sm:$0xff] }
 0x29b   : > { %v4277_v14 = vrot.slane %v14553_v53, %v11287_v62  ;;  %v4284_v7 = vrot.slane %v14553_v53, %v11293_v60  ;;  %14554 = vst [vmem:[#allocation61_spill] sm:$0xff] %v12515_v31  ;;  %v4291_v21 = vrot.slane %v14553_v53, %v11300_v18  ;;  %v4298_v19 = vrot.slane %v14553_v53, %v11303_v22  ;;  %v14559_v53 = vld [vmem:[#allocation79_spill] sm:$0xff] }
 0x29c   : > { %v4417_v28 = vrot.slane %v14555_v44, %v11287_v62  ;;  %v4424_v30 = vrot.slane %v14555_v44, %v11293_v60  ;;  %8350 = vperm.xlu1 %9585, %v6441_v37   ;;  %v12525_v10 = vcombine.low %v4235_v24, %v4242_v29  ;;  %v6628_v13 = vcombine.low %v6620_v58, %v6627_v45  ;;  %v14562_v58 = vld [vmem:[#allocation69_spill] sm:$0xff] }
 0x29d   : > { %v6654_v51 = vrot.slane %v14557_v34, %v12085_v3  ;;  %v6661_v31 = vrot.slane %v14558_v26, %v12085_v3  ;;  %v12531_v11 = vcombine.low %v4361_v35, %v4368_v52  ;;  %v6475_v25 = vcombine.low %v6467_v27, %v6474_v1  ;;  %14561 = vst [vmem:[#allocation62_spill] sm:$0xff] %v12537_v63  ;;  %v14574_v63 = vld [vmem:[#allocation78_spill] sm:$0xff] }
 0x29e   : > { %14556 = vst [vmem:[#allocation59_spill] sm:$0xff] %v12525_v10  ;;  %v6501_v57 = vrot.slane %v14559_v53, %v12085_v3  ;;  %v6508_v2 = vrot.slane %v14560_v50, %v12085_v3  ;;  %v4431_v24 = vrot.slane %v14555_v44, %v11300_v18  ;;  %v4438_v29 = vrot.slane %v14555_v44, %v11303_v22 }
 0x29f   : > { %v4333_v26 = vrot.slane %v14562_v58, %v11287_v62  ;;  %v4340_v35 = vrot.slane %v14562_v58, %v11293_v60  ;;  %8383 = vperm.xlu0 %9584, %v6628_v13   ;;  %v12547_v45 = vcombine.low %v4375_v23, %v4382_v56  ;;  %v12549_v52 = vcombine.low %v4277_v14, %v4284_v7  ;;  %v12561_v13 = vpop.xlane.xlu1 %2333  ;;  %v14566_v14 = vld [vmem:[#allocation88_spill] sm:$0xff] }
 0x2a0   : > { %v12551_v50 = vcombine.low %v4291_v21, %v4298_v19  ;;  %v12553_v37 = vcombine.low %v4417_v28, %v4424_v30  ;;  %8356 = vperm.xlu1 %9585, %v6475_v25   ;;  %v4347_v27 = vrot.slane %v14562_v58, %v11300_v18  ;;  %v6662_v1 = vcombine.low %v6654_v51, %v6661_v31  ;;  %v14567_v25 = vld [vmem:[#allocation89_spill] sm:$0xff] }
 0x2a1   : > { %14563 = vst [vmem:[#allocation64_spill] sm:$0xff] %v12549_v52  ;;  %v6688_v44 = vrot.slane %v12016_v48, %v12085_v3  ;;  %v6695_v34 = vrot.slane %v12020_v12, %v12085_v3  ;;  %14565 = vst [vmem:[#allocation63_spill] sm:$0xff] %v12561_v13  ;;  %v4354_v23 = vrot.slane %v14562_v58, %v11303_v22  ;;  %v14569_v48 = vld [vmem:[#allocation75_spill] sm:$0xff]  ;;  %v14570_v30 = vld [vmem:[#allocation73_spill] sm:$0xff] }
 0x2a2   : > { %14564 = vst [vmem:[#allocation65_spill] sm:$0xff] %v12551_v50  ;;  %v6509_v56 = vcombine.low %v6501_v57, %v6508_v2  ;;  %v6535_v7 = vrot.slane %v14566_v14, %v12085_v3  ;;  %v6542_v21 = vrot.slane %v14567_v25, %v12085_v3  ;;  %v12569_v19 = vcombine.low %v4431_v24, %v4438_v29  ;;  %v12585_v24 = vpop.xlane.xlu0 %2330  ;;  %v14572_v25 = vld [vmem:[#allocation92_spill] sm:$0xff] }
 0x2a3   : > { %v12571_v31 = vcombine.low %v4333_v26, %v4340_v35  ;;  %v4473_v28 = vrot.slane %v14569_v48, %v11287_v62  ;;  %v4480_v12 = vrot.slane %v14569_v48, %v11293_v60  ;;  %8389 = vperm.xlu0 %9584, %v6662_v1   ;;  %v4487_v2 = vrot.slane %v14569_v48, %v11300_v18 }
 0x2a4   : > { %v4494_v57 = vrot.slane %v14569_v48, %v11303_v22  ;;  %v4389_v51 = vrot.slane %v14570_v30, %v11287_v62  ;;  %v4396_v53 = vrot.slane %v14570_v30, %v11293_v60  ;;  %8362 = vperm.xlu1 %9585, %v6509_v56   ;;  %14571 = vst [vmem:[#allocation87_spill] sm:$0xff] %v12585_v24  ;;  %v14573_v56 = vld [vmem:[#allocation93_spill] sm:$0xff] }
 0x2a5   : > { %14568 = vst [vmem:[#allocation86_spill] sm:$0xff] %v12571_v31  ;;  %v4403_v29 = vrot.slane %v14570_v30, %v11300_v18  ;;  %v6696_v58 = vcombine.low %v6688_v44, %v6695_v34  ;;  %v6722_v26 = vrot.slane %v12026_v39, %v12085_v3  ;;  %v6729_v35 = vrot.slane %v12028_v36, %v12085_v3  ;;  %v12607_v34 = vpop.xlane.xlu1 %2339 }
 0x2a6   : > { %v4410_v1 = vrot.slane %v14570_v30, %v11303_v22  ;;  %v6543_v14 = vcombine.low %v6535_v7, %v6542_v21  ;;  %v6569_v48 = vrot.slane %v14572_v25, %v12085_v3  ;;  %v6576_v24 = vrot.slane %v14573_v56, %v12085_v3  ;;  %14575 = vst [vmem:[#allocation71_spill] sm:$0xff] %v12607_v34  ;;  %v14577_v30 = vld [vmem:[#allocation77_spill] sm:$0xff]  ;;  %v12629_v34 = vpop.xlane.xlu0 %2336 }
 0x2a7   : > { %v4529_v13 = vrot.slane %v14574_v63, %v11287_v62  ;;  %v4536_v44 = vrot.slane %v14574_v63, %v11293_v60  ;;  %v4543_v39 = vrot.slane %v14574_v63, %v11300_v18  ;;  %v4550_v36 = vrot.slane %v14574_v63, %v11303_v22  ;;  %8395 = vperm.xlu0 %9584, %v6696_v58  }
 0x2a8   : > { %v12609_v7 = vcombine.low %v4347_v27, %v4354_v23  ;;  %v12611_v21 = vcombine.low %v4473_v28, %v4480_v12  ;;  %v4445_v25 = vrot.slane %v14577_v30, %v11287_v62  ;;  %v4452_v56 = vrot.slane %v14577_v30, %v11293_v60  ;;  %8368 = vperm.xlu1 %9585, %v6543_v14  }
 0x2a9   : > { %v12617_v31 = vcombine.low %v4487_v2, %v4494_v57  ;;  %v6730_v50 = vcombine.low %v6722_v26, %v6729_v35  ;;  %v6756_v63 = vrot.slane %v12034_v15, %v12085_v3  ;;  %v6763_v58 = vrot.slane %v12036_v32, %v12085_v3  ;;  %14579 = vst [vmem:[#allocation90_spill] sm:$0xff] %v12629_v34  ;;  %v12653_v14 = vpop.xlane.xlu1 %2345  ;;  %v14593_v34 = vld [vmem:[#allocation82_spill] sm:$0xff] }
 0x2aa   : > { %14576 = vst [vmem:[#allocation72_spill] sm:$0xff] %v12609_v7  ;;  %v12623_v27 = vcombine.low %v4389_v51, %v4396_v53  ;;  %v6577_v23 = vcombine.low %v6569_v48, %v6576_v24  ;;  %v6603_v28 = vrot.slane %v12012_v47, %v12085_v3  ;;  %v6610_v12 = vrot.slane %v12014_v9, %v12085_v3  ;;  %v14584_v47 = vld [vmem:[#allocation81_spill] sm:$0xff] }
 0x2ab   : > { %v12631_v2 = vcombine.low %v4403_v29, %v4410_v1  ;;  %v12633_v57 = vcombine.low %v4529_v13, %v4536_v44  ;;  %v12635_v26 = vcombine.low %v4543_v39, %v4550_v36  ;;  %v4459_v15 = vrot.slane %v14577_v30, %v11300_v18  ;;  %8401 = vperm.xlu0 %9584, %v6730_v50   ;;  %v14585_v29 = vld [vmem:[#allocation33_spill] sm:$0xff]  ;;  %v14586_v50 = vld [vmem:[#allocation35_spill] sm:$0xff] }
 0x2ac   : > { %14578 = vst [vmem:[#allocation68_spill] sm:$0xff] %v12623_v27  ;;  %v4466_v32 = vrot.slane %v14577_v30, %v11303_v22  ;;  %v12641_v51 = vcombine.low %v4445_v25, %v4452_v56  ;;  %v4585_v9 = vrot.slane %v14584_v47, %v11287_v62  ;;  %v4592_v53 = vrot.slane %v14584_v47, %v11293_v60  ;;  %v14588_v39 = vld [vmem:[#allocation99_spill] sm:$0xff]  ;;  %v14589_v30 = vld [vmem:[#allocation100_spill] sm:$0xff] }
 0x2ad   : > { %14580 = vst [vmem:[#allocation91_spill] sm:$0xff] %v12631_v2  ;;  %14581 = vst [vmem:[#allocation74_spill] sm:$0xff] %v12633_v57  ;;  %8374 = vperm.xlu1 %9585, %v6577_v23   ;;  %v4599_v13 = vrot.slane %v14584_v47, %v11300_v18  ;;  %v6764_v24 = vcombine.low %v6756_v63, %v6763_v58  ;;  %v6790_v35 = vrot.slane %v14585_v29, %v12085_v3  ;;  %v14590_v56 = vld [vmem:[#allocation80_spill] sm:$0xff]  ;;  %v14595_v2 = vld [vmem:[#allocation106_spill] sm:$0xff] }
 0x2ae   : > { %14582 = vst [vmem:[#allocation76_spill] sm:$0xff] %v12635_v26  ;;  %14583 = vst [vmem:[#allocation67_spill] sm:$0xff] %v12641_v51  ;;  %v6797_v1 = vrot.slane %v14586_v50, %v12085_v3  ;;  %v4606_v48 = vrot.slane %v14584_v47, %v11303_v22  ;;  %v6611_v44 = vcombine.low %v6603_v28, %v6610_v12  ;;  %v14591_v28 = vld [vmem:[#allocation83_spill] sm:$0xff]  ;;  %v14596_v26 = vld [vmem:[#allocation101_spill] sm:$0xff] }
 0x2af   : > { %14587 = vst [vmem:[#allocation70_spill] sm:$0xff] %v12653_v14  ;;  %v6637_v36 = vrot.slane %v14588_v39, %v12085_v3  ;;  %v6644_v25 = vrot.slane %v14589_v30, %v12085_v3  ;;  %v4501_v63 = vrot.slane %v14590_v56, %v11287_v62  ;;  %v4508_v58 = vrot.slane %v14590_v56, %v11293_v60  ;;  %v12677_v30 = vpop.xlane.xlu0 %2342 }
 0x2b0   : > { %v4515_v23 = vrot.slane %v14590_v56, %v11300_v18  ;;  %v4522_v29 = vrot.slane %v14590_v56, %v11303_v22  ;;  %8407 = vperm.xlu0 %9584, %v6764_v24   ;;  %v4641_v12 = vrot.slane %v14591_v28, %v11287_v62  ;;  %v4648_v47 = vrot.slane %v14591_v28, %v11293_v60  ;;  %v14594_v24 = vld [vmem:[#allocation26_spill] sm:$0xff] }
 0x2b1   : > { %v4655_v50 = vrot.slane %v14591_v28, %v11300_v18  ;;  %v4662_v39 = vrot.slane %v14591_v28, %v11303_v22  ;;  %8380 = vperm.xlu1 %9585, %v6611_v44   ;;  %14592 = vst [vmem:[#allocation94_spill] sm:$0xff] %v12677_v30  ;;  %v4557_v14 = vrot.slane %v14593_v34, %v11287_v62  ;;  %v14597_v44 = vld [vmem:[#allocation102_spill] sm:$0xff] }
 0x2b2   : > { %v6798_v56 = vcombine.low %v6790_v35, %v6797_v1  ;;  %v6824_v51 = vrot.slane %v14594_v24, %v12085_v3  ;;  %v6831_v27 = vrot.slane %v14595_v2, %v12085_v3  ;;  %v4564_v7 = vrot.slane %v14593_v34, %v11293_v60  ;;  %v12699_v2 = vpop.xlane.xlu1 %2351 }
 0x2b3   : > { %v6645_v52 = vcombine.low %v6637_v36, %v6644_v25  ;;  %v6671_v28 = vrot.slane %v14596_v26, %v12085_v3  ;;  %v6678_v30 = vrot.slane %v14597_v44, %v12085_v3  ;;  %v12691_v57 = vcombine.low %v4459_v15, %v4466_v32  ;;  %14600 = vst [vmem:[#allocation84_spill] sm:$0xff] %v12699_v2  ;;  %v14610_v44 = vld [vmem:[#allocation98_spill] sm:$0xff] }
 0x2b4   : > { %v12693_v10 = vcombine.low %v4585_v9, %v4592_v53  ;;  %v12695_v35 = vcombine.low %v4599_v13, %v4606_v48  ;;  %v12697_v1 = vcombine.low %v4501_v63, %v4508_v58  ;;  %8413 = vperm.xlu0 %9584, %v6798_v56   ;;  %v12701_v24 = vcombine.low %v4515_v23, %v4522_v29  ;;  %v14602_v9 = vld [vmem:[#allocation109_spill] sm:$0xff]  ;;  %v14603_v13 = vld [vmem:[#allocation110_spill] sm:$0xff]  ;;  %v14605_v23 = vld [vmem:[#allocation103_spill] sm:$0xff] }
 0x2b5   : > { %14598 = vst [vmem:[#allocation96_spill] sm:$0xff] %v12691_v57  ;;  %v12703_v36 = vcombine.low %v4641_v12, %v4648_v47  ;;  %v12705_v25 = vcombine.low %v4655_v50, %v4662_v39  ;;  %v4571_v26 = vrot.slane %v14593_v34, %v11300_v18  ;;  %8386 = vperm.xlu1 %9585, %v6645_v52   ;;  %v14606_v12 = vld [vmem:[#allocation25_spill] sm:$0xff]  ;;  %v12721_v52 = vpop.xlane.xlu0 %2348 }
 0x2b6   : > { %14599 = vst [vmem:[#allocation79_spill] sm:$0xff] %v12697_v1  ;;  %14601 = vst [vmem:[#allocation69_spill] sm:$0xff] %v12701_v24  ;;  %v4578_v15 = vrot.slane %v14593_v34, %v11303_v22  ;;  %v6832_v32 = vcombine.low %v6824_v51, %v6831_v27  ;;  %v6858_v53 = vrot.slane %v14602_v9, %v12085_v3  ;;  %v14608_v34 = vld [vmem:[#allocation95_spill] sm:$0xff] }
 0x2b7   : > { %v6865_v48 = vrot.slane %v14603_v13, %v12085_v3  ;;  %v12715_v63 = vcombine.low %v4557_v14, %v4564_v7  ;;  %v6679_v58 = vcombine.low %v6671_v28, %v6678_v30  ;;  %v6705_v29 = vrot.slane %v14605_v23, %v12085_v3  ;;  %14607 = vst [vmem:[#allocation89_spill] sm:$0xff] %v12721_v52  ;;  %v14609_v14 = vld [vmem:[#allocation85_spill] sm:$0xff] }
 0x2b8   : > { %v6712_v47 = vrot.slane %v14606_v12, %v12085_v3  ;;  %v4697_v27 = vrot.slane %v14608_v34, %v11287_v62  ;;  %v4704_v51 = vrot.slane %v14608_v34, %v11293_v60  ;;  %v4711_v50 = vrot.slane %v14608_v34, %v11300_v18  ;;  %8419 = vperm.xlu0 %9584, %v6832_v32   ;;  %v12745_v12 = vpop.xlane.xlu1 %2357  ;;  %v14612_v52 = vld [vmem:[#allocation105_spill] sm:$0xff] }
 0x2b9   : > { %14604 = vst [vmem:[#allocation88_spill] sm:$0xff] %v12715_v63  ;;  %v4718_v7 = vrot.slane %v14608_v34, %v11303_v22  ;;  %v4613_v39 = vrot.slane %v14609_v14, %v11287_v62  ;;  %v4620_v30 = vrot.slane %v14609_v14, %v11293_v60  ;;  %v4627_v56 = vrot.slane %v14609_v14, %v11300_v18  ;;  %v12769_v24 = vpop.xlane.xlu0 %2354 }
 0x2ba   : > { %v4634_v28 = vrot.slane %v14609_v14, %v11303_v22  ;;  %8392 = vperm.xlu1 %9585, %v6679_v58   ;;  %v4753_v9 = vrot.slane %v14610_v44, %v11287_v62  ;;  %v6866_v13 = vcombine.low %v6858_v53, %v6865_v48  ;;  %v6892_v32 = vrot.slane %v12173_v6, %v12085_v3  ;;  %v14613_v58 = vld [vmem:[#allocation24_spill] sm:$0xff] }
 0x2bb   : > { %v6899_v23 = vrot.slane %v12179_v4, %v12085_v3  ;;  %14611 = vst [vmem:[#allocation75_spill] sm:$0xff] %v12745_v12  ;;  %v4760_v34 = vrot.slane %v14610_v44, %v11293_v60  ;;  %v6713_v2 = vcombine.low %v6705_v29, %v6712_v47  ;;  %v6739_v14 = vrot.slane %v14612_v52, %v12085_v3  ;;  %v14614_v4 = vld [vmem:[#allocation97_spill] sm:$0xff] }
 0x2bc   : > { %v6746_v63 = vrot.slane %v14613_v58, %v12085_v3  ;;  %v4767_v53 = vrot.slane %v14610_v44, %v11300_v18  ;;  %v4774_v6 = vrot.slane %v14610_v44, %v11303_v22  ;;  %v4669_v48 = vrot.slane %v14614_v4, %v11287_v62  ;;  %8425 = vperm.xlu0 %9584, %v6866_v13  }
 0x2bd   : > { %v4676_v12 = vrot.slane %v14614_v4, %v11293_v60  ;;  %v12761_v29 = vcombine.low %v4571_v26, %v4578_v15  ;;  %v12763_v47 = vcombine.low %v4697_v27, %v4704_v51  ;;  %v12765_v52 = vcombine.low %v4711_v50, %v4718_v7  ;;  %14616 = vst [vmem:[#allocation92_spill] sm:$0xff] %v12769_v24  ;;  %v14618_v27 = vld [vmem:[#allocation107_spill] sm:$0xff]  ;;  %v14619_v50 = vld [vmem:[#allocation108_spill] sm:$0xff] }
 0x2be   : > { %v12767_v58 = vcombine.low %v4613_v39, %v4620_v30  ;;  %8398 = vperm.xlu1 %9585, %v6713_v2   ;;  %v12771_v1 = vcombine.low %v4627_v56, %v4634_v28  ;;  %v6900_v44 = vcombine.low %v6892_v32, %v6899_v23  ;;  %v6926_v57 = vrot.slane %v12185_v41, %v12085_v3  ;;  %v14622_v23 = vld [vmem:[#allocation21_spill] sm:$0xff] }
 0x2bf   : > { %v6933_v13 = vrot.slane %v12187_v33, %v12085_v3  ;;  %v12777_v26 = vcombine.low %v4753_v9, %v4760_v34  ;;  %v6747_v15 = vcombine.low %v6739_v14, %v6746_v63  ;;  %v6773_v51 = vrot.slane %v14618_v27, %v12085_v3  ;;  %v12791_v33 = vpop.xlane.xlu1 %2363  ;;  %v14621_v63 = vld [vmem:[#allocation104_spill] sm:$0xff] }
 0x2c0   : > { %14615 = vst [vmem:[#allocation73_spill] sm:$0xff] %v12767_v58  ;;  %14617 = vst [vmem:[#allocation93_spill] sm:$0xff] %v12771_v1  ;;  %v6780_v2 = vrot.slane %v14619_v50, %v12085_v3  ;;  %v12783_v7 = vcombine.low %v4767_v53, %v4774_v6  ;;  %v4683_v39 = vrot.slane %v14614_v4, %v11300_v18  ;;  %8431 = vperm.xlu0 %9584, %v6900_v44   ;;  %v14626_v58 = vld [vmem:[#allocation16_spill] sm:$0xff] }
 0x2c1   : > { %v4690_v41 = vrot.slane %v14614_v4, %v11303_v22  ;;  %v12789_v30 = vcombine.low %v4669_v48, %v4676_v12  ;;  %v4809_v56 = vrot.slane %v14621_v63, %v11287_v62  ;;  %v4816_v28 = vrot.slane %v14621_v63, %v11293_v60 }
 0x2c2   : > { %v4823_v9 = vrot.slane %v14621_v63, %v11300_v18  ;;  %v4830_v32 = vrot.slane %v14621_v63, %v11303_v22  ;;  %8404 = vperm.xlu1 %9585, %v6747_v15   ;;  %v4725_v12 = vrot.slane %v14622_v23, %v11287_v62  ;;  %v6934_v34 = vcombine.low %v6926_v57, %v6933_v13  ;;  %v12813_v15 = vpop.xlane.xlu0 %2360 }
 0x2c3   : > { %14620 = vst [vmem:[#allocation78_spill] sm:$0xff] %v12789_v30  ;;  %v6960_v14 = vrot.slane %v12243_v55, %v12085_v3  ;;  %v6967_v53 = vrot.slane %v12249_v42, %v12085_v3  ;;  %v4732_v6 = vrot.slane %v14622_v23, %v11293_v60  ;;  %v6781_v4 = vcombine.low %v6773_v51, %v6780_v2  ;;  %v14624_v42 = vld [vmem:[#allocation29_spill] sm:$0xff]  ;;  %v14625_v51 = vld [vmem:[#allocation27_spill] sm:$0xff]  ;;  %v12837_v30 = vpop.xlane.xlu1 %2369 }
 0x2c4   : > { %v6807_v48 = vrot.slane %v12163_v38, %v12085_v3  ;;  %v6814_v44 = vrot.slane %v12171_v16, %v12085_v3  ;;  %14623 = vst [vmem:[#allocation77_spill] sm:$0xff] %v12813_v15  ;;  %v4739_v57 = vrot.slane %v14622_v23, %v11300_v18  ;;  %v4746_v55 = vrot.slane %v14622_v23, %v11303_v22 }
 0x2c5   : > { %v4865_v13 = vrot.slane %v14624_v42, %v11287_v62  ;;  %v4872_v27 = vrot.slane %v14624_v42, %v11293_v60  ;;  %8437 = vperm.xlu0 %9584, %v6934_v34   ;;  %v4879_v38 = vrot.slane %v14624_v42, %v11300_v18  ;;  %v4886_v16 = vrot.slane %v14624_v42, %v11303_v22 }
 0x2c6   : > { %v4781_v50 = vrot.slane %v14625_v51, %v11287_v62  ;;  %v4788_v2 = vrot.slane %v14625_v51, %v11293_v60  ;;  %8410 = vperm.xlu1 %9585, %v6781_v4   ;;  %v12831_v63 = vcombine.low %v4683_v39, %v4690_v41  ;;  %v6968_v23 = vcombine.low %v6960_v14, %v6967_v53 }
 0x2c7   : > { %v6994_v24 = vrot.slane %v12265_v61, %v12085_v3  ;;  %v7001_v34 = vrot.slane %v12267_v43, %v12085_v3  ;;  %v12839_v15 = vcombine.low %v4809_v56, %v4816_v28  ;;  %v6815_v42 = vcombine.low %v6807_v48, %v6814_v44 }
 0x2c8   : > { %v6841_v1 = vrot.slane %v12181_v20, %v12085_v3  ;;  %v6848_v4 = vrot.slane %v14626_v58, %v12085_v3  ;;  %v12845_v39 = vcombine.low %v4823_v9, %v4830_v32  ;;  %v12847_v41 = vcombine.low %v4725_v12, %v4732_v6  ;;  %v12861_v58 = vpop.xlane.xlu0 %2366  ;;  %v14631_v9 = vld [vmem:[#allocation37_spill] sm:$0xff] }
 0x2c9   : > { %v12849_v14 = vcombine.low %v4739_v57, %v4746_v55  ;;  %v12851_v61 = vcombine.low %v4865_v13, %v4872_v27  ;;  %8443 = vperm.xlu0 %9584, %v6968_v23   ;;  %v12853_v43 = vcombine.low %v4879_v38, %v4886_v16  ;;  %v4795_v56 = vrot.slane %v14625_v51, %v11300_v18  ;;  %v14632_v57 = vld [vmem:[#allocation39_spill] sm:$0xff]  ;;  %v14633_v13 = vld [vmem:[#allocation17_spill] sm:$0xff] }
 0x2ca   : > { %14627 = vst [vmem:[#allocation81_spill] sm:$0xff] %v12847_v41  ;;  %v4802_v20 = vrot.slane %v14625_v51, %v11303_v22  ;;  %v12859_v28 = vcombine.low %v4781_v50, %v4788_v2  ;;  %8416 = vperm.xlu1 %9585, %v6815_v42   ;;  %14630 = vst [vmem:[#allocation99_spill] sm:$0xff] %v12861_v58  ;;  %v4921_v32 = vrot.slane %v14631_v9, %v11287_v62  ;;  %v14635_v2 = vld [vmem:[#allocation36_spill] sm:$0xff] }
 0x2cb   : > { %14628 = vst [vmem:[#allocation33_spill] sm:$0xff] %v12849_v14  ;;  %v7002_v12 = vcombine.low %v6994_v24, %v7001_v34  ;;  %v7028_v53 = vrot.slane %v12325_v49, %v12085_v3  ;;  %v7035_v6 = vrot.slane %v12327_v8, %v12085_v3  ;;  %v4928_v48 = vrot.slane %v14631_v9, %v11293_v60  ;;  %v14634_v49 = vld [vmem:[#allocation34_spill] sm:$0xff]  ;;  %v14637_v14 = vld [vmem:[#allocation31_spill] sm:$0xff] }
 0x2cc   : > { %14629 = vst [vmem:[#allocation35_spill] sm:$0xff] %v12859_v28  ;;  %v6849_v44 = vcombine.low %v6841_v1, %v6848_v4  ;;  %v6875_v55 = vrot.slane %v14632_v57, %v12085_v3  ;;  %v6882_v27 = vrot.slane %v14633_v13, %v12085_v3  ;;  %v4935_v38 = vrot.slane %v14631_v9, %v11300_v18  ;;  %v12883_v1 = vpop.xlane.xlu1 %2375  ;;  %v12905_v41 = vpop.xlane.xlu0 %2372 }
 0x2cd   : > { %v4942_v24 = vrot.slane %v14631_v9, %v11303_v22  ;;  %v4837_v16 = vrot.slane %v14634_v49, %v11287_v62  ;;  %v4844_v8 = vrot.slane %v14634_v49, %v11293_v60  ;;  %8449 = vperm.xlu0 %9584, %v7002_v12   ;;  %v4851_v51 = vrot.slane %v14634_v49, %v11300_v18 }
 0x2ce   : > { %v4858_v50 = vrot.slane %v14634_v49, %v11303_v22  ;;  %v4977_v23 = vrot.slane %v14635_v2, %v11287_v62  ;;  %v4984_v34 = vrot.slane %v14635_v2, %v11293_v60  ;;  %8422 = vperm.xlu1 %9585, %v6849_v44   ;;  %v4991_v42 = vrot.slane %v14635_v2, %v11300_v18  ;;  %v14636_v49 = vld [vmem:[#allocation18_spill] sm:$0xff] }
 0x2cf   : > { %v7036_v4 = vcombine.low %v7028_v53, %v7035_v6  ;;  %v7062_v9 = vrot.slane %v12335_v5, %v12085_v3  ;;  %v7069_v12 = vrot.slane %v12337_v46, %v12085_v3  ;;  %v4998_v57 = vrot.slane %v14635_v2, %v11303_v22  ;;  %14638 = vst [vmem:[#allocation100_spill] sm:$0xff] %v12905_v41  ;;  %v14640_v5 = vld [vmem:[#allocation15_spill] sm:$0xff] }
 0x2d0   : > { %v6883_v13 = vcombine.low %v6875_v55, %v6882_v27  ;;  %v6909_v28 = vrot.slane %v14636_v49, %v12085_v3  ;;  %v6916_v44 = vrot.slane %v14637_v14, %v12085_v3  ;;  %v12907_v58 = vcombine.low %v4795_v56, %v4802_v20  ;;  %v12953_v49 = vpop.xlane.xlu0 %2378 }
 0x2d1   : > { %v12909_v53 = vcombine.low %v4921_v32, %v4928_v48  ;;  %v4893_v6 = vrot.slane %v14640_v5, %v11287_v62  ;;  %v4900_v46 = vrot.slane %v14640_v5, %v11293_v60  ;;  %8455 = vperm.xlu0 %9584, %v7036_v4   ;;  %v12915_v55 = vcombine.low %v4935_v38, %v4942_v24  ;;  %v12929_v4 = vpop.xlane.xlu1 %2381 }
 0x2d2   : > { %14639 = vst [vmem:[#allocation80_spill] sm:$0xff] %v12907_v58  ;;  %v12917_v27 = vcombine.low %v4837_v16, %v4844_v8  ;;  %v12919_v2 = vcombine.low %v4851_v51, %v4858_v50  ;;  %v12921_v14 = vcombine.low %v4977_v23, %v4984_v34  ;;  %8428 = vperm.xlu1 %9585, %v6883_v13   ;;  %14643 = vst [vmem:[#allocation26_spill] sm:$0xff] %v12929_v4  ;;  %v14644_v16 = vld [vmem:[#allocation32_spill] sm:$0xff] }
 0x2d3   : > { %v4907_v56 = vrot.slane %v14640_v5, %v11300_v18  ;;  %v7070_v20 = vcombine.low %v7062_v9, %v7069_v12  ;;  %v7096_v32 = vrot.slane %v12395_v40, %v12085_v3  ;;  %v7103_v48 = vrot.slane %v12397_v54, %v12085_v3  ;;  %v14645_v51 = vld [vmem:[#allocation44_spill] sm:$0xff]  ;;  %v14648_v12 = vld [vmem:[#allocation19_spill] sm:$0xff]  ;;  %14649 = vst [vmem:[#allocation101_spill] sm:$0xff] %v12953_v49 }
 0x2d4   : > { %14641 = vst [vmem:[#allocation83_spill] sm:$0xff] %v12917_v27  ;;  %14642 = vst [vmem:[#allocation82_spill] sm:$0xff] %v12919_v2  ;;  %v12931_v38 = vcombine.low %v4991_v42, %v4998_v57  ;;  %v6917_v24 = vcombine.low %v6909_v28, %v6916_v44  ;;  %v6943_v8 = vrot.slane %v14644_v16, %v12085_v3  ;;  %v14647_v40 = vld [vmem:[#allocation20_spill] sm:$0xff]  ;;  %v14654_v27 = vld [vmem:[#allocation22_spill] sm:$0xff] }
 0x2d5   : > { %v6950_v50 = vrot.slane %v14645_v51, %v12085_v3  ;;  %v4914_v23 = vrot.slane %v14640_v5, %v11303_v22  ;;  %v12939_v34 = vcombine.low %v4893_v6, %v4900_v46  ;;  %v5033_v9 = vrot.slane %v14647_v40, %v11287_v62  ;;  %8461 = vperm.xlu0 %9584, %v7070_v20   ;;  %v14650_v6 = vld [vmem:[#allocation43_spill] sm:$0xff]  ;;  %v14651_v20 = vld [vmem:[#allocation46_spill] sm:$0xff] }
 0x2d6   : > { %v5040_v54 = vrot.slane %v14647_v40, %v11293_v60  ;;  %v5047_v28 = vrot.slane %v14647_v40, %v11300_v18  ;;  %v5054_v42 = vrot.slane %v14647_v40, %v11303_v22  ;;  %v4949_v57 = vrot.slane %v14648_v12, %v11287_v62  ;;  %8434 = vperm.xlu1 %9585, %v6917_v24   ;;  %v14653_v24 = vld [vmem:[#allocation41_spill] sm:$0xff] }
 0x2d7   : > { %14646 = vst [vmem:[#allocation106_spill] sm:$0xff] %v12939_v34  ;;  %v4956_v13 = vrot.slane %v14648_v12, %v11293_v60  ;;  %v4963_v44 = vrot.slane %v14648_v12, %v11300_v18  ;;  %v7104_v5 = vcombine.low %v7096_v32, %v7103_v48  ;;  %v7130_v46 = vrot.slane %v14650_v6, %v12085_v3  ;;  %v14652_v34 = vld [vmem:[#allocation45_spill] sm:$0xff] }
 0x2d8   : > { %v7137_v16 = vrot.slane %v14651_v20, %v12085_v3  ;;  %v4970_v51 = vrot.slane %v14648_v12, %v11303_v22  ;;  %v6951_v40 = vcombine.low %v6943_v8, %v6950_v50  ;;  %v6977_v2 = vrot.slane %v14652_v34, %v12085_v3  ;;  %v12975_v8 = vpop.xlane.xlu1 %2387  ;;  %v14658_v12 = vld [vmem:[#allocation38_spill] sm:$0xff] }
 0x2d9   : > { %v6984_v49 = vrot.slane %v14653_v24, %v12085_v3  ;;  %v5089_v58 = vrot.slane %v14654_v27, %v11287_v62  ;;  %v5096_v32 = vrot.slane %v14654_v27, %v11293_v60  ;;  %v5103_v48 = vrot.slane %v14654_v27, %v11300_v18  ;;  %8467 = vperm.xlu0 %9584, %v7104_v5  }
 0x2da   : > { %v5110_v6 = vrot.slane %v14654_v27, %v11303_v22  ;;  %14655 = vst [vmem:[#allocation102_spill] sm:$0xff] %v12975_v8  ;;  %v12977_v50 = vcombine.low %v4907_v56, %v4914_v23  ;;  %v12979_v34 = vcombine.low %v5033_v9, %v5040_v54  ;;  %v5005_v20 = vrot.slane %v14658_v12, %v11287_v62  ;;  %v14660_v9 = vld [vmem:[#allocation49_spill] sm:$0xff] }
 0x2db   : > { %v5012_v24 = vrot.slane %v14658_v12, %v11293_v60  ;;  %8440 = vperm.xlu1 %9585, %v6951_v40   ;;  %v12985_v41 = vcombine.low %v5047_v28, %v5054_v42  ;;  %v7138_v4 = vcombine.low %v7130_v46, %v7137_v16  ;;  %v7164_v27 = vrot.slane %v12471_v17, %v12085_v3 }
 0x2dc   : > { %14656 = vst [vmem:[#allocation109_spill] sm:$0xff] %v12977_v50  ;;  %14657 = vst [vmem:[#allocation110_spill] sm:$0xff] %v12979_v34  ;;  %v7171_v5 = vrot.slane %v12477_v0, %v12085_v3  ;;  %v12991_v56 = vcombine.low %v4949_v57, %v4956_v13  ;;  %v6985_v23 = vcombine.low %v6977_v2, %v6984_v49  ;;  %v14661_v50 = vld [vmem:[#allocation48_spill] sm:$0xff]  ;;  %v12997_v34 = vpop.xlane.xlu0 %2384  ;;  %v13017_v16 = vpop.xlane.xlu1 %2393 }
 0x2dd   : > { %v7011_v54 = vrot.slane %v14660_v9, %v12085_v3  ;;  %v7018_v8 = vrot.slane %v14661_v50, %v12085_v3  ;;  %14662 = vst [vmem:[#allocation25_spill] sm:$0xff] %v12997_v34  ;;  %v12999_v28 = vcombine.low %v4963_v44, %v4970_v51  ;;  %v13001_v42 = vcombine.low %v5089_v58, %v5096_v32  ;;  %v14667_v57 = vld [vmem:[#allocation40_spill] sm:$0xff]  ;;  %v14669_v51 = vld [vmem:[#allocation55_spill] sm:$0xff] }
 0x2de   : > { %14659 = vst [vmem:[#allocation103_spill] sm:$0xff] %v12991_v56  ;;  %v13003_v46 = vcombine.low %v5103_v48, %v5110_v6  ;;  %v5019_v17 = vrot.slane %v14658_v12, %v11300_v18  ;;  %8473 = vperm.xlu0 %9584, %v7138_v4   ;;  %v5026_v0 = vrot.slane %v14658_v12, %v11303_v22  ;;  %14668 = vst [vmem:[#allocation24_spill] sm:$0xff] %v13017_v16  ;;  %v14670_v6 = vld [vmem:[#allocation51_spill] sm:$0xff]  ;;  %v14671_v12 = vld [vmem:[#allocation42_spill] sm:$0xff] }
 0x2df   : > { %14663 = vst [vmem:[#allocation95_spill] sm:$0xff] %v12999_v28  ;;  %14664 = vst [vmem:[#allocation85_spill] sm:$0xff] %v13001_v42  ;;  %v13009_v2 = vcombine.low %v5005_v20, %v5012_v24  ;;  %v5145_v13 = vrot.slane %v14667_v57, %v11287_v62  ;;  %v5152_v49 = vrot.slane %v14667_v57, %v11293_v60  ;;  %8446 = vperm.xlu1 %9585, %v6985_v23   ;;  %v14672_v24 = vld [vmem:[#allocation23_spill] sm:$0xff] }
 0x2e0   : > { %14665 = vst [vmem:[#allocation98_spill] sm:$0xff] %v13003_v46  ;;  %v5159_v58 = vrot.slane %v14667_v57, %v11300_v18  ;;  %v7172_v44 = vcombine.low %v7164_v27, %v7171_v5  ;;  %v7198_v4 = vrot.slane %v12483_v59, %v12085_v3  ;;  %v7205_v40 = vrot.slane %v14669_v51, %v12085_v3  ;;  %v14676_v56 = vld [vmem:[#allocation47_spill] sm:$0xff] }
 0x2e1   : > { %14666 = vst [vmem:[#allocation105_spill] sm:$0xff] %v13009_v2  ;;  %v5166_v32 = vrot.slane %v14667_v57, %v11303_v22  ;;  %v7019_v48 = vcombine.low %v7011_v54, %v7018_v8  ;;  %v7045_v50 = vrot.slane %v14670_v6, %v12085_v3  ;;  %v7052_v20 = vrot.slane %v14671_v12, %v12085_v3  ;;  %v14673_v8 = vld [vmem:[#allocation30_spill] sm:$0xff]  ;;  %v13045_v6 = vpop.xlane.xlu0 %2390  ;;  %v14675_v12 = vld [vmem:[#allocation28_spill] sm:$0xff] }
 0x2e2   : > { %v5061_v27 = vrot.slane %v14672_v24, %v11287_v62  ;;  %v5068_v5 = vrot.slane %v14672_v24, %v11293_v60  ;;  %v5075_v59 = vrot.slane %v14672_v24, %v11300_v18  ;;  %v5082_v23 = vrot.slane %v14672_v24, %v11303_v22  ;;  %8479 = vperm.xlu0 %9584, %v7172_v44  }
 0x2e3   : > { %v5201_v9 = vrot.slane %v14673_v8, %v11287_v62  ;;  %v5208_v54 = vrot.slane %v14673_v8, %v11293_v60  ;;  %v5215_v57 = vrot.slane %v14673_v8, %v11300_v18  ;;  %v5222_v51 = vrot.slane %v14673_v8, %v11303_v22  ;;  %8452 = vperm.xlu1 %9585, %v7019_v48   ;;  %v14677_v48 = vld [vmem:[#allocation58_spill] sm:$0xff] }
 0x2e4   : > { %14674 = vst [vmem:[#allocation97_spill] sm:$0xff] %v13045_v6  ;;  %v5117_v16 = vrot.slane %v14675_v12, %v11287_v62  ;;  %v7206_v24 = vcombine.low %v7198_v4, %v7205_v40  ;;  %v7232_v44 = vrot.slane %v12531_v11, %v12085_v3  ;;  %v7239_v34 = vrot.slane %v12547_v45, %v12085_v3  ;;  %v13067_v45 = vpop.xlane.xlu1 %2399 }
 0x2e5   : > { %v5124_v2 = vrot.slane %v14675_v12, %v11293_v60  ;;  %v7053_v28 = vcombine.low %v7045_v50, %v7052_v20  ;;  %v7079_v8 = vrot.slane %v14676_v56, %v12085_v3  ;;  %v7086_v6 = vrot.slane %v14677_v48, %v12085_v3  ;;  %14680 = vst [vmem:[#allocation104_spill] sm:$0xff] %v13067_v45 }
 0x2e6   : > { %v13059_v46 = vcombine.low %v5019_v17, %v5026_v0  ;;  %v13061_v42 = vcombine.low %v5145_v13, %v5152_v49  ;;  %v13063_v4 = vcombine.low %v5159_v58, %v5166_v32  ;;  %v13065_v11 = vcombine.low %v5061_v27, %v5068_v5  ;;  %8485 = vperm.xlu0 %9584, %v7206_v24   ;;  %v13085_v27 = vpop.xlane.xlu0 %2396  ;;  %v14684_v5 = vld [vmem:[#allocation54_spill] sm:$0xff] }
 0x2e7   : > { %v13069_v40 = vcombine.low %v5075_v59, %v5082_v23  ;;  %v13071_v50 = vcombine.low %v5201_v9, %v5208_v54  ;;  %v13073_v20 = vcombine.low %v5215_v57, %v5222_v51  ;;  %v5131_v56 = vrot.slane %v14675_v12, %v11300_v18  ;;  %8458 = vperm.xlu1 %9585, %v7053_v28   ;;  %v14685_v28 = vld [vmem:[#allocation56_spill] sm:$0xff]  ;;  %v14686_v9 = vld [vmem:[#allocation53_spill] sm:$0xff]  ;;  %v14689_v24 = vld [vmem:[#allocation66_spill] sm:$0xff] }
 0x2e8   : > { %14678 = vst [vmem:[#allocation107_spill] sm:$0xff] %v13059_v46  ;;  %14679 = vst [vmem:[#allocation108_spill] sm:$0xff] %v13065_v11  ;;  %v5138_v17 = vrot.slane %v14675_v12, %v11303_v22  ;;  %v7240_v0 = vcombine.low %v7232_v44, %v7239_v34  ;;  %v7266_v13 = vrot.slane %v12553_v37, %v12085_v3  ;;  %v13107_v12 = vpop.xlane.xlu1 %2405  ;;  %v14697_v11 = vld [vmem:[#allocation74_spill] sm:$0xff] }
 0x2e9   : > { %14681 = vst [vmem:[#allocation21_spill] sm:$0xff] %v13069_v40  ;;  %v7273_v49 = vrot.slane %v12569_v19, %v12085_v3  ;;  %v13083_v58 = vcombine.low %v5117_v16, %v5124_v2  ;;  %v7087_v32 = vcombine.low %v7079_v8, %v7086_v6  ;;  %14683 = vst [vmem:[#allocation27_spill] sm:$0xff] %v13085_v27  ;;  %v14687_v16 = vld [vmem:[#allocation50_spill] sm:$0xff] }
 0x2ea   : > { %v7113_v59 = vrot.slane %v14684_v5, %v12085_v3  ;;  %v7120_v23 = vrot.slane %v14685_v28, %v12085_v3  ;;  %v5257_v34 = vrot.slane %v14686_v9, %v11287_v62  ;;  %v5264_v37 = vrot.slane %v14686_v9, %v11293_v60  ;;  %8491 = vperm.xlu0 %9584, %v7240_v0  }
 0x2eb   : > { %14682 = vst [vmem:[#allocation29_spill] sm:$0xff] %v13083_v58  ;;  %v5271_v19 = vrot.slane %v14686_v9, %v11300_v18  ;;  %v5278_v2 = vrot.slane %v14686_v9, %v11303_v22  ;;  %v5173_v54 = vrot.slane %v14687_v16, %v11287_v62  ;;  %v5180_v57 = vrot.slane %v14687_v16, %v11293_v60  ;;  %v14690_v9 = vld [vmem:[#allocation57_spill] sm:$0xff]  ;;  %v13139_v58 = vpop.xlane.xlu0 %2402 }
 0x2ec   : > { %v5187_v51 = vrot.slane %v14687_v16, %v11300_v18  ;;  %v5194_v6 = vrot.slane %v14687_v16, %v11303_v22  ;;  %14688 = vst [vmem:[#allocation16_spill] sm:$0xff] %v13107_v12  ;;  %8464 = vperm.xlu1 %9585, %v7087_v32   ;;  %v5313_v44 = vrot.slane %v14689_v24, %v11287_v62  ;;  %v14691_v12 = vld [vmem:[#allocation59_spill] sm:$0xff]  ;;  %v13137_v45 = vpop.permute.xlu1 %8299  ;;  %14695 = vst [vmem:[#allocation17_spill] sm:$0xff] %v13139_v58 }
 0x2ed   : > { %v7274_v8 = vcombine.low %v7266_v13, %v7273_v49  ;;  %v7300_v48 = vrot.slane %v12611_v21, %v12085_v3  ;;  %v7307_v0 = vrot.slane %v12617_v31, %v12085_v3  ;;  %v5320_v5 = vrot.slane %v14689_v24, %v11293_v60  ;;  %v14692_v21 = vld [vmem:[#allocation52_spill] sm:$0xff]  ;;  %14694 = vst [vmem:[#allocation39_spill] sm:$0xff] %v13137_v45 }
 0x2ee   : > { %v7121_v28 = vcombine.low %v7113_v59, %v7120_v23  ;;  %v7147_v16 = vrot.slane %v14690_v9, %v12085_v3  ;;  %v7154_v32 = vrot.slane %v14691_v12, %v12085_v3  ;;  %v5327_v27 = vrot.slane %v14689_v24, %v11300_v18 }
 0x2ef   : > { %v5334_v13 = vrot.slane %v14689_v24, %v11303_v22  ;;  %v5229_v49 = vrot.slane %v14692_v21, %v11287_v62  ;;  %v5236_v31 = vrot.slane %v14692_v21, %v11293_v60  ;;  %8497 = vperm.xlu0 %9584, %v7274_v8   ;;  %v13129_v59 = vcombine.low %v5131_v56, %v5138_v17  ;;  %v14698_v56 = vld [vmem:[#allocation76_spill] sm:$0xff] }
 0x2f0   : > { %v13131_v23 = vcombine.low %v5257_v34, %v5264_v37  ;;  %v13133_v9 = vcombine.low %v5271_v19, %v5278_v2  ;;  %v13135_v12 = vcombine.low %v5173_v54, %v5180_v57  ;;  %8470 = vperm.xlu1 %9585, %v7121_v28   ;;  %v13141_v24 = vcombine.low %v5187_v51, %v5194_v6  ;;  %v14700_v19 = vld [vmem:[#allocation64_spill] sm:$0xff]  ;;  %v14701_v54 = vld [vmem:[#allocation65_spill] sm:$0xff]  ;;  %v13169_v28 = vpop.permute.xlu1 %8302 }
 0x2f1   : > { %v7308_v40 = vcombine.low %v7300_v48, %v7307_v0  ;;  %v7334_v46 = vrot.slane %v14697_v11, %v12085_v3  ;;  %v7341_v17 = vrot.slane %v14698_v56, %v12085_v3  ;;  %v13147_v34 = vcombine.low %v5313_v44, %v5320_v5  ;;  %v14704_v44 = vld [vmem:[#allocation61_spill] sm:$0xff]  ;;  %14705 = vst [vmem:[#allocation15_spill] sm:$0xff] %v13169_v28 }
 0x2f2   : > { %14693 = vst [vmem:[#allocation37_spill] sm:$0xff] %v13135_v12  ;;  %14696 = vst [vmem:[#allocation34_spill] sm:$0xff] %v13141_v24  ;;  %v7155_v37 = vcombine.low %v7147_v16, %v7154_v32  ;;  %v7181_v2 = vrot.slane %v14700_v19, %v12085_v3  ;;  %v7188_v57 = vrot.slane %v14701_v54, %v12085_v3  ;;  %v14706_v16 = vld [vmem:[#allocation60_spill] sm:$0xff]  ;;  %v14708_v19 = vld [vmem:[#allocation86_spill] sm:$0xff] }
 0x2f3   : > { %14699 = vst [vmem:[#allocation36_spill] sm:$0xff] %v13147_v34  ;;  %v13153_v8 = vcombine.low %v5327_v27, %v5334_v13  ;;  %v5243_v51 = vrot.slane %v14692_v21, %v11300_v18  ;;  %v5250_v11 = vrot.slane %v14692_v21, %v11303_v22  ;;  %v13159_v6 = vcombine.low %v5229_v49, %v5236_v31  ;;  %v13179_v31 = vpop.permute.xlu0 %8296  ;;  %v14715_v24 = vld [vmem:[#allocation68_spill] sm:$0xff] }
 0x2f4   : > { %8503 = vperm.xlu0 %9584, %v7308_v40   ;;  %v5369_v48 = vrot.slane %v14704_v44, %v11287_v62  ;;  %v5376_v0 = vrot.slane %v14704_v44, %v11293_v60  ;;  %v5383_v5 = vrot.slane %v14704_v44, %v11300_v18  ;;  %v5390_v27 = vrot.slane %v14704_v44, %v11303_v22 }
 0x2f5   : > { %14702 = vst [vmem:[#allocation18_spill] sm:$0xff] %v13153_v8  ;;  %14703 = vst [vmem:[#allocation31_spill] sm:$0xff] %v13159_v6  ;;  %8476 = vperm.xlu1 %9585, %v7155_v37   ;;  %v5285_v32 = vrot.slane %v14706_v16, %v11287_v62  ;;  %v7342_v13 = vcombine.low %v7334_v46, %v7341_v17  ;;  %v7368_v40 = vrot.slane %v12693_v10, %v12085_v3  ;;  %v14709_v37 = vld [vmem:[#allocation72_spill] sm:$0xff] }
 0x2f6   : > { %v7375_v21 = vrot.slane %v12695_v35, %v12085_v3  ;;  %v5292_v49 = vrot.slane %v14706_v16, %v11293_v60  ;;  %14707 = vst [vmem:[#allocation32_spill] sm:$0xff] %v13179_v31  ;;  %v7189_v56 = vcombine.low %v7181_v2, %v7188_v57  ;;  %v7215_v54 = vrot.slane %v14708_v19, %v12085_v3  ;;  %v14710_v35 = vld [vmem:[#allocation63_spill] sm:$0xff]  ;;  %v14711_v19 = vld [vmem:[#allocation62_spill] sm:$0xff] }
 0x2f7   : > { %v7222_v44 = vrot.slane %v14709_v37, %v12085_v3  ;;  %v5299_v46 = vrot.slane %v14706_v16, %v11300_v18  ;;  %v5306_v10 = vrot.slane %v14706_v16, %v11303_v22  ;;  %v5425_v17 = vrot.slane %v14710_v35, %v11287_v62  ;;  %v13201_v16 = vpop.permute.xlu1 %8305 }
 0x2f8   : > { %v5432_v28 = vrot.slane %v14710_v35, %v11293_v60  ;;  %8509 = vperm.xlu0 %9584, %v7342_v13   ;;  %v5439_v2 = vrot.slane %v14710_v35, %v11300_v18  ;;  %v5446_v57 = vrot.slane %v14710_v35, %v11303_v22  ;;  %v5341_v37 = vrot.slane %v14711_v19, %v11287_v62  ;;  %v13211_v35 = vpop.permute.xlu0 %8323 }
 0x2f9   : > { %v5348_v45 = vrot.slane %v14711_v19, %v11293_v60  ;;  %14712 = vst [vmem:[#allocation44_spill] sm:$0xff] %v13201_v16  ;;  %8482 = vperm.xlu1 %9585, %v7189_v56   ;;  %v13203_v31 = vcombine.low %v5243_v51, %v5250_v11  ;;  %v7376_v58 = vcombine.low %v7368_v40, %v7375_v21  ;;  %14714 = vst [vmem:[#allocation19_spill] sm:$0xff] %v13211_v35  ;;  %v14716_v16 = vld [vmem:[#allocation91_spill] sm:$0xff] }
 0x2fa   : > { %v7402_v13 = vrot.slane %v12703_v36, %v12085_v3  ;;  %v7409_v8 = vrot.slane %v12705_v25, %v12085_v3  ;;  %v13209_v34 = vcombine.low %v5369_v48, %v5376_v0  ;;  %v7223_v6 = vcombine.low %v7215_v54, %v7222_v44  ;;  %v14723_v44 = vld [vmem:[#allocation67_spill] sm:$0xff] }
 0x2fb   : > { %v7249_v12 = vrot.slane %v14715_v24, %v12085_v3  ;;  %v7256_v56 = vrot.slane %v14716_v16, %v12085_v3  ;;  %v13217_v51 = vcombine.low %v5383_v5, %v5390_v27  ;;  %v13219_v11 = vcombine.low %v5285_v32, %v5292_v49  ;;  %v13233_v21 = vpop.permute.xlu1 %8308  ;;  %v14721_v5 = vld [vmem:[#allocation71_spill] sm:$0xff] }
 0x2fc   : > { %14713 = vst [vmem:[#allocation20_spill] sm:$0xff] %v13209_v34  ;;  %v13221_v40 = vcombine.low %v5299_v46, %v5306_v10  ;;  %v13223_v36 = vcombine.low %v5425_v17, %v5432_v28  ;;  %8515 = vperm.xlu0 %9584, %v7376_v58   ;;  %v13225_v25 = vcombine.low %v5439_v2, %v5446_v57  ;;  %14720 = vst [vmem:[#allocation41_spill] sm:$0xff] %v13233_v21  ;;  %v13243_v54 = vpop.permute.xlu0 %8329  ;;  %v14731_v35 = vld [vmem:[#allocation79_spill] sm:$0xff] }
 0x2fd   : > { %14717 = vst [vmem:[#allocation43_spill] sm:$0xff] %v13217_v51  ;;  %v5355_v48 = vrot.slane %v14711_v19, %v11300_v18  ;;  %v5362_v24 = vrot.slane %v14711_v19, %v11303_v22  ;;  %v13231_v0 = vcombine.low %v5341_v37, %v5348_v45  ;;  %8488 = vperm.xlu1 %9585, %v7223_v6   ;;  %14722 = vst [vmem:[#allocation22_spill] sm:$0xff] %v13243_v54  ;;  %v14724_v6 = vld [vmem:[#allocation96_spill] sm:$0xff]  ;;  %v14726_v19 = vld [vmem:[#allocation70_spill] sm:$0xff] }
 0x2fe   : > { %14718 = vst [vmem:[#allocation46_spill] sm:$0xff] %v13223_v36  ;;  %14719 = vst [vmem:[#allocation45_spill] sm:$0xff] %v13225_v25  ;;  %v5481_v27 = vrot.slane %v14721_v5, %v11287_v62  ;;  %v7410_v32 = vcombine.low %v7402_v13, %v7409_v8  ;;  %v7436_v58 = vrot.slane %v12763_v47, %v12085_v3 }
 0x2ff   : > { %v7443_v28 = vrot.slane %v12765_v52, %v12085_v3  ;;  %v5488_v49 = vrot.slane %v14721_v5, %v11293_v60  ;;  %v7257_v45 = vcombine.low %v7249_v12, %v7256_v56  ;;  %v7283_v46 = vrot.slane %v14723_v44, %v12085_v3  ;;  %v14725_v52 = vld [vmem:[#allocation87_spill] sm:$0xff]  ;;  %v13265_v13 = vpop.permute.xlu1 %8311 }
 0x300   : > { %v7290_v10 = vrot.slane %v14724_v6, %v12085_v3  ;;  %v5495_v8 = vrot.slane %v14721_v5, %v11300_v18  ;;  %v5502_v47 = vrot.slane %v14721_v5, %v11303_v22  ;;  %v5397_v17 = vrot.slane %v14725_v52, %v11287_v62  ;;  %8521 = vperm.xlu0 %9584, %v7410_v32  }
 0x301   : > { %v5404_v2 = vrot.slane %v14725_v52, %v11293_v60  ;;  %v5411_v12 = vrot.slane %v14725_v52, %v11300_v18  ;;  %v5418_v57 = vrot.slane %v14725_v52, %v11303_v22  ;;  %v5537_v37 = vrot.slane %v14726_v19, %v11287_v62  ;;  %14727 = vst [vmem:[#allocation38_spill] sm:$0xff] %v13265_v13  ;;  %v13275_v52 = vpop.permute.xlu0 %8335  ;;  %v14732_v13 = vld [vmem:[#allocation69_spill] sm:$0xff] }
 0x302   : > { %v5544_v16 = vrot.slane %v14726_v19, %v11293_v60  ;;  %8494 = vperm.xlu1 %9585, %v7257_v45   ;;  %v13267_v56 = vcombine.low %v5355_v48, %v5362_v24  ;;  %v7444_v5 = vcombine.low %v7436_v58, %v7443_v28  ;;  %v7470_v32 = vrot.slane %v12777_v26, %v12085_v3  ;;  %v14735_v26 = vld [vmem:[#allocation90_spill] sm:$0xff] }
 0x303   : > { %v7477_v44 = vrot.slane %v12783_v7, %v12085_v3  ;;  %v13273_v6 = vcombine.low %v5481_v27, %v5488_v49  ;;  %14730 = vst [vmem:[#allocation40_spill] sm:$0xff] %v13275_v52  ;;  %v7291_v54 = vcombine.low %v7283_v46, %v7290_v10  ;;  %v7317_v21 = vrot.slane %v14731_v35, %v12085_v3  ;;  %v13297_v46 = vpop.permute.xlu1 %8314  ;;  %v14744_v10 = vld [vmem:[#allocation73_spill] sm:$0xff] }
 0x304   : > { %14728 = vst [vmem:[#allocation49_spill] sm:$0xff] %v13267_v56  ;;  %v7324_v45 = vrot.slane %v14732_v13, %v12085_v3  ;;  %v13281_v48 = vcombine.low %v5495_v8, %v5502_v47  ;;  %v13283_v24 = vcombine.low %v5397_v17, %v5404_v2  ;;  %v5453_v58 = vrot.slane %v14735_v26, %v11287_v62 }
 0x305   : > { %14729 = vst [vmem:[#allocation48_spill] sm:$0xff] %v13273_v6  ;;  %v5460_v7 = vrot.slane %v14735_v26, %v11293_v60  ;;  %8527 = vperm.xlu0 %9584, %v7444_v5   ;;  %v13289_v27 = vcombine.low %v5411_v12, %v5418_v57  ;;  %v13295_v49 = vcombine.low %v5537_v37, %v5544_v16  ;;  %14738 = vst [vmem:[#allocation30_spill] sm:$0xff] %v13297_v46  ;;  %v13307_v12 = vpop.permute.xlu0 %8341  ;;  %v14740_v37 = vld [vmem:[#allocation88_spill] sm:$0xff]  ;;  %v14742_v5 = vld [vmem:[#allocation94_spill] sm:$0xff] }
 0x306   : > { %14733 = vst [vmem:[#allocation55_spill] sm:$0xff] %v13281_v48  ;;  %14734 = vst [vmem:[#allocation51_spill] sm:$0xff] %v13283_v24  ;;  %8500 = vperm.xlu1 %9585, %v7291_v54   ;;  %v7478_v8 = vcombine.low %v7470_v32, %v7477_v44  ;;  %v7504_v47 = vrot.slane %v12839_v15, %v12085_v3  ;;  %v7511_v17 = vrot.slane %v12845_v39, %v12085_v3  ;;  %v14768_v24 = vld [vmem:[#allocation106_spill] sm:$0xff] }
 0x307   : > { %14736 = vst [vmem:[#allocation42_spill] sm:$0xff] %v13289_v27  ;;  %14737 = vst [vmem:[#allocation23_spill] sm:$0xff] %v13295_v49  ;;  %v7325_v57 = vcombine.low %v7317_v21, %v7324_v45  ;;  %v7351_v16 = vrot.slane %v14740_v37, %v12085_v3  ;;  %v7358_v54 = vrot.slane %v12761_v29, %v12085_v3  ;;  %v14748_v49 = vld [vmem:[#allocation78_spill] sm:$0xff] }
 0x308   : > { %14739 = vst [vmem:[#allocation28_spill] sm:$0xff] %v13307_v12  ;;  %v13313_v13 = vcombine.low %v5453_v58, %v5460_v7  ;;  %v5705_v39 = vrot.slane %v12791_v33, %v11287_v62  ;;  %v5712_v32 = vrot.slane %v12791_v33, %v11293_v60  ;;  %v5719_v21 = vrot.slane %v12791_v33, %v11300_v18  ;;  %v13329_v58 = vpop.permute.xlu1 %8317 }
 0x309   : > { %8533 = vperm.xlu0 %9584, %v7478_v8   ;;  %v5726_v44 = vrot.slane %v12791_v33, %v11303_v22  ;;  %v5761_v29 = vrot.slane %v12837_v30, %v11287_v62  ;;  %v5768_v45 = vrot.slane %v12837_v30, %v11293_v60  ;;  %14743 = vst [vmem:[#allocation58_spill] sm:$0xff] %v13329_v58  ;;  %v13339_v35 = vpop.permute.xlu0 %8347 }
 0x30a   : > { %14741 = vst [vmem:[#allocation47_spill] sm:$0xff] %v13313_v13  ;;  %8506 = vperm.xlu1 %9585, %v7325_v57   ;;  %v5775_v7 = vrot.slane %v12837_v30, %v11300_v18  ;;  %v7512_v37 = vcombine.low %v7504_v47, %v7511_v17  ;;  %v7538_v8 = vrot.slane %v12851_v61, %v12085_v3  ;;  %v14745_v57 = vld [vmem:[#allocation93_spill] sm:$0xff] }
 0x30b   : > { %v7545_v28 = vrot.slane %v12853_v43, %v12085_v3  ;;  %v5782_v33 = vrot.slane %v12837_v30, %v11303_v22  ;;  %v7359_v15 = vcombine.low %v7351_v16, %v7358_v54  ;;  %v7385_v2 = vrot.slane %v14744_v10, %v12085_v3  ;;  %v14746_v47 = vld [vmem:[#allocation77_spill] sm:$0xff] }
 0x30c   : > { %v7392_v12 = vrot.slane %v14745_v57, %v12085_v3  ;;  %v5677_v17 = vrot.slane %v14746_v47, %v11287_v62  ;;  %v5684_v61 = vrot.slane %v14746_v47, %v11293_v60  ;;  %v5691_v43 = vrot.slane %v14746_v47, %v11300_v18  ;;  %v13361_v52 = vpop.permute.xlu1 %8320 }
 0x30d   : > { %v5698_v30 = vrot.slane %v14746_v47, %v11303_v22  ;;  %8539 = vperm.xlu0 %9584, %v7512_v37   ;;  %v13355_v10 = vcombine.low %v5705_v39, %v5712_v32  ;;  %v5817_v54 = vrot.slane %v12883_v1, %v11287_v62  ;;  %v5824_v57 = vrot.slane %v12883_v1, %v11293_v60  ;;  %v13371_v32 = vpop.permute.xlu0 %8353 }
 0x30e   : > { %14747 = vst [vmem:[#allocation54_spill] sm:$0xff] %v13361_v52  ;;  %8512 = vperm.xlu1 %9585, %v7359_v15   ;;  %v13363_v58 = vcombine.low %v5719_v21, %v5726_v44  ;;  %v7546_v46 = vcombine.low %v7538_v8, %v7545_v28  ;;  %v7572_v37 = vrot.slane %v12909_v53, %v12085_v3 }
 0x30f   : > { %v7579_v47 = vrot.slane %v12915_v55, %v12085_v3  ;;  %v13369_v39 = vcombine.low %v5761_v29, %v5768_v45  ;;  %v7393_v16 = vcombine.low %v7385_v2, %v7392_v12  ;;  %v7419_v19 = vrot.slane %v14748_v49, %v12085_v3  ;;  %v14749_v49 = vld [vmem:[#allocation99_spill] sm:$0xff] }
 0x310   : > { %v7426_v15 = vrot.slane %v12831_v63, %v12085_v3  ;;  %v13377_v21 = vcombine.low %v5775_v7, %v5782_v33  ;;  %v13379_v28 = vcombine.low %v5677_v17, %v5684_v61  ;;  %v13381_v44 = vcombine.low %v5691_v43, %v5698_v30  ;;  %v13393_v29 = vpop.permute.xlu1 %8326  ;;  %v14751_v61 = vld [vmem:[#allocation81_spill] sm:$0xff] }
 0x311   : > { %v5831_v53 = vrot.slane %v12883_v1, %v11300_v18  ;;  %8545 = vperm.xlu0 %9584, %v7546_v46   ;;  %v5838_v55 = vrot.slane %v12883_v1, %v11303_v22  ;;  %v13387_v2 = vcombine.low %v5817_v54, %v5824_v57  ;;  %v5733_v12 = vrot.slane %v14749_v49, %v11287_v62  ;;  %v13403_v33 = vpop.permute.xlu0 %8359  ;;  %v14752_v30 = vld [vmem:[#allocation33_spill] sm:$0xff]  ;;  %v14753_v54 = vld [vmem:[#allocation26_spill] sm:$0xff] }
 0x312   : > { %v5740_v63 = vrot.slane %v14749_v49, %v11293_v60  ;;  %14750 = vst [vmem:[#allocation56_spill] sm:$0xff] %v13393_v29  ;;  %8518 = vperm.xlu1 %9585, %v7393_v16   ;;  %v5747_v45 = vrot.slane %v14749_v49, %v11300_v18  ;;  %v7580_v7 = vcombine.low %v7572_v37, %v7579_v47  ;;  %v14756_v29 = vlaneseq }
 0x313   : > { %v7606_v46 = vrot.slane %v12921_v14, %v12085_v3  ;;  %v7613_v1 = vrot.slane %v12931_v38, %v12085_v3  ;;  %v5754_v8 = vrot.slane %v14749_v49, %v11303_v22  ;;  %v7427_v17 = vcombine.low %v7419_v19, %v7426_v15  ;;  %v14754_v19 = vld [vmem:[#allocation100_spill] sm:$0xff] }
 0x314   : > { %v7453_v43 = vrot.slane %v14751_v61, %v12085_v3  ;;  %v7460_v16 = vrot.slane %v14752_v30, %v12085_v3  ;;  %v5873_v57 = vrot.slane %v14753_v54, %v11287_v62  ;;  %v5880_v14 = vrot.slane %v14753_v54, %v11293_v60  ;;  %v13425_v30 = vpop.permute.xlu1 %8332 }
 0x315   : > { %v5887_v38 = vrot.slane %v14753_v54, %v11300_v18  ;;  %v5894_v37 = vrot.slane %v14753_v54, %v11303_v22  ;;  %8551 = vperm.xlu0 %9584, %v7580_v7   ;;  %v5789_v47 = vrot.slane %v14754_v19, %v11287_v62  ;;  %v5796_v15 = vrot.slane %v14754_v19, %v11293_v60  ;;  %v14757_v7 = vld [vmem:[#allocation110_spill] sm:$0xff]  ;;  %v13436_v25 = vpop.permute.xlu0 %8365 }
 0x316   : > { %v5803_v49 = vrot.slane %v14754_v19, %v11300_v18  ;;  %v5810_v61 = vrot.slane %v14754_v19, %v11303_v22  ;;  %14755 = vst [vmem:[#allocation53_spill] sm:$0xff] %v13425_v30  ;;  %8524 = vperm.xlu1 %9585, %v7427_v17   ;;  %v13428_v52 = vand.u32 127, %v14756_v29  ;;  %v7614_v54 = vcombine.low %v7606_v46, %v7613_v1  ;;  %v14758_v19 = vld [vmem:[#allocation35_spill] sm:$0xff]  ;;  %v14759_v17 = vld [vmem:[#allocation80_spill] sm:$0xff] }
 0x317   : > { %v7640_v48 = vrot.slane %v14757_v7, %v12085_v3  ;;  %v7647_v6 = vrot.slane %v12985_v41, %v12085_v3  ;;  %v13434_v13 = vcombine.low %v5831_v53, %v5838_v55  ;;  %v7461_v36 = vcombine.low %v7453_v43, %v7460_v16  ;;  %v14760_v55 = vld [vmem:[#allocation102_spill] sm:$0xff] }
 0x318   : > { %v7487_v27 = vrot.slane %v14758_v19, %v12085_v3  ;;  %v7494_v30 = vrot.slane %v14759_v17, %v12085_v3  ;;  %v13442_v29 = vcombine.low %v5733_v12, %v5740_v63  ;;  %v13444_v46 = vcombine.low %v5747_v45, %v5754_v8  ;;  %v13458_v19 = vpop.permute.xlu1 %8338  ;;  %v14762_v45 = vld [vmem:[#allocation85_spill] sm:$0xff] }
 0x319   : > { %v13446_v1 = vcombine.low %v5873_v57, %v5880_v14  ;;  %v13448_v7 = vcombine.low %v5887_v38, %v5894_v37  ;;  %8557 = vperm.xlu0 %9584, %v7614_v54   ;;  %v13450_v41 = vcombine.low %v5789_v47, %v5796_v15  ;;  %v13452_v53 = vcombine.low %v5803_v49, %v5810_v61  ;;  %v14763_v57 = vld [vmem:[#allocation98_spill] sm:$0xff]  ;;  %v13467_v37 = vpop.permute.xlu0 %8371  ;;  %v14764_v15 = vld [vmem:[#allocation83_spill] sm:$0xff] }
 0x31a   : > { %14761 = vst [vmem:[#allocation50_spill] sm:$0xff] %v13458_v19  ;;  %8530 = vperm.xlu1 %9585, %v7461_v36   ;;  %v8685_v12 = vadd.s32 4294967288, %v13428_v52  ;;  %v7648_v63 = vcombine.low %v7640_v48, %v7647_v6  ;;  %v7674_v8 = vrot.slane %v14762_v45, %v12085_v3  ;;  %v7681_v14 = vrot.slane %v14763_v57, %v12085_v3  ;;  %v14765_v36 = vld [vmem:[#allocation82_spill] sm:$0xff]  ;;  %v14766_v48 = vld [vmem:[#allocation101_spill] sm:$0xff] }
 0x31b   : > { %v7495_v47 = vcombine.low %v7487_v27, %v7494_v30  ;;  %v7521_v49 = vrot.slane %v14764_v15, %v12085_v3  ;;  %v7528_v61 = vrot.slane %v14765_v36, %v12085_v3  ;;  %v5845_v54 = vrot.slane %v14766_v48, %v11287_v62  ;;  %v14767_v57 = vld [vmem:[#allocation14_spill] sm:$0xff] }
 0x31c   : > { %v5852_v17 = vrot.slane %v14766_v48, %v11293_v60  ;;  %v8692_v45 = vadd.s32 4294967280, %v13428_v52  ;;  %v13486_v15 = vsub.s32 %v13428_v52, %v14767_v57  ;;  %v8699_v36 = vadd.s32 4294967272, %v13428_v52  ;;  %v8345_v38 = vpop.permute.xlu1 %8344 }
 0x31d   : > { %8563 = vperm.xlu0 %9584, %v7648_v63   ;;  %v13490_v6 = vsub.s32 %v8685_v12, %v14767_v57  ;;  %v7682_v43 = vcombine.low %v7674_v8, %v7681_v14  ;;  %v7708_v63 = vrot.slane %v13061_v42, %v12085_v3  ;;  %v7715_v16 = vrot.slane %v13063_v4, %v12085_v3  ;;  %v13497_v30 = vpop.permute.xlu0 %8377 }
 0x31e   : > { %8536 = vperm.xlu1 %9585, %v7495_v47   ;;  %v8793_v27 = vrot.slane %v8345_v38, %v13486_v15  ;;  %v7529_v19 = vcombine.low %v7521_v49, %v7528_v61  ;;  %v7555_v51 = vrot.slane %v14768_v24, %v12085_v3  ;;  %v14769_v47 = vld [vmem:[#allocation109_spill] sm:$0xff]  ;;  %v13503_v12 = vcombine.low %v5845_v54, %v5852_v17 }
 0x31f   : > { %v7562_v34 = vrot.slane %v14769_v47, %v12085_v3  ;;  %v13506_v8 = vsub.s32 %v8692_v45, %v14767_v57  ;;  %v8706_v42 = vadd.s32 4294967264, %v13428_v52  ;;  %v13510_v4 = vsub.s32 %v8699_v36, %v14767_v57  ;;  %v14770_v47 = vld [vmem:[#allocation103_spill] sm:$0xff] }
 0x320   : > { %v8713_v14 = vadd.s32 4294967256, %v13428_v52  ;;  %v8797_v24 = vrot.slane %v13339_v35, %v13490_v6  ;;  %v8351_v38 = vpop.permute.xlu1 %8350  ;;  %v7716_v61 = vcombine.low %v7708_v63, %v7715_v16  ;;  %v7742_v54 = vrot.slane %v13071_v50, %v12085_v3  ;;  %v14771_v35 = vld [vmem:[#allocation95_spill] sm:$0xff] }
 0x321   : > { %8569 = vperm.xlu0 %9584, %v7682_v43   ;;  %v8802_v49 = vrot.slane %v8351_v38, %v13506_v8  ;;  %v7749_v43 = vrot.slane %v13073_v20, %v12085_v3  ;;  %v13521_v45 = vpop.permute.xlu0 %8383  ;;  %v7563_v36 = vcombine.low %v7555_v51, %v7562_v34  ;;  %v7589_v56 = vrot.slane %v14770_v47, %v12085_v3  ;;  %v14772_v47 = vld [vmem:[#allocation105_spill] sm:$0xff] }
 0x322   : > { %8542 = vperm.xlu1 %9585, %v7529_v19   ;;  %v8798_v17 = vsel %vm8690_vm0, %v8797_v24, %v8793_v27  ;;  %v7596_v19 = vrot.slane %v14771_v35, %v12085_v3  ;;  %v13528_v16 = vsub.s32 %v8706_v42, %v14767_v57  ;;  %v8720_v50 = vadd.s32 4294967248, %v13428_v52 }
 0x323   : > { %v8803_v63 = vsel %vm8697_vm1, %v8802_v49, %v8798_v17  ;;  %v13533_v20 = vsub.s32 %v8713_v14, %v14767_v57  ;;  %v8727_v34 = vadd.s32 4294967240, %v13428_v52  ;;  %v8807_v51 = vrot.slane %v13371_v32, %v13510_v4  ;;  %v14773_v32 = vld [vmem:[#allocation107_spill] sm:$0xff] }
 0x324   : > { %v8357_v27 = vpop.permute.xlu1 %8356  ;;  %v7750_v42 = vcombine.low %v7742_v54, %v7749_v43  ;;  %v7776_v38 = vrot.slane %v13131_v23, %v12085_v3  ;;  %v7783_v49 = vrot.slane %v13133_v9, %v12085_v3  ;;  %v7597_v17 = vcombine.low %v7589_v56, %v7596_v19 }
 0x325   : > { %8575 = vperm.xlu0 %9584, %v7716_v61   ;;  %v8812_v24 = vrot.slane %v8357_v27, %v13528_v16  ;;  %v8808_v61 = vsel %vm8704_vm2, %v8807_v51, %v8803_v63  ;;  %v13544_v14 = vpop.permute.xlu0 %8389  ;;  %v7623_v35 = vrot.slane %v14772_v47, %v12085_v3  ;;  %v8741_v27 = vadd.s32 4294967224, %v13428_v52  ;;  %v14774_v47 = vld [vmem:[#allocation108_spill] sm:$0xff] }
 0x326   : > { %8548 = vperm.xlu1 %9585, %v7563_v36   ;;  %v7630_v36 = vrot.slane %v14773_v32, %v12085_v3  ;;  %v13552_v54 = vsub.s32 %v8720_v50, %v14767_v57  ;;  %v8734_v23 = vadd.s32 4294967232, %v13428_v52  ;;  %v13557_v56 = vsub.s32 %v8727_v34, %v14767_v57 }
 0x327   : > { %v8813_v9 = vsel %vm8711_vm3, %v8812_v24, %v8808_v61  ;;  %v8817_v43 = vrot.slane %v13403_v33, %v13533_v20  ;;  %v7784_v51 = vcombine.low %v7776_v38, %v7783_v49  ;;  %v8048_v50 = vrot.slane %v13355_v10, %v12085_v3  ;;  %v14775_v33 = vld [vmem:[#allocation21_spill] sm:$0xff] }
 0x328   : > { %v8363_v19 = vpop.permute.xlu1 %8362  ;;  %v8055_v24 = vrot.slane %v13363_v58, %v12085_v3  ;;  %v7631_v34 = vcombine.low %v7623_v35, %v7630_v36  ;;  %v7657_v32 = vrot.slane %v14774_v47, %v12085_v3  ;;  %v13575_v38 = vsub.s32 %v8734_v23, %v14767_v57  ;;  %v14776_v47 = vld [vmem:[#allocation29_spill] sm:$0xff] }
 0x329   : > { %8581 = vperm.xlu0 %9584, %v7750_v42   ;;  %v8822_v63 = vrot.slane %v8363_v19, %v13552_v54  ;;  %v8818_v42 = vsel %vm8718_vm4, %v8817_v43, %v8813_v9  ;;  %v13567_v61 = vpop.permute.xlu0 %8395  ;;  %v8755_v19 = vadd.s32 4294967208, %v13428_v52  ;;  %v8748_v10 = vadd.s32 4294967216, %v13428_v52 }
 0x32a   : > { %8554 = vperm.xlu1 %9585, %v7597_v17   ;;  %v7664_v17 = vrot.slane %v14775_v33, %v12085_v3  ;;  %v13580_v49 = vsub.s32 %v8741_v27, %v14767_v57  ;;  %v8827_v35 = vrot.slane %v13436_v25, %v13557_v56  ;;  %v8056_v43 = vcombine.low %v8048_v50, %v8055_v24 }
 0x32b   : > { %v8823_v58 = vsel %vm8725_vm5, %v8822_v63, %v8818_v42  ;;  %v8065_v23 = vrot.slane %v13442_v29, %v12085_v3  ;;  %v8072_v63 = vrot.slane %v13444_v46, %v12085_v3  ;;  %v7691_v33 = vrot.slane %v14776_v47, %v12085_v3 }
 0x32c   : > { %v8369_v36 = vpop.permute.xlu1 %8368  ;;  %v7665_v42 = vcombine.low %v7657_v32, %v7664_v17  ;;  %v7698_v25 = vrot.slane %v13129_v59, %v12085_v3  ;;  %v13600_v50 = vsub.s32 %v8748_v10, %v14767_v57  ;;  %v8762_v29 = vadd.s32 4294967200, %v13428_v52 }
 0x32d   : > { %8587 = vperm.xlu0 %9584, %v7784_v51   ;;  %v8832_v9 = vrot.slane %v8369_v36, %v13575_v38  ;;  %v8828_v51 = vsel %vm8732_vm6, %v8827_v35, %v8823_v58  ;;  %v13590_v27 = vpop.permute.xlu0 %8401  ;;  %v8769_v24 = vadd.s32 4294967192, %v13428_v52  ;;  %v8837_v32 = vrot.slane %v13467_v37, %v13580_v49  ;;  %v14778_v37 = vld [vmem:[#allocation34_spill] sm:$0xff] }
 0x32e   : > { %8560 = vperm.xlu1 %9585, %v7631_v34   ;;  %v13597_v34 = vsub.s32 %v8755_v19, %v14767_v57  ;;  %v8073_v19 = vcombine.low %v8065_v23, %v8072_v63  ;;  %v8082_v10 = vrot.slane %v13369_v39, %v12085_v3  ;;  %v8089_v58 = vrot.slane %v13377_v21, %v12085_v3 }
 0x32f   : > { %v8833_v46 = vsel %vm8739_vm7, %v8832_v9, %v8828_v51  ;;  %v7699_v9 = vcombine.low %v7691_v33, %v7698_v25  ;;  %v8783_v47 = vadd.s32 4294967176, %v13428_v52  ;;  %v13621_v23 = vsub.s32 %v8762_v29, %v14767_v57 }
 0x330   : > { %v8375_v17 = vpop.permute.xlu1 %8374  ;;  %v8838_v35 = vsel %vm8746_vm8, %v8837_v32, %v8833_v46  ;;  %v8776_v39 = vadd.s32 4294967184, %v13428_v52  ;;  %v13626_v63 = vsub.s32 %v8769_v24, %v14767_v57  ;;  %v8847_v33 = vrot.slane %v13497_v30, %v13597_v34 }
 0x331   : > { %8635 = vperm.xlu0 %9584, %v8056_v43   ;;  %v8842_v59 = vrot.slane %v8375_v17, %v13600_v50  ;;  %v13613_v36 = vpop.permute.xlu0 %8407  ;;  %v14777_v43 = vld [vmem:[#allocation37_spill] sm:$0xff]  ;;  %v8090_v32 = vcombine.low %v8082_v10, %v8089_v58  ;;  %v8099_v29 = vrot.slane %v13450_v41, %v12085_v3  ;;  %v8106_v52 = vrot.slane %v13452_v53, %v12085_v3 }
 0x332   : > { %8566 = vperm.xlu1 %9585, %v7665_v42   ;;  %v7725_v51 = vrot.slane %v14777_v43, %v12085_v3  ;;  %v7732_v42 = vrot.slane %v14778_v37, %v12085_v3  ;;  %v7766_v30 = vrot.slane %v13203_v31, %v12085_v3  ;;  %v14780_v10 = vrot.slane %v14766_v48, %v11303_v22 }
 0x333   : > { %v8843_v21 = vsel %vm8753_vm9, %v8842_v59, %v8838_v35  ;;  %v14781_v41 = vrot.slane %v14766_v48, %v11300_v18  ;;  %v13649_v53 = vsub.s32 %v8783_v47, %v14767_v57  ;;  %v8857_v31 = vrot.slane %v13521_v45, %v13626_v63 }
 0x334   : > { %v8381_v25 = vpop.permute.xlu1 %8380  ;;  %v8848_v17 = vsel %vm8760_vm10, %v8847_v33, %v8843_v21  ;;  %v7733_v59 = vcombine.low %v7725_v51, %v7732_v42  ;;  %v8116_v37 = vrot.slane %v13387_v2, %v12085_v3  ;;  %v8123_v48 = vrot.slane %v13434_v13, %v12085_v3  ;;  %v14782_v13 = vld [vmem:[#allocation25_spill] sm:$0xff] }
 0x335   : > { %8638 = vperm.xlu0 %9584, %v8073_v19   ;;  %v8852_v46 = vrot.slane %v8381_v25, %v13621_v23  ;;  %v13636_v24 = vpop.permute.xlu0 %8413  ;;  %v14779_v19 = vld [vmem:[#allocation31_spill] sm:$0xff]  ;;  %v8126_v58 = vcombine.low %v14781_v41, %v14780_v10  ;;  %v8031_v47 = vrot.slane %v13379_v28, %v12085_v3  ;;  %v8038_v2 = vrot.slane %v13381_v44, %v12085_v3 }
 0x336   : > { %8572 = vperm.xlu1 %9585, %v7699_v9   ;;  %v7759_v35 = vrot.slane %v14779_v19, %v12085_v3  ;;  %v13652_v9 = vsub.s32 %v8776_v39, %v14767_v57  ;;  %v8107_v57 = vcombine.low %v8099_v29, %v8106_v52  ;;  %v8867_v39 = vrot.slane %v13544_v14, %v13649_v53 }
 0x337   : > { %v8853_v43 = vsel %vm8767_vm11, %v8852_v46, %v8848_v17  ;;  %v5901_v25 = vrot.slane %v14782_v13, %v11287_v62  ;;  %v5908_v46 = vrot.slane %v14782_v13, %v11293_v60  ;;  %v5915_v14 = vrot.slane %v14782_v13, %v11300_v18 }
 0x338   : > { %v8387_v51 = vpop.permute.xlu1 %8386  ;;  %v8858_v45 = vsel %vm8774_vm12, %v8857_v31, %v8853_v43  ;;  %v7767_v33 = vcombine.low %v7759_v35, %v7766_v30  ;;  %v8124_v52 = vcombine.low %v8116_v37, %v8123_v48  ;;  %v8876_v17 = vrot.slane %v13567_v61, %v13490_v6 }
 0x339   : > { %8641 = vperm.xlu0 %9584, %v8090_v32   ;;  %v8862_v42 = vrot.slane %v8387_v51, %v13652_v9  ;;  %v13667_v21 = vpop.permute.xlu0 %8419  ;;  %v5922_v32 = vrot.slane %v14782_v13, %v11303_v22  ;;  %v8133_v19 = vrot.slane %v13503_v12, %v12085_v3  ;;  %v8140_v35 = vrot.slane %v8126_v58, %v12085_v3 }
 0x33a   : > { %8578 = vperm.xlu1 %9585, %v7733_v59   ;;  %v14783_v30 = vrot.slane %v14735_v26, %v11303_v22  ;;  %v14784_v10 = vrot.slane %v14735_v26, %v11300_v18  ;;  %v8039_v31 = vcombine.low %v8031_v47, %v8038_v2  ;;  %v7793_v61 = vrot.slane %v13219_v11, %v12085_v3 }
 0x33b   : > { %v8863_v28 = vsel %vm8781_vm13, %v8862_v42, %v8858_v45  ;;  %v7800_v51 = vrot.slane %v13221_v40, %v12085_v3  ;;  %v5523_v12 = vrot.slane %v14742_v5, %v11300_v18  ;;  %v5530_v58 = vrot.slane %v14742_v5, %v11303_v22 }
 0x33c   : > { %v13681_v29 = vsel %vm8788_vm14, %v8867_v39, %v8863_v28  ;;  %v8393_v44 = vpop.permute.xlu1 %8392  ;;  %v13695_v41 = vcombine.low %v14784_v10, %v14783_v30  ;;  %v14785_v26 = vrot.slane %v14742_v5, %v11293_v60  ;;  %v14786_v37 = vrot.slane %v14742_v5, %v11287_v62 }
 0x33d   : > { %8644 = vperm.xlu0 %9584, %v8107_v57   ;;  %v8872_v59 = vrot.slane %v8393_v44, %v13486_v15  ;;  %v13697_v43 = vpop.permute.xlu0 %8425  ;;  %v14787_v11 = vrot.slane %v14760_v55, %v11293_v60  ;;  %v14788_v40 = vrot.slane %v14760_v55, %v11287_v62  ;;  %v14789_v47 = vrot.slane %v14760_v55, %v11303_v22 }
 0x33e   : > { %8584 = vperm.xlu1 %9585, %v7767_v33   ;;  %v13713_v48 = vcombine.low %v14786_v37, %v14785_v26  ;;  %v14790_v39 = vrot.slane %v14760_v55, %v11300_v18  ;;  %v8159_v45 = vcombine.low %v5901_v25, %v5908_v46  ;;  %v8160_v33 = vcombine.low %v5915_v14, %v5922_v32  ;;  %v14791_v25 = vld [vmem:[#allocation36_spill] sm:$0xff]  ;;  %v14792_v14 = vld [vmem:[#allocation18_spill] sm:$0xff] }
 0x33f   : > { %v8877_v42 = vsel %vm8690_vm0, %v8876_v17, %v8872_v59  ;;  %v13722_v57 = vcombine.low %v14788_v40, %v14787_v11  ;;  %v8141_v28 = vcombine.low %v8133_v19, %v8140_v35  ;;  %v8150_v44 = vrot.slane %v13446_v1, %v12085_v3  ;;  %v14793_v19 = vld [vmem:[#allocation24_spill] sm:$0xff] }
 0x340   : > { %v13730_v5 = vcombine.low %v14790_v39, %v14789_v47  ;;  %v8399_v2 = vpop.permute.xlu1 %8398  ;;  %v8886_v17 = vrot.slane %v13590_v27, %v13510_v4  ;;  %v7801_v55 = vcombine.low %v7793_v61, %v7800_v51  ;;  %v7810_v46 = vrot.slane %v14791_v25, %v12085_v3 }
 0x341   : > { %8647 = vperm.xlu0 %9584, %v8124_v52   ;;  %v8881_v13 = vrot.slane %v8399_v2, %v13506_v8  ;;  %v8157_v52 = vrot.slane %v13448_v7, %v12085_v3  ;;  %v13739_v59 = vpop.permute.xlu0 %8431  ;;  %v7817_v32 = vrot.slane %v14792_v14, %v12085_v3  ;;  %v5985_v35 = vrot.slane %v14793_v19, %v11287_v62  ;;  %v14794_v7 = vld [vmem:[#allocation97_spill] sm:$0xff] }
 0x342   : > { %8632 = vperm.xlu1 %9585, %v8039_v31   ;;  %v5992_v1 = vrot.slane %v14793_v19, %v11293_v60  ;;  %v5957_v30 = vrot.slane %v14794_v7, %v11287_v62  ;;  %v5964_v10 = vrot.slane %v14794_v7, %v11293_v60  ;;  %v5971_v31 = vrot.slane %v14794_v7, %v11300_v18 }
 0x343   : > { %v8882_v27 = vsel %vm8697_vm1, %v8881_v13, %v8877_v42  ;;  %v5978_v61 = vrot.slane %v14794_v7, %v11303_v22  ;;  %v8158_v11 = vcombine.low %v8150_v44, %v8157_v52  ;;  %v8167_v40 = vrot.slane %v8159_v45, %v12085_v3  ;;  %v14796_v7 = vld [vmem:[#allocation20_spill] sm:$0xff] }
 0x344   : > { %v8405_v51 = vpop.permute.xlu1 %8404  ;;  %v8887_v26 = vsel %vm8704_vm2, %v8886_v17, %v8882_v27  ;;  %v8174_v42 = vrot.slane %v8160_v33, %v12085_v3  ;;  %v8896_v47 = vrot.slane %v13613_v36, %v13533_v20  ;;  %v7818_v2 = vcombine.low %v7810_v46, %v7817_v32  ;;  %v14797_v27 = vld [vmem:[#allocation43_spill] sm:$0xff] }
 0x345   : > { %8650 = vperm.xlu0 %9584, %v8141_v28   ;;  %v8891_v37 = vrot.slane %v8405_v51, %v13528_v16  ;;  %v13764_v39 = vpop.permute.xlu0 %8437  ;;  %v7827_v13 = vrot.slane %v13231_v0, %v12085_v3  ;;  %v14795_v28 = vld [vmem:[#allocation49_spill] sm:$0xff]  ;;  %v5999_v44 = vrot.slane %v14793_v19, %v11300_v18  ;;  %v6006_v45 = vrot.slane %v14793_v19, %v11303_v22 }
 0x346   : > { %8590 = vperm.xlu1 %9585, %v7801_v55   ;;  %v7834_v17 = vrot.slane %v14795_v28, %v12085_v3  ;;  %v13770_v55 = vcombine.low %v5523_v12, %v5530_v58  ;;  %v13777_v36 = vcombine.low %v5985_v35, %v5992_v1  ;;  %v8193_v52 = vcombine.low %v5957_v30, %v5964_v10 }
 0x347   : > { %v8892_v33 = vsel %vm8711_vm3, %v8891_v37, %v8887_v26  ;;  %v8194_v25 = vcombine.low %v5971_v31, %v5978_v61  ;;  %v8175_v58 = vcombine.low %v8167_v40, %v8174_v42  ;;  %v8184_v14 = vrot.slane %v13722_v57, %v12085_v3  ;;  %v14798_v61 = vld [vmem:[#allocation104_spill] sm:$0xff]  ;;  %v14799_v57 = vld [vmem:[#allocation27_spill] sm:$0xff] }
 0x348   : > { %v8411_v46 = vpop.permute.xlu1 %8410  ;;  %v8897_v0 = vsel %vm8718_vm4, %v8896_v47, %v8892_v33  ;;  %v8191_v32 = vrot.slane %v13730_v5, %v12085_v3  ;;  %v8906_v19 = vrot.slane %v13636_v24, %v13557_v56  ;;  %v7835_v1 = vcombine.low %v7827_v13, %v7834_v17  ;;  %v14800_v33 = vld [vmem:[#allocation51_spill] sm:$0xff] }
 0x349   : > { %8653 = vperm.xlu0 %9584, %v8158_v11   ;;  %v8901_v12 = vrot.slane %v8411_v46, %v13552_v54  ;;  %v13787_v35 = vpop.permute.xlu0 %8443  ;;  %v7844_v30 = vrot.slane %v14796_v7, %v12085_v3  ;;  %v7851_v10 = vrot.slane %v14797_v27, %v12085_v3  ;;  %v8211_v31 = vcombine.low %v5999_v44, %v6006_v45 }
 0x34a   : > { %8593 = vperm.xlu1 %9585, %v7818_v2   ;;  %v6041_v51 = vrot.slane %v14798_v61, %v11287_v62  ;;  %v6013_v26 = vrot.slane %v14799_v57, %v11287_v62  ;;  %v6020_v24 = vrot.slane %v14799_v57, %v11293_v60  ;;  %v6027_v37 = vrot.slane %v14799_v57, %v11300_v18 }
 0x34b   : > { %v8902_v5 = vsel %vm8725_vm5, %v8901_v12, %v8897_v0  ;;  %v6034_v11 = vrot.slane %v14799_v57, %v11303_v22  ;;  %v8192_v2 = vcombine.low %v8184_v14, %v8191_v32  ;;  %v8201_v13 = vrot.slane %v8193_v52, %v12085_v3  ;;  %v14801_v0 = vld [vmem:[#allocation42_spill] sm:$0xff]  ;;  %v14802_v14 = vld [vmem:[#allocation89_spill] sm:$0xff] }
 0x34c   : > { %v8417_v40 = vpop.permute.xlu1 %8416  ;;  %v8907_v42 = vsel %vm8732_vm6, %v8906_v19, %v8902_v5  ;;  %v8208_v28 = vrot.slane %v8194_v25, %v12085_v3  ;;  %v8916_v17 = vrot.slane %v13667_v21, %v13580_v49  ;;  %v7852_v45 = vcombine.low %v7844_v30, %v7851_v10 }
 0x34d   : > { %8656 = vperm.xlu0 %9584, %v8175_v58   ;;  %v8911_v47 = vrot.slane %v8417_v40, %v13575_v38  ;;  %v13810_v44 = vpop.permute.xlu0 %8449  ;;  %v7861_v46 = vrot.slane %v14800_v33, %v12085_v3  ;;  %v7868_v12 = vrot.slane %v14801_v0, %v12085_v3  ;;  %v6048_v58 = vrot.slane %v14798_v61, %v11293_v60 }
 0x34e   : > { %8596 = vperm.xlu1 %9585, %v7835_v1   ;;  %v6055_v52 = vrot.slane %v14798_v61, %v11300_v18  ;;  %v6062_v25 = vrot.slane %v14798_v61, %v11303_v22  ;;  %v5565_v32 = vrot.slane %v14802_v14, %v11287_v62  ;;  %v8227_v19 = vcombine.low %v6013_v26, %v6020_v24  ;;  %v14803_v26 = vld [vmem:[#allocation46_spill] sm:$0xff] }
 0x34f   : > { %v8912_v21 = vsel %vm8739_vm7, %v8911_v47, %v8907_v42  ;;  %v8228_v1 = vcombine.low %v6027_v37, %v6034_v11  ;;  %v8209_v10 = vcombine.low %v8201_v13, %v8208_v28  ;;  %v8218_v57 = vrot.slane %v13777_v36, %v12085_v3  ;;  %v14804_v37 = vld [vmem:[#allocation45_spill] sm:$0xff] }
 0x350   : > { %v8423_v7 = vpop.permute.xlu1 %8422  ;;  %v8917_v30 = vsel %vm8746_vm8, %v8916_v17, %v8912_v21  ;;  %v8225_v61 = vrot.slane %v8211_v31, %v12085_v3  ;;  %v8926_v5 = vrot.slane %v13697_v43, %v13597_v34  ;;  %v7869_v42 = vcombine.low %v7861_v46, %v7868_v12  ;;  %v14805_v13 = vld [vmem:[#allocation17_spill] sm:$0xff]  ;;  %v14806_v21 = vld [vmem:[#allocation47_spill] sm:$0xff] }
 0x351   : > { %8659 = vperm.xlu0 %9584, %v8192_v2   ;;  %v8921_v27 = vrot.slane %v8423_v7, %v13600_v50  ;;  %v13832_v40 = vpop.permute.xlu0 %8455  ;;  %v7878_v24 = vrot.slane %v14803_v26, %v12085_v3  ;;  %v7885_v11 = vrot.slane %v14804_v37, %v12085_v3  ;;  %v8244_v47 = vcombine.low %v6041_v51, %v6048_v58 }
 0x352   : > { %8599 = vperm.xlu1 %9585, %v7852_v45   ;;  %v8245_v2 = vcombine.low %v6055_v52, %v6062_v25  ;;  %v6069_v28 = vrot.slane %v14805_v13, %v11287_v62  ;;  %v6076_v43 = vrot.slane %v14805_v13, %v11293_v60  ;;  %v6083_v31 = vrot.slane %v14805_v13, %v11300_v18 }
 0x353   : > { %v8922_v36 = vsel %vm8753_vm9, %v8921_v27, %v8917_v30  ;;  %v6090_v17 = vrot.slane %v14805_v13, %v11303_v22  ;;  %v8226_v46 = vcombine.low %v8218_v57, %v8225_v61  ;;  %v8235_v0 = vrot.slane %v8227_v19, %v12085_v3  ;;  %v14807_v27 = vld [vmem:[#allocation16_spill] sm:$0xff] }
 0x354   : > { %v8429_v45 = vpop.permute.xlu1 %8428  ;;  %v8927_v33 = vsel %vm8760_vm10, %v8926_v5, %v8922_v36  ;;  %v8242_v12 = vrot.slane %v8228_v1, %v12085_v3  ;;  %v8936_v58 = vrot.slane %v13739_v59, %v13626_v63  ;;  %v7886_v25 = vcombine.low %v7878_v24, %v7885_v11 }
 0x355   : > { %8662 = vperm.xlu0 %9584, %v8209_v10   ;;  %v8931_v51 = vrot.slane %v8429_v45, %v13621_v23  ;;  %v13853_v52 = vpop.permute.xlu0 %8461  ;;  %v7895_v7 = vrot.slane %v14806_v21, %v12085_v3  ;;  %v7902_v30 = vrot.slane %v13695_v41, %v12085_v3  ;;  %v6097_v10 = vrot.slane %v14807_v27, %v11287_v62 }
 0x356   : > { %8602 = vperm.xlu1 %9585, %v7869_v42   ;;  %v6104_v19 = vrot.slane %v14807_v27, %v11293_v60  ;;  %v6111_v1 = vrot.slane %v14807_v27, %v11300_v18  ;;  %v6118_v57 = vrot.slane %v14807_v27, %v11303_v22  ;;  %v8252_v41 = vrot.slane %v8244_v47, %v12085_v3  ;;  %v14810_v27 = vld [vmem:[#allocation70_spill] sm:$0xff] }
 0x357   : > { %v8932_v59 = vsel %vm8767_vm11, %v8931_v51, %v8927_v33  ;;  %v8259_v42 = vrot.slane %v8245_v2, %v12085_v3  ;;  %v8261_v26 = vcombine.low %v6069_v28, %v6076_v43  ;;  %v8262_v24 = vcombine.low %v6083_v31, %v6090_v17  ;;  %v14808_v33 = vld [vmem:[#allocation48_spill] sm:$0xff] }
 0x358   : > { %v8435_v61 = vpop.permute.xlu1 %8434  ;;  %v8937_v5 = vsel %vm8774_vm12, %v8936_v58, %v8932_v59  ;;  %v8243_v11 = vcombine.low %v8235_v0, %v8242_v12  ;;  %v8946_v13 = vrot.slane %v13764_v39, %v13649_v53  ;;  %v7903_v45 = vcombine.low %v7895_v7, %v7902_v30 }
 0x359   : > { %8665 = vperm.xlu0 %9584, %v8226_v46   ;;  %v8941_v37 = vrot.slane %v8435_v61, %v13652_v9  ;;  %v13874_v36 = vpop.permute.xlu0 %8467  ;;  %v7912_v51 = vrot.slane %v14808_v33, %v12085_v3  ;;  %v14809_v46 = vld [vmem:[#allocation55_spill] sm:$0xff]  ;;  %v5572_v47 = vrot.slane %v14802_v14, %v11293_v60  ;;  %v5579_v2 = vrot.slane %v14802_v14, %v11300_v18 }
 0x35a   : > { %8605 = vperm.xlu1 %9585, %v7886_v25   ;;  %v7919_v58 = vrot.slane %v14809_v46, %v12085_v3  ;;  %v5586_v28 = vrot.slane %v14802_v14, %v11303_v22  ;;  %v8278_v43 = vcombine.low %v6097_v10, %v6104_v19  ;;  %v8279_v31 = vcombine.low %v6111_v1, %v6118_v57 }
 0x35b   : > { %v8942_v39 = vsel %vm8781_vm13, %v8941_v37, %v8937_v5  ;;  %v8260_v12 = vcombine.low %v8252_v41, %v8259_v42  ;;  %v8955_v25 = vrot.slane %v13787_v35, %v13490_v6  ;;  %v8269_v7 = vrot.slane %v8261_v26, %v12085_v3  ;;  %v14813_v5 = vld [vmem:[#allocation84_spill] sm:$0xff] }
 0x35c   : > { %v13888_v17 = vsel %vm8788_vm14, %v8946_v13, %v8942_v39  ;;  %v8441_v0 = vpop.permute.xlu1 %8440  ;;  %v8276_v30 = vrot.slane %v8262_v24, %v12085_v3  ;;  %v14811_v59 = vrot.slane %v14810_v27, %v11303_v22  ;;  %v14812_v10 = vrot.slane %v14810_v27, %v11300_v18 }
 0x35d   : > { %8668 = vperm.xlu0 %9584, %v8243_v11   ;;  %v8951_v21 = vrot.slane %v8441_v0, %v13486_v15  ;;  %v13901_v1 = vpop.permute.xlu0 %8473  ;;  %v7920_v57 = vcombine.low %v7912_v51, %v7919_v58  ;;  %v7929_v61 = vrot.slane %v13713_v48, %v12085_v3  ;;  %v7936_v35 = vrot.slane %v13770_v55, %v12085_v3  ;;  %v14814_v0 = vld [vmem:[#allocation23_spill] sm:$0xff] }
 0x35e   : > { %8608 = vperm.xlu1 %9585, %v7903_v45   ;;  %v7939_v19 = vcombine.low %v14812_v10, %v14811_v59  ;;  %v5593_v41 = vrot.slane %v14813_v5, %v11287_v62  ;;  %v5600_v42 = vrot.slane %v14813_v5, %v11293_v60  ;;  %v5607_v24 = vrot.slane %v14813_v5, %v11300_v18 }
 0x35f   : > { %v8956_v26 = vsel %vm8690_vm0, %v8955_v25, %v8951_v21  ;;  %v5614_v37 = vrot.slane %v14813_v5, %v11303_v22  ;;  %v7955_v48 = vcombine.low %v5565_v32, %v5572_v47  ;;  %v7956_v55 = vcombine.low %v5579_v2, %v5586_v28  ;;  %v14816_v5 = vld [vmem:[#allocation75_spill] sm:$0xff] }
 0x360   : > { %v8447_v11 = vpop.permute.xlu1 %8446  ;;  %v8277_v45 = vcombine.low %v8269_v7, %v8276_v30  ;;  %v8286_v33 = vrot.slane %v8278_v43, %v12085_v3  ;;  %v8293_v51 = vrot.slane %v8279_v31, %v12085_v3  ;;  %v8965_v46 = vrot.slane %v13810_v44, %v13510_v4  ;;  %v14815_v43 = vld [vmem:[#allocation92_spill] sm:$0xff] }
 0x361   : > { %8671 = vperm.xlu0 %9584, %v8260_v12   ;;  %v8960_v13 = vrot.slane %v8447_v11, %v13506_v8  ;;  %v13924_v58 = vpop.permute.xlu0 %8479  ;;  %v7937_v39 = vcombine.low %v7929_v61, %v7936_v35  ;;  %v7946_v14 = vrot.slane %v14814_v0, %v12085_v3  ;;  %v7953_v32 = vrot.slane %v7939_v19, %v12085_v3 }
 0x362   : > { %8611 = vperm.xlu1 %9585, %v7920_v57   ;;  %v7972_v47 = vcombine.low %v5593_v41, %v5600_v42  ;;  %v7973_v28 = vcombine.low %v5607_v24, %v5614_v37  ;;  %v5621_v12 = vrot.slane %v14815_v43, %v11287_v62  ;;  %v5628_v31 = vrot.slane %v14815_v43, %v11293_v60 }
 0x363   : > { %v8961_v2 = vsel %vm8697_vm1, %v8960_v13, %v8956_v26  ;;  %v5635_v21 = vrot.slane %v14815_v43, %v11300_v18  ;;  %v5642_v7 = vrot.slane %v14815_v43, %v11303_v22  ;;  %v8294_v27 = vcombine.low %v8286_v33, %v8293_v51 }
 0x364   : > { %v8453_v44 = vpop.permute.xlu1 %8452  ;;  %v8966_v25 = vsel %vm8704_vm2, %v8965_v46, %v8961_v2  ;;  %v8975_v59 = vrot.slane %v13832_v40, %v13533_v20  ;;  %v7954_v19 = vcombine.low %v7946_v14, %v7953_v32  ;;  %v7963_v57 = vrot.slane %v7955_v48, %v12085_v3 }
 0x365   : > { %8674 = vperm.xlu0 %9584, %v8277_v45   ;;  %v8970_v30 = vrot.slane %v8453_v44, %v13528_v16  ;;  %v8486_v10 = vpop.permute.xlu0 %8485  ;;  %v7970_v61 = vrot.slane %v7956_v55, %v12085_v3  ;;  %v5649_v41 = vrot.slane %v14816_v5, %v11287_v62  ;;  %v5656_v42 = vrot.slane %v14816_v5, %v11293_v60 }
 0x366   : > { %8614 = vperm.xlu1 %9585, %v7937_v39   ;;  %v5663_v26 = vrot.slane %v14816_v5, %v11300_v18  ;;  %v5670_v37 = vrot.slane %v14816_v5, %v11303_v22  ;;  %v7989_v48 = vcombine.low %v5621_v12, %v5628_v31  ;;  %v7990_v55 = vcombine.low %v5635_v21, %v5642_v7 }
 0x367   : > { %v8971_v35 = vsel %vm8711_vm3, %v8970_v30, %v8966_v25  ;;  %v8985_v62 = vrot.slane %v13853_v52, %v13557_v56  ;;  %v7971_v45 = vcombine.low %v7963_v57, %v7970_v61  ;;  %v7980_v60 = vrot.slane %v7972_v47, %v12085_v3 }
 0x368   : > { %v8459_v24 = vpop.permute.xlu1 %8458  ;;  %v8976_v40 = vsel %vm8718_vm4, %v8975_v59, %v8971_v35  ;;  %v7987_v18 = vrot.slane %v7973_v28, %v12085_v3  ;;  %v8006_v22 = vcombine.low %v5649_v41, %v5656_v42  ;;  %v8007_v39 = vcombine.low %v5663_v26, %v5670_v37 }
 0x369   : > { %8677 = vperm.xlu0 %9584, %v8294_v27   ;;  %v8980_v11 = vrot.slane %v8459_v24, %v13552_v54  ;;  %v8492_v13 = vpop.permute.xlu0 %8491  ;;  %v8995_v14 = vrot.slane %v13874_v36, %v13580_v49  ;;  %v7997_v2 = vrot.slane %v7989_v48, %v12085_v3  ;;  %v8004_v47 = vrot.slane %v7990_v55, %v12085_v3 }
 0x36a   : > { %8617 = vperm.xlu1 %9585, %v7954_v19   ;;  %v7988_v32 = vcombine.low %v7980_v60, %v7987_v18  ;;  %v9005_v44 = vrot.slane %v13901_v1, %v13597_v34  ;;  %v8014_v36 = vrot.slane %v8006_v22, %v12085_v3  ;;  %v8021_v7 = vrot.slane %v8007_v39, %v12085_v3 }
 0x36b   : > { %v8981_v33 = vsel %vm8725_vm5, %v8980_v11, %v8976_v40  ;;  %v8005_v21 = vcombine.low %v7997_v2, %v8004_v47  ;;  %v9015_v57 = vrot.slane %v13924_v58, %v13626_v63  ;;  %v9025_v26 = vrot.slane %v8486_v10, %v13649_v53 }
 0x36c   : > { %v8465_v51 = vpop.permute.xlu1 %8464  ;;  %v8986_v46 = vsel %vm8732_vm6, %v8985_v62, %v8981_v33  ;;  %v8022_v35 = vcombine.low %v8014_v36, %v8021_v7  ;;  %v9034_v58 = vrot.slane %v8492_v13, %v13490_v6 }
 0x36d   : > { %v8990_v0 = vrot.slane %v8465_v51, %v13575_v38 }
 0x36e   : > { %8620 = vperm.xlu1 %9585, %v7971_v45   ;;  %v8498_v52 = vpop.permute.xlu0 %8497 }
 0x36f   : > { %v8991_v28 = vsel %vm8739_vm7, %v8990_v0, %v8986_v46  ;;  %v9044_v18 = vrot.slane %v8498_v52, %v13510_v4 }
 0x370   : > { %v8471_v43 = vpop.permute.xlu1 %8470  ;;  %v8996_v12 = vsel %vm8746_vm8, %v8995_v14, %v8991_v28 }
 0x371   : > { %v9000_v31 = vrot.slane %v8471_v43, %v13600_v50 }
 0x372   : > { %8623 = vperm.xlu1 %9585, %v7988_v32  }
 0x373   : > { %v8504_v25 = vpop.permute.xlu0 %8503  ;;  %v9001_v30 = vsel %vm8753_vm9, %v9000_v31, %v8996_v12 }
 0x374   : > { %v8477_v27 = vpop.permute.xlu1 %8476  ;;  %v9006_v59 = vsel %vm8760_vm10, %v9005_v44, %v9001_v30  ;;  %v9054_v13 = vrot.slane %v8504_v25, %v13533_v20 }
 0x375   : > { %v9010_v19 = vrot.slane %v8477_v27, %v13621_v23 }
 0x376   : > { %8626 = vperm.xlu1 %9585, %v8005_v21  }
 0x377   : > { %v8510_v61 = vpop.permute.xlu0 %8509  ;;  %v9011_v1 = vsel %vm8767_vm11, %v9010_v19, %v9006_v59 }
 0x378   : > { %v8483_v5 = vpop.permute.xlu1 %8482  ;;  %v9016_v41 = vsel %vm8774_vm12, %v9015_v57, %v9011_v1  ;;  %v9064_v52 = vrot.slane %v8510_v61, %v13557_v56 }
 0x379   : > { %v9020_v42 = vrot.slane %v8483_v5, %v13652_v9 }
 0x37a   : > { %8629 = vperm.xlu1 %9585, %v8022_v35  }
 0x37b   : > { %v8516_v24 = vpop.permute.xlu0 %8515  ;;  %v9021_v40 = vsel %vm8781_vm13, %v9020_v42, %v9016_v41 }
 0x37c   : > { %v13984_v37 = vsel %vm8788_vm14, %v9025_v26, %v9021_v40  ;;  %v8489_v48 = vpop.permute.xlu1 %8488  ;;  %v9074_v44 = vrot.slane %v8516_v24, %v13580_v49 }
 0x37d   : > { %v9030_v55 = vrot.slane %v8489_v48, %v13486_v15 }
 0x37f   : > { %v8522_v11 = vpop.permute.xlu0 %8521  ;;  %v9035_v62 = vsel %vm8690_vm0, %v9034_v58, %v9030_v55 }
 0x380   : > { %v9084_v27 = vrot.slane %v8522_v11, %v13597_v34 }
 0x381   : > { %v8495_v45 = vpop.permute.xlu1 %8494 }
 0x382   : > { %v9039_v60 = vrot.slane %v8495_v45, %v13506_v8 }
 0x384   : > { %v8528_v10 = vpop.permute.xlu0 %8527  ;;  %v9040_v33 = vsel %vm8697_vm1, %v9039_v60, %v9035_v62 }
 0x385   : > { %v8501_v51 = vpop.permute.xlu1 %8500  ;;  %v9045_v46 = vsel %vm8704_vm2, %v9044_v18, %v9040_v33  ;;  %v9094_v1 = vrot.slane %v8528_v10, %v13626_v63  ;;  %v14817_v10 = vld [vmem:[#allocation32_spill] sm:$0xff] }
 0x386   : > { %v9049_v22 = vrot.slane %v8501_v51, %v13528_v16  ;;  %v8684_v33 = vrot.slane %v14817_v10, %v13486_v15 }
 0x388   : > { %v8534_v39 = vpop.permute.xlu0 %8533  ;;  %v9050_v0 = vsel %vm8711_vm3, %v9049_v22, %v9045_v46  ;;  %v14818_v22 = vld [vmem:[#allocation39_spill] sm:$0xff] }
 0x389   : > { %v8507_v14 = vpop.permute.xlu1 %8506  ;;  %v9055_v32 = vsel %vm8718_vm4, %v9054_v13, %v9050_v0  ;;  %v9104_v40 = vrot.slane %v8534_v39, %v13649_v53  ;;  %v8689_v13 = vrot.slane %v14818_v22, %v13490_v6 }
 0x38a   : > { %v9059_v2 = vrot.slane %v8507_v14, %v13552_v54  ;;  %v14819_v14 = vld [vmem:[#allocation15_spill] sm:$0xff] }
 0x38c   : > { %v8540_v47 = vpop.permute.xlu0 %8539  ;;  %v9060_v28 = vsel %vm8725_vm5, %v9059_v2, %v9055_v32  ;;  %v8696_v32 = vrot.slane %v14819_v14, %v13506_v8 }
 0x38d   : > { %v8513_v43 = vpop.permute.xlu1 %8512  ;;  %v9065_v12 = vsel %vm8732_vm6, %v9064_v52, %v9060_v28  ;;  %v9113_v62 = vrot.slane %v8540_v47, %v13490_v6  ;;  %v8691_v52 = vsel %vm8690_vm0, %v8689_v13, %v8684_v33  ;;  %v14820_v47 = vld [vmem:[#allocation44_spill] sm:$0xff] }
 0x38e   : > { %v9069_v31 = vrot.slane %v8513_v43, %v13575_v38  ;;  %v8703_v28 = vrot.slane %v14820_v47, %v13510_v4  ;;  %v14826_v13 = vld [vmem:[#allocation56_spill] sm:$0xff] }
 0x390   : > { %v8546_v25 = vpop.permute.xlu0 %8545  ;;  %v9070_v21 = vsel %vm8739_vm7, %v9069_v31, %v9065_v12  ;;  %v14821_v31 = vld [vmem:[#allocation41_spill] sm:$0xff] }
 0x391   : > { %v8519_v36 = vpop.permute.xlu1 %8518  ;;  %v9075_v7 = vsel %vm8746_vm8, %v9074_v44, %v9070_v21  ;;  %v9123_v39 = vrot.slane %v8546_v25, %v13510_v4  ;;  %v8710_v44 = vrot.slane %v14821_v31, %v13528_v16  ;;  %v14822_v25 = vld [vmem:[#allocation38_spill] sm:$0xff] }
 0x392   : > { %v9079_v30 = vrot.slane %v8519_v36, %v13600_v50  ;;  %v8717_v36 = vrot.slane %v14822_v25, %v13533_v20 }
 0x394   : > { %v8552_v59 = vpop.permute.xlu0 %8551  ;;  %v9080_v19 = vsel %vm8753_vm9, %v9079_v30, %v9075_v7 }
 0x395   : > { %v8525_v57 = vpop.permute.xlu1 %8524  ;;  %v9085_v61 = vsel %vm8760_vm10, %v9084_v27, %v9080_v19  ;;  %v9133_v7 = vrot.slane %v8552_v59, %v13533_v20  ;;  %v8698_v27 = vsel %vm8697_vm1, %v8696_v32, %v8691_v52  ;;  %v14823_v19 = vld [vmem:[#allocation30_spill] sm:$0xff] }
 0x396   : > { %v9089_v35 = vrot.slane %v8525_v57, %v13621_v23  ;;  %v8724_v57 = vrot.slane %v14823_v19, %v13552_v54  ;;  %v14825_v59 = vld [vmem:[#allocation54_spill] sm:$0xff] }
 0x398   : > { %v8558_v5 = vpop.permute.xlu0 %8557  ;;  %v9090_v41 = vsel %vm8767_vm11, %v9089_v35, %v9085_v61  ;;  %v8705_v35 = vsel %vm8704_vm2, %v8703_v28, %v8698_v27 }
 0x399   : > { %v8531_v42 = vpop.permute.xlu1 %8530  ;;  %v9095_v26 = vsel %vm8774_vm12, %v9094_v1, %v9090_v41  ;;  %v14824_v1 = vld [vmem:[#allocation58_spill] sm:$0xff] }
 0x39a   : > { %v9099_v24 = vrot.slane %v8531_v42, %v13652_v9  ;;  %v8731_v41 = vrot.slane %v14824_v1, %v13557_v56 }
 0x39c   : > { %v8564_v48 = vpop.permute.xlu0 %8563  ;;  %v9100_v58 = vsel %vm8781_vm13, %v9099_v24, %v9095_v26  ;;  %v8712_v24 = vsel %vm8711_vm3, %v8710_v44, %v8705_v35  ;;  %v14828_v44 = vld [vmem:[#allocation53_spill] sm:$0xff] }
 0x39d   : > { %v14017_v55 = vsel %vm8788_vm14, %v9104_v40, %v9100_v58  ;;  %v8537_v11 = vpop.permute.xlu1 %8536  ;;  %v8738_v40 = vrot.slane %v14825_v59, %v13575_v38 }
 0x39e   : > { %v9109_v45 = vrot.slane %v8537_v11, %v13486_v15  ;;  %v8719_v11 = vsel %vm8718_vm4, %v8717_v36, %v8712_v24  ;;  %v14829_v36 = vld [vmem:[#allocation22_spill] sm:$0xff]  ;;  %v14831_v24 = vld [vmem:[#allocation40_spill] sm:$0xff] }
 0x39f   : > { %v8773_v59 = vrot.slane %v14831_v24, %v13626_v63 }
 0x3a0   : > { %v8570_v60 = vpop.permute.xlu0 %8569  ;;  %v9114_v18 = vsel %vm8690_vm0, %v9113_v62, %v9109_v45  ;;  %v9143_v62 = vrot.slane %v8558_v5, %v13557_v56  ;;  %v14827_v5 = vld [vmem:[#allocation19_spill] sm:$0xff] }
 0x3a1   : > { %v8543_v51 = vpop.permute.xlu1 %8542  ;;  %v8745_v32 = vrot.slane %v14827_v5, %v13580_v49 }
 0x3a2   : > { %v9118_v46 = vrot.slane %v8543_v51, %v13506_v8 }
 0x3a4   : > { %v8576_v0 = vpop.permute.xlu0 %8575  ;;  %v9119_v2 = vsel %vm8697_vm1, %v9118_v46, %v9114_v18  ;;  %v8726_v18 = vsel %vm8725_vm5, %v8724_v57, %v8719_v11 }
 0x3a5   : > { %v8549_v43 = vpop.permute.xlu1 %8548  ;;  %v9124_v12 = vsel %vm8704_vm2, %v9123_v39, %v9119_v2  ;;  %v8733_v33 = vsel %vm8732_vm6, %v8731_v41, %v8726_v18  ;;  %v8752_v39 = vrot.slane %v14826_v13, %v13600_v50  ;;  %v9153_v2 = vrot.slane %v8564_v48, %v13580_v49  ;;  %v14830_v41 = vld [vmem:[#allocation50_spill] sm:$0xff] }
 0x3a6   : > { %v9128_v21 = vrot.slane %v8549_v43, %v13528_v16  ;;  %v8740_v22 = vsel %vm8739_vm7, %v8738_v40, %v8733_v33  ;;  %v9163_v48 = vrot.slane %v8570_v60, %v13597_v34  ;;  %v9173_v60 = vrot.slane %v8576_v0, %v13626_v63 }
 0x3a7   : > { %v8747_v28 = vsel %vm8746_vm8, %v8745_v32, %v8740_v22 }
 0x3a8   : > { %v8582_v30 = vpop.permute.xlu0 %8581  ;;  %v9129_v61 = vsel %vm8711_vm3, %v9128_v21, %v9124_v12  ;;  %v8754_v31 = vsel %vm8753_vm9, %v8752_v39, %v8747_v28  ;;  %v8766_v21 = vrot.slane %v14828_v44, %v13621_v23 }
 0x3a9   : > { %v8555_v42 = vpop.permute.xlu1 %8554  ;;  %v9134_v26 = vsel %vm8718_vm4, %v9133_v7, %v9129_v61  ;;  %v8759_v7 = vrot.slane %v14829_v36, %v13597_v34  ;;  %v9183_v22 = vrot.slane %v8582_v30, %v13649_v53 }
 0x3aa   : > { %v9138_v58 = vrot.slane %v8555_v42, %v13552_v54  ;;  %v8780_v42 = vrot.slane %v14830_v41, %v13652_v9 }
 0x3ab   : > { %v8761_v57 = vsel %vm8760_vm10, %v8759_v7, %v8754_v31 }
 0x3ac   : > { %v14055_v45 = vpop.permute.xlu0 %8587  ;;  %v9139_v10 = vsel %vm8725_vm5, %v9138_v58, %v9134_v26  ;;  %v8768_v1 = vsel %vm8767_vm11, %v8766_v21, %v8761_v57 }
 0x3ad   : > { %v8561_v51 = vpop.permute.xlu1 %8560  ;;  %v9144_v46 = vsel %vm8732_vm6, %v9143_v62, %v9139_v10  ;;  %v8775_v11 = vsel %vm8774_vm12, %v8773_v59, %v8768_v1 }
 0x3ae   : > { %v9148_v14 = vrot.slane %v8561_v51, %v13575_v38  ;;  %v8782_v10 = vsel %vm8781_vm13, %v8780_v42, %v8775_v11  ;;  %v14832_v51 = vld [vmem:[#allocation28_spill] sm:$0xff] }
 0x3b0   : > { %v8636_v52 = vpop.permute.xlu0 %8635  ;;  %v9149_v47 = vsel %vm8739_vm7, %v9148_v14, %v9144_v46  ;;  %v8787_v46 = vrot.slane %v14832_v51, %v13649_v53 }
 0x3b1   : > { %v8567_v43 = vpop.permute.xlu1 %8566  ;;  %v9154_v12 = vsel %vm8746_vm8, %v9153_v2, %v9149_v47 }
 0x3b2   : > { %v9158_v25 = vrot.slane %v8567_v43, %v13600_v50  ;;  %v8789_v39 = vsel %vm8788_vm14, %v8787_v46, %v8782_v10 }
 0x3b3   : > { %v14101_v32 = vsel %vm9343_vm15, %v14017_v55, %v8789_v39 }
 0x3b4   : > { %v8639_v27 = vpop.permute.xlu0 %8638  ;;  %v9159_v19 = vsel %vm8753_vm9, %v9158_v25, %v9154_v12 }
 0x3b5   : > { %v8573_v61 = vpop.permute.xlu1 %8572  ;;  %v9164_v35 = vsel %vm8760_vm10, %v9163_v48, %v9159_v19  ;;  %v9276_v41 = vrot.slane %v8639_v27, %v13506_v8 }
 0x3b6   : > { %v9168_v26 = vrot.slane %v8573_v61, %v13621_v23  ;;  %v9271_v61 = vrot.slane %v8636_v52, %v13490_v6 }
 0x3b8   : > { %v8642_v40 = vpop.permute.xlu0 %8641  ;;  %v9169_v58 = vsel %vm8767_vm11, %v9168_v26, %v9164_v35 }
 0x3b9   : > { %v8579_v62 = vpop.permute.xlu1 %8578  ;;  %v9174_v18 = vsel %vm8774_vm12, %v9173_v60, %v9169_v58  ;;  %v9281_v59 = vrot.slane %v8642_v40, %v13510_v4  ;;  %v9192_v40 = vrot.slane %v14055_v45, %v13490_v6 }
 0x3ba   : > { %v9178_v33 = vrot.slane %v8579_v62, %v13652_v9 }
 0x3bc   : > { %v8645_v13 = vpop.permute.xlu0 %8644  ;;  %v9179_v0 = vsel %vm8781_vm13, %v9178_v33, %v9174_v18 }
 0x3bd   : > { %v9184_v14 = vsel %vm8788_vm14, %v9183_v22, %v9179_v0  ;;  %v8585_v5 = vpop.permute.xlu1 %8584  ;;  %v9286_v58 = vrot.slane %v8645_v13, %v13528_v16 }
 0x3be   : > { %v14105_v2 = vsel %vm9343_vm15, %v9184_v14, %v13681_v29  ;;  %v9188_v33 = vrot.slane %v8585_v5, %v13486_v15 }
 0x3bf   : > { %v9348_v47 = vcombine.low %v14101_v32, %v14105_v2 }
 0x3c0   : > { %v8648_v30 = vpop.permute.xlu0 %8647 }
 0x3c1   : > { %v8633_v28 = vpop.permute.xlu1 %8632  ;;  %v9291_v52 = vrot.slane %v8648_v30, %v13533_v20  ;;  %v9193_v30 = vsel %vm8690_vm0, %v9192_v40, %v9188_v33  ;;  %v9356_v40 = vrot.slane %v9348_v47, %v12085_v3 }
 0x3c2   : > { %v9267_v57 = vrot.slane %v8633_v28, %v13486_v15 }
 0x3c4   : > { %v8651_v43 = vpop.permute.xlu0 %8650  ;;  %v9272_v1 = vsel %vm8690_vm0, %v9271_v61, %v9267_v57 }
 0x3c5   : > { %v8591_v12 = vpop.permute.xlu1 %8590  ;;  %v9277_v42 = vsel %vm8697_vm1, %v9276_v41, %v9272_v1  ;;  %v9296_v51 = vrot.slane %v8651_v43, %v13552_v54 }
 0x3c6   : > { %v9282_v60 = vsel %vm8704_vm2, %v9281_v59, %v9277_v42  ;;  %v9197_v46 = vrot.slane %v8591_v12, %v13506_v8 }
 0x3c7   : > { %v9287_v62 = vsel %vm8711_vm3, %v9286_v58, %v9282_v60 }
 0x3c8   : > { %v8654_v31 = vpop.permute.xlu0 %8653  ;;  %v9292_v27 = vsel %vm8718_vm4, %v9291_v52, %v9287_v62  ;;  %v9198_v28 = vsel %vm8697_vm1, %v9197_v46, %v9193_v30 }
 0x3c9   : > { %v8594_v44 = vpop.permute.xlu1 %8593  ;;  %v9297_v13 = vsel %vm8725_vm5, %v9296_v51, %v9292_v27  ;;  %v9301_v15 = vrot.slane %v8654_v31, %v13557_v56 }
 0x3ca   : > { %v9202_v22 = vrot.slane %v8594_v44, %v13510_v4 }
 0x3cb   : > { %v9302_v4 = vsel %vm8732_vm6, %v9301_v15, %v9297_v13  ;;  %v14833_v13 = vld [vmem:[#allocation13_spill] sm:$0xff] }
 0x3cc   : > { %v8657_v21 = vpop.permute.xlu0 %8656  ;;  %v9203_v45 = vsel %vm8704_vm2, %v9202_v22, %v9198_v28 }
 0x3cd   : > { %v8597_v25 = vpop.permute.xlu1 %8596  ;;  %v9306_v8 = vrot.slane %v8657_v21, %v13575_v38 }
 0x3ce   : > { %v9207_v0 = vrot.slane %v8597_v25, %v13528_v16 }
 0x3d0   : > { %v8660_v36 = vpop.permute.xlu0 %8659  ;;  %v9208_v12 = vsel %vm8711_vm3, %v9207_v0, %v9203_v45 }
 0x3d1   : > { %v8600_v7 = vpop.permute.xlu1 %8599  ;;  %v9311_v16 = vrot.slane %v8660_v36, %v13580_v49 }
 0x3d2   : > { %v9212_v5 = vrot.slane %v8600_v7, %v13533_v20  ;;  %v9307_v7 = vsel %vm8739_vm7, %v9306_v8, %v9302_v4 }
 0x3d4   : > { %v8663_v48 = vpop.permute.xlu0 %8662  ;;  %v9213_v25 = vsel %vm8718_vm4, %v9212_v5, %v9208_v12 }
 0x3d5   : > { %v8603_v55 = vpop.permute.xlu1 %8602  ;;  %v9316_v31 = vrot.slane %v8663_v48, %v13600_v50  ;;  %v9312_v48 = vsel %vm8746_vm8, %v9311_v16, %v9307_v7 }
 0x3d6   : > { %v9217_v6 = vrot.slane %v8603_v55, %v13552_v54 }
 0x3d8   : > { %v8666_v29 = vpop.permute.xlu0 %8665  ;;  %v9218_v55 = vsel %vm8725_vm5, %v9217_v6, %v9213_v25 }
 0x3d9   : > { %v8606_v19 = vpop.permute.xlu1 %8605  ;;  %v9321_v21 = vrot.slane %v8666_v29, %v13597_v34  ;;  %v9317_v29 = vsel %vm8753_vm9, %v9316_v31, %v9312_v48 }
 0x3da   : > { %v9222_v43 = vrot.slane %v8606_v19, %v13557_v56 }
 0x3dc   : > { %v8669_v26 = vpop.permute.xlu0 %8668 }
 0x3dd   : > { %v8609_v35 = vpop.permute.xlu1 %8608  ;;  %v9326_v36 = vrot.slane %v8669_v26, %v13621_v23 }
 0x3de   : > { %v9227_v20 = vrot.slane %v8609_v35, %v13575_v38  ;;  %v9223_v38 = vsel %vm8732_vm6, %v9222_v43, %v9218_v55 }
 0x3e0   : > { %v8672_v18 = vpop.permute.xlu0 %8671 }
 0x3e1   : > { %v8612_v24 = vpop.permute.xlu1 %8611  ;;  %v9331_v57 = vrot.slane %v8672_v18, %v13626_v63 }
 0x3e2   : > { %v9232_v54 = vrot.slane %v8612_v24, %v13580_v49  ;;  %v9228_v49 = vsel %vm8739_vm7, %v9227_v20, %v9223_v38 }
 0x3e4   : > { %v8675_v39 = vpop.permute.xlu0 %8674  ;;  %v9233_v42 = vsel %vm8746_vm8, %v9232_v54, %v9228_v49 }
 0x3e5   : > { %v8615_v11 = vpop.permute.xlu1 %8614  ;;  %v9336_v35 = vrot.slane %v8675_v39, %v13652_v9 }
 0x3e6   : > { %v9237_v56 = vrot.slane %v8615_v11, %v13600_v50  ;;  %v9322_v50 = vsel %vm8760_vm10, %v9321_v21, %v9317_v29 }
 0x3e7   : > { %v9327_v59 = vsel %vm8767_vm11, %v9326_v36, %v9322_v50 }
 0x3e8   : > { %v8678_v19 = vpop.permute.xlu0 %8677  ;;  %v9332_v58 = vsel %vm8774_vm12, %v9331_v57, %v9327_v59 }
 0x3e9   : > { %v8618_v10 = vpop.permute.xlu1 %8617  ;;  %v9341_v26 = vrot.slane %v8678_v19, %v13649_v53 }
 0x3ea   : > { %v9242_v61 = vrot.slane %v8618_v10, %v13597_v34  ;;  %v9238_v34 = vsel %vm8753_vm9, %v9237_v56, %v9233_v42 }
 0x3ec   : > { %v9243_v11 = vsel %vm8760_vm10, %v9242_v61, %v9238_v34 }
 0x3ed   : > { %v8621_v14 = vpop.permute.xlu1 %8620 }
 0x3ee   : > { %v9247_v1 = vrot.slane %v8621_v14, %v13621_v23  ;;  %v9337_v23 = vsel %vm8781_vm13, %v9336_v35, %v9332_v58 }
 0x3ef   : > { %v9342_v52 = vsel %vm8788_vm14, %v9341_v26, %v9337_v23 }
 0x3f0   : > { %v9248_v62 = vsel %vm8767_vm11, %v9247_v1, %v9243_v11 }
 0x3f1   : > { %v8624_v44 = vpop.permute.xlu1 %8623 }
 0x3f2   : > { %v9252_v24 = vrot.slane %v8624_v44, %v13626_v63 }
 0x3f4   : > { %v9253_v10 = vsel %vm8774_vm12, %v9252_v24, %v9248_v62 }
 0x3f5   : > { %v8627_v41 = vpop.permute.xlu1 %8626 }
 0x3f6   : > { %v9257_v60 = vrot.slane %v8627_v41, %v13652_v9  ;;  %v9347_v9 = vsel %vm9343_vm15, %v9342_v52, %v13984_v37 }
 0x3f8   : > { %v9258_v33 = vsel %vm8781_vm13, %v9257_v60, %v9253_v10 }
 0x3f9   : > { %v8630_v18 = vpop.permute.xlu1 %8629 }
 0x3fa   : > { %v9262_v63 = vrot.slane %v8630_v18, %v13649_v53 }
 0x3fc   : > { %v9263_v27 = vsel %vm8788_vm14, %v9262_v63, %v9258_v33 }
 0x3fd   : > { %v9346_v51 = vsel %vm9343_vm15, %v9263_v27, %v13888_v17 }
 0x3fe   : > { %v9349_v46 = vcombine.low %v9346_v51, %v9347_v9 }
 0x400   : > { %v9363_v53 = vrot.slane %v9349_v46, %v12085_v3 }
 0x402   : > { %v9364_v22 = vcombine.low %v9356_v40, %v9363_v53 }
 0x404   : > { %10610 = vlog2.f32 %v9364_v22 }
 0x405   : > { %10612 = vrcp.f32 %v14833_v13 }
 0x40e   : > { %v10611_v0 = vpop.eup %10610 }
 0x40f   : > { %v9373_v39 = vmul.f32 0.6931472, %v10611_v0  ;;  %v10613_v37 = vpop.eup %10612 }
 0x411   : > { %v9499_v14 = vadd.f32 -5.5451775, %v9373_v39 }
 0x413   : > { %v9376_v30 = vmul.f32 %v10613_v37, %v9499_v14 }
 0x415   : > { %v9377_v17 = vmul.f32 1.442695, %v9376_v30 }
 0x417   : > { %10614 = vpow2.f32 %v9377_v17 }
 0x421   : > { %v10615_v3 = vpop.eup %10614 }
 0x422   : > { %9379 = vst [vmem:[%s218_s3] sm:$0xff] %v10615_v3 }
 0x423   : > { %10629 = shalt.err (!%p10626_p8)
}
 0x424   : > { %s10630_s21 = scalar_lea.hbm %s14187_s9, 128  ;;  %s10634_s29 = scalar_lea.hbm %s14237_s2, 512 }
 0x425   : > { %p10631_p10 = scmp.ne.s32.totalorder %s14187_s9, %s10630_s21  ;;  %p10635_p0 = scmp.lt.u32.totalorder %s14187_s9, %s14237_s2 }
 0x426   : > { %p10636_p1 = scmp.lt.u32.totalorder %s10634_s29, %s10630_s21  ;;  %p10638_p3 = scmp.lt.u32.totalorder %s10630_s21, %s14187_s9 }
 0x427   : > { %p10632_p12 = pnand %p10631_p10, %p10782_p9 }
 0x428   : > { %p10637_p2 = por %p10636_p1, %p10635_p0 }
 0x429   : > { %p10633_p13 = pneg %p10632_p12 }
 0x42a   : > { %p10639_p4 = por %p10638_p3, %p10637_p2 }
 0x42c   : > { %p10640_p5 = pnand %p10639_p4, %p10633_p13 }
 0x42e   : > { %10643 = shalt.err (!%p10640_p5)
}
 0x42f   : > { %9517 = dma.vmem_to_hbm [thread:$0]  (%p10782_p9), %s14189_s6, 128, %s14187_s9, %s9381_s10  }
 0x430 PF: > { %p9523_p6 = scmp.ge.s32.totalorder %s10698_s16, 2  ;;  %s9409_s5 = sand.u32 1, %s10678_s11  }
 0x431   : > { %s9410_s20 = scalar_lea.sflag [#allocation6], %s9409_s5 }
 0x432   : > { %p9520_p7 = pnand %p9523_p6, %p10789_p11 }
 0x434   : > { %10673 = dma.done.wait (!%p9520_p7), %s9410_s20, 128  }
 0x435   : > { %10675 = vsyncadd (!%p9520_p7), %s9410_s20, 4294967168  ;;  %s19_s16 = sadd.s32 1, %s10698_s16   ;;  %s14834_s11 = smov %s10682_s12 }
 0x436   : > { %p16_p8 = scmp.ge.s32.totalorder %s19_s16, 6   ;;  %s14835_s12 = smov %s10686_s13 }
 0x437   : > { %s14836_s13 = smov %s10787_s24  ;;  %s14837_s14 = smov %s10694_s15 }
 0x438   : > { %s14838_s15 = smov %s14840_s18  ;;  %18 = sbr.rel (!%p16_p8) target bundleno = 8 (0x8), region = 86 }
 0x43f   :  { %9415 = vsyncpa [#allocation5], 1 }
 0x440   :  { %9417 = vsyncpa [#allocation5 + $0x1], 1 }
 0x441   :  { %9418 = vsyncpa [#allocation6], 1 }
 0x442   :  { %9420 = vsyncpa [#allocation6 + $0x1], 1 }

</bundles_post_ra>
